<compile_context>
chip_gen: v7x
topology: tpu7x:2x2x1
jax: 0.10.0
libtpu: 0.0.40
codegen_flags: <defaults>
</compile_context>

<pallas_src>
import functools

import jax
import jax.numpy as jnp
from jax.experimental import pallas as pl
from jax.experimental.pallas import tpu as pltpu

_VMEM_LIMIT = 32 * 1024 * 1024        # explicit per-kernel scoped-VMEM cap
_BLOCK_BYTES = 1 << 20                # ~1 MiB target per streamed input block


def _largest_divisor(n, cap, multiple_of=1):
    """Largest divisor of n that is <= cap (and a multiple of `multiple_of`),
    falling back to n (full extent, always BlockSpec-legal)."""
    cap = int(max(1, min(n, cap)))
    for d in range(cap, 0, -1):
        if n % d == 0 and (d % multiple_of == 0 or d == n):
            return d
    return n


def _fold_bn(bn, eps=1e-5):
    gamma, beta, mean, var = bn
    s = gamma / jnp.sqrt(var + eps)
    return s, beta - mean * s


# -----------------------------------------------------------------------------
# Pallas kernels
# -----------------------------------------------------------------------------
def conv1x1_bn_act_kernel(x_ref, w_ref, b_ref, o_ref, *, stride, relu):
    """1x1 conv (as bf16 matmul) + folded BN + optional ReLU for one row tile.

    x_ref: (1, th*stride, W, Cin);  w_ref: (Cin, Cout) bf16;  b_ref: (1, Cout) f32
    o_ref: (1, th, W//stride, Cout)
    """
    x = x_ref[0]
    if stride > 1:
        # Subsample in-kernel (reshape + static slice) so the wrapper never
        # issues an XLA-side strided gather over HBM.  (Only traced if stride>1.)
        ti, wi, ci = x.shape
        x = x.reshape(ti // stride, stride, wi // stride, stride, ci)[:, 0, :, 0, :]
    th, wo, ci = x.shape
    acc = jnp.dot(x.reshape(th * wo, ci).astype(jnp.bfloat16), w_ref[...],
                  preferred_element_type=jnp.float32)
    acc = acc + b_ref[...]
    if relu:
        acc = jnp.maximum(acc, 0.0)
    o_ref[0] = acc.reshape(th, wo, -1).astype(o_ref.dtype)


def conv3x3_bn_relu_kernel(x_ref, w_ref, b_ref, o_ref, patch_ref):
    """3x3 conv (pad=1) + folded BN + ReLU for one image via in-kernel im2col.

    x_ref:  (1, H, W, C) bf16 (un-padded; the zero border lives in the scratch)
    w_ref:  (9*C, Cout)  bf16 folded weights, rows ordered (dy, dx, cin)
    b_ref:  (1, Cout)    f32
    o_ref:  (1, H*W, Cout)
    patch_ref: VMEM (H, W, 9*C) bf16 im2col scratch (zeros == implicit padding)
    """
    _, H, W, C = x_ref.shape
    patch_ref[...] = jnp.zeros_like(patch_ref)
    for dy in range(3):
        for dx in range(3):
            oy, ox = dy - 1, dx - 1
            h0, h1 = max(0, -oy), H - max(0, oy)
            w0, w1 = max(0, -ox), W - max(0, ox)
            t = dy * 3 + dx
            patch_ref[h0:h1, w0:w1, t * C:(t + 1) * C] = (
                x_ref[0, h0 + oy:h1 + oy, w0 + ox:w1 + ox, :])
    patches = patch_ref[...].reshape(H * W, 9 * C)
    acc = jnp.dot(patches, w_ref[...], preferred_element_type=jnp.float32)
    acc = jnp.maximum(acc + b_ref[...], 0.0)
    o_ref[0] = acc.astype(o_ref.dtype)


def conv3_ca_kernel(x_ref, w_ref, b_ref, w1_ref, b1_ref, w2_ref, b2_ref,
                    v_ref, att_ref, sum_sc, max_sc, *, inv_hw):
    """conv3 (1x1) + folded BN3, fused with the CBAM channel-attention gate.

    Grid = (batch, spatial tiles).  The spatial axis is a reduction for the
    avg/max pooling (VMEM scratch accumulators, pl.when init/finalize); the
    shared MLP + sigmoid runs once per batch in the finalize step.

    x_ref: (1, ts, C1) bf16; w_ref: (C1, Cexp) bf16; b_ref: (1, Cexp) f32
    w1/b1/w2/b2: shared-MLP params (f32, tiny)
    v_ref: (1, ts, Cexp) f32 conv3 output;  att_ref: (1, 1, Cexp) f32 gate
    """
    j = pl.program_id(1)

    @pl.when(j == 0)
    def _():
        sum_sc[...] = jnp.zeros_like(sum_sc)
        max_sc[...] = jnp.full(max_sc.shape, -jnp.inf, max_sc.dtype)

    y = jnp.dot(x_ref[0].astype(jnp.bfloat16), w_ref[...],
                preferred_element_type=jnp.float32) + b_ref[...]
    v_ref[0] = y
    sum_sc[...] += jnp.sum(y, axis=0, keepdims=True)
    max_sc[...] = jnp.maximum(max_sc[...], jnp.max(y, axis=0, keepdims=True))

    @pl.when(j == pl.num_programs(1) - 1)
    def _():
        def mlp(p):
            h = jnp.maximum(
                jnp.dot(p, w1_ref[...], preferred_element_type=jnp.float32)
                + b1_ref[...], 0.0)
            return jnp.dot(h, w2_ref[...],
                           preferred_element_type=jnp.float32) + b2_ref[...]

        avg = sum_sc[...] * inv_hw
        att_ref[0] = jax.nn.sigmoid(mlp(avg) + mlp(max_sc[...]))


def cbam_spatial_residual_kernel(v_ref, att_ref, id_ref, w_ref, b_ref,
                                 o_ref, pp_ref):
    """Fused per-image: channel-attention scale -> ChannelPool -> 7x7 spatial
    conv (BN folded) -> sigmoid gate -> residual add -> ReLU.

    v_ref:  (1, H, W, C) f32 (conv3+bn3 output)
    att_ref:(1, 1, C)    f32 channel-attention gate
    id_ref: (1, H, W, C) f32 identity branch
    w_ref:  SMEM (2, 7, 7) f32 folded weights (channel 0: max-pool, 1: mean)
    b_ref:  SMEM (1,)     f32 folded bias
    pp_ref: VMEM (2, H+6, W+6) f32 zero-padded pooled maps (halo in-kernel)
    """
    _, H, W, C = v_ref.shape
    y = v_ref[0] * att_ref[0]                         # channel attention scale
    pp_ref[...] = jnp.zeros_like(pp_ref)
    pp_ref[0, 3:3 + H, 3:3 + W] = jnp.max(y, axis=-1)
    pp_ref[1, 3:3 + H, 3:3 + W] = jnp.mean(y, axis=-1)
    acc = jnp.zeros((H, W), jnp.float32) + b_ref[0]
    for c in range(2):
        for dy in range(7):
            for dx in range(7):
                acc = acc + pp_ref[c, dy:dy + H, dx:dx + W] * w_ref[c, dy, dx]
    gate = jax.nn.sigmoid(acc)
    o_ref[0] = jnp.maximum(y * gate[:, :, None] + id_ref[0], 0.0)


def add_relu_kernel(a_ref, b_ref, o_ref):
    """Residual add + ReLU (only used when with_cbam=False)."""
    o_ref[...] = jnp.maximum(
        a_ref[...].astype(jnp.float32) + b_ref[...].astype(jnp.float32), 0.0)


# -----------------------------------------------------------------------------
# Wrappers
# -----------------------------------------------------------------------------
def conv1x1_bn_act(x, w, bn, *, relu, stride=1, out_dtype=jnp.float32):
    """x: (B,H,W,Cin) NHWC, w: (Cin,Cout). 1x1 conv + eval-mode BN (+ReLU)."""
    B, H, W, Cin = x.shape
    Ho, Wo = H // stride, W // stride
    Cout = w.shape[1]
    s, bias = _fold_bn(bn)
    wf = (w * s[None, :]).astype(jnp.bfloat16)
    cap = max(1, _BLOCK_BYTES // (W * Cin * 4 * stride))
    th = _largest_divisor(Ho, cap)
    th_in = th * stride
    return pl.pallas_call(
        functools.partial(conv1x1_bn_act_kernel, stride=stride, relu=relu),
        grid=(B, Ho // th),
        in_specs=[
            pl.BlockSpec((1, th_in, W, Cin), lambda bi, ri: (bi, ri, 0, 0)),
            pl.BlockSpec((Cin, Cout), lambda bi, ri: (0, 0)),
            pl.BlockSpec((1, Cout), lambda bi, ri: (0, 0)),
        ],
        out_specs=pl.BlockSpec((1, th, Wo, Cout), lambda bi, ri: (bi, ri, 0, 0)),
        out_shape=jax.ShapeDtypeStruct((B, Ho, Wo, Cout), out_dtype),
        compiler_params=pltpu.CompilerParams(
            dimension_semantics=("parallel", "parallel"),
            vmem_limit_bytes=_VMEM_LIMIT),
    )(x, wf, bias.reshape(1, Cout).astype(jnp.float32))


def conv3x3_bn_relu(x, w, bn):
    """x: (B,H,W,C) bf16, w: (3,3,C,Cout). Returns (B, H*W, Cout) bf16."""
    B, H, W, C = x.shape
    Cout = w.shape[-1]
    s, bias = _fold_bn(bn)
    wf = (w * s).reshape(9 * C, Cout).astype(jnp.bfloat16)
    return pl.pallas_call(
        conv3x3_bn_relu_kernel,
        grid=(B,),
        in_specs=[
            pl.BlockSpec((1, H, W, C), lambda bi: (bi, 0, 0, 0)),
            pl.BlockSpec((9 * C, Cout), lambda bi: (0, 0)),
            pl.BlockSpec((1, Cout), lambda bi: (0, 0)),
        ],
        out_specs=pl.BlockSpec((1, H * W, Cout), lambda bi: (bi, 0, 0)),
        out_shape=jax.ShapeDtypeStruct((B, H * W, Cout), jnp.bfloat16),
        scratch_shapes=[pltpu.VMEM((H, W, 9 * C), jnp.bfloat16)],
        compiler_params=pltpu.CompilerParams(
            dimension_semantics=("parallel",),
            vmem_limit_bytes=_VMEM_LIMIT),
    )(x, wf, bias.reshape(1, Cout).astype(jnp.float32))


def conv3_ca(x, w, bn, ca_w1, ca_b1, ca_w2, ca_b2):
    """x: (B, S, C1) bf16 -> (conv3 output (B,S,Cexp) f32, CA gate (B,1,Cexp) f32)."""
    B, S, C1 = x.shape
    Cexp = w.shape[1]
    Cred = ca_w1.shape[1]
    s, bias = _fold_bn(bn)
    wf = (w * s[None, :]).astype(jnp.bfloat16)
    ts = _largest_divisor(S, max(8, _BLOCK_BYTES // (Cexp * 4)), multiple_of=8)
    v, att = pl.pallas_call(
        functools.partial(conv3_ca_kernel, inv_hw=1.0 / S),
        grid=(B, S // ts),
        in_specs=[
            pl.BlockSpec((1, ts, C1), lambda bi, si: (bi, si, 0)),
            pl.BlockSpec((C1, Cexp), lambda bi, si: (0, 0)),
            pl.BlockSpec((1, Cexp), lambda bi, si: (0, 0)),
            pl.BlockSpec((Cexp, Cred), lambda bi, si: (0, 0)),
            pl.BlockSpec((1, Cred), lambda bi, si: (0, 0)),
            pl.BlockSpec((Cred, Cexp), lambda bi, si: (0, 0)),
            pl.BlockSpec((1, Cexp), lambda bi, si: (0, 0)),
        ],
        out_specs=[
            pl.BlockSpec((1, ts, Cexp), lambda bi, si: (bi, si, 0)),
            pl.BlockSpec((1, 1, Cexp), lambda bi, si: (bi, 0, 0)),
        ],
        out_shape=[
            jax.ShapeDtypeStruct((B, S, Cexp), jnp.float32),
            jax.ShapeDtypeStruct((B, 1, Cexp), jnp.float32),
        ],
        scratch_shapes=[pltpu.VMEM((1, Cexp), jnp.float32),
                        pltpu.VMEM((1, Cexp), jnp.float32)],
        compiler_params=pltpu.CompilerParams(
            dimension_semantics=("parallel", "arbitrary"),
            vmem_limit_bytes=_VMEM_LIMIT),
    )(x, wf, bias.reshape(1, Cexp).astype(jnp.float32),
      ca_w1, ca_b1.reshape(1, -1), ca_w2, ca_b2.reshape(1, -1))
    return v, att


def cbam_spatial_residual(v4, att, ident, sa_w, sa_bn):
    """Fused spatial attention + channel scale + residual add + ReLU."""
    B, H, W, C = v4.shape
    s, bias = _fold_bn(sa_bn)                 # shapes (1,)
    wf = (sa_w * s[0]).astype(jnp.float32)
    return pl.pallas_call(
        cbam_spatial_residual_kernel,
        grid=(B,),
        in_specs=[
            pl.BlockSpec((1, H, W, C), lambda bi: (bi, 0, 0, 0)),
            pl.BlockSpec((1, 1, C), lambda bi: (bi, 0, 0)),
            pl.BlockSpec((1, H, W, C), lambda bi: (bi, 0, 0, 0)),
            pl.BlockSpec(memory_space=pltpu.MemorySpace.SMEM),
            pl.BlockSpec(memory_space=pltpu.MemorySpace.SMEM),
        ],
        out_specs=pl.BlockSpec((1, H, W, C), lambda bi: (bi, 0, 0, 0)),
        out_shape=jax.ShapeDtypeStruct((B, H, W, C), jnp.float32),
        scratch_shapes=[pltpu.VMEM((2, H + 6, W + 6), jnp.float32)],
        compiler_params=pltpu.CompilerParams(
            dimension_semantics=("parallel",),
            vmem_limit_bytes=_VMEM_LIMIT),
    )(v4, att, ident, wf, bias.astype(jnp.float32))


def add_relu(a, b):
    B, H, W, C = a.shape
    return pl.pallas_call(
        add_relu_kernel,
        grid=(B,),
        in_specs=[pl.BlockSpec((1, H, W, C), lambda bi: (bi, 0, 0, 0)),
                  pl.BlockSpec((1, H, W, C), lambda bi: (bi, 0, 0, 0))],
        out_specs=pl.BlockSpec((1, H, W, C), lambda bi: (bi, 0, 0, 0)),
        out_shape=jax.ShapeDtypeStruct((B, H, W, C), jnp.float32),
        compiler_params=pltpu.CompilerParams(
            dimension_semantics=("parallel",),
            vmem_limit_bytes=_VMEM_LIMIT),
    )(a, b)


def bottleneck_forward(x_nchw, p, *, stride=1, with_cbam=True):
    x = jnp.transpose(x_nchw, (0, 2, 3, 1)).astype(jnp.float32)   # NCHW -> NHWC
    B, H, W, Cin = x.shape
    Cexp = p["w3"].shape[1]
    Ho, Wo = H // stride, W // stride

    # conv1 (1x1, stride) + BN1 + ReLU  -> bf16 activation
    a1 = conv1x1_bn_act(x, p["w1"], p["bn1"], relu=True, stride=stride,
                        out_dtype=jnp.bfloat16)
    # conv2 (3x3, pad=1) + BN2 + ReLU   -> (B, Ho*Wo, C1) bf16
    a2 = conv3x3_bn_relu(a1, p["w2"], p["bn2"])

    # identity branch (projection only when PyTorch would use one)
    if stride != 1 or Cin != Cexp:
        ident = conv1x1_bn_act(x, p["wid"], p["bnid"], relu=False,
                               stride=stride, out_dtype=jnp.float32)
    else:
        ident = x

    if with_cbam:
        v, att = conv3_ca(a2, p["w3"], p["bn3"],
                          p["ca_w1"], p["ca_b1"], p["ca_w2"], p["ca_b2"])
        v4 = v.reshape(B, Ho, Wo, Cexp)        # row-major reshape: no data movement
        out = cbam_spatial_residual(v4, att, ident, p["sa_w"], p["sa_bn"])
    else:
        v4 = conv1x1_bn_act(a2.reshape(B, Ho, Wo, -1), p["w3"], p["bn3"],
                            relu=False, stride=1, out_dtype=jnp.float32)
        out = add_relu(v4, ident)
    return jnp.transpose(out, (0, 3, 1, 2))                        # NHWC -> NCHW


# -----------------------------------------------------------------------------
# Deterministic parameter construction + demo run
# -----------------------------------------------------------------------------
def make_params(key, in_channels, out_channels, expansion, reduction_ratio=16):
    c_exp = out_channels * expansion
    c_red = c_exp // reduction_ratio
    ks = jax.random.split(key, 16)

    def nrm(k, shape, scale=0.1):
        return (scale * jax.random.normal(k, shape)).astype(jnp.float32)

    def bn(k, c):
        k1, k2, k3, k4 = jax.random.split(k, 4)
        gamma = 1.0 + nrm(k1, (c,), 0.05)
        beta = nrm(k2, (c,), 0.05)
        mean = nrm(k3, (c,), 0.05)
        var = 1.0 + 0.1 * jax.random.uniform(k4, (c,), dtype=jnp.float32)
        return (gamma, beta, mean, var)

    return dict(
        w1=nrm(ks[0], (in_channels, out_channels)),
        bn1=bn(ks[1], out_channels),
        w2=nrm(ks[2], (3, 3, out_channels, out_channels)),
        bn2=bn(ks[3], out_channels),
        w3=nrm(ks[4], (out_channels, c_exp)),
        bn3=bn(ks[5], c_exp),
        wid=nrm(ks[6], (in_channels, c_exp)),
        bnid=bn(ks[7], c_exp),
        ca_w1=nrm(ks[8], (c_exp, c_red)),
        ca_b1=nrm(ks[9], (c_red,)),
        ca_w2=nrm(ks[10], (c_red, c_exp)),
        ca_b2=nrm(ks[11], (c_exp,)),
        sa_w=nrm(ks[12], (2, 7, 7)),
        sa_bn=bn(ks[13], 1),
    )


if __name__ == "__main__":
    B, C_in, H, W = 2, 16, 16, 16
    out_channels, expansion, stride = 8, 4, 1

    key = jax.random.PRNGKey(0)
    kx, kp = jax.random.split(key)
    x = jax.random.normal(kx, (B, C_in, H, W), dtype=jnp.float32)   # NCHW like PyTorch
    params = make_params(kp, C_in, out_channels, expansion)

    fwd = jax.jit(functools.partial(bottleneck_forward,
                                    stride=stride, with_cbam=True))
    y = jax.block_until_ready(fwd(x, params))
    assert y.shape == (B, out_channels * expansion, H, W)
    assert bool(jnp.all(y >= 0.0))          # final ReLU
    assert bool(jnp.all(jnp.isfinite(y)))
    print("KERNEL_OK")
</pallas_src>

<mosaic_0001>
module attributes {stable_mosaic.version = 11 : i64} {
  func.func @conv1x1_bn_act_kernel(%arg0: i32, %arg1: i32, %arg2: memref<1x16x16x16xf32, #tpu.memory_space<vmem>>, %arg3: memref<16x8xbf16, #tpu.memory_space<vmem>>, %arg4: memref<1x8xf32, #tpu.memory_space<vmem>>, %arg5: memref<1x16x16x8xbf16, #tpu.memory_space<vmem>>) attributes {dimension_semantics = [#tpu.dimension_semantics<parallel>, #tpu.dimension_semantics<parallel>], iteration_bounds = array<i64: 2, 1>, scalar_prefetch = 0 : i64, scratch_operands = 0 : i64, tpu.core_type = #tpu.core_type<tc>, window_params = [{transform_indices = @transform_0, window_bounds = array<i64: 1, 16, 16, 16>}, {pipeline_mode = #tpu.pipeline_mode<synchronous>, transform_indices = @transform_1, window_bounds = array<i64: 16, 8>}, {pipeline_mode = #tpu.pipeline_mode<synchronous>, transform_indices = @transform_2, window_bounds = array<i64: 1, 8>}, {transform_indices = @transform_3, window_bounds = array<i64: 1, 16, 16, 8>}]} {
    %c0 = arith.constant 0 : index
    %c0_0 = arith.constant 0 : index
    %c0_1 = arith.constant 0 : index
    %c0_2 = arith.constant 0 : index
    %0 = vector.load %arg2[%c0, %c0_0, %c0_1, %c0_2] : memref<1x16x16x16xf32, #tpu.memory_space<vmem>>, vector<1x16x16x16xf32>
    %1 = vector.shape_cast %0 : vector<1x16x16x16xf32> to vector<16x16x16xf32>
    %2 = vector.shape_cast %1 : vector<16x16x16xf32> to vector<256x16xf32>
    %3 = arith.truncf %2 : vector<256x16xf32> to vector<256x16xbf16>
    %c0_3 = arith.constant 0 : index
    %c0_4 = arith.constant 0 : index
    %4 = vector.load %arg3[%c0_3, %c0_4] : memref<16x8xbf16, #tpu.memory_space<vmem>>, vector<16x8xbf16>
    %cst = arith.constant dense<0.000000e+00> : vector<256x8xf32>
    %5 = tpu.matmul %3, %4, %cst {dimension_numbers = #tpu.dot_dimension_numbers<[1], [0], [0], [1], [0, 0, 1, 1], [], []>} : vector<256x16xbf16>, vector<16x8xbf16>, vector<256x8xf32> -> vector<256x8xf32>
    %c0_5 = arith.constant 0 : index
    %c0_6 = arith.constant 0 : index
    %6 = vector.load %arg4[%c0_5, %c0_6] : memref<1x8xf32, #tpu.memory_space<vmem>>, vector<1x8xf32>
    %7 = vector.broadcast %6 : vector<1x8xf32> to vector<256x8xf32>
    %8 = arith.addf %5, %7 : vector<256x8xf32>
    %cst_7 = arith.constant 0.000000e+00 : f32
    %9 = vector.broadcast %cst_7 : f32 to vector<256x8xf32>
    %10 = arith.maximumf %8, %9 : vector<256x8xf32>
    %11 = vector.shape_cast %10 : vector<256x8xf32> to vector<16x16x8xf32>
    %12 = arith.truncf %11 : vector<16x16x8xf32> to vector<16x16x8xbf16>
    %c0_8 = arith.constant 0 : index
    %c0_9 = arith.constant 0 : index
    %c0_10 = arith.constant 0 : index
    %c0_11 = arith.constant 0 : index
    %13 = vector.load %arg5[%c0_8, %c0_9, %c0_10, %c0_11] : memref<1x16x16x8xbf16, #tpu.memory_space<vmem>>, vector<1x16x16x8xbf16>
    %14 = vector.shape_cast %13 : vector<1x16x16x8xbf16> to vector<16x16x8xbf16>
    %15 = vector.shape_cast %12 : vector<16x16x8xbf16> to vector<1x16x16x8xbf16>
    tpu.vector_store %arg5[%c0_8, %c0_9, %c0_10, %c0_11], %15 {strides = array<i32>} : memref<1x16x16x8xbf16, #tpu.memory_space<vmem>>, vector<1x16x16x8xbf16>,
    return
  }
  func.func @transform_0(%arg0: i32, %arg1: i32) -> (i32, i32, i32, i32) {
    %c0_i32 = arith.constant 0 : i32
    %c0_i32_0 = arith.constant 0 : i32
    %c0_i32_1 = arith.constant 0 : i32
    return %arg0, %arg1, %c0_i32, %c0_i32_0 : i32, i32, i32, i32
  }
  func.func @transform_1(%arg0: i32, %arg1: i32) -> (i32, i32) {
    %c0_i32 = arith.constant 0 : i32
    %c0_i32_0 = arith.constant 0 : i32
    %c0_i32_1 = arith.constant 0 : i32
    return %c0_i32, %c0_i32_0 : i32, i32
  }
  func.func @transform_2(%arg0: i32, %arg1: i32) -> (i32, i32) {
    %c0_i32 = arith.constant 0 : i32
    %c0_i32_0 = arith.constant 0 : i32
    %c0_i32_1 = arith.constant 0 : i32
    return %c0_i32, %c0_i32_0 : i32, i32
  }
  func.func @transform_3(%arg0: i32, %arg1: i32) -> (i32, i32, i32, i32) {
    %c0_i32 = arith.constant 0 : i32
    %c0_i32_0 = arith.constant 0 : i32
    %c0_i32_1 = arith.constant 0 : i32
    return %arg0, %arg1, %c0_i32, %c0_i32_0 : i32, i32, i32, i32
  }
}

module attributes {stable_mosaic.version = 11 : i64} {
  func.func @conv1x1_bn_act_kernel(%arg0: i32, %arg1: i32, %arg2: memref<1x16x16x16xf32, #tpu.memory_space<vmem>>, %arg3: memref<16x32xbf16, #tpu.memory_space<vmem>>, %arg4: memref<1x32xf32, #tpu.memory_space<vmem>>, %arg5: memref<1x16x16x32xf32, #tpu.memory_space<vmem>>) attributes {dimension_semantics = [#tpu.dimension_semantics<parallel>, #tpu.dimension_semantics<parallel>], iteration_bounds = array<i64: 2, 1>, scalar_prefetch = 0 : i64, scratch_operands = 0 : i64, tpu.core_type = #tpu.core_type<tc>, window_params = [{transform_indices = @transform_0, window_bounds = array<i64: 1, 16, 16, 16>}, {pipeline_mode = #tpu.pipeline_mode<synchronous>, transform_indices = @transform_1, window_bounds = array<i64: 16, 32>}, {pipeline_mode = #tpu.pipeline_mode<synchronous>, transform_indices = @transform_2, window_bounds = array<i64: 1, 32>}, {transform_indices = @transform_3, window_bounds = array<i64: 1, 16, 16, 32>}]} {
    %c0 = arith.constant 0 : index
    %c0_0 = arith.constant 0 : index
    %c0_1 = arith.constant 0 : index
    %c0_2 = arith.constant 0 : index
    %0 = vector.load %arg2[%c0, %c0_0, %c0_1, %c0_2] : memref<1x16x16x16xf32, #tpu.memory_space<vmem>>, vector<1x16x16x16xf32>
    %1 = vector.shape_cast %0 : vector<1x16x16x16xf32> to vector<16x16x16xf32>
    %2 = vector.shape_cast %1 : vector<16x16x16xf32> to vector<256x16xf32>
    %3 = arith.truncf %2 : vector<256x16xf32> to vector<256x16xbf16>
    %c0_3 = arith.constant 0 : index
    %c0_4 = arith.constant 0 : index
    %4 = vector.load %arg3[%c0_3, %c0_4] : memref<16x32xbf16, #tpu.memory_space<vmem>>, vector<16x32xbf16>
    %cst = arith.constant dense<0.000000e+00> : vector<256x32xf32>
    %5 = tpu.matmul %3, %4, %cst {dimension_numbers = #tpu.dot_dimension_numbers<[1], [0], [0], [1], [0, 0, 1, 1], [], []>} : vector<256x16xbf16>, vector<16x32xbf16>, vector<256x32xf32> -> vector<256x32xf32>
    %c0_5 = arith.constant 0 : index
    %c0_6 = arith.constant 0 : index
    %6 = vector.load %arg4[%c0_5, %c0_6] : memref<1x32xf32, #tpu.memory_space<vmem>>, vector<1x32xf32>
    %7 = vector.broadcast %6 : vector<1x32xf32> to vector<256x32xf32>
    %8 = arith.addf %5, %7 : vector<256x32xf32>
    %9 = vector.shape_cast %8 : vector<256x32xf32> to vector<16x16x32xf32>
    %c0_7 = arith.constant 0 : index
    %c0_8 = arith.constant 0 : index
    %c0_9 = arith.constant 0 : index
    %c0_10 = arith.constant 0 : index
    %10 = vector.load %arg5[%c0_7, %c0_8, %c0_9, %c0_10] : memref<1x16x16x32xf32, #tpu.memory_space<vmem>>, vector<1x16x16x32xf32>
    %11 = vector.shape_cast %10 : vector<1x16x16x32xf32> to vector<16x16x32xf32>
    %12 = vector.shape_cast %9 : vector<16x16x32xf32> to vector<1x16x16x32xf32>
    tpu.vector_store %arg5[%c0_7, %c0_8, %c0_9, %c0_10], %12 {strides = array<i32>} : memref<1x16x16x32xf32, #tpu.memory_space<vmem>>, vector<1x16x16x32xf32>,
    return
  }
  func.func @transform_0(%arg0: i32, %arg1: i32) -> (i32, i32, i32, i32) {
    %c0_i32 = arith.constant 0 : i32
    %c0_i32_0 = arith.constant 0 : i32
    %c0_i32_1 = arith.constant 0 : i32
    return %arg0, %arg1, %c0_i32, %c0_i32_0 : i32, i32, i32, i32
  }
  func.func @transform_1(%arg0: i32, %arg1: i32) -> (i32, i32) {
    %c0_i32 = arith.constant 0 : i32
    %c0_i32_0 = arith.constant 0 : i32
    %c0_i32_1 = arith.constant 0 : i32
    return %c0_i32, %c0_i32_0 : i32, i32
  }
  func.func @transform_2(%arg0: i32, %arg1: i32) -> (i32, i32) {
    %c0_i32 = arith.constant 0 : i32
    %c0_i32_0 = arith.constant 0 : i32
    %c0_i32_1 = arith.constant 0 : i32
    return %c0_i32, %c0_i32_0 : i32, i32
  }
  func.func @transform_3(%arg0: i32, %arg1: i32) -> (i32, i32, i32, i32) {
    %c0_i32 = arith.constant 0 : i32
    %c0_i32_0 = arith.constant 0 : i32
    %c0_i32_1 = arith.constant 0 : i32
    return %arg0, %arg1, %c0_i32, %c0_i32_0 : i32, i32, i32, i32
  }
}

module attributes {stable_mosaic.version = 11 : i64} {
  func.func @conv3x3_bn_relu_kernel(%arg0: i32, %arg1: memref<1x16x16x8xbf16, #tpu.memory_space<vmem>>, %arg2: memref<72x8xbf16, #tpu.memory_space<vmem>>, %arg3: memref<1x8xf32, #tpu.memory_space<vmem>>, %arg4: memref<1x256x8xbf16, #tpu.memory_space<vmem>>, %arg5: memref<16x16x72xbf16, #tpu.memory_space<vmem>>) attributes {dimension_semantics = [#tpu.dimension_semantics<parallel>], iteration_bounds = array<i64: 2>, scalar_prefetch = 0 : i64, scratch_operands = 1 : i64, tpu.core_type = #tpu.core_type<tc>, window_params = [{transform_indices = @transform_0, window_bounds = array<i64: 1, 16, 16, 8>}, {pipeline_mode = #tpu.pipeline_mode<synchronous>, transform_indices = @transform_1, window_bounds = array<i64: 72, 8>}, {pipeline_mode = #tpu.pipeline_mode<synchronous>, transform_indices = @transform_2, window_bounds = array<i64: 1, 8>}, {transform_indices = @transform_3, window_bounds = array<i64: 1, 256, 8>}]} {
    %cst = arith.constant 0.000000e+00 : bf16
    %0 = vector.broadcast %cst : bf16 to vector<16x16x72xbf16>
    %c0 = arith.constant 0 : index
    %c0_0 = arith.constant 0 : index
    %c0_1 = arith.constant 0 : index
    %1 = vector.load %arg5[%c0, %c0_0, %c0_1] : memref<16x16x72xbf16, #tpu.memory_space<vmem>>, vector<16x16x72xbf16>
    tpu.vector_store %arg5[%c0, %c0_0, %c0_1], %0 {strides = array<i32>} : memref<16x16x72xbf16, #tpu.memory_space<vmem>>, vector<16x16x72xbf16>,
    %c0_2 = arith.constant 0 : index
    %c0_3 = arith.constant 0 : index
    %c0_4 = arith.constant 0 : index
    %c0_5 = arith.constant 0 : index
    %2 = vector.load %arg1[%c0_2, %c0_3, %c0_4, %c0_5] : memref<1x16x16x8xbf16, #tpu.memory_space<vmem>>, vector<1x15x15x8xbf16>
    %3 = vector.shape_cast %2 : vector<1x15x15x8xbf16> to vector<15x15x8xbf16>
    %c1 = arith.constant 1 : index
    %c1_6 = arith.constant 1 : index
    %c0_7 = arith.constant 0 : index
    %4 = vector.load %arg5[%c1, %c1_6, %c0_7] : memref<16x16x72xbf16, #tpu.memory_space<vmem>>, vector<15x15x8xbf16>
    tpu.vector_store %arg5[%c1, %c1_6, %c0_7], %3 {strides = array<i32>} : memref<16x16x72xbf16, #tpu.memory_space<vmem>>, vector<15x15x8xbf16>,
    %c0_8 = arith.constant 0 : index
    %c0_9 = arith.constant 0 : index
    %c0_10 = arith.constant 0 : index
    %c0_11 = arith.constant 0 : index
    %5 = vector.load %arg1[%c0_8, %c0_9, %c0_10, %c0_11] : memref<1x16x16x8xbf16, #tpu.memory_space<vmem>>, vector<1x15x16x8xbf16>
    %6 = vector.shape_cast %5 : vector<1x15x16x8xbf16> to vector<15x16x8xbf16>
    %c1_12 = arith.constant 1 : index
    %c0_13 = arith.constant 0 : index
    %c8 = arith.constant 8 : index
    %7 = vector.load %arg5[%c1_12, %c0_13, %c8] : memref<16x16x72xbf16, #tpu.memory_space<vmem>>, vector<15x16x8xbf16>
    tpu.vector_store %arg5[%c1_12, %c0_13, %c8], %6 {strides = array<i32>} : memref<16x16x72xbf16, #tpu.memory_space<vmem>>, vector<15x16x8xbf16>,
    %c0_14 = arith.constant 0 : index
    %c0_15 = arith.constant 0 : index
    %c1_16 = arith.constant 1 : index
    %c0_17 = arith.constant 0 : index
    %8 = vector.load %arg1[%c0_14, %c0_15, %c1_16, %c0_17] : memref<1x16x16x8xbf16, #tpu.memory_space<vmem>>, vector<1x15x15x8xbf16>
    %9 = vector.shape_cast %8 : vector<1x15x15x8xbf16> to vector<15x15x8xbf16>
    %c1_18 = arith.constant 1 : index
    %c0_19 = arith.constant 0 : index
    %c16 = arith.constant 16 : index
    %10 = vector.load %arg5[%c1_18, %c0_19, %c16] : memref<16x16x72xbf16, #tpu.memory_space<vmem>>, vector<15x15x8xbf16>
    tpu.vector_store %arg5[%c1_18, %c0_19, %c16], %9 {strides = array<i32>} : memref<16x16x72xbf16, #tpu.memory_space<vmem>>, vector<15x15x8xbf16>,
    %c0_20 = arith.constant 0 : index
    %c0_21 = arith.constant 0 : index
    %c0_22 = arith.constant 0 : index
    %c0_23 = arith.constant 0 : index
    %11 = vector.load %arg1[%c0_20, %c0_21, %c0_22, %c0_23] : memref<1x16x16x8xbf16, #tpu.memory_space<vmem>>, vector<1x16x15x8xbf16>
    %12 = vector.shape_cast %11 : vector<1x16x15x8xbf16> to vector<16x15x8xbf16>
    %c0_24 = arith.constant 0 : index
    %c1_25 = arith.constant 1 : index
    %c24 = arith.constant 24 : index
    %13 = vector.load %arg5[%c0_24, %c1_25, %c24] : memref<16x16x72xbf16, #tpu.memory_space<vmem>>, vector<16x15x8xbf16>
    tpu.vector_store %arg5[%c0_24, %c1_25, %c24], %12 {strides = array<i32>} : memref<16x16x72xbf16, #tpu.memory_space<vmem>>, vector<16x15x8xbf16>,
    %c0_26 = arith.constant 0 : index
    %c0_27 = arith.constant 0 : index
    %c0_28 = arith.constant 0 : index
    %c0_29 = arith.constant 0 : index
    %14 = vector.load %arg1[%c0_26, %c0_27, %c0_28, %c0_29] : memref<1x16x16x8xbf16, #tpu.memory_space<vmem>>, vector<1x16x16x8xbf16>
    %15 = vector.shape_cast %14 : vector<1x16x16x8xbf16> to vector<16x16x8xbf16>
    %c0_30 = arith.constant 0 : index
    %c0_31 = arith.constant 0 : index
    %c32 = arith.constant 32 : index
    %16 = vector.load %arg5[%c0_30, %c0_31, %c32] : memref<16x16x72xbf16, #tpu.memory_space<vmem>>, vector<16x16x8xbf16>
    tpu.vector_store %arg5[%c0_30, %c0_31, %c32], %15 {strides = array<i32>} : memref<16x16x72xbf16, #tpu.memory_space<vmem>>, vector<16x16x8xbf16>,
    %c0_32 = arith.constant 0 : index
    %c0_33 = arith.constant 0 : index
    %c1_34 = arith.constant 1 : index
    %c0_35 = arith.constant 0 : index
    %17 = vector.load %arg1[%c0_32, %c0_33, %c1_34, %c0_35] : memref<1x16x16x8xbf16, #tpu.memory_space<vmem>>, vector<1x16x15x8xbf16>
    %18 = vector.shape_cast %17 : vector<1x16x15x8xbf16> to vector<16x15x8xbf16>
    %c0_36 = arith.constant 0 : index
    %c0_37 = arith.constant 0 : index
    %c40 = arith.constant 40 : index
    %19 = vector.load %arg5[%c0_36, %c0_37, %c40] : memref<16x16x72xbf16, #tpu.memory_space<vmem>>, vector<16x15x8xbf16>
    tpu.vector_store %arg5[%c0_36, %c0_37, %c40], %18 {strides = array<i32>} : memref<16x16x72xbf16, #tpu.memory_space<vmem>>, vector<16x15x8xbf16>,
    %c0_38 = arith.constant 0 : index
    %c1_39 = arith.constant 1 : index
    %c0_40 = arith.constant 0 : index
    %c0_41 = arith.constant 0 : index
    %20 = vector.load %arg1[%c0_38, %c1_39, %c0_40, %c0_41] : memref<1x16x16x8xbf16, #tpu.memory_space<vmem>>, vector<1x15x15x8xbf16>
    %21 = vector.shape_cast %20 : vector<1x15x15x8xbf16> to vector<15x15x8xbf16>
    %c0_42 = arith.constant 0 : index
    %c1_43 = arith.constant 1 : index
    %c48 = arith.constant 48 : index
    %22 = vector.load %arg5[%c0_42, %c1_43, %c48] : memref<16x16x72xbf16, #tpu.memory_space<vmem>>, vector<15x15x8xbf16>
    tpu.vector_store %arg5[%c0_42, %c1_43, %c48], %21 {strides = array<i32>} : memref<16x16x72xbf16, #tpu.memory_space<vmem>>, vector<15x15x8xbf16>,
    %c0_44 = arith.constant 0 : index
    %c1_45 = arith.constant 1 : index
    %c0_46 = arith.constant 0 : index
    %c0_47 = arith.constant 0 : index
    %23 = vector.load %arg1[%c0_44, %c1_45, %c0_46, %c0_47] : memref<1x16x16x8xbf16, #tpu.memory_space<vmem>>, vector<1x15x16x8xbf16>
    %24 = vector.shape_cast %23 : vector<1x15x16x8xbf16> to vector<15x16x8xbf16>
    %c0_48 = arith.constant 0 : index
    %c0_49 = arith.constant 0 : index
    %c56 = arith.constant 56 : index
    %25 = vector.load %arg5[%c0_48, %c0_49, %c56] : memref<16x16x72xbf16, #tpu.memory_space<vmem>>, vector<15x16x8xbf16>
    tpu.vector_store %arg5[%c0_48, %c0_49, %c56], %24 {strides = array<i32>} : memref<16x16x72xbf16, #tpu.memory_space<vmem>>, vector<15x16x8xbf16>,
    %c0_50 = arith.constant 0 : index
    %c1_51 = arith.constant 1 : index
    %c1_52 = arith.constant 1 : index
    %c0_53 = arith.constant 0 : index
    %26 = vector.load %arg1[%c0_50, %c1_51, %c1_52, %c0_53] : memref<1x16x16x8xbf16, #tpu.memory_space<vmem>>, vector<1x15x15x8xbf16>
    %27 = vector.shape_cast %26 : vector<1x15x15x8xbf16> to vector<15x15x8xbf16>
    %c0_54 = arith.constant 0 : index
    %c0_55 = arith.constant 0 : index
    %c64 = arith.constant 64 : index
    %28 = vector.load %arg5[%c0_54, %c0_55, %c64] : memref<16x16x72xbf16, #tpu.memory_space<vmem>>, vector<15x15x8xbf16>
    tpu.vector_store %arg5[%c0_54, %c0_55, %c64], %27 {strides = array<i32>} : memref<16x16x72xbf16, #tpu.memory_space<vmem>>, vector<15x15x8xbf16>,
    %c0_56 = arith.constant 0 : index
    %c0_57 = arith.constant 0 : index
    %c0_58 = arith.constant 0 : index
    %29 = vector.load %arg5[%c0_56, %c0_57, %c0_58] : memref<16x16x72xbf16, #tpu.memory_space<vmem>>, vector<16x16x72xbf16>
    %30 = vector.shape_cast %29 : vector<16x16x72xbf16> to vector<256x72xbf16>
    %c0_59 = arith.constant 0 : index
    %c0_60 = arith.constant 0 : index
    %31 = vector.load %arg2[%c0_59, %c0_60] : memref<72x8xbf16, #tpu.memory_space<vmem>>, vector<72x8xbf16>
    %cst_61 = arith.constant dense<0.000000e+00> : vector<256x8xf32>
    %32 = tpu.matmul %30, %31, %cst_61 {dimension_numbers = #tpu.dot_dimension_numbers<[1], [0], [0], [1], [0, 0, 1, 1], [], []>} : vector<256x72xbf16>, vector<72x8xbf16>, vector<256x8xf32> -> vector<256x8xf32>
    %c0_62 = arith.constant 0 : index
    %c0_63 = arith.constant 0 : index
    %33 = vector.load %arg3[%c0_62, %c0_63] : memref<1x8xf32, #tpu.memory_space<vmem>>, vector<1x8xf32>
    %34 = vector.broadcast %33 : vector<1x8xf32> to vector<256x8xf32>
    %35 = arith.addf %32, %34 : vector<256x8xf32>
    %cst_64 = arith.constant 0.000000e+00 : f32
    %36 = vector.broadcast %cst_64 : f32 to vector<256x8xf32>
    %37 = arith.maximumf %35, %36 : vector<256x8xf32>
    %38 = arith.truncf %37 : vector<256x8xf32> to vector<256x8xbf16>
    %c0_65 = arith.constant 0 : index
    %c0_66 = arith.constant 0 : index
    %c0_67 = arith.constant 0 : index
    %39 = vector.load %arg4[%c0_65, %c0_66, %c0_67] : memref<1x256x8xbf16, #tpu.memory_space<vmem>>, vector<1x256x8xbf16>
    %40 = vector.shape_cast %39 : vector<1x256x8xbf16> to vector<256x8xbf16>
    %41 = vector.shape_cast %38 : vector<256x8xbf16> to vector<1x256x8xbf16>
    tpu.vector_store %arg4[%c0_65, %c0_66, %c0_67], %41 {strides = array<i32>} : memref<1x256x8xbf16, #tpu.memory_space<vmem>>, vector<1x256x8xbf16>,
    return
  }
  func.func @transform_0(%arg0: i32) -> (i32, i32, i32, i32) {
    %c0_i32 = arith.constant 0 : i32
    %c0_i32_0 = arith.constant 0 : i32
    %c0_i32_1 = arith.constant 0 : i32
    %c0_i32_2 = arith.constant 0 : i32
    return %arg0, %c0_i32, %c0_i32_0, %c0_i32_1 : i32, i32, i32, i32
  }
  func.func @transform_1(%arg0: i32) -> (i32, i32) {
    %c0_i32 = arith.constant 0 : i32
    %c0_i32_0 = arith.constant 0 : i32
    %c0_i32_1 = arith.constant 0 : i32
    return %c0_i32, %c0_i32_0 : i32, i32
  }
  func.func @transform_2(%arg0: i32) -> (i32, i32) {
    %c0_i32 = arith.constant 0 : i32
    %c0_i32_0 = arith.constant 0 : i32
    %c0_i32_1 = arith.constant 0 : i32
    return %c0_i32, %c0_i32_0 : i32, i32
  }
  func.func @transform_3(%arg0: i32) -> (i32, i32, i32) {
    %c0_i32 = arith.constant 0 : i32
    %c0_i32_0 = arith.constant 0 : i32
    %c0_i32_1 = arith.constant 0 : i32
    return %arg0, %c0_i32, %c0_i32_0 : i32, i32, i32
  }
}

module attributes {stable_mosaic.version = 11 : i64} {
  func.func @conv3_ca_kernel(%arg0: i32, %arg1: i32, %arg2: memref<1x256x8xbf16, #tpu.memory_space<vmem>>, %arg3: memref<8x32xbf16, #tpu.memory_space<vmem>>, %arg4: memref<1x32xf32, #tpu.memory_space<vmem>>, %arg5: memref<32x2xf32, #tpu.memory_space<vmem>>, %arg6: memref<1x2xf32, #tpu.memory_space<vmem>>, %arg7: memref<2x32xf32, #tpu.memory_space<vmem>>, %arg8: memref<1x32xf32, #tpu.memory_space<vmem>>, %arg9: memref<1x256x32xf32, #tpu.memory_space<vmem>>, %arg10: memref<1x1x32xf32, #tpu.memory_space<vmem>>, %arg11: memref<1x32xf32, #tpu.memory_space<vmem>>, %arg12: memref<1x32xf32, #tpu.memory_space<vmem>>) attributes {dimension_semantics = [#tpu.dimension_semantics<parallel>, #tpu.dimension_semantics<arbitrary>], iteration_bounds = array<i64: 2, 1>, scalar_prefetch = 0 : i64, scratch_operands = 2 : i64, tpu.core_type = #tpu.core_type<tc>, window_params = [{transform_indices = @transform_0, window_bounds = array<i64: 1, 256, 8>}, {pipeline_mode = #tpu.pipeline_mode<synchronous>, transform_indices = @transform_1, window_bounds = array<i64: 8, 32>}, {pipeline_mode = #tpu.pipeline_mode<synchronous>, transform_indices = @transform_2, window_bounds = array<i64: 1, 32>}, {pipeline_mode = #tpu.pipeline_mode<synchronous>, transform_indices = @transform_3, window_bounds = array<i64: 32, 2>}, {pipeline_mode = #tpu.pipeline_mode<synchronous>, transform_indices = @transform_4, window_bounds = array<i64: 1, 2>}, {pipeline_mode = #tpu.pipeline_mode<synchronous>, transform_indices = @transform_5, window_bounds = array<i64: 2, 32>}, {pipeline_mode = #tpu.pipeline_mode<synchronous>, transform_indices = @transform_6, window_bounds = array<i64: 1, 32>}, {transform_indices = @transform_7, window_bounds = array<i64: 1, 256, 32>}, {transform_indices = @transform_8, window_bounds = array<i64: 1, 1, 32>}]} {
    %c0_i32 = arith.constant 0 : i32
    %0 = arith.cmpi eq, %arg1, %c0_i32 : i32
    %1 = arith.extui %0 : i1 to i32
    %c0_i32_0 = arith.constant 0 : i32
    %2 = arith.cmpi ne, %1, %c0_i32_0 : i32
    scf.if %2 {
      %cst_22 = arith.constant 0.000000e+00 : f32
      %26 = vector.broadcast %cst_22 : f32 to vector<1x32xf32>
      %c0_23 = arith.constant 0 : index
      %c0_24 = arith.constant 0 : index
      %27 = vector.load %arg11[%c0_23, %c0_24] : memref<1x32xf32, #tpu.memory_space<vmem>>, vector<1x32xf32>
      tpu.vector_store %arg11[%c0_23, %c0_24], %26 {strides = array<i32>} : memref<1x32xf32, #tpu.memory_space<vmem>>, vector<1x32xf32>,
      %cst_25 = arith.constant 0xFF800000 : f32
      %28 = vector.broadcast %cst_25 : f32 to vector<1x32xf32>
      %c0_26 = arith.constant 0 : index
      %c0_27 = arith.constant 0 : index
      %29 = vector.load %arg12[%c0_26, %c0_27] : memref<1x32xf32, #tpu.memory_space<vmem>>, vector<1x32xf32>
      tpu.vector_store %arg12[%c0_26, %c0_27], %28 {strides = array<i32>} : memref<1x32xf32, #tpu.memory_space<vmem>>, vector<1x32xf32>,
    } else {
    }
    %c0 = arith.constant 0 : index
    %c0_1 = arith.constant 0 : index
    %c0_2 = arith.constant 0 : index
    %3 = vector.load %arg2[%c0, %c0_1, %c0_2] : memref<1x256x8xbf16, #tpu.memory_space<vmem>>, vector<1x256x8xbf16>
    %4 = vector.shape_cast %3 : vector<1x256x8xbf16> to vector<256x8xbf16>
    %c0_3 = arith.constant 0 : index
    %c0_4 = arith.constant 0 : index
    %5 = vector.load %arg3[%c0_3, %c0_4] : memref<8x32xbf16, #tpu.memory_space<vmem>>, vector<8x32xbf16>
    %cst = arith.constant dense<0.000000e+00> : vector<256x32xf32>
    %6 = tpu.matmul %4, %5, %cst {dimension_numbers = #tpu.dot_dimension_numbers<[1], [0], [0], [1], [0, 0, 1, 1], [], []>} : vector<256x8xbf16>, vector<8x32xbf16>, vector<256x32xf32> -> vector<256x32xf32>
    %c0_5 = arith.constant 0 : index
    %c0_6 = arith.constant 0 : index
    %7 = vector.load %arg4[%c0_5, %c0_6] : memref<1x32xf32, #tpu.memory_space<vmem>>, vector<1x32xf32>
    %8 = vector.broadcast %7 : vector<1x32xf32> to vector<256x32xf32>
    %9 = arith.addf %6, %8 : vector<256x32xf32>
    %c0_7 = arith.constant 0 : index
    %c0_8 = arith.constant 0 : index
    %c0_9 = arith.constant 0 : index
    %10 = vector.load %arg9[%c0_7, %c0_8, %c0_9] : memref<1x256x32xf32, #tpu.memory_space<vmem>>, vector<1x256x32xf32>
    %11 = vector.shape_cast %10 : vector<1x256x32xf32> to vector<256x32xf32>
    %12 = vector.shape_cast %9 : vector<256x32xf32> to vector<1x256x32xf32>
    tpu.vector_store %arg9[%c0_7, %c0_8, %c0_9], %12 {strides = array<i32>} : memref<1x256x32xf32, #tpu.memory_space<vmem>>, vector<1x256x32xf32>,
    %c0_10 = arith.constant 0 : index
    %c0_11 = arith.constant 0 : index
    %13 = vector.load %arg11[%c0_10, %c0_11] : memref<1x32xf32, #tpu.memory_space<vmem>>, vector<1x32xf32>
    %cst_12 = arith.constant dense<0.000000e+00> : vector<32xf32>
    %14 = vector.multi_reduction <add>, %9, %cst_12 [0] : vector<256x32xf32> to vector<32xf32>
    %15 = vector.shape_cast %14 : vector<32xf32> to vector<1x32xf32>
    %16 = arith.addf %13, %15 : vector<1x32xf32>
    %c0_13 = arith.constant 0 : index
    %c0_14 = arith.constant 0 : index
    %17 = vector.load %arg11[%c0_13, %c0_14] : memref<1x32xf32, #tpu.memory_space<vmem>>, vector<1x32xf32>
    tpu.vector_store %arg11[%c0_13, %c0_14], %16 {strides = array<i32>} : memref<1x32xf32, #tpu.memory_space<vmem>>, vector<1x32xf32>,
    %c0_15 = arith.constant 0 : index
    %c0_16 = arith.constant 0 : index
    %18 = vector.load %arg12[%c0_15, %c0_16] : memref<1x32xf32, #tpu.memory_space<vmem>>, vector<1x32xf32>
    %cst_17 = arith.constant dense<0xFF800000> : vector<32xf32>
    %19 = vector.multi_reduction <maximumf>, %9, %cst_17 [0] : vector<256x32xf32> to vector<32xf32>
    %20 = vector.shape_cast %19 : vector<32xf32> to vector<1x32xf32>
    %21 = arith.maximumf %18, %20 : vector<1x32xf32>
    %c0_18 = arith.constant 0 : index
    %c0_19 = arith.constant 0 : index
    %22 = vector.load %arg12[%c0_18, %c0_19] : memref<1x32xf32, #tpu.memory_space<vmem>>, vector<1x32xf32>
    tpu.vector_store %arg12[%c0_18, %c0_19], %21 {strides = array<i32>} : memref<1x32xf32, #tpu.memory_space<vmem>>, vector<1x32xf32>,
    %c0_i32_20 = arith.constant 0 : i32
    %23 = arith.cmpi eq, %arg1, %c0_i32_20 : i32
    %24 = arith.extui %23 : i1 to i32
    %c0_i32_21 = arith.constant 0 : i32
    %25 = arith.cmpi ne, %24, %c0_i32_21 : i32
    scf.if %25 {
      %c0_22 = arith.constant 0 : index
      %c0_23 = arith.constant 0 : index
      %26 = vector.load %arg11[%c0_22, %c0_23] : memref<1x32xf32, #tpu.memory_space<vmem>>, vector<1x32xf32>
      %cst_24 = arith.constant 3.906250e-03 : f32
      %27 = vector.broadcast %cst_24 : f32 to vector<1x32xf32>
      %28 = arith.mulf %26, %27 : vector<1x32xf32>
      %c0_25 = arith.constant 0 : index
      %c0_26 = arith.constant 0 : index
      %29 = vector.load %arg5[%c0_25, %c0_26] : memref<32x2xf32, #tpu.memory_space<vmem>>, vector<32x2xf32>
      %cst_27 = arith.constant dense<0.000000e+00> : vector<1x2xf32>
      %30 = tpu.matmul %28, %29, %cst_27 {dimension_numbers = #tpu.dot_dimension_numbers<[1], [0], [0], [1], [0, 0, 1, 1], [], []>} : vector<1x32xf32>, vector<32x2xf32>, vector<1x2xf32> -> vector<1x2xf32>
      %c0_28 = arith.constant 0 : index
      %c0_29 = arith.constant 0 : index
      %31 = vector.load %arg6[%c0_28, %c0_29] : memref<1x2xf32, #tpu.memory_space<vmem>>, vector<1x2xf32>
      %32 = arith.addf %30, %31 : vector<1x2xf32>
      %cst_30 = arith.constant 0.000000e+00 : f32
      %33 = vector.broadcast %cst_30 : f32 to vector<1x2xf32>
      %34 = arith.maximumf %32, %33 : vector<1x2xf32>
      %c0_31 = arith.constant 0 : index
      %c0_32 = arith.constant 0 : index
      %35 = vector.load %arg7[%c0_31, %c0_32] : memref<2x32xf32, #tpu.memory_space<vmem>>, vector<2x32xf32>
      %cst_33 = arith.constant dense<0.000000e+00> : vector<1x32xf32>
      %36 = tpu.matmul %34, %35, %cst_33 {dimension_numbers = #tpu.dot_dimension_numbers<[1], [0], [0], [1], [0, 0, 1, 1], [], []>} : vector<1x2xf32>, vector<2x32xf32>, vector<1x32xf32> -> vector<1x32xf32>
      %c0_34 = arith.constant 0 : index
      %c0_35 = arith.constant 0 : index
      %37 = vector.load %arg8[%c0_34, %c0_35] : memref<1x32xf32, #tpu.memory_space<vmem>>, vector<1x32xf32>
      %38 = arith.addf %36, %37 : vector<1x32xf32>
      %c0_36 = arith.constant 0 : index
      %c0_37 = arith.constant 0 : index
      %39 = vector.load %arg12[%c0_36, %c0_37] : memref<1x32xf32, #tpu.memory_space<vmem>>, vector<1x32xf32>
      %c0_38 = arith.constant 0 : index
      %c0_39 = arith.constant 0 : index
      %40 = vector.load %arg5[%c0_38, %c0_39] : memref<32x2xf32, #tpu.memory_space<vmem>>, vector<32x2xf32>
      %cst_40 = arith.constant dense<0.000000e+00> : vector<1x2xf32>
      %41 = tpu.matmul %39, %40, %cst_40 {dimension_numbers = #tpu.dot_dimension_numbers<[1], [0], [0], [1], [0, 0, 1, 1], [], []>} : vector<1x32xf32>, vector<32x2xf32>, vector<1x2xf32> -> vector<1x2xf32>
      %c0_41 = arith.constant 0 : index
      %c0_42 = arith.constant 0 : index
      %42 = vector.load %arg6[%c0_41, %c0_42] : memref<1x2xf32, #tpu.memory_space<vmem>>, vector<1x2xf32>
      %43 = arith.addf %41, %42 : vector<1x2xf32>
      %cst_43 = arith.constant 0.000000e+00 : f32
      %44 = vector.broadcast %cst_43 : f32 to vector<1x2xf32>
      %45 = arith.maximumf %43, %44 : vector<1x2xf32>
      %c0_44 = arith.constant 0 : index
      %c0_45 = arith.constant 0 : index
      %46 = vector.load %arg7[%c0_44, %c0_45] : memref<2x32xf32, #tpu.memory_space<vmem>>, vector<2x32xf32>
      %cst_46 = arith.constant dense<0.000000e+00> : vector<1x32xf32>
      %47 = tpu.matmul %45, %46, %cst_46 {dimension_numbers = #tpu.dot_dimension_numbers<[1], [0], [0], [1], [0, 0, 1, 1], [], []>} : vector<1x2xf32>, vector<2x32xf32>, vector<1x32xf32> -> vector<1x32xf32>
      %c0_47 = arith.constant 0 : index
      %c0_48 = arith.constant 0 : index
      %48 = vector.load %arg8[%c0_47, %c0_48] : memref<1x32xf32, #tpu.memory_space<vmem>>, vector<1x32xf32>
      %49 = arith.addf %47, %48 : vector<1x32xf32>
      %50 = arith.addf %38, %49 : vector<1x32xf32>
      %51 = arith.negf %50 : vector<1x32xf32>
      %52 = math.exp %51 : vector<1x32xf32>
      %cst_49 = arith.constant 1.000000e+00 : f32
      %53 = vector.broadcast %cst_49 : f32 to vector<1x32xf32>
      %54 = arith.addf %53, %52 : vector<1x32xf32>
      %55 = arith.divf %53, %54 : vector<1x32xf32>
      %c0_50 = arith.constant 0 : index
      %c0_51 = arith.constant 0 : index
      %c0_52 = arith.constant 0 : index
      %56 = vector.load %arg10[%c0_50, %c0_51, %c0_52] : memref<1x1x32xf32, #tpu.memory_space<vmem>>, vector<1x1x32xf32>
      %57 = vector.shape_cast %56 : vector<1x1x32xf32> to vector<1x32xf32>
      %58 = vector.shape_cast %55 : vector<1x32xf32> to vector<1x1x32xf32>
      tpu.vector_store %arg10[%c0_50, %c0_51, %c0_52], %58 {strides = array<i32>} : memref<1x1x32xf32, #tpu.memory_space<vmem>>, vector<1x1x32xf32>,
    } else {
    }
    return
  }
  func.func @transform_0(%arg0: i32, %arg1: i32) -> (i32, i32, i32) {
    %c0_i32 = arith.constant 0 : i32
    %c0_i32_0 = arith.constant 0 : i32
    return %arg0, %arg1, %c0_i32 : i32, i32, i32
  }
  func.func @transform_1(%arg0: i32, %arg1: i32) -> (i32, i32) {
    %c0_i32 = arith.constant 0 : i32
    %c0_i32_0 = arith.constant 0 : i32
    %c0_i32_1 = arith.constant 0 : i32
    return %c0_i32, %c0_i32_0 : i32, i32
  }
  func.func @transform_2(%arg0: i32, %arg1: i32) -> (i32, i32) {
    %c0_i32 = arith.constant 0 : i32
    %c0_i32_0 = arith.constant 0 : i32
    %c0_i32_1 = arith.constant 0 : i32
    return %c0_i32, %c0_i32_0 : i32, i32
  }
  func.func @transform_3(%arg0: i32, %arg1: i32) -> (i32, i32) {
    %c0_i32 = arith.constant 0 : i32
    %c0_i32_0 = arith.constant 0 : i32
    %c0_i32_1 = arith.constant 0 : i32
    return %c0_i32, %c0_i32_0 : i32, i32
  }
  func.func @transform_4(%arg0: i32, %arg1: i32) -> (i32, i32) {
    %c0_i32 = arith.constant 0 : i32
    %c0_i32_0 = arith.constant 0 : i32
    %c0_i32_1 = arith.constant 0 : i32
    return %c0_i32, %c0_i32_0 : i32, i32
  }
  func.func @transform_5(%arg0: i32, %arg1: i32) -> (i32, i32) {
    %c0_i32 = arith.constant 0 : i32
    %c0_i32_0 = arith.constant 0 : i32
    %c0_i32_1 = arith.constant 0 : i32
    return %c0_i32, %c0_i32_0 : i32, i32
  }
  func.func @transform_6(%arg0: i32, %arg1: i32) -> (i32, i32) {
    %c0_i32 = arith.constant 0 : i32
    %c0_i32_0 = arith.constant 0 : i32
    %c0_i32_1 = arith.constant 0 : i32
    return %c0_i32, %c0_i32_0 : i32, i32
  }
  func.func @transform_7(%arg0: i32, %arg1: i32) -> (i32, i32, i32) {
    %c0_i32 = arith.constant 0 : i32
    %c0_i32_0 = arith.constant 0 : i32
    return %arg0, %arg1, %c0_i32 : i32, i32, i32
  }
  func.func @transform_8(%arg0: i32, %arg1: i32) -> (i32, i32, i32) {
    %c0_i32 = arith.constant 0 : i32
    %c0_i32_0 = arith.constant 0 : i32
    %c0_i32_1 = arith.constant 0 : i32
    return %arg0, %c0_i32, %c0_i32_0 : i32, i32, i32
  }
}

module attributes {stable_mosaic.version = 11 : i64} {
  func.func @cbam_spatial_residual_kernel(%arg0: i32, %arg1: memref<1x16x16x32xf32, #tpu.memory_space<vmem>>, %arg2: memref<1x1x32xf32, #tpu.memory_space<vmem>>, %arg3: memref<1x16x16x32xf32, #tpu.memory_space<vmem>>, %arg4: memref<2x7x7xf32, #tpu.memory_space<smem>>, %arg5: memref<1xf32, #tpu.memory_space<smem>>, %arg6: memref<1x16x16x32xf32, #tpu.memory_space<vmem>>, %arg7: memref<2x22x22xf32, #tpu.memory_space<vmem>>) attributes {dimension_semantics = [#tpu.dimension_semantics<parallel>], iteration_bounds = array<i64: 2>, scalar_prefetch = 0 : i64, scratch_operands = 1 : i64, tpu.core_type = #tpu.core_type<tc>, window_params = [{transform_indices = @transform_0, window_bounds = array<i64: 1, 16, 16, 32>}, {transform_indices = @transform_1, window_bounds = array<i64: 1, 1, 32>}, {transform_indices = @transform_2, window_bounds = array<i64: 1, 16, 16, 32>}, {transform_indices = @transform_3, window_bounds = array<i64: 2, 7, 7>}, {transform_indices = @transform_4, window_bounds = array<i64: 1>}, {transform_indices = @transform_5, window_bounds = array<i64: 1, 16, 16, 32>}]} {
    %c0 = arith.constant 0 : index
    %c0_0 = arith.constant 0 : index
    %c0_1 = arith.constant 0 : index
    %c0_2 = arith.constant 0 : index
    %0 = vector.load %arg1[%c0, %c0_0, %c0_1, %c0_2] : memref<1x16x16x32xf32, #tpu.memory_space<vmem>>, vector<1x16x16x32xf32>
    %1 = vector.shape_cast %0 : vector<1x16x16x32xf32> to vector<16x16x32xf32>
    %c0_3 = arith.constant 0 : index
    %c0_4 = arith.constant 0 : index
    %c0_5 = arith.constant 0 : index
    %2 = vector.load %arg2[%c0_3, %c0_4, %c0_5] : memref<1x1x32xf32, #tpu.memory_space<vmem>>, vector<1x1x32xf32>
    %3 = vector.shape_cast %2 : vector<1x1x32xf32> to vector<1x32xf32>
    %4 = vector.shape_cast %3 : vector<1x32xf32> to vector<1x1x32xf32>
    %5 = vector.broadcast %4 : vector<1x1x32xf32> to vector<16x16x32xf32>
    %6 = arith.mulf %1, %5 : vector<16x16x32xf32>
    %cst = arith.constant 0.000000e+00 : f32
    %7 = vector.broadcast %cst : f32 to vector<2x22x22xf32>
    %c0_6 = arith.constant 0 : index
    %c0_7 = arith.constant 0 : index
    %c0_8 = arith.constant 0 : index
    %8 = vector.load %arg7[%c0_6, %c0_7, %c0_8] : memref<2x22x22xf32, #tpu.memory_space<vmem>>, vector<2x22x22xf32>
    tpu.vector_store %arg7[%c0_6, %c0_7, %c0_8], %7 {strides = array<i32>} : memref<2x22x22xf32, #tpu.memory_space<vmem>>, vector<2x22x22xf32>,
    %cst_9 = arith.constant dense<0xFF800000> : vector<16x16xf32>
    %9 = vector.multi_reduction <maximumf>, %6, %cst_9 [2] : vector<16x16x32xf32> to vector<16x16xf32>
    %c0_10 = arith.constant 0 : index
    %c3 = arith.constant 3 : index
    %c3_11 = arith.constant 3 : index
    %10 = vector.load %arg7[%c0_10, %c3, %c3_11] : memref<2x22x22xf32, #tpu.memory_space<vmem>>, vector<1x16x16xf32>
    %11 = vector.shape_cast %10 : vector<1x16x16xf32> to vector<16x16xf32>
    %12 = vector.shape_cast %9 : vector<16x16xf32> to vector<1x16x16xf32>
    tpu.vector_store %arg7[%c0_10, %c3, %c3_11], %12 {strides = array<i32>} : memref<2x22x22xf32, #tpu.memory_space<vmem>>, vector<1x16x16xf32>,
    %cst_12 = arith.constant dense<0.000000e+00> : vector<16x16xf32>
    %13 = vector.multi_reduction <add>, %6, %cst_12 [2] : vector<16x16x32xf32> to vector<16x16xf32>
    %cst_13 = arith.constant 3.200000e+01 : f32
    %14 = vector.broadcast %cst_13 : f32 to vector<16x16xf32>
    %15 = arith.divf %13, %14 : vector<16x16xf32>
    %c1 = arith.constant 1 : index
    %c3_14 = arith.constant 3 : index
    %c3_15 = arith.constant 3 : index
    %16 = vector.load %arg7[%c1, %c3_14, %c3_15] : memref<2x22x22xf32, #tpu.memory_space<vmem>>, vector<1x16x16xf32>
    %17 = vector.shape_cast %16 : vector<1x16x16xf32> to vector<16x16xf32>
    %18 = vector.shape_cast %15 : vector<16x16xf32> to vector<1x16x16xf32>
    tpu.vector_store %arg7[%c1, %c3_14, %c3_15], %18 {strides = array<i32>} : memref<2x22x22xf32, #tpu.memory_space<vmem>>, vector<1x16x16xf32>,
    %cst_16 = arith.constant 0.000000e+00 : f32
    %19 = vector.broadcast %cst_16 : f32 to vector<16x16xf32>
    %c0_17 = arith.constant 0 : index
    %20 = memref.load %arg5[%c0_17] : memref<1xf32, #tpu.memory_space<smem>>
    %21 = vector.broadcast %20 : f32 to vector<16x16xf32>
    %22 = arith.addf %19, %21 : vector<16x16xf32>
    %c0_18 = arith.constant 0 : index
    %c0_19 = arith.constant 0 : index
    %c0_20 = arith.constant 0 : index
    %23 = vector.load %arg7[%c0_18, %c0_19, %c0_20] : memref<2x22x22xf32, #tpu.memory_space<vmem>>, vector<1x16x16xf32>
    %24 = vector.shape_cast %23 : vector<1x16x16xf32> to vector<16x16xf32>
    %c0_21 = arith.constant 0 : index
    %c0_22 = arith.constant 0 : index
    %c0_23 = arith.constant 0 : index
    %25 = memref.load %arg4[%c0_21, %c0_22, %c0_23] : memref<2x7x7xf32, #tpu.memory_space<smem>>
    %26 = vector.broadcast %25 : f32 to vector<16x16xf32>
    %27 = arith.mulf %24, %26 : vector<16x16xf32>
    %28 = arith.addf %22, %27 : vector<16x16xf32>
    %c0_24 = arith.constant 0 : index
    %c0_25 = arith.constant 0 : index
    %c1_26 = arith.constant 1 : index
    %29 = vector.load %arg7[%c0_24, %c0_25, %c1_26] : memref<2x22x22xf32, #tpu.memory_space<vmem>>, vector<1x16x16xf32>
    %30 = vector.shape_cast %29 : vector<1x16x16xf32> to vector<16x16xf32>
    %c0_27 = arith.constant 0 : index
    %c0_28 = arith.constant 0 : index
    %c1_29 = arith.constant 1 : index
    %31 = memref.load %arg4[%c0_27, %c0_28, %c1_29] : memref<2x7x7xf32, #tpu.memory_space<smem>>
    %32 = vector.broadcast %31 : f32 to vector<16x16xf32>
    %33 = arith.mulf %30, %32 : vector<16x16xf32>
    %34 = arith.addf %28, %33 : vector<16x16xf32>
    %c0_30 = arith.constant 0 : index
    %c0_31 = arith.constant 0 : index
    %c2 = arith.constant 2 : index
    %35 = vector.load %arg7[%c0_30, %c0_31, %c2] : memref<2x22x22xf32, #tpu.memory_space<vmem>>, vector<1x16x16xf32>
    %36 = vector.shape_cast %35 : vector<1x16x16xf32> to vector<16x16xf32>
    %c0_32 = arith.constant 0 : index
    %c0_33 = arith.constant 0 : index
    %c2_34 = arith.constant 2 : index
    %37 = memref.load %arg4[%c0_32, %c0_33, %c2_34] : memref<2x7x7xf32, #tpu.memory_space<smem>>
    %38 = vector.broadcast %37 : f32 to vector<16x16xf32>
    %39 = arith.mulf %36, %38 : vector<16x16xf32>
    %40 = arith.addf %34, %39 : vector<16x16xf32>
    %c0_35 = arith.constant 0 : index
    %c0_36 = arith.constant 0 : index
    %c3_37 = arith.constant 3 : index
    %41 = vector.load %arg7[%c0_35, %c0_36, %c3_37] : memref<2x22x22xf32, #tpu.memory_space<vmem>>, vector<1x16x16xf32>
    %42 = vector.shape_cast %41 : vector<1x16x16xf32> to vector<16x16xf32>
    %c0_38 = arith.constant 0 : index
    %c0_39 = arith.constant 0 : index
    %c3_40 = arith.constant 3 : index
    %43 = memref.load %arg4[%c0_38, %c0_39, %c3_40] : memref<2x7x7xf32, #tpu.memory_space<smem>>
    %44 = vector.broadcast %43 : f32 to vector<16x16xf32>
    %45 = arith.mulf %42, %44 : vector<16x16xf32>
    %46 = arith.addf %40, %45 : vector<16x16xf32>
    %c0_41 = arith.constant 0 : index
    %c0_42 = arith.constant 0 : index
    %c4 = arith.constant 4 : index
    %47 = vector.load %arg7[%c0_41, %c0_42, %c4] : memref<2x22x22xf32, #tpu.memory_space<vmem>>, vector<1x16x16xf32>
    %48 = vector.shape_cast %47 : vector<1x16x16xf32> to vector<16x16xf32>
    %c0_43 = arith.constant 0 : index
    %c0_44 = arith.constant 0 : index
    %c4_45 = arith.constant 4 : index
    %49 = memref.load %arg4[%c0_43, %c0_44, %c4_45] : memref<2x7x7xf32, #tpu.memory_space<smem>>
    %50 = vector.broadcast %49 : f32 to vector<16x16xf32>
    %51 = arith.mulf %48, %50 : vector<16x16xf32>
    %52 = arith.addf %46, %51 : vector<16x16xf32>
    %c0_46 = arith.constant 0 : index
    %c0_47 = arith.constant 0 : index
    %c5 = arith.constant 5 : index
    %53 = vector.load %arg7[%c0_46, %c0_47, %c5] : memref<2x22x22xf32, #tpu.memory_space<vmem>>, vector<1x16x16xf32>
    %54 = vector.shape_cast %53 : vector<1x16x16xf32> to vector<16x16xf32>
    %c0_48 = arith.constant 0 : index
    %c0_49 = arith.constant 0 : index
    %c5_50 = arith.constant 5 : index
    %55 = memref.load %arg4[%c0_48, %c0_49, %c5_50] : memref<2x7x7xf32, #tpu.memory_space<smem>>
    %56 = vector.broadcast %55 : f32 to vector<16x16xf32>
    %57 = arith.mulf %54, %56 : vector<16x16xf32>
    %58 = arith.addf %52, %57 : vector<16x16xf32>
    %c0_51 = arith.constant 0 : index
    %c0_52 = arith.constant 0 : index
    %c6 = arith.constant 6 : index
    %59 = vector.load %arg7[%c0_51, %c0_52, %c6] : memref<2x22x22xf32, #tpu.memory_space<vmem>>, vector<1x16x16xf32>
    %60 = vector.shape_cast %59 : vector<1x16x16xf32> to vector<16x16xf32>
    %c0_53 = arith.constant 0 : index
    %c0_54 = arith.constant 0 : index
    %c6_55 = arith.constant 6 : index
    %61 = memref.load %arg4[%c0_53, %c0_54, %c6_55] : memref<2x7x7xf32, #tpu.memory_space<smem>>
    %62 = vector.broadcast %61 : f32 to vector<16x16xf32>
    %63 = arith.mulf %60, %62 : vector<16x16xf32>
    %64 = arith.addf %58, %63 : vector<16x16xf32>
    %c0_56 = arith.constant 0 : index
    %c1_57 = arith.constant 1 : index
    %c0_58 = arith.constant 0 : index
    %65 = vector.load %arg7[%c0_56, %c1_57, %c0_58] : memref<2x22x22xf32, #tpu.memory_space<vmem>>, vector<1x16x16xf32>
    %66 = vector.shape_cast %65 : vector<1x16x16xf32> to vector<16x16xf32>
    %c0_59 = arith.constant 0 : index
    %c1_60 = arith.constant 1 : index
    %c0_61 = arith.constant 0 : index
    %67 = memref.load %arg4[%c0_59, %c1_60, %c0_61] : memref<2x7x7xf32, #tpu.memory_space<smem>>
    %68 = vector.broadcast %67 : f32 to vector<16x16xf32>
    %69 = arith.mulf %66, %68 : vector<16x16xf32>
    %70 = arith.addf %64, %69 : vector<16x16xf32>
    %c0_62 = arith.constant 0 : index
    %c1_63 = arith.constant 1 : index
    %c1_64 = arith.constant 1 : index
    %71 = vector.load %arg7[%c0_62, %c1_63, %c1_64] : memref<2x22x22xf32, #tpu.memory_space<vmem>>, vector<1x16x16xf32>
    %72 = vector.shape_cast %71 : vector<1x16x16xf32> to vector<16x16xf32>
    %c0_65 = arith.constant 0 : index
    %c1_66 = arith.constant 1 : index
    %c1_67 = arith.constant 1 : index
    %73 = memref.load %arg4[%c0_65, %c1_66, %c1_67] : memref<2x7x7xf32, #tpu.memory_space<smem>>
    %74 = vector.broadcast %73 : f32 to vector<16x16xf32>
    %75 = arith.mulf %72, %74 : vector<16x16xf32>
    %76 = arith.addf %70, %75 : vector<16x16xf32>
    %c0_68 = arith.constant 0 : index
    %c1_69 = arith.constant 1 : index
    %c2_70 = arith.constant 2 : index
    %77 = vector.load %arg7[%c0_68, %c1_69, %c2_70] : memref<2x22x22xf32, #tpu.memory_space<vmem>>, vector<1x16x16xf32>
    %78 = vector.shape_cast %77 : vector<1x16x16xf32> to vector<16x16xf32>
    %c0_71 = arith.constant 0 : index
    %c1_72 = arith.constant 1 : index
    %c2_73 = arith.constant 2 : index
    %79 = memref.load %arg4[%c0_71, %c1_72, %c2_73] : memref<2x7x7xf32, #tpu.memory_space<smem>>
    %80 = vector.broadcast %79 : f32 to vector<16x16xf32>
    %81 = arith.mulf %78, %80 : vector<16x16xf32>
    %82 = arith.addf %76, %81 : vector<16x16xf32>
    %c0_74 = arith.constant 0 : index
    %c1_75 = arith.constant 1 : index
    %c3_76 = arith.constant 3 : index
    %83 = vector.load %arg7[%c0_74, %c1_75, %c3_76] : memref<2x22x22xf32, #tpu.memory_space<vmem>>, vector<1x16x16xf32>
    %84 = vector.shape_cast %83 : vector<1x16x16xf32> to vector<16x16xf32>
    %c0_77 = arith.constant 0 : index
    %c1_78 = arith.constant 1 : index
    %c3_79 = arith.constant 3 : index
    %85 = memref.load %arg4[%c0_77, %c1_78, %c3_79] : memref<2x7x7xf32, #tpu.memory_space<smem>>
    %86 = vector.broadcast %85 : f32 to vector<16x16xf32>
    %87 = arith.mulf %84, %86 : vector<16x16xf32>
    %88 = arith.addf %82, %87 : vector<16x16xf32>
    %c0_80 = arith.constant 0 : index
    %c1_81 = arith.constant 1 : index
    %c4_82 = arith.constant 4 : index
    %89 = vector.load %arg7[%c0_80, %c1_81, %c4_82] : memref<2x22x22xf32, #tpu.memory_space<vmem>>, vector<1x16x16xf32>
    %90 = vector.shape_cast %89 : vector<1x16x16xf32> to vector<16x16xf32>
    %c0_83 = arith.constant 0 : index
    %c1_84 = arith.constant 1 : index
    %c4_85 = arith.constant 4 : index
    %91 = memref.load %arg4[%c0_83, %c1_84, %c4_85] : memref<2x7x7xf32, #tpu.memory_space<smem>>
    %92 = vector.broadcast %91 : f32 to vector<16x16xf32>
    %93 = arith.mulf %90, %92 : vector<16x16xf32>
    %94 = arith.addf %88, %93 : vector<16x16xf32>
    %c0_86 = arith.constant 0 : index
    %c1_87 = arith.constant 1 : index
    %c5_88 = arith.constant 5 : index
    %95 = vector.load %arg7[%c0_86, %c1_87, %c5_88] : memref<2x22x22xf32, #tpu.memory_space<vmem>>, vector<1x16x16xf32>
    %96 = vector.shape_cast %95 : vector<1x16x16xf32> to vector<16x16xf32>
    %c0_89 = arith.constant 0 : index
    %c1_90 = arith.constant 1 : index
    %c5_91 = arith.constant 5 : index
    %97 = memref.load %arg4[%c0_89, %c1_90, %c5_91] : memref<2x7x7xf32, #tpu.memory_space<smem>>
    %98 = vector.broadcast %97 : f32 to vector<16x16xf32>
    %99 = arith.mulf %96, %98 : vector<16x16xf32>
    %100 = arith.addf %94, %99 : vector<16x16xf32>
    %c0_92 = arith.constant 0 : index
    %c1_93 = arith.constant 1 : index
    %c6_94 = arith.constant 6 : index
    %101 = vector.load %arg7[%c0_92, %c1_93, %c6_94] : memref<2x22x22xf32, #tpu.memory_space<vmem>>, vector<1x16x16xf32>
    %102 = vector.shape_cast %101 : vector<1x16x16xf32> to vector<16x16xf32>
    %c0_95 = arith.constant 0 : index
    %c1_96 = arith.constant 1 : index
    %c6_97 = arith.constant 6 : index
    %103 = memref.load %arg4[%c0_95, %c1_96, %c6_97] : memref<2x7x7xf32, #tpu.memory_space<smem>>
    %104 = vector.broadcast %103 : f32 to vector<16x16xf32>
    %105 = arith.mulf %102, %104 : vector<16x16xf32>
    %106 = arith.addf %100, %105 : vector<16x16xf32>
    %c0_98 = arith.constant 0 : index
    %c2_99 = arith.constant 2 : index
    %c0_100 = arith.constant 0 : index
    %107 = vector.load %arg7[%c0_98, %c2_99, %c0_100] : memref<2x22x22xf32, #tpu.memory_space<vmem>>, vector<1x16x16xf32>
    %108 = vector.shape_cast %107 : vector<1x16x16xf32> to vector<16x16xf32>
    %c0_101 = arith.constant 0 : index
    %c2_102 = arith.constant 2 : index
    %c0_103 = arith.constant 0 : index
    %109 = memref.load %arg4[%c0_101, %c2_102, %c0_103] : memref<2x7x7xf32, #tpu.memory_space<smem>>
    %110 = vector.broadcast %109 : f32 to vector<16x16xf32>
    %111 = arith.mulf %108, %110 : vector<16x16xf32>
    %112 = arith.addf %106, %111 : vector<16x16xf32>
    %c0_104 = arith.constant 0 : index
    %c2_105 = arith.constant 2 : index
    %c1_106 = arith.constant 1 : index
    %113 = vector.load %arg7[%c0_104, %c2_105, %c1_106] : memref<2x22x22xf32, #tpu.memory_space<vmem>>, vector<1x16x16xf32>
    %114 = vector.shape_cast %113 : vector<1x16x16xf32> to vector<16x16xf32>
    %c0_107 = arith.constant 0 : index
    %c2_108 = arith.constant 2 : index
    %c1_109 = arith.constant 1 : index
    %115 = memref.load %arg4[%c0_107, %c2_108, %c1_109] : memref<2x7x7xf32, #tpu.memory_space<smem>>
    %116 = vector.broadcast %115 : f32 to vector<16x16xf32>
    %117 = arith.mulf %114, %116 : vector<16x16xf32>
    %118 = arith.addf %112, %117 : vector<16x16xf32>
    %c0_110 = arith.constant 0 : index
    %c2_111 = arith.constant 2 : index
    %c2_112 = arith.constant 2 : index
    %119 = vector.load %arg7[%c0_110, %c2_111, %c2_112] : memref<2x22x22xf32, #tpu.memory_space<vmem>>, vector<1x16x16xf32>
    %120 = vector.shape_cast %119 : vector<1x16x16xf32> to vector<16x16xf32>
    %c0_113 = arith.constant 0 : index
    %c2_114 = arith.constant 2 : index
    %c2_115 = arith.constant 2 : index
    %121 = memref.load %arg4[%c0_113, %c2_114, %c2_115] : memref<2x7x7xf32, #tpu.memory_space<smem>>
    %122 = vector.broadcast %121 : f32 to vector<16x16xf32>
    %123 = arith.mulf %120, %122 : vector<16x16xf32>
    %124 = arith.addf %118, %123 : vector<16x16xf32>
    %c0_116 = arith.constant 0 : index
    %c2_117 = arith.constant 2 : index
    %c3_118 = arith.constant 3 : index
    %125 = vector.load %arg7[%c0_116, %c2_117, %c3_118] : memref<2x22x22xf32, #tpu.memory_space<vmem>>, vector<1x16x16xf32>
    %126 = vector.shape_cast %125 : vector<1x16x16xf32> to vector<16x16xf32>
    %c0_119 = arith.constant 0 : index
    %c2_120 = arith.constant 2 : index
    %c3_121 = arith.constant 3 : index
    %127 = memref.load %arg4[%c0_119, %c2_120, %c3_121] : memref<2x7x7xf32, #tpu.memory_space<smem>>
    %128 = vector.broadcast %127 : f32 to vector<16x16xf32>
    %129 = arith.mulf %126, %128 : vector<16x16xf32>
    %130 = arith.addf %124, %129 : vector<16x16xf32>
    %c0_122 = arith.constant 0 : index
    %c2_123 = arith.constant 2 : index
    %c4_124 = arith.constant 4 : index
    %131 = vector.load %arg7[%c0_122, %c2_123, %c4_124] : memref<2x22x22xf32, #tpu.memory_space<vmem>>, vector<1x16x16xf32>
    %132 = vector.shape_cast %131 : vector<1x16x16xf32> to vector<16x16xf32>
    %c0_125 = arith.constant 0 : index
    %c2_126 = arith.constant 2 : index
    %c4_127 = arith.constant 4 : index
    %133 = memref.load %arg4[%c0_125, %c2_126, %c4_127] : memref<2x7x7xf32, #tpu.memory_space<smem>>
    %134 = vector.broadcast %133 : f32 to vector<16x16xf32>
    %135 = arith.mulf %132, %134 : vector<16x16xf32>
    %136 = arith.addf %130, %135 : vector<16x16xf32>
    %c0_128 = arith.constant 0 : index
    %c2_129 = arith.constant 2 : index
    %c5_130 = arith.constant 5 : index
    %137 = vector.load %arg7[%c0_128, %c2_129, %c5_130] : memref<2x22x22xf32, #tpu.memory_space<vmem>>, vector<1x16x16xf32>
    %138 = vector.shape_cast %137 : vector<1x16x16xf32> to vector<16x16xf32>
    %c0_131 = arith.constant 0 : index
    %c2_132 = arith.constant 2 : index
    %c5_133 = arith.constant 5 : index
    %139 = memref.load %arg4[%c0_131, %c2_132, %c5_133] : memref<2x7x7xf32, #tpu.memory_space<smem>>
    %140 = vector.broadcast %139 : f32 to vector<16x16xf32>
    %141 = arith.mulf %138, %140 : vector<16x16xf32>
    %142 = arith.addf %136, %141 : vector<16x16xf32>
    %c0_134 = arith.constant 0 : index
    %c2_135 = arith.constant 2 : index
    %c6_136 = arith.constant 6 : index
    %143 = vector.load %arg7[%c0_134, %c2_135, %c6_136] : memref<2x22x22xf32, #tpu.memory_space<vmem>>, vector<1x16x16xf32>
    %144 = vector.shape_cast %143 : vector<1x16x16xf32> to vector<16x16xf32>
    %c0_137 = arith.constant 0 : index
    %c2_138 = arith.constant 2 : index
    %c6_139 = arith.constant 6 : index
    %145 = memref.load %arg4[%c0_137, %c2_138, %c6_139] : memref<2x7x7xf32, #tpu.memory_space<smem>>
    %146 = vector.broadcast %145 : f32 to vector<16x16xf32>
    %147 = arith.mulf %144, %146 : vector<16x16xf32>
    %148 = arith.addf %142, %147 : vector<16x16xf32>
    %c0_140 = arith.constant 0 : index
    %c3_141 = arith.constant 3 : index
    %c0_142 = arith.constant 0 : index
    %149 = vector.load %arg7[%c0_140, %c3_141, %c0_142] : memref<2x22x22xf32, #tpu.memory_space<vmem>>, vector<1x16x16xf32>
    %150 = vector.shape_cast %149 : vector<1x16x16xf32> to vector<16x16xf32>
    %c0_143 = arith.constant 0 : index
    %c3_144 = arith.constant 3 : index
    %c0_145 = arith.constant 0 : index
    %151 = memref.load %arg4[%c0_143, %c3_144, %c0_145] : memref<2x7x7xf32, #tpu.memory_space<smem>>
    %152 = vector.broadcast %151 : f32 to vector<16x16xf32>
    %153 = arith.mulf %150, %152 : vector<16x16xf32>
    %154 = arith.addf %148, %153 : vector<16x16xf32>
    %c0_146 = arith.constant 0 : index
    %c3_147 = arith.constant 3 : index
    %c1_148 = arith.constant 1 : index
    %155 = vector.load %arg7[%c0_146, %c3_147, %c1_148] : memref<2x22x22xf32, #tpu.memory_space<vmem>>, vector<1x16x16xf32>
    %156 = vector.shape_cast %155 : vector<1x16x16xf32> to vector<16x16xf32>
    %c0_149 = arith.constant 0 : index
    %c3_150 = arith.constant 3 : index
    %c1_151 = arith.constant 1 : index
    %157 = memref.load %arg4[%c0_149, %c3_150, %c1_151] : memref<2x7x7xf32, #tpu.memory_space<smem>>
    %158 = vector.broadcast %157 : f32 to vector<16x16xf32>
    %159 = arith.mulf %156, %158 : vector<16x16xf32>
    %160 = arith.addf %154, %159 : vector<16x16xf32>
    %c0_152 = arith.constant 0 : index
    %c3_153 = arith.constant 3 : index
    %c2_154 = arith.constant 2 : index
    %161 = vector.load %arg7[%c0_152, %c3_153, %c2_154] : memref<2x22x22xf32, #tpu.memory_space<vmem>>, vector<1x16x16xf32>
    %162 = vector.shape_cast %161 : vector<1x16x16xf32> to vector<16x16xf32>
    %c0_155 = arith.constant 0 : index
    %c3_156 = arith.constant 3 : index
    %c2_157 = arith.constant 2 : index
    %163 = memref.load %arg4[%c0_155, %c3_156, %c2_157] : memref<2x7x7xf32, #tpu.memory_space<smem>>
    %164 = vector.broadcast %163 : f32 to vector<16x16xf32>
    %165 = arith.mulf %162, %164 : vector<16x16xf32>
    %166 = arith.addf %160, %165 : vector<16x16xf32>
    %c0_158 = arith.constant 0 : index
    %c3_159 = arith.constant 3 : index
    %c3_160 = arith.constant 3 : index
    %167 = vector.load %arg7[%c0_158, %c3_159, %c3_160] : memref<2x22x22xf32, #tpu.memory_space<vmem>>, vector<1x16x16xf32>
    %168 = vector.shape_cast %167 : vector<1x16x16xf32> to vector<16x16xf32>
    %c0_161 = arith.constant 0 : index
    %c3_162 = arith.constant 3 : index
    %c3_163 = arith.constant 3 : index
    %169 = memref.load %arg4[%c0_161, %c3_162, %c3_163] : memref<2x7x7xf32, #tpu.memory_space<smem>>
    %170 = vector.broadcast %169 : f32 to vector<16x16xf32>
    %171 = arith.mulf %168, %170 : vector<16x16xf32>
    %172 = arith.addf %166, %171 : vector<16x16xf32>
    %c0_164 = arith.constant 0 : index
    %c3_165 = arith.constant 3 : index
    %c4_166 = arith.constant 4 : index
    %173 = vector.load %arg7[%c0_164, %c3_165, %c4_166] : memref<2x22x22xf32, #tpu.memory_space<vmem>>, vector<1x16x16xf32>
    %174 = vector.shape_cast %173 : vector<1x16x16xf32> to vector<16x16xf32>
    %c0_167 = arith.constant 0 : index
    %c3_168 = arith.constant 3 : index
    %c4_169 = arith.constant 4 : index
    %175 = memref.load %arg4[%c0_167, %c3_168, %c4_169] : memref<2x7x7xf32, #tpu.memory_space<smem>>
    %176 = vector.broadcast %175 : f32 to vector<16x16xf32>
    %177 = arith.mulf %174, %176 : vector<16x16xf32>
    %178 = arith.addf %172, %177 : vector<16x16xf32>
    %c0_170 = arith.constant 0 : index
    %c3_171 = arith.constant 3 : index
    %c5_172 = arith.constant 5 : index
    %179 = vector.load %arg7[%c0_170, %c3_171, %c5_172] : memref<2x22x22xf32, #tpu.memory_space<vmem>>, vector<1x16x16xf32>
    %180 = vector.shape_cast %179 : vector<1x16x16xf32> to vector<16x16xf32>
    %c0_173 = arith.constant 0 : index
    %c3_174 = arith.constant 3 : index
    %c5_175 = arith.constant 5 : index
    %181 = memref.load %arg4[%c0_173, %c3_174, %c5_175] : memref<2x7x7xf32, #tpu.memory_space<smem>>
    %182 = vector.broadcast %181 : f32 to vector<16x16xf32>
    %183 = arith.mulf %180, %182 : vector<16x16xf32>
    %184 = arith.addf %178, %183 : vector<16x16xf32>
    %c0_176 = arith.constant 0 : index
    %c3_177 = arith.constant 3 : index
    %c6_178 = arith.constant 6 : index
    %185 = vector.load %arg7[%c0_176, %c3_177, %c6_178] : memref<2x22x22xf32, #tpu.memory_space<vmem>>, vector<1x16x16xf32>
    %186 = vector.shape_cast %185 : vector<1x16x16xf32> to vector<16x16xf32>
    %c0_179 = arith.constant 0 : index
    %c3_180 = arith.constant 3 : index
    %c6_181 = arith.constant 6 : index
    %187 = memref.load %arg4[%c0_179, %c3_180, %c6_181] : memref<2x7x7xf32, #tpu.memory_space<smem>>
    %188 = vector.broadcast %187 : f32 to vector<16x16xf32>
    %189 = arith.mulf %186, %188 : vector<16x16xf32>
    %190 = arith.addf %184, %189 : vector<16x16xf32>
    %c0_182 = arith.constant 0 : index
    %c4_183 = arith.constant 4 : index
    %c0_184 = arith.constant 0 : index
    %191 = vector.load %arg7[%c0_182, %c4_183, %c0_184] : memref<2x22x22xf32, #tpu.memory_space<vmem>>, vector<1x16x16xf32>
    %192 = vector.shape_cast %191 : vector<1x16x16xf32> to vector<16x16xf32>
    %c0_185 = arith.constant 0 : index
    %c4_186 = arith.constant 4 : index
    %c0_187 = arith.constant 0 : index
    %193 = memref.load %arg4[%c0_185, %c4_186, %c0_187] : memref<2x7x7xf32, #tpu.memory_space<smem>>
    %194 = vector.broadcast %193 : f32 to vector<16x16xf32>
    %195 = arith.mulf %192, %194 : vector<16x16xf32>
    %196 = arith.addf %190, %195 : vector<16x16xf32>
    %c0_188 = arith.constant 0 : index
    %c4_189 = arith.constant 4 : index
    %c1_190 = arith.constant 1 : index
    %197 = vector.load %arg7[%c0_188, %c4_189, %c1_190] : memref<2x22x22xf32, #tpu.memory_space<vmem>>, vector<1x16x16xf32>
    %198 = vector.shape_cast %197 : vector<1x16x16xf32> to vector<16x16xf32>
    %c0_191 = arith.constant 0 : index
    %c4_192 = arith.constant 4 : index
    %c1_193 = arith.constant 1 : index
    %199 = memref.load %arg4[%c0_191, %c4_192, %c1_193] : memref<2x7x7xf32, #tpu.memory_space<smem>>
    %200 = vector.broadcast %199 : f32 to vector<16x16xf32>
    %201 = arith.mulf %198, %200 : vector<16x16xf32>
    %202 = arith.addf %196, %201 : vector<16x16xf32>
    %c0_194 = arith.constant 0 : index
    %c4_195 = arith.constant 4 : index
    %c2_196 = arith.constant 2 : index
    %203 = vector.load %arg7[%c0_194, %c4_195, %c2_196] : memref<2x22x22xf32, #tpu.memory_space<vmem>>, vector<1x16x16xf32>
    %204 = vector.shape_cast %203 : vector<1x16x16xf32> to vector<16x16xf32>
    %c0_197 = arith.constant 0 : index
    %c4_198 = arith.constant 4 : index
    %c2_199 = arith.constant 2 : index
    %205 = memref.load %arg4[%c0_197, %c4_198, %c2_199] : memref<2x7x7xf32, #tpu.memory_space<smem>>
    %206 = vector.broadcast %205 : f32 to vector<16x16xf32>
    %207 = arith.mulf %204, %206 : vector<16x16xf32>
    %208 = arith.addf %202, %207 : vector<16x16xf32>
    %c0_200 = arith.constant 0 : index
    %c4_201 = arith.constant 4 : index
    %c3_202 = arith.constant 3 : index
    %209 = vector.load %arg7[%c0_200, %c4_201, %c3_202] : memref<2x22x22xf32, #tpu.memory_space<vmem>>, vector<1x16x16xf32>
    %210 = vector.shape_cast %209 : vector<1x16x16xf32> to vector<16x16xf32>
    %c0_203 = arith.constant 0 : index
    %c4_204 = arith.constant 4 : index
    %c3_205 = arith.constant 3 : index
    %211 = memref.load %arg4[%c0_203, %c4_204, %c3_205] : memref<2x7x7xf32, #tpu.memory_space<smem>>
    %212 = vector.broadcast %211 : f32 to vector<16x16xf32>
    %213 = arith.mulf %210, %212 : vector<16x16xf32>
    %214 = arith.addf %208, %213 : vector<16x16xf32>
    %c0_206 = arith.constant 0 : index
    %c4_207 = arith.constant 4 : index
    %c4_208 = arith.constant 4 : index
    %215 = vector.load %arg7[%c0_206, %c4_207, %c4_208] : memref<2x22x22xf32, #tpu.memory_space<vmem>>, vector<1x16x16xf32>
    %216 = vector.shape_cast %215 : vector<1x16x16xf32> to vector<16x16xf32>
    %c0_209 = arith.constant 0 : index
    %c4_210 = arith.constant 4 : index
    %c4_211 = arith.constant 4 : index
    %217 = memref.load %arg4[%c0_209, %c4_210, %c4_211] : memref<2x7x7xf32, #tpu.memory_space<smem>>
    %218 = vector.broadcast %217 : f32 to vector<16x16xf32>
    %219 = arith.mulf %216, %218 : vector<16x16xf32>
    %220 = arith.addf %214, %219 : vector<16x16xf32>
    %c0_212 = arith.constant 0 : index
    %c4_213 = arith.constant 4 : index
    %c5_214 = arith.constant 5 : index
    %221 = vector.load %arg7[%c0_212, %c4_213, %c5_214] : memref<2x22x22xf32, #tpu.memory_space<vmem>>, vector<1x16x16xf32>
    %222 = vector.shape_cast %221 : vector<1x16x16xf32> to vector<16x16xf32>
    %c0_215 = arith.constant 0 : index
    %c4_216 = arith.constant 4 : index
    %c5_217 = arith.constant 5 : index
    %223 = memref.load %arg4[%c0_215, %c4_216, %c5_217] : memref<2x7x7xf32, #tpu.memory_space<smem>>
    %224 = vector.broadcast %223 : f32 to vector<16x16xf32>
    %225 = arith.mulf %222, %224 : vector<16x16xf32>
    %226 = arith.addf %220, %225 : vector<16x16xf32>
    %c0_218 = arith.constant 0 : index
    %c4_219 = arith.constant 4 : index
    %c6_220 = arith.constant 6 : index
    %227 = vector.load %arg7[%c0_218, %c4_219, %c6_220] : memref<2x22x22xf32, #tpu.memory_space<vmem>>, vector<1x16x16xf32>
    %228 = vector.shape_cast %227 : vector<1x16x16xf32> to vector<16x16xf32>
    %c0_221 = arith.constant 0 : index
    %c4_222 = arith.constant 4 : index
    %c6_223 = arith.constant 6 : index
    %229 = memref.load %arg4[%c0_221, %c4_222, %c6_223] : memref<2x7x7xf32, #tpu.memory_space<smem>>
    %230 = vector.broadcast %229 : f32 to vector<16x16xf32>
    %231 = arith.mulf %228, %230 : vector<16x16xf32>
    %232 = arith.addf %226, %231 : vector<16x16xf32>
    %c0_224 = arith.constant 0 : index
    %c5_225 = arith.constant 5 : index
    %c0_226 = arith.constant 0 : index
    %233 = vector.load %arg7[%c0_224, %c5_225, %c0_226] : memref<2x22x22xf32, #tpu.memory_space<vmem>>, vector<1x16x16xf32>
    %234 = vector.shape_cast %233 : vector<1x16x16xf32> to vector<16x16xf32>
    %c0_227 = arith.constant 0 : index
    %c5_228 = arith.constant 5 : index
    %c0_229 = arith.constant 0 : index
    %235 = memref.load %arg4[%c0_227, %c5_228, %c0_229] : memref<2x7x7xf32, #tpu.memory_space<smem>>
    %236 = vector.broadcast %235 : f32 to vector<16x16xf32>
    %237 = arith.mulf %234, %236 : vector<16x16xf32>
    %238 = arith.addf %232, %237 : vector<16x16xf32>
    %c0_230 = arith.constant 0 : index
    %c5_231 = arith.constant 5 : index
    %c1_232 = arith.constant 1 : index
    %239 = vector.load %arg7[%c0_230, %c5_231, %c1_232] : memref<2x22x22xf32, #tpu.memory_space<vmem>>, vector<1x16x16xf32>
    %240 = vector.shape_cast %239 : vector<1x16x16xf32> to vector<16x16xf32>
    %c0_233 = arith.constant 0 : index
    %c5_234 = arith.constant 5 : index
    %c1_235 = arith.constant 1 : index
    %241 = memref.load %arg4[%c0_233, %c5_234, %c1_235] : memref<2x7x7xf32, #tpu.memory_space<smem>>
    %242 = vector.broadcast %241 : f32 to vector<16x16xf32>
    %243 = arith.mulf %240, %242 : vector<16x16xf32>
    %244 = arith.addf %238, %243 : vector<16x16xf32>
    %c0_236 = arith.constant 0 : index
    %c5_237 = arith.constant 5 : index
    %c2_238 = arith.constant 2 : index
    %245 = vector.load %arg7[%c0_236, %c5_237, %c2_238] : memref<2x22x22xf32, #tpu.memory_space<vmem>>, vector<1x16x16xf32>
    %246 = vector.shape_cast %245 : vector<1x16x16xf32> to vector<16x16xf32>
    %c0_239 = arith.constant 0 : index
    %c5_240 = arith.constant 5 : index
    %c2_241 = arith.constant 2 : index
    %247 = memref.load %arg4[%c0_239, %c5_240, %c2_241] : memref<2x7x7xf32, #tpu.memory_space<smem>>
    %248 = vector.broadcast %247 : f32 to vector<16x16xf32>
    %249 = arith.mulf %246, %248 : vector<16x16xf32>
    %250 = arith.addf %244, %249 : vector<16x16xf32>
    %c0_242 = arith.constant 0 : index
    %c5_243 = arith.constant 5 : index
    %c3_244 = arith.constant 3 : index
    %251 = vector.load %arg7[%c0_242, %c5_243, %c3_244] : memref<2x22x22xf32, #tpu.memory_space<vmem>>, vector<1x16x16xf32>
    %252 = vector.shape_cast %251 : vector<1x16x16xf32> to vector<16x16xf32>
    %c0_245 = arith.constant 0 : index
    %c5_246 = arith.constant 5 : index
    %c3_247 = arith.constant 3 : index
    %253 = memref.load %arg4[%c0_245, %c5_246, %c3_247] : memref<2x7x7xf32, #tpu.memory_space<smem>>
    %254 = vector.broadcast %253 : f32 to vector<16x16xf32>
    %255 = arith.mulf %252, %254 : vector<16x16xf32>
    %256 = arith.addf %250, %255 : vector<16x16xf32>
    %c0_248 = arith.constant 0 : index
    %c5_249 = arith.constant 5 : index
    %c4_250 = arith.constant 4 : index
    %257 = vector.load %arg7[%c0_248, %c5_249, %c4_250] : memref<2x22x22xf32, #tpu.memory_space<vmem>>, vector<1x16x16xf32>
    %258 = vector.shape_cast %257 : vector<1x16x16xf32> to vector<16x16xf32>
    %c0_251 = arith.constant 0 : index
    %c5_252 = arith.constant 5 : index
    %c4_253 = arith.constant 4 : index
    %259 = memref.load %arg4[%c0_251, %c5_252, %c4_253] : memref<2x7x7xf32, #tpu.memory_space<smem>>
    %260 = vector.broadcast %259 : f32 to vector<16x16xf32>
    %261 = arith.mulf %258, %260 : vector<16x16xf32>
    %262 = arith.addf %256, %261 : vector<16x16xf32>
    %c0_254 = arith.constant 0 : index
    %c5_255 = arith.constant 5 : index
    %c5_256 = arith.constant 5 : index
    %263 = vector.load %arg7[%c0_254, %c5_255, %c5_256] : memref<2x22x22xf32, #tpu.memory_space<vmem>>, vector<1x16x16xf32>
    %264 = vector.shape_cast %263 : vector<1x16x16xf32> to vector<16x16xf32>
    %c0_257 = arith.constant 0 : index
    %c5_258 = arith.constant 5 : index
    %c5_259 = arith.constant 5 : index
    %265 = memref.load %arg4[%c0_257, %c5_258, %c5_259] : memref<2x7x7xf32, #tpu.memory_space<smem>>
    %266 = vector.broadcast %265 : f32 to vector<16x16xf32>
    %267 = arith.mulf %264, %266 : vector<16x16xf32>
    %268 = arith.addf %262, %267 : vector<16x16xf32>
    %c0_260 = arith.constant 0 : index
    %c5_261 = arith.constant 5 : index
    %c6_262 = arith.constant 6 : index
    %269 = vector.load %arg7[%c0_260, %c5_261, %c6_262] : memref<2x22x22xf32, #tpu.memory_space<vmem>>, vector<1x16x16xf32>
    %270 = vector.shape_cast %269 : vector<1x16x16xf32> to vector<16x16xf32>
    %c0_263 = arith.constant 0 : index
    %c5_264 = arith.constant 5 : index
    %c6_265 = arith.constant 6 : index
    %271 = memref.load %arg4[%c0_263, %c5_264, %c6_265] : memref<2x7x7xf32, #tpu.memory_space<smem>>
    %272 = vector.broadcast %271 : f32 to vector<16x16xf32>
    %273 = arith.mulf %270, %272 : vector<16x16xf32>
    %274 = arith.addf %268, %273 : vector<16x16xf32>
    %c0_266 = arith.constant 0 : index
    %c6_267 = arith.constant 6 : index
    %c0_268 = arith.constant 0 : index
    %275 = vector.load %arg7[%c0_266, %c6_267, %c0_268] : memref<2x22x22xf32, #tpu.memory_space<vmem>>, vector<1x16x16xf32>
    %276 = vector.shape_cast %275 : vector<1x16x16xf32> to vector<16x16xf32>
    %c0_269 = arith.constant 0 : index
    %c6_270 = arith.constant 6 : index
    %c0_271 = arith.constant 0 : index
    %277 = memref.load %arg4[%c0_269, %c6_270, %c0_271] : memref<2x7x7xf32, #tpu.memory_space<smem>>
    %278 = vector.broadcast %277 : f32 to vector<16x16xf32>
    %279 = arith.mulf %276, %278 : vector<16x16xf32>
    %280 = arith.addf %274, %279 : vector<16x16xf32>
    %c0_272 = arith.constant 0 : index
    %c6_273 = arith.constant 6 : index
    %c1_274 = arith.constant 1 : index
    %281 = vector.load %arg7[%c0_272, %c6_273, %c1_274] : memref<2x22x22xf32, #tpu.memory_space<vmem>>, vector<1x16x16xf32>
    %282 = vector.shape_cast %281 : vector<1x16x16xf32> to vector<16x16xf32>
    %c0_275 = arith.constant 0 : index
    %c6_276 = arith.constant 6 : index
    %c1_277 = arith.constant 1 : index
    %283 = memref.load %arg4[%c0_275, %c6_276, %c1_277] : memref<2x7x7xf32, #tpu.memory_space<smem>>
    %284 = vector.broadcast %283 : f32 to vector<16x16xf32>
    %285 = arith.mulf %282, %284 : vector<16x16xf32>
    %286 = arith.addf %280, %285 : vector<16x16xf32>
    %c0_278 = arith.constant 0 : index
    %c6_279 = arith.constant 6 : index
    %c2_280 = arith.constant 2 : index
    %287 = vector.load %arg7[%c0_278, %c6_279, %c2_280] : memref<2x22x22xf32, #tpu.memory_space<vmem>>, vector<1x16x16xf32>
    %288 = vector.shape_cast %287 : vector<1x16x16xf32> to vector<16x16xf32>
    %c0_281 = arith.constant 0 : index
    %c6_282 = arith.constant 6 : index
    %c2_283 = arith.constant 2 : index
    %289 = memref.load %arg4[%c0_281, %c6_282, %c2_283] : memref<2x7x7xf32, #tpu.memory_space<smem>>
    %290 = vector.broadcast %289 : f32 to vector<16x16xf32>
    %291 = arith.mulf %288, %290 : vector<16x16xf32>
    %292 = arith.addf %286, %291 : vector<16x16xf32>
    %c0_284 = arith.constant 0 : index
    %c6_285 = arith.constant 6 : index
    %c3_286 = arith.constant 3 : index
    %293 = vector.load %arg7[%c0_284, %c6_285, %c3_286] : memref<2x22x22xf32, #tpu.memory_space<vmem>>, vector<1x16x16xf32>
    %294 = vector.shape_cast %293 : vector<1x16x16xf32> to vector<16x16xf32>
    %c0_287 = arith.constant 0 : index
    %c6_288 = arith.constant 6 : index
    %c3_289 = arith.constant 3 : index
    %295 = memref.load %arg4[%c0_287, %c6_288, %c3_289] : memref<2x7x7xf32, #tpu.memory_space<smem>>
    %296 = vector.broadcast %295 : f32 to vector<16x16xf32>
    %297 = arith.mulf %294, %296 : vector<16x16xf32>
    %298 = arith.addf %292, %297 : vector<16x16xf32>
    %c0_290 = arith.constant 0 : index
    %c6_291 = arith.constant 6 : index
    %c4_292 = arith.constant 4 : index
    %299 = vector.load %arg7[%c0_290, %c6_291, %c4_292] : memref<2x22x22xf32, #tpu.memory_space<vmem>>, vector<1x16x16xf32>
    %300 = vector.shape_cast %299 : vector<1x16x16xf32> to vector<16x16xf32>
    %c0_293 = arith.constant 0 : index
    %c6_294 = arith.constant 6 : index
    %c4_295 = arith.constant 4 : index
    %301 = memref.load %arg4[%c0_293, %c6_294, %c4_295] : memref<2x7x7xf32, #tpu.memory_space<smem>>
    %302 = vector.broadcast %301 : f32 to vector<16x16xf32>
    %303 = arith.mulf %300, %302 : vector<16x16xf32>
    %304 = arith.addf %298, %303 : vector<16x16xf32>
    %c0_296 = arith.constant 0 : index
    %c6_297 = arith.constant 6 : index
    %c5_298 = arith.constant 5 : index
    %305 = vector.load %arg7[%c0_296, %c6_297, %c5_298] : memref<2x22x22xf32, #tpu.memory_space<vmem>>, vector<1x16x16xf32>
    %306 = vector.shape_cast %305 : vector<1x16x16xf32> to vector<16x16xf32>
    %c0_299 = arith.constant 0 : index
    %c6_300 = arith.constant 6 : index
    %c5_301 = arith.constant 5 : index
    %307 = memref.load %arg4[%c0_299, %c6_300, %c5_301] : memref<2x7x7xf32, #tpu.memory_space<smem>>
    %308 = vector.broadcast %307 : f32 to vector<16x16xf32>
    %309 = arith.mulf %306, %308 : vector<16x16xf32>
    %310 = arith.addf %304, %309 : vector<16x16xf32>
    %c0_302 = arith.constant 0 : index
    %c6_303 = arith.constant 6 : index
    %c6_304 = arith.constant 6 : index
    %311 = vector.load %arg7[%c0_302, %c6_303, %c6_304] : memref<2x22x22xf32, #tpu.memory_space<vmem>>, vector<1x16x16xf32>
    %312 = vector.shape_cast %311 : vector<1x16x16xf32> to vector<16x16xf32>
    %c0_305 = arith.constant 0 : index
    %c6_306 = arith.constant 6 : index
    %c6_307 = arith.constant 6 : index
    %313 = memref.load %arg4[%c0_305, %c6_306, %c6_307] : memref<2x7x7xf32, #tpu.memory_space<smem>>
    %314 = vector.broadcast %313 : f32 to vector<16x16xf32>
    %315 = arith.mulf %312, %314 : vector<16x16xf32>
    %316 = arith.addf %310, %315 : vector<16x16xf32>
    %c1_308 = arith.constant 1 : index
    %c0_309 = arith.constant 0 : index
    %c0_310 = arith.constant 0 : index
    %317 = vector.load %arg7[%c1_308, %c0_309, %c0_310] : memref<2x22x22xf32, #tpu.memory_space<vmem>>, vector<1x16x16xf32>
    %318 = vector.shape_cast %317 : vector<1x16x16xf32> to vector<16x16xf32>
    %c1_311 = arith.constant 1 : index
    %c0_312 = arith.constant 0 : index
    %c0_313 = arith.constant 0 : index
    %319 = memref.load %arg4[%c1_311, %c0_312, %c0_313] : memref<2x7x7xf32, #tpu.memory_space<smem>>
    %320 = vector.broadcast %319 : f32 to vector<16x16xf32>
    %321 = arith.mulf %318, %320 : vector<16x16xf32>
    %322 = arith.addf %316, %321 : vector<16x16xf32>
    %c1_314 = arith.constant 1 : index
    %c0_315 = arith.constant 0 : index
    %c1_316 = arith.constant 1 : index
    %323 = vector.load %arg7[%c1_314, %c0_315, %c1_316] : memref<2x22x22xf32, #tpu.memory_space<vmem>>, vector<1x16x16xf32>
    %324 = vector.shape_cast %323 : vector<1x16x16xf32> to vector<16x16xf32>
    %c1_317 = arith.constant 1 : index
    %c0_318 = arith.constant 0 : index
    %c1_319 = arith.constant 1 : index
    %325 = memref.load %arg4[%c1_317, %c0_318, %c1_319] : memref<2x7x7xf32, #tpu.memory_space<smem>>
    %326 = vector.broadcast %325 : f32 to vector<16x16xf32>
    %327 = arith.mulf %324, %326 : vector<16x16xf32>
    %328 = arith.addf %322, %327 : vector<16x16xf32>
    %c1_320 = arith.constant 1 : index
    %c0_321 = arith.constant 0 : index
    %c2_322 = arith.constant 2 : index
    %329 = vector.load %arg7[%c1_320, %c0_321, %c2_322] : memref<2x22x22xf32, #tpu.memory_space<vmem>>, vector<1x16x16xf32>
    %330 = vector.shape_cast %329 : vector<1x16x16xf32> to vector<16x16xf32>
    %c1_323 = arith.constant 1 : index
    %c0_324 = arith.constant 0 : index
    %c2_325 = arith.constant 2 : index
    %331 = memref.load %arg4[%c1_323, %c0_324, %c2_325] : memref<2x7x7xf32, #tpu.memory_space<smem>>
    %332 = vector.broadcast %331 : f32 to vector<16x16xf32>
    %333 = arith.mulf %330, %332 : vector<16x16xf32>
    %334 = arith.addf %328, %333 : vector<16x16xf32>
    %c1_326 = arith.constant 1 : index
    %c0_327 = arith.constant 0 : index
    %c3_328 = arith.constant 3 : index
    %335 = vector.load %arg7[%c1_326, %c0_327, %c3_328] : memref<2x22x22xf32, #tpu.memory_space<vmem>>, vector<1x16x16xf32>
    %336 = vector.shape_cast %335 : vector<1x16x16xf32> to vector<16x16xf32>
    %c1_329 = arith.constant 1 : index
    %c0_330 = arith.constant 0 : index
    %c3_331 = arith.constant 3 : index
    %337 = memref.load %arg4[%c1_329, %c0_330, %c3_331] : memref<2x7x7xf32, #tpu.memory_space<smem>>
    %338 = vector.broadcast %337 : f32 to vector<16x16xf32>
    %339 = arith.mulf %336, %338 : vector<16x16xf32>
    %340 = arith.addf %334, %339 : vector<16x16xf32>
    %c1_332 = arith.constant 1 : index
    %c0_333 = arith.constant 0 : index
    %c4_334 = arith.constant 4 : index
    %341 = vector.load %arg7[%c1_332, %c0_333, %c4_334] : memref<2x22x22xf32, #tpu.memory_space<vmem>>, vector<1x16x16xf32>
    %342 = vector.shape_cast %341 : vector<1x16x16xf32> to vector<16x16xf32>
    %c1_335 = arith.constant 1 : index
    %c0_336 = arith.constant 0 : index
    %c4_337 = arith.constant 4 : index
    %343 = memref.load %arg4[%c1_335, %c0_336, %c4_337] : memref<2x7x7xf32, #tpu.memory_space<smem>>
    %344 = vector.broadcast %343 : f32 to vector<16x16xf32>
    %345 = arith.mulf %342, %344 : vector<16x16xf32>
    %346 = arith.addf %340, %345 : vector<16x16xf32>
    %c1_338 = arith.constant 1 : index
    %c0_339 = arith.constant 0 : index
    %c5_340 = arith.constant 5 : index
    %347 = vector.load %arg7[%c1_338, %c0_339, %c5_340] : memref<2x22x22xf32, #tpu.memory_space<vmem>>, vector<1x16x16xf32>
    %348 = vector.shape_cast %347 : vector<1x16x16xf32> to vector<16x16xf32>
    %c1_341 = arith.constant 1 : index
    %c0_342 = arith.constant 0 : index
    %c5_343 = arith.constant 5 : index
    %349 = memref.load %arg4[%c1_341, %c0_342, %c5_343] : memref<2x7x7xf32, #tpu.memory_space<smem>>
    %350 = vector.broadcast %349 : f32 to vector<16x16xf32>
    %351 = arith.mulf %348, %350 : vector<16x16xf32>
    %352 = arith.addf %346, %351 : vector<16x16xf32>
    %c1_344 = arith.constant 1 : index
    %c0_345 = arith.constant 0 : index
    %c6_346 = arith.constant 6 : index
    %353 = vector.load %arg7[%c1_344, %c0_345, %c6_346] : memref<2x22x22xf32, #tpu.memory_space<vmem>>, vector<1x16x16xf32>
    %354 = vector.shape_cast %353 : vector<1x16x16xf32> to vector<16x16xf32>
    %c1_347 = arith.constant 1 : index
    %c0_348 = arith.constant 0 : index
    %c6_349 = arith.constant 6 : index
    %355 = memref.load %arg4[%c1_347, %c0_348, %c6_349] : memref<2x7x7xf32, #tpu.memory_space<smem>>
    %356 = vector.broadcast %355 : f32 to vector<16x16xf32>
    %357 = arith.mulf %354, %356 : vector<16x16xf32>
    %358 = arith.addf %352, %357 : vector<16x16xf32>
    %c1_350 = arith.constant 1 : index
    %c1_351 = arith.constant 1 : index
    %c0_352 = arith.constant 0 : index
    %359 = vector.load %arg7[%c1_350, %c1_351, %c0_352] : memref<2x22x22xf32, #tpu.memory_space<vmem>>, vector<1x16x16xf32>
    %360 = vector.shape_cast %359 : vector<1x16x16xf32> to vector<16x16xf32>
    %c1_353 = arith.constant 1 : index
    %c1_354 = arith.constant 1 : index
    %c0_355 = arith.constant 0 : index
    %361 = memref.load %arg4[%c1_353, %c1_354, %c0_355] : memref<2x7x7xf32, #tpu.memory_space<smem>>
    %362 = vector.broadcast %361 : f32 to vector<16x16xf32>
    %363 = arith.mulf %360, %362 : vector<16x16xf32>
    %364 = arith.addf %358, %363 : vector<16x16xf32>
    %c1_356 = arith.constant 1 : index
    %c1_357 = arith.constant 1 : index
    %c1_358 = arith.constant 1 : index
    %365 = vector.load %arg7[%c1_356, %c1_357, %c1_358] : memref<2x22x22xf32, #tpu.memory_space<vmem>>, vector<1x16x16xf32>
    %366 = vector.shape_cast %365 : vector<1x16x16xf32> to vector<16x16xf32>
    %c1_359 = arith.constant 1 : index
    %c1_360 = arith.constant 1 : index
    %c1_361 = arith.constant 1 : index
    %367 = memref.load %arg4[%c1_359, %c1_360, %c1_361] : memref<2x7x7xf32, #tpu.memory_space<smem>>
    %368 = vector.broadcast %367 : f32 to vector<16x16xf32>
    %369 = arith.mulf %366, %368 : vector<16x16xf32>
    %370 = arith.addf %364, %369 : vector<16x16xf32>
    %c1_362 = arith.constant 1 : index
    %c1_363 = arith.constant 1 : index
    %c2_364 = arith.constant 2 : index
    %371 = vector.load %arg7[%c1_362, %c1_363, %c2_364] : memref<2x22x22xf32, #tpu.memory_space<vmem>>, vector<1x16x16xf32>
    %372 = vector.shape_cast %371 : vector<1x16x16xf32> to vector<16x16xf32>
    %c1_365 = arith.constant 1 : index
    %c1_366 = arith.constant 1 : index
    %c2_367 = arith.constant 2 : index
    %373 = memref.load %arg4[%c1_365, %c1_366, %c2_367] : memref<2x7x7xf32, #tpu.memory_space<smem>>
    %374 = vector.broadcast %373 : f32 to vector<16x16xf32>
    %375 = arith.mulf %372, %374 : vector<16x16xf32>
    %376 = arith.addf %370, %375 : vector<16x16xf32>
    %c1_368 = arith.constant 1 : index
    %c1_369 = arith.constant 1 : index
    %c3_370 = arith.constant 3 : index
    %377 = vector.load %arg7[%c1_368, %c1_369, %c3_370] : memref<2x22x22xf32, #tpu.memory_space<vmem>>, vector<1x16x16xf32>
    %378 = vector.shape_cast %377 : vector<1x16x16xf32> to vector<16x16xf32>
    %c1_371 = arith.constant 1 : index
    %c1_372 = arith.constant 1 : index
    %c3_373 = arith.constant 3 : index
    %379 = memref.load %arg4[%c1_371, %c1_372, %c3_373] : memref<2x7x7xf32, #tpu.memory_space<smem>>
    %380 = vector.broadcast %379 : f32 to vector<16x16xf32>
    %381 = arith.mulf %378, %380 : vector<16x16xf32>
    %382 = arith.addf %376, %381 : vector<16x16xf32>
    %c1_374 = arith.constant 1 : index
    %c1_375 = arith.constant 1 : index
    %c4_376 = arith.constant 4 : index
    %383 = vector.load %arg7[%c1_374, %c1_375, %c4_376] : memref<2x22x22xf32, #tpu.memory_space<vmem>>, vector<1x16x16xf32>
    %384 = vector.shape_cast %383 : vector<1x16x16xf32> to vector<16x16xf32>
    %c1_377 = arith.constant 1 : index
    %c1_378 = arith.constant 1 : index
    %c4_379 = arith.constant 4 : index
    %385 = memref.load %arg4[%c1_377, %c1_378, %c4_379] : memref<2x7x7xf32, #tpu.memory_space<smem>>
    %386 = vector.broadcast %385 : f32 to vector<16x16xf32>
    %387 = arith.mulf %384, %386 : vector<16x16xf32>
    %388 = arith.addf %382, %387 : vector<16x16xf32>
    %c1_380 = arith.constant 1 : index
    %c1_381 = arith.constant 1 : index
    %c5_382 = arith.constant 5 : index
    %389 = vector.load %arg7[%c1_380, %c1_381, %c5_382] : memref<2x22x22xf32, #tpu.memory_space<vmem>>, vector<1x16x16xf32>
    %390 = vector.shape_cast %389 : vector<1x16x16xf32> to vector<16x16xf32>
    %c1_383 = arith.constant 1 : index
    %c1_384 = arith.constant 1 : index
    %c5_385 = arith.constant 5 : index
    %391 = memref.load %arg4[%c1_383, %c1_384, %c5_385] : memref<2x7x7xf32, #tpu.memory_space<smem>>
    %392 = vector.broadcast %391 : f32 to vector<16x16xf32>
    %393 = arith.mulf %390, %392 : vector<16x16xf32>
    %394 = arith.addf %388, %393 : vector<16x16xf32>
    %c1_386 = arith.constant 1 : index
    %c1_387 = arith.constant 1 : index
    %c6_388 = arith.constant 6 : index
    %395 = vector.load %arg7[%c1_386, %c1_387, %c6_388] : memref<2x22x22xf32, #tpu.memory_space<vmem>>, vector<1x16x16xf32>
    %396 = vector.shape_cast %395 : vector<1x16x16xf32> to vector<16x16xf32>
    %c1_389 = arith.constant 1 : index
    %c1_390 = arith.constant 1 : index
    %c6_391 = arith.constant 6 : index
    %397 = memref.load %arg4[%c1_389, %c1_390, %c6_391] : memref<2x7x7xf32, #tpu.memory_space<smem>>
    %398 = vector.broadcast %397 : f32 to vector<16x16xf32>
    %399 = arith.mulf %396, %398 : vector<16x16xf32>
    %400 = arith.addf %394, %399 : vector<16x16xf32>
    %c1_392 = arith.constant 1 : index
    %c2_393 = arith.constant 2 : index
    %c0_394 = arith.constant 0 : index
    %401 = vector.load %arg7[%c1_392, %c2_393, %c0_394] : memref<2x22x22xf32, #tpu.memory_space<vmem>>, vector<1x16x16xf32>
    %402 = vector.shape_cast %401 : vector<1x16x16xf32> to vector<16x16xf32>
    %c1_395 = arith.constant 1 : index
    %c2_396 = arith.constant 2 : index
    %c0_397 = arith.constant 0 : index
    %403 = memref.load %arg4[%c1_395, %c2_396, %c0_397] : memref<2x7x7xf32, #tpu.memory_space<smem>>
    %404 = vector.broadcast %403 : f32 to vector<16x16xf32>
    %405 = arith.mulf %402, %404 : vector<16x16xf32>
    %406 = arith.addf %400, %405 : vector<16x16xf32>
    %c1_398 = arith.constant 1 : index
    %c2_399 = arith.constant 2 : index
    %c1_400 = arith.constant 1 : index
    %407 = vector.load %arg7[%c1_398, %c2_399, %c1_400] : memref<2x22x22xf32, #tpu.memory_space<vmem>>, vector<1x16x16xf32>
    %408 = vector.shape_cast %407 : vector<1x16x16xf32> to vector<16x16xf32>
    %c1_401 = arith.constant 1 : index
    %c2_402 = arith.constant 2 : index
    %c1_403 = arith.constant 1 : index
    %409 = memref.load %arg4[%c1_401, %c2_402, %c1_403] : memref<2x7x7xf32, #tpu.memory_space<smem>>
    %410 = vector.broadcast %409 : f32 to vector<16x16xf32>
    %411 = arith.mulf %408, %410 : vector<16x16xf32>
    %412 = arith.addf %406, %411 : vector<16x16xf32>
    %c1_404 = arith.constant 1 : index
    %c2_405 = arith.constant 2 : index
    %c2_406 = arith.constant 2 : index
    %413 = vector.load %arg7[%c1_404, %c2_405, %c2_406] : memref<2x22x22xf32, #tpu.memory_space<vmem>>, vector<1x16x16xf32>
    %414 = vector.shape_cast %413 : vector<1x16x16xf32> to vector<16x16xf32>
    %c1_407 = arith.constant 1 : index
    %c2_408 = arith.constant 2 : index
    %c2_409 = arith.constant 2 : index
    %415 = memref.load %arg4[%c1_407, %c2_408, %c2_409] : memref<2x7x7xf32, #tpu.memory_space<smem>>
    %416 = vector.broadcast %415 : f32 to vector<16x16xf32>
    %417 = arith.mulf %414, %416 : vector<16x16xf32>
    %418 = arith.addf %412, %417 : vector<16x16xf32>
    %c1_410 = arith.constant 1 : index
    %c2_411 = arith.constant 2 : index
    %c3_412 = arith.constant 3 : index
    %419 = vector.load %arg7[%c1_410, %c2_411, %c3_412] : memref<2x22x22xf32, #tpu.memory_space<vmem>>, vector<1x16x16xf32>
    %420 = vector.shape_cast %419 : vector<1x16x16xf32> to vector<16x16xf32>
    %c1_413 = arith.constant 1 : index
    %c2_414 = arith.constant 2 : index
    %c3_415 = arith.constant 3 : index
    %421 = memref.load %arg4[%c1_413, %c2_414, %c3_415] : memref<2x7x7xf32, #tpu.memory_space<smem>>
    %422 = vector.broadcast %421 : f32 to vector<16x16xf32>
    %423 = arith.mulf %420, %422 : vector<16x16xf32>
    %424 = arith.addf %418, %423 : vector<16x16xf32>
    %c1_416 = arith.constant 1 : index
    %c2_417 = arith.constant 2 : index
    %c4_418 = arith.constant 4 : index
    %425 = vector.load %arg7[%c1_416, %c2_417, %c4_418] : memref<2x22x22xf32, #tpu.memory_space<vmem>>, vector<1x16x16xf32>
    %426 = vector.shape_cast %425 : vector<1x16x16xf32> to vector<16x16xf32>
    %c1_419 = arith.constant 1 : index
    %c2_420 = arith.constant 2 : index
    %c4_421 = arith.constant 4 : index
    %427 = memref.load %arg4[%c1_419, %c2_420, %c4_421] : memref<2x7x7xf32, #tpu.memory_space<smem>>
    %428 = vector.broadcast %427 : f32 to vector<16x16xf32>
    %429 = arith.mulf %426, %428 : vector<16x16xf32>
    %430 = arith.addf %424, %429 : vector<16x16xf32>
    %c1_422 = arith.constant 1 : index
    %c2_423 = arith.constant 2 : index
    %c5_424 = arith.constant 5 : index
    %431 = vector.load %arg7[%c1_422, %c2_423, %c5_424] : memref<2x22x22xf32, #tpu.memory_space<vmem>>, vector<1x16x16xf32>
    %432 = vector.shape_cast %431 : vector<1x16x16xf32> to vector<16x16xf32>
    %c1_425 = arith.constant 1 : index
    %c2_426 = arith.constant 2 : index
    %c5_427 = arith.constant 5 : index
    %433 = memref.load %arg4[%c1_425, %c2_426, %c5_427] : memref<2x7x7xf32, #tpu.memory_space<smem>>
    %434 = vector.broadcast %433 : f32 to vector<16x16xf32>
    %435 = arith.mulf %432, %434 : vector<16x16xf32>
    %436 = arith.addf %430, %435 : vector<16x16xf32>
    %c1_428 = arith.constant 1 : index
    %c2_429 = arith.constant 2 : index
    %c6_430 = arith.constant 6 : index
    %437 = vector.load %arg7[%c1_428, %c2_429, %c6_430] : memref<2x22x22xf32, #tpu.memory_space<vmem>>, vector<1x16x16xf32>
    %438 = vector.shape_cast %437 : vector<1x16x16xf32> to vector<16x16xf32>
    %c1_431 = arith.constant 1 : index
    %c2_432 = arith.constant 2 : index
    %c6_433 = arith.constant 6 : index
    %439 = memref.load %arg4[%c1_431, %c2_432, %c6_433] : memref<2x7x7xf32, #tpu.memory_space<smem>>
    %440 = vector.broadcast %439 : f32 to vector<16x16xf32>
    %441 = arith.mulf %438, %440 : vector<16x16xf32>
    %442 = arith.addf %436, %441 : vector<16x16xf32>
    %c1_434 = arith.constant 1 : index
    %c3_435 = arith.constant 3 : index
    %c0_436 = arith.constant 0 : index
    %443 = vector.load %arg7[%c1_434, %c3_435, %c0_436] : memref<2x22x22xf32, #tpu.memory_space<vmem>>, vector<1x16x16xf32>
    %444 = vector.shape_cast %443 : vector<1x16x16xf32> to vector<16x16xf32>
    %c1_437 = arith.constant 1 : index
    %c3_438 = arith.constant 3 : index
    %c0_439 = arith.constant 0 : index
    %445 = memref.load %arg4[%c1_437, %c3_438, %c0_439] : memref<2x7x7xf32, #tpu.memory_space<smem>>
    %446 = vector.broadcast %445 : f32 to vector<16x16xf32>
    %447 = arith.mulf %444, %446 : vector<16x16xf32>
    %448 = arith.addf %442, %447 : vector<16x16xf32>
    %c1_440 = arith.constant 1 : index
    %c3_441 = arith.constant 3 : index
    %c1_442 = arith.constant 1 : index
    %449 = vector.load %arg7[%c1_440, %c3_441, %c1_442] : memref<2x22x22xf32, #tpu.memory_space<vmem>>, vector<1x16x16xf32>
    %450 = vector.shape_cast %449 : vector<1x16x16xf32> to vector<16x16xf32>
    %c1_443 = arith.constant 1 : index
    %c3_444 = arith.constant 3 : index
    %c1_445 = arith.constant 1 : index
    %451 = memref.load %arg4[%c1_443, %c3_444, %c1_445] : memref<2x7x7xf32, #tpu.memory_space<smem>>
    %452 = vector.broadcast %451 : f32 to vector<16x16xf32>
    %453 = arith.mulf %450, %452 : vector<16x16xf32>
    %454 = arith.addf %448, %453 : vector<16x16xf32>
    %c1_446 = arith.constant 1 : index
    %c3_447 = arith.constant 3 : index
    %c2_448 = arith.constant 2 : index
    %455 = vector.load %arg7[%c1_446, %c3_447, %c2_448] : memref<2x22x22xf32, #tpu.memory_space<vmem>>, vector<1x16x16xf32>
    %456 = vector.shape_cast %455 : vector<1x16x16xf32> to vector<16x16xf32>
    %c1_449 = arith.constant 1 : index
    %c3_450 = arith.constant 3 : index
    %c2_451 = arith.constant 2 : index
    %457 = memref.load %arg4[%c1_449, %c3_450, %c2_451] : memref<2x7x7xf32, #tpu.memory_space<smem>>
    %458 = vector.broadcast %457 : f32 to vector<16x16xf32>
    %459 = arith.mulf %456, %458 : vector<16x16xf32>
    %460 = arith.addf %454, %459 : vector<16x16xf32>
    %c1_452 = arith.constant 1 : index
    %c3_453 = arith.constant 3 : index
    %c3_454 = arith.constant 3 : index
    %461 = vector.load %arg7[%c1_452, %c3_453, %c3_454] : memref<2x22x22xf32, #tpu.memory_space<vmem>>, vector<1x16x16xf32>
    %462 = vector.shape_cast %461 : vector<1x16x16xf32> to vector<16x16xf32>
    %c1_455 = arith.constant 1 : index
    %c3_456 = arith.constant 3 : index
    %c3_457 = arith.constant 3 : index
    %463 = memref.load %arg4[%c1_455, %c3_456, %c3_457] : memref<2x7x7xf32, #tpu.memory_space<smem>>
    %464 = vector.broadcast %463 : f32 to vector<16x16xf32>
    %465 = arith.mulf %462, %464 : vector<16x16xf32>
    %466 = arith.addf %460, %465 : vector<16x16xf32>
    %c1_458 = arith.constant 1 : index
    %c3_459 = arith.constant 3 : index
    %c4_460 = arith.constant 4 : index
    %467 = vector.load %arg7[%c1_458, %c3_459, %c4_460] : memref<2x22x22xf32, #tpu.memory_space<vmem>>, vector<1x16x16xf32>
    %468 = vector.shape_cast %467 : vector<1x16x16xf32> to vector<16x16xf32>
    %c1_461 = arith.constant 1 : index
    %c3_462 = arith.constant 3 : index
    %c4_463 = arith.constant 4 : index
    %469 = memref.load %arg4[%c1_461, %c3_462, %c4_463] : memref<2x7x7xf32, #tpu.memory_space<smem>>
    %470 = vector.broadcast %469 : f32 to vector<16x16xf32>
    %471 = arith.mulf %468, %470 : vector<16x16xf32>
    %472 = arith.addf %466, %471 : vector<16x16xf32>
    %c1_464 = arith.constant 1 : index
    %c3_465 = arith.constant 3 : index
    %c5_466 = arith.constant 5 : index
    %473 = vector.load %arg7[%c1_464, %c3_465, %c5_466] : memref<2x22x22xf32, #tpu.memory_space<vmem>>, vector<1x16x16xf32>
    %474 = vector.shape_cast %473 : vector<1x16x16xf32> to vector<16x16xf32>
    %c1_467 = arith.constant 1 : index
    %c3_468 = arith.constant 3 : index
    %c5_469 = arith.constant 5 : index
    %475 = memref.load %arg4[%c1_467, %c3_468, %c5_469] : memref<2x7x7xf32, #tpu.memory_space<smem>>
    %476 = vector.broadcast %475 : f32 to vector<16x16xf32>
    %477 = arith.mulf %474, %476 : vector<16x16xf32>
    %478 = arith.addf %472, %477 : vector<16x16xf32>
    %c1_470 = arith.constant 1 : index
    %c3_471 = arith.constant 3 : index
    %c6_472 = arith.constant 6 : index
    %479 = vector.load %arg7[%c1_470, %c3_471, %c6_472] : memref<2x22x22xf32, #tpu.memory_space<vmem>>, vector<1x16x16xf32>
    %480 = vector.shape_cast %479 : vector<1x16x16xf32> to vector<16x16xf32>
    %c1_473 = arith.constant 1 : index
    %c3_474 = arith.constant 3 : index
    %c6_475 = arith.constant 6 : index
    %481 = memref.load %arg4[%c1_473, %c3_474, %c6_475] : memref<2x7x7xf32, #tpu.memory_space<smem>>
    %482 = vector.broadcast %481 : f32 to vector<16x16xf32>
    %483 = arith.mulf %480, %482 : vector<16x16xf32>
    %484 = arith.addf %478, %483 : vector<16x16xf32>
    %c1_476 = arith.constant 1 : index
    %c4_477 = arith.constant 4 : index
    %c0_478 = arith.constant 0 : index
    %485 = vector.load %arg7[%c1_476, %c4_477, %c0_478] : memref<2x22x22xf32, #tpu.memory_space<vmem>>, vector<1x16x16xf32>
    %486 = vector.shape_cast %485 : vector<1x16x16xf32> to vector<16x16xf32>
    %c1_479 = arith.constant 1 : index
    %c4_480 = arith.constant 4 : index
    %c0_481 = arith.constant 0 : index
    %487 = memref.load %arg4[%c1_479, %c4_480, %c0_481] : memref<2x7x7xf32, #tpu.memory_space<smem>>
    %488 = vector.broadcast %487 : f32 to vector<16x16xf32>
    %489 = arith.mulf %486, %488 : vector<16x16xf32>
    %490 = arith.addf %484, %489 : vector<16x16xf32>
    %c1_482 = arith.constant 1 : index
    %c4_483 = arith.constant 4 : index
    %c1_484 = arith.constant 1 : index
    %491 = vector.load %arg7[%c1_482, %c4_483, %c1_484] : memref<2x22x22xf32, #tpu.memory_space<vmem>>, vector<1x16x16xf32>
    %492 = vector.shape_cast %491 : vector<1x16x16xf32> to vector<16x16xf32>
    %c1_485 = arith.constant 1 : index
    %c4_486 = arith.constant 4 : index
    %c1_487 = arith.constant 1 : index
    %493 = memref.load %arg4[%c1_485, %c4_486, %c1_487] : memref<2x7x7xf32, #tpu.memory_space<smem>>
    %494 = vector.broadcast %493 : f32 to vector<16x16xf32>
    %495 = arith.mulf %492, %494 : vector<16x16xf32>
    %496 = arith.addf %490, %495 : vector<16x16xf32>
    %c1_488 = arith.constant 1 : index
    %c4_489 = arith.constant 4 : index
    %c2_490 = arith.constant 2 : index
    %497 = vector.load %arg7[%c1_488, %c4_489, %c2_490] : memref<2x22x22xf32, #tpu.memory_space<vmem>>, vector<1x16x16xf32>
    %498 = vector.shape_cast %497 : vector<1x16x16xf32> to vector<16x16xf32>
    %c1_491 = arith.constant 1 : index
    %c4_492 = arith.constant 4 : index
    %c2_493 = arith.constant 2 : index
    %499 = memref.load %arg4[%c1_491, %c4_492, %c2_493] : memref<2x7x7xf32, #tpu.memory_space<smem>>
    %500 = vector.broadcast %499 : f32 to vector<16x16xf32>
    %501 = arith.mulf %498, %500 : vector<16x16xf32>
    %502 = arith.addf %496, %501 : vector<16x16xf32>
    %c1_494 = arith.constant 1 : index
    %c4_495 = arith.constant 4 : index
    %c3_496 = arith.constant 3 : index
    %503 = vector.load %arg7[%c1_494, %c4_495, %c3_496] : memref<2x22x22xf32, #tpu.memory_space<vmem>>, vector<1x16x16xf32>
    %504 = vector.shape_cast %503 : vector<1x16x16xf32> to vector<16x16xf32>
    %c1_497 = arith.constant 1 : index
    %c4_498 = arith.constant 4 : index
    %c3_499 = arith.constant 3 : index
    %505 = memref.load %arg4[%c1_497, %c4_498, %c3_499] : memref<2x7x7xf32, #tpu.memory_space<smem>>
    %506 = vector.broadcast %505 : f32 to vector<16x16xf32>
    %507 = arith.mulf %504, %506 : vector<16x16xf32>
    %508 = arith.addf %502, %507 : vector<16x16xf32>
    %c1_500 = arith.constant 1 : index
    %c4_501 = arith.constant 4 : index
    %c4_502 = arith.constant 4 : index
    %509 = vector.load %arg7[%c1_500, %c4_501, %c4_502] : memref<2x22x22xf32, #tpu.memory_space<vmem>>, vector<1x16x16xf32>
    %510 = vector.shape_cast %509 : vector<1x16x16xf32> to vector<16x16xf32>
    %c1_503 = arith.constant 1 : index
    %c4_504 = arith.constant 4 : index
    %c4_505 = arith.constant 4 : index
    %511 = memref.load %arg4[%c1_503, %c4_504, %c4_505] : memref<2x7x7xf32, #tpu.memory_space<smem>>
    %512 = vector.broadcast %511 : f32 to vector<16x16xf32>
    %513 = arith.mulf %510, %512 : vector<16x16xf32>
    %514 = arith.addf %508, %513 : vector<16x16xf32>
    %c1_506 = arith.constant 1 : index
    %c4_507 = arith.constant 4 : index
    %c5_508 = arith.constant 5 : index
    %515 = vector.load %arg7[%c1_506, %c4_507, %c5_508] : memref<2x22x22xf32, #tpu.memory_space<vmem>>, vector<1x16x16xf32>
    %516 = vector.shape_cast %515 : vector<1x16x16xf32> to vector<16x16xf32>
    %c1_509 = arith.constant 1 : index
    %c4_510 = arith.constant 4 : index
    %c5_511 = arith.constant 5 : index
    %517 = memref.load %arg4[%c1_509, %c4_510, %c5_511] : memref<2x7x7xf32, #tpu.memory_space<smem>>
    %518 = vector.broadcast %517 : f32 to vector<16x16xf32>
    %519 = arith.mulf %516, %518 : vector<16x16xf32>
    %520 = arith.addf %514, %519 : vector<16x16xf32>
    %c1_512 = arith.constant 1 : index
    %c4_513 = arith.constant 4 : index
    %c6_514 = arith.constant 6 : index
    %521 = vector.load %arg7[%c1_512, %c4_513, %c6_514] : memref<2x22x22xf32, #tpu.memory_space<vmem>>, vector<1x16x16xf32>
    %522 = vector.shape_cast %521 : vector<1x16x16xf32> to vector<16x16xf32>
    %c1_515 = arith.constant 1 : index
    %c4_516 = arith.constant 4 : index
    %c6_517 = arith.constant 6 : index
    %523 = memref.load %arg4[%c1_515, %c4_516, %c6_517] : memref<2x7x7xf32, #tpu.memory_space<smem>>
    %524 = vector.broadcast %523 : f32 to vector<16x16xf32>
    %525 = arith.mulf %522, %524 : vector<16x16xf32>
    %526 = arith.addf %520, %525 : vector<16x16xf32>
    %c1_518 = arith.constant 1 : index
    %c5_519 = arith.constant 5 : index
    %c0_520 = arith.constant 0 : index
    %527 = vector.load %arg7[%c1_518, %c5_519, %c0_520] : memref<2x22x22xf32, #tpu.memory_space<vmem>>, vector<1x16x16xf32>
    %528 = vector.shape_cast %527 : vector<1x16x16xf32> to vector<16x16xf32>
    %c1_521 = arith.constant 1 : index
    %c5_522 = arith.constant 5 : index
    %c0_523 = arith.constant 0 : index
    %529 = memref.load %arg4[%c1_521, %c5_522, %c0_523] : memref<2x7x7xf32, #tpu.memory_space<smem>>
    %530 = vector.broadcast %529 : f32 to vector<16x16xf32>
    %531 = arith.mulf %528, %530 : vector<16x16xf32>
    %532 = arith.addf %526, %531 : vector<16x16xf32>
    %c1_524 = arith.constant 1 : index
    %c5_525 = arith.constant 5 : index
    %c1_526 = arith.constant 1 : index
    %533 = vector.load %arg7[%c1_524, %c5_525, %c1_526] : memref<2x22x22xf32, #tpu.memory_space<vmem>>, vector<1x16x16xf32>
    %534 = vector.shape_cast %533 : vector<1x16x16xf32> to vector<16x16xf32>
    %c1_527 = arith.constant 1 : index
    %c5_528 = arith.constant 5 : index
    %c1_529 = arith.constant 1 : index
    %535 = memref.load %arg4[%c1_527, %c5_528, %c1_529] : memref<2x7x7xf32, #tpu.memory_space<smem>>
    %536 = vector.broadcast %535 : f32 to vector<16x16xf32>
    %537 = arith.mulf %534, %536 : vector<16x16xf32>
    %538 = arith.addf %532, %537 : vector<16x16xf32>
    %c1_530 = arith.constant 1 : index
    %c5_531 = arith.constant 5 : index
    %c2_532 = arith.constant 2 : index
    %539 = vector.load %arg7[%c1_530, %c5_531, %c2_532] : memref<2x22x22xf32, #tpu.memory_space<vmem>>, vector<1x16x16xf32>
    %540 = vector.shape_cast %539 : vector<1x16x16xf32> to vector<16x16xf32>
    %c1_533 = arith.constant 1 : index
    %c5_534 = arith.constant 5 : index
    %c2_535 = arith.constant 2 : index
    %541 = memref.load %arg4[%c1_533, %c5_534, %c2_535] : memref<2x7x7xf32, #tpu.memory_space<smem>>
    %542 = vector.broadcast %541 : f32 to vector<16x16xf32>
    %543 = arith.mulf %540, %542 : vector<16x16xf32>
    %544 = arith.addf %538, %543 : vector<16x16xf32>
    %c1_536 = arith.constant 1 : index
    %c5_537 = arith.constant 5 : index
    %c3_538 = arith.constant 3 : index
    %545 = vector.load %arg7[%c1_536, %c5_537, %c3_538] : memref<2x22x22xf32, #tpu.memory_space<vmem>>, vector<1x16x16xf32>
    %546 = vector.shape_cast %545 : vector<1x16x16xf32> to vector<16x16xf32>
    %c1_539 = arith.constant 1 : index
    %c5_540 = arith.constant 5 : index
    %c3_541 = arith.constant 3 : index
    %547 = memref.load %arg4[%c1_539, %c5_540, %c3_541] : memref<2x7x7xf32, #tpu.memory_space<smem>>
    %548 = vector.broadcast %547 : f32 to vector<16x16xf32>
    %549 = arith.mulf %546, %548 : vector<16x16xf32>
    %550 = arith.addf %544, %549 : vector<16x16xf32>
    %c1_542 = arith.constant 1 : index
    %c5_543 = arith.constant 5 : index
    %c4_544 = arith.constant 4 : index
    %551 = vector.load %arg7[%c1_542, %c5_543, %c4_544] : memref<2x22x22xf32, #tpu.memory_space<vmem>>, vector<1x16x16xf32>
    %552 = vector.shape_cast %551 : vector<1x16x16xf32> to vector<16x16xf32>
    %c1_545 = arith.constant 1 : index
    %c5_546 = arith.constant 5 : index
    %c4_547 = arith.constant 4 : index
    %553 = memref.load %arg4[%c1_545, %c5_546, %c4_547] : memref<2x7x7xf32, #tpu.memory_space<smem>>
    %554 = vector.broadcast %553 : f32 to vector<16x16xf32>
    %555 = arith.mulf %552, %554 : vector<16x16xf32>
    %556 = arith.addf %550, %555 : vector<16x16xf32>
    %c1_548 = arith.constant 1 : index
    %c5_549 = arith.constant 5 : index
    %c5_550 = arith.constant 5 : index
    %557 = vector.load %arg7[%c1_548, %c5_549, %c5_550] : memref<2x22x22xf32, #tpu.memory_space<vmem>>, vector<1x16x16xf32>
    %558 = vector.shape_cast %557 : vector<1x16x16xf32> to vector<16x16xf32>
    %c1_551 = arith.constant 1 : index
    %c5_552 = arith.constant 5 : index
    %c5_553 = arith.constant 5 : index
    %559 = memref.load %arg4[%c1_551, %c5_552, %c5_553] : memref<2x7x7xf32, #tpu.memory_space<smem>>
    %560 = vector.broadcast %559 : f32 to vector<16x16xf32>
    %561 = arith.mulf %558, %560 : vector<16x16xf32>
    %562 = arith.addf %556, %561 : vector<16x16xf32>
    %c1_554 = arith.constant 1 : index
    %c5_555 = arith.constant 5 : index
    %c6_556 = arith.constant 6 : index
    %563 = vector.load %arg7[%c1_554, %c5_555, %c6_556] : memref<2x22x22xf32, #tpu.memory_space<vmem>>, vector<1x16x16xf32>
    %564 = vector.shape_cast %563 : vector<1x16x16xf32> to vector<16x16xf32>
    %c1_557 = arith.constant 1 : index
    %c5_558 = arith.constant 5 : index
    %c6_559 = arith.constant 6 : index
    %565 = memref.load %arg4[%c1_557, %c5_558, %c6_559] : memref<2x7x7xf32, #tpu.memory_space<smem>>
    %566 = vector.broadcast %565 : f32 to vector<16x16xf32>
    %567 = arith.mulf %564, %566 : vector<16x16xf32>
    %568 = arith.addf %562, %567 : vector<16x16xf32>
    %c1_560 = arith.constant 1 : index
    %c6_561 = arith.constant 6 : index
    %c0_562 = arith.constant 0 : index
    %569 = vector.load %arg7[%c1_560, %c6_561, %c0_562] : memref<2x22x22xf32, #tpu.memory_space<vmem>>, vector<1x16x16xf32>
    %570 = vector.shape_cast %569 : vector<1x16x16xf32> to vector<16x16xf32>
    %c1_563 = arith.constant 1 : index
    %c6_564 = arith.constant 6 : index
    %c0_565 = arith.constant 0 : index
    %571 = memref.load %arg4[%c1_563, %c6_564, %c0_565] : memref<2x7x7xf32, #tpu.memory_space<smem>>
    %572 = vector.broadcast %571 : f32 to vector<16x16xf32>
    %573 = arith.mulf %570, %572 : vector<16x16xf32>
    %574 = arith.addf %568, %573 : vector<16x16xf32>
    %c1_566 = arith.constant 1 : index
    %c6_567 = arith.constant 6 : index
    %c1_568 = arith.constant 1 : index
    %575 = vector.load %arg7[%c1_566, %c6_567, %c1_568] : memref<2x22x22xf32, #tpu.memory_space<vmem>>, vector<1x16x16xf32>
    %576 = vector.shape_cast %575 : vector<1x16x16xf32> to vector<16x16xf32>
    %c1_569 = arith.constant 1 : index
    %c6_570 = arith.constant 6 : index
    %c1_571 = arith.constant 1 : index
    %577 = memref.load %arg4[%c1_569, %c6_570, %c1_571] : memref<2x7x7xf32, #tpu.memory_space<smem>>
    %578 = vector.broadcast %577 : f32 to vector<16x16xf32>
    %579 = arith.mulf %576, %578 : vector<16x16xf32>
    %580 = arith.addf %574, %579 : vector<16x16xf32>
    %c1_572 = arith.constant 1 : index
    %c6_573 = arith.constant 6 : index
    %c2_574 = arith.constant 2 : index
    %581 = vector.load %arg7[%c1_572, %c6_573, %c2_574] : memref<2x22x22xf32, #tpu.memory_space<vmem>>, vector<1x16x16xf32>
    %582 = vector.shape_cast %581 : vector<1x16x16xf32> to vector<16x16xf32>
    %c1_575 = arith.constant 1 : index
    %c6_576 = arith.constant 6 : index
    %c2_577 = arith.constant 2 : index
    %583 = memref.load %arg4[%c1_575, %c6_576, %c2_577] : memref<2x7x7xf32, #tpu.memory_space<smem>>
    %584 = vector.broadcast %583 : f32 to vector<16x16xf32>
    %585 = arith.mulf %582, %584 : vector<16x16xf32>
    %586 = arith.addf %580, %585 : vector<16x16xf32>
    %c1_578 = arith.constant 1 : index
    %c6_579 = arith.constant 6 : index
    %c3_580 = arith.constant 3 : index
    %587 = vector.load %arg7[%c1_578, %c6_579, %c3_580] : memref<2x22x22xf32, #tpu.memory_space<vmem>>, vector<1x16x16xf32>
    %588 = vector.shape_cast %587 : vector<1x16x16xf32> to vector<16x16xf32>
    %c1_581 = arith.constant 1 : index
    %c6_582 = arith.constant 6 : index
    %c3_583 = arith.constant 3 : index
    %589 = memref.load %arg4[%c1_581, %c6_582, %c3_583] : memref<2x7x7xf32, #tpu.memory_space<smem>>
    %590 = vector.broadcast %589 : f32 to vector<16x16xf32>
    %591 = arith.mulf %588, %590 : vector<16x16xf32>
    %592 = arith.addf %586, %591 : vector<16x16xf32>
    %c1_584 = arith.constant 1 : index
    %c6_585 = arith.constant 6 : index
    %c4_586 = arith.constant 4 : index
    %593 = vector.load %arg7[%c1_584, %c6_585, %c4_586] : memref<2x22x22xf32, #tpu.memory_space<vmem>>, vector<1x16x16xf32>
    %594 = vector.shape_cast %593 : vector<1x16x16xf32> to vector<16x16xf32>
    %c1_587 = arith.constant 1 : index
    %c6_588 = arith.constant 6 : index
    %c4_589 = arith.constant 4 : index
    %595 = memref.load %arg4[%c1_587, %c6_588, %c4_589] : memref<2x7x7xf32, #tpu.memory_space<smem>>
    %596 = vector.broadcast %595 : f32 to vector<16x16xf32>
    %597 = arith.mulf %594, %596 : vector<16x16xf32>
    %598 = arith.addf %592, %597 : vector<16x16xf32>
    %c1_590 = arith.constant 1 : index
    %c6_591 = arith.constant 6 : index
    %c5_592 = arith.constant 5 : index
    %599 = vector.load %arg7[%c1_590, %c6_591, %c5_592] : memref<2x22x22xf32, #tpu.memory_space<vmem>>, vector<1x16x16xf32>
    %600 = vector.shape_cast %599 : vector<1x16x16xf32> to vector<16x16xf32>
    %c1_593 = arith.constant 1 : index
    %c6_594 = arith.constant 6 : index
    %c5_595 = arith.constant 5 : index
    %601 = memref.load %arg4[%c1_593, %c6_594, %c5_595] : memref<2x7x7xf32, #tpu.memory_space<smem>>
    %602 = vector.broadcast %601 : f32 to vector<16x16xf32>
    %603 = arith.mulf %600, %602 : vector<16x16xf32>
    %604 = arith.addf %598, %603 : vector<16x16xf32>
    %c1_596 = arith.constant 1 : index
    %c6_597 = arith.constant 6 : index
    %c6_598 = arith.constant 6 : index
    %605 = vector.load %arg7[%c1_596, %c6_597, %c6_598] : memref<2x22x22xf32, #tpu.memory_space<vmem>>, vector<1x16x16xf32>
    %606 = vector.shape_cast %605 : vector<1x16x16xf32> to vector<16x16xf32>
    %c1_599 = arith.constant 1 : index
    %c6_600 = arith.constant 6 : index
    %c6_601 = arith.constant 6 : index
    %607 = memref.load %arg4[%c1_599, %c6_600, %c6_601] : memref<2x7x7xf32, #tpu.memory_space<smem>>
    %608 = vector.broadcast %607 : f32 to vector<16x16xf32>
    %609 = arith.mulf %606, %608 : vector<16x16xf32>
    %610 = arith.addf %604, %609 : vector<16x16xf32>
    %611 = arith.negf %610 : vector<16x16xf32>
    %612 = math.exp %611 : vector<16x16xf32>
    %cst_602 = arith.constant 1.000000e+00 : f32
    %613 = vector.broadcast %cst_602 : f32 to vector<16x16xf32>
    %614 = arith.addf %613, %612 : vector<16x16xf32>
    %615 = arith.divf %613, %614 : vector<16x16xf32>
    %616 = vector.shape_cast %615 : vector<16x16xf32> to vector<16x16x1xf32>
    %617 = vector.broadcast %616 : vector<16x16x1xf32> to vector<16x16x32xf32>
    %618 = arith.mulf %6, %617 : vector<16x16x32xf32>
    %c0_603 = arith.constant 0 : index
    %c0_604 = arith.constant 0 : index
    %c0_605 = arith.constant 0 : index
    %c0_606 = arith.constant 0 : index
    %619 = vector.load %arg3[%c0_603, %c0_604, %c0_605, %c0_606] : memref<1x16x16x32xf32, #tpu.memory_space<vmem>>, vector<1x16x16x32xf32>
    %620 = vector.shape_cast %619 : vector<1x16x16x32xf32> to vector<16x16x32xf32>
    %621 = arith.addf %618, %620 : vector<16x16x32xf32>
    %cst_607 = arith.constant 0.000000e+00 : f32
    %622 = vector.broadcast %cst_607 : f32 to vector<16x16x32xf32>
    %623 = arith.maximumf %621, %622 : vector<16x16x32xf32>
    %c0_608 = arith.constant 0 : index
    %c0_609 = arith.constant 0 : index
    %c0_610 = arith.constant 0 : index
    %c0_611 = arith.constant 0 : index
    %624 = vector.load %arg6[%c0_608, %c0_609, %c0_610, %c0_611] : memref<1x16x16x32xf32, #tpu.memory_space<vmem>>, vector<1x16x16x32xf32>
    %625 = vector.shape_cast %624 : vector<1x16x16x32xf32> to vector<16x16x32xf32>
    %626 = vector.shape_cast %623 : vector<16x16x32xf32> to vector<1x16x16x32xf32>
    tpu.vector_store %arg6[%c0_608, %c0_609, %c0_610, %c0_611], %626 {strides = array<i32>} : memref<1x16x16x32xf32, #tpu.memory_space<vmem>>, vector<1x16x16x32xf32>,
    return
  }
  func.func @transform_0(%arg0: i32) -> (i32, i32, i32, i32) {
    %c0_i32 = arith.constant 0 : i32
    %c0_i32_0 = arith.constant 0 : i32
    %c0_i32_1 = arith.constant 0 : i32
    %c0_i32_2 = arith.constant 0 : i32
    return %arg0, %c0_i32, %c0_i32_0, %c0_i32_1 : i32, i32, i32, i32
  }
  func.func @transform_1(%arg0: i32) -> (i32, i32, i32) {
    %c0_i32 = arith.constant 0 : i32
    %c0_i32_0 = arith.constant 0 : i32
    %c0_i32_1 = arith.constant 0 : i32
    return %arg0, %c0_i32, %c0_i32_0 : i32, i32, i32
  }
  func.func @transform_2(%arg0: i32) -> (i32, i32, i32, i32) {
    %c0_i32 = arith.constant 0 : i32
    %c0_i32_0 = arith.constant 0 : i32
    %c0_i32_1 = arith.constant 0 : i32
    %c0_i32_2 = arith.constant 0 : i32
    return %arg0, %c0_i32, %c0_i32_0, %c0_i32_1 : i32, i32, i32, i32
  }
  func.func @transform_3(%arg0: i32) -> (i32, i32, i32) {
    %c0_i32 = arith.constant 0 : i32
    %c0_i32_0 = arith.constant 0 : i32
    %c0_i32_1 = arith.constant 0 : i32
    %c0_i32_2 = arith.constant 0 : i32
    return %c0_i32, %c0_i32_0, %c0_i32_1 : i32, i32, i32
  }
  func.func @transform_4(%arg0: i32) -> i32 {
    %c0_i32 = arith.constant 0 : i32
    %c0_i32_0 = arith.constant 0 : i32
    return %c0_i32 : i32
  }
  func.func @transform_5(%arg0: i32) -> (i32, i32, i32, i32) {
    %c0_i32 = arith.constant 0 : i32
    %c0_i32_0 = arith.constant 0 : i32
    %c0_i32_1 = arith.constant 0 : i32
    %c0_i32_2 = arith.constant 0 : i32
    return %arg0, %c0_i32, %c0_i32_0, %c0_i32_1 : i32, i32, i32, i32
  }
}

</mosaic_0001>

<bundles_post_ra>
// kernel: bottleneck_forward.5
= control target key start
LH: loop header
LB: loop body
LE: loop exit
PB: predicated region body
PF: predicated region fallthrough
CT: control target
= control target key end

     0   :  { %s995_s12 = smov 0   ;;  %s997_s13 = smov 0   ;;  %s1188_s0 = inlined_call_operand.vmem [shape: f32[2,16,16,16], index: 0, kind: input, shape index: {}]   ;;  %s1189_s1 = inlined_call_operand.vmem [shape: bf16[16,8], index: 1, kind: input, shape index: {}]   ;;  %s1190_s2 = inlined_call_operand.vmem [shape: f32[1,8], index: 2, kind: input, shape index: {}]   ;;  %s1191_s3 = inlined_call_operand.vmem [shape: bf16[2,16,16,8], index: 3, kind: output, shape index: {}]  }
   0x1   :  { %s999_s14 = smov 0  }
   0x2 LB: > { %s25_s15 = sadd.s32 1, %s969_s13  ;;  %p782_p0 = scmp.ge.s32.totalorder %s973_s14, 1  ;;  %s973_s14 = sphi %s999_s14, %s13_s14   ;;  %s969_s13 = sphi %s997_s13, %s1193_s13   ;;  %s965_s12 = sphi %s995_s12, %s1192_s12  }
   0x3   : > { %p27_p1 = scmp.ge.s32.totalorder %s25_s15, 2  ;;  %p159_p2 = scmp.lt.s32.totalorder %s973_s14, 3 }
   0x5   : > { %s1195_s15 = smov (%p27_p1, %s25_s15), 0  ;;  %p160_p3 = pnand %p782_p0, %p159_p2 }
   0x6   : > { %v950_v0 = vld [vmem:[%s1189_s1] sm:$0xff] (!%p160_p3)   ;;  %p194_p4 = scmp.lt.s32.totalorder (!%p160_p3), %s965_s12, 1  ;;  %vm279_vm0 = vcmask (!%p160_p3), 130048   ;;  %vm649_vm1 = vcmask (!%p160_p3), 60416  }
   0x7   : > { %163 = sbr.rel (%p160_p3) target bundleno = 268 (0x10c), region = 32  ;;  %890 = vmatprep.subr.bf16.mxu0 (!%p160_p3), %v950_v0  ;;  %924 = vmatprep.subr.bf16.mxu1 (!%p160_p3), %v950_v0  ;;  %v1075_v49 = vld [vmem:[%s1190_s2] ss:$0 sm:$0xff] (!%p160_p3) }
   0x8   : > { %891 = vmatpush3.bf16.msra.mxu0 (!%p160_p3), %v950_v0  ;;  %925 = vmatpush3.bf16.msra.mxu1 (!%p160_p3), %v950_v0 }
   0xe   : > { %s1197_s12 = smov (!%p194_p4, %s965_s12), 1 }
   0xf   : > { %s839_s18 = sshll.u32 %s1197_s12, 8  ;;  %s840_s24 = sshll.u32 %s1197_s12, 7 }
  0x10   : > { %s1022_s21 = scalar_lea.vmem %s1188_s0, %s839_s18  ;;  %s1086_s27 = scalar_lea.vmem %s1191_s3, %s840_s24 }
  0x11   : > { %v216_v1 = vld [vmem:[%s1022_s21] sm:$0xff]  ;;  %v217_v2 = vld [vmem:[%s1022_s21 + $0x8] sm:$0xff]  ;;  %v218_v6 = vld [vmem:[%s1022_s21 + $0x10] sm:$0xff] }
  0x12   : > { %v232_v3 = vld [vmem:[%s1022_s21 + $0x80] sm:$0xff]  ;;  %v248_v4 = vpack.c.bf16 %v217_v2, %v216_v1  ;;  %v233_v5 = vld [vmem:[%s1022_s21 + $0x88] sm:$0xff]  ;;  %v219_v7 = vld [vmem:[%s1022_s21 + $0x18] sm:$0xff] }
  0x13   : > { %v256_v8 = vpack.c.bf16 %v233_v5, %v232_v3  ;;  %v249_v9 = vpack.c.bf16 %v219_v7, %v218_v6  ;;  %v234_v10 = vld [vmem:[%s1022_s21 + $0x90] sm:$0xff]  ;;  %v235_v11 = vld [vmem:[%s1022_s21 + $0x98] sm:$0xff]  ;;  %v220_v12 = vld [vmem:[%s1022_s21 + $0x20] sm:$0xff] }
  0x14   : > { %892 = vmatprep.mubr.msk.bf16.mxu0 %vm279_vm0, %v248_v4  ;;  %v257_v13 = vpack.c.bf16 %v235_v11, %v234_v10  ;;  %v221_v14 = vld [vmem:[%s1022_s21 + $0x28] sm:$0xff]  ;;  %v236_v15 = vld [vmem:[%s1022_s21 + $0xa0] sm:$0xff]  ;;  %v222_v19 = vld [vmem:[%s1022_s21 + $0x30] sm:$0xff] }
  0x15   : > { %v237_v16 = vld [vmem:[%s1022_s21 + $0xa8] sm:$0xff]  ;;  %908 = vmatprep.mubr.msk.bf16.mxu1 %vm279_vm0, %v256_v8  ;;  %893 = vmatmul.mubr.msk.bf16.vlgmr.msra.gmra.mrb[0].mxu0 %vm279_vm0, %v249_v9  ;;  %v250_v17 = vpack.c.bf16 %v221_v14, %v220_v12  ;;  %v223_v20 = vld [vmem:[%s1022_s21 + $0x38] sm:$0xff]  ;;  %v238_v21 = vld [vmem:[%s1022_s21 + $0xb0] sm:$0xff] }
  0x16   : > { %v258_v18 = vpack.c.bf16 %v237_v16, %v236_v15  ;;  %909 = vmatmul.mubr.msk.bf16.vlgmr.msra.gmra.mrb[0].mxu1 %vm279_vm0, %v257_v13  ;;  %v239_v22 = vld [vmem:[%s1022_s21 + $0xb8] sm:$0xff]  ;;  %v224_v23 = vld [vmem:[%s1022_s21 + $0x40] sm:$0xff]  ;;  %v225_v24 = vld [vmem:[%s1022_s21 + $0x48] sm:$0xff]  ;;  %v251_v27 = vpack.c.bf16 %v223_v20, %v222_v19 }
  0x17   : > { %896 = vmatprep.mubr.msk.bf16.mxu0 %vm279_vm0, %v250_v17  ;;  %v240_v25 = vld [vmem:[%s1022_s21 + $0xc0] sm:$0xff]  ;;  %v241_v26 = vld [vmem:[%s1022_s21 + $0xc8] sm:$0xff]  ;;  %v259_v28 = vpack.c.bf16 %v239_v22, %v238_v21  ;;  %v252_v29 = vpack.c.bf16 %v225_v24, %v224_v23  ;;  %v226_v31 = vld [vmem:[%s1022_s21 + $0x50] sm:$0xff] }
  0x18   : > { %912 = vmatprep.mubr.msk.bf16.mxu1 %vm279_vm0, %v258_v18  ;;  %v260_v30 = vpack.c.bf16 %v241_v26, %v240_v25  ;;  %v227_v32 = vld [vmem:[%s1022_s21 + $0x58] sm:$0xff]  ;;  %v242_v33 = vld [vmem:[%s1022_s21 + $0xd0] sm:$0xff]  ;;  %v228_v35 = vld [vmem:[%s1022_s21 + $0x60] sm:$0xff] }
  0x19   : > { %v243_v34 = vld [vmem:[%s1022_s21 + $0xd8] sm:$0xff]  ;;  %v229_v36 = vld [vmem:[%s1022_s21 + $0x68] sm:$0xff]  ;;  %v244_v37 = vld [vmem:[%s1022_s21 + $0xe0] sm:$0xff]  ;;  %v253_v39 = vpack.c.bf16 %v227_v32, %v226_v31 }
  0x1a   : > { %v245_v38 = vld [vmem:[%s1022_s21 + $0xe8] sm:$0xff]  ;;  %v261_v40 = vpack.c.bf16 %v243_v34, %v242_v33  ;;  %v254_v41 = vpack.c.bf16 %v229_v36, %v228_v35  ;;  %v230_v43 = vld [vmem:[%s1022_s21 + $0x70] sm:$0xff]  ;;  %v231_v44 = vld [vmem:[%s1022_s21 + $0x78] sm:$0xff] }
  0x1b   : > { %v262_v42 = vpack.c.bf16 %v245_v38, %v244_v37  ;;  %v246_v45 = vld [vmem:[%s1022_s21 + $0xf0] sm:$0xff]  ;;  %v247_v46 = vld [vmem:[%s1022_s21 + $0xf8] sm:$0xff]  ;;  %v255_v47 = vpack.c.bf16 %v231_v44, %v230_v43 }
  0x1c   : > { %v263_v48 = vpack.c.bf16 %v247_v46, %v246_v45 }
  0x1d   : > { %897 = vmatmul.mubr.msk.bf16.gmra.mrb[4].mxu0 %vm279_vm0, %v251_v27 }
  0x1e   : > { %913 = vmatmul.mubr.msk.bf16.gmra.mrb[4].mxu1 %vm279_vm0, %v259_v28  ;;  %900 = vmatprep.mubr.msk.bf16.mxu0 %vm279_vm0, %v252_v29 }
  0x1f   : > { %916 = vmatprep.mubr.msk.bf16.mxu1 %vm279_vm0, %v260_v30 }
  0x25   : > { %901 = vmatmul.mubr.msk.bf16.gmra.mrb[8].mxu0 %vm279_vm0, %v253_v39 }
  0x26   : > { %917 = vmatmul.mubr.msk.bf16.gmra.mrb[8].mxu1 %vm279_vm0, %v261_v40  ;;  %904 = vmatprep.mubr.msk.bf16.mxu0 %vm279_vm0, %v254_v41 }
  0x27   : > { %920 = vmatprep.mubr.msk.bf16.mxu1 %vm279_vm0, %v262_v42 }
  0x2d   : > { %905 = vmatmul.mubr.msk.bf16.gmra.mrb[12].mxu0 %vm279_vm0, %v255_v47 }
  0x2e   : > { %921 = vmatmul.mubr.msk.bf16.gmra.mrb[12].mxu1 %vm279_vm0, %v263_v48 }
  0xe8   : > { %v894_v50 = vpop.f32.mrb[0].mxu0 }
  0xe9   : > { %v371_v51 = vadd.f32 %v894_v50, %v1075_v49  ;;  %v910_v52 = vpop.f32.mrb[0].mxu1  ;;  %v362_v53 = vpop.f32.mrb[1].mxu0 }
  0xea   : > { %v435_v54 = vadd.f32 %v910_v52, %v1075_v49  ;;  %v363_v55 = vadd.f32 %v1075_v49, %v362_v53  ;;  %v426_v56 = vpop.f32.mrb[1].mxu1  ;;  %v895_v57 = vpop.f32.mrb[2].mxu0 }
  0xeb   : > { %v491_v58 = vmax.f32 %v371_v51, 0.0  ;;  %v427_v59 = vadd.f32 %v1075_v49, %v426_v56  ;;  %v374_v60 = vadd.f32 %v895_v57, %v1075_v49  ;;  %v911_v61 = vpop.f32.mrb[2].mxu1  ;;  %v365_v62 = vpop.f32.mrb[3].mxu0 }
  0xec   : > { %v507_v63 = vmax.f32 %v435_v54, 0.0  ;;  %v489_v0 = vmax.f32 %v363_v55, 0.0  ;;  %v438_v1 = vadd.f32 %v911_v61, %v1075_v49  ;;  %v366_v2 = vadd.f32 %v1075_v49, %v365_v62  ;;  %v429_v3 = vpop.f32.mrb[3].mxu1 }
  0xed   : > { %v843_v4 = vpack.c.bf16 %v491_v58, %v491_v58  ;;  %v505_v5 = vmax.f32 %v427_v59, 0.0  ;;  %v492_v6 = vmax.f32 %v374_v60, 0.0  ;;  %v430_v7 = vadd.f32 %v1075_v49, %v429_v3 }
  0xee   : > { %v859_v8 = vpack.c.bf16 %v507_v63, %v507_v63  ;;  %v841_v9 = vpack.c.bf16 %v489_v0, %v489_v0  ;;  %v508_v10 = vmax.f32 %v438_v1, 0.0  ;;  %v490_v11 = vmax.f32 %v366_v2, 0.0 }
  0xef   : > { %652 = vst.msk [vmem:[%s1086_s27 + $0x8] sm:$0xf] %vm649_vm1, %v843_v4  ;;  %v857_v12 = vpack.c.bf16 %v505_v5, %v505_v5  ;;  %v844_v13 = vpack.c.bf16 %v492_v6, %v492_v6  ;;  %v506_v14 = vmax.f32 %v430_v7, 0.0 }
  0xf0   : > { %668 = vst.msk [vmem:[%s1086_s27 + $0x48] sm:$0xf] %vm649_vm1, %v859_v8  ;;  %650 = vst.msk [vmem:[%s1086_s27] sm:$0xf] %vm649_vm1, %v841_v9  ;;  %v860_v15 = vpack.c.bf16 %v508_v10, %v508_v10  ;;  %v842_v16 = vpack.c.bf16 %v490_v11, %v490_v11  ;;  %v898_v17 = vpop.f32.mrb[4].mxu0 }
  0xf1   : > { %666 = vst.msk [vmem:[%s1086_s27 + $0x40] sm:$0xf] %vm649_vm1, %v857_v12  ;;  %653 = vst.msk [vmem:[%s1086_s27 + $0xc] sm:$0xf] %vm649_vm1, %v844_v13  ;;  %v858_v18 = vpack.c.bf16 %v506_v14, %v506_v14  ;;  %v387_v19 = vadd.f32 %v898_v17, %v1075_v49  ;;  %v914_v20 = vpop.f32.mrb[4].mxu1  ;;  %v378_v21 = vpop.f32.mrb[5].mxu0 }
  0xf2   : > { %669 = vst.msk [vmem:[%s1086_s27 + $0x4c] sm:$0xf] %vm649_vm1, %v860_v15  ;;  %651 = vst.msk [vmem:[%s1086_s27 + $0x4] sm:$0xf] %vm649_vm1, %v842_v16  ;;  %v451_v22 = vadd.f32 %v914_v20, %v1075_v49  ;;  %v379_v23 = vadd.f32 %v1075_v49, %v378_v21  ;;  %v442_v24 = vpop.f32.mrb[5].mxu1  ;;  %v899_v25 = vpop.f32.mrb[6].mxu0 }
  0xf3   : > { %667 = vst.msk [vmem:[%s1086_s27 + $0x44] sm:$0xf] %vm649_vm1, %v858_v18  ;;  %v495_v26 = vmax.f32 %v387_v19, 0.0  ;;  %v443_v27 = vadd.f32 %v1075_v49, %v442_v24  ;;  %v390_v28 = vadd.f32 %v899_v25, %v1075_v49  ;;  %v915_v29 = vpop.f32.mrb[6].mxu1  ;;  %v381_v30 = vpop.f32.mrb[7].mxu0 }
  0xf4   : > { %v511_v31 = vmax.f32 %v451_v22, 0.0  ;;  %v493_v32 = vmax.f32 %v379_v23, 0.0  ;;  %v454_v33 = vadd.f32 %v915_v29, %v1075_v49  ;;  %v382_v34 = vadd.f32 %v1075_v49, %v381_v30  ;;  %v445_v35 = vpop.f32.mrb[7].mxu1 }
  0xf5   : > { %v847_v36 = vpack.c.bf16 %v495_v26, %v495_v26  ;;  %v509_v37 = vmax.f32 %v443_v27, 0.0  ;;  %v496_v38 = vmax.f32 %v390_v28, 0.0  ;;  %v446_v39 = vadd.f32 %v1075_v49, %v445_v35 }
  0xf6   : > { %v863_v40 = vpack.c.bf16 %v511_v31, %v511_v31  ;;  %v845_v41 = vpack.c.bf16 %v493_v32, %v493_v32  ;;  %v512_v42 = vmax.f32 %v454_v33, 0.0  ;;  %v494_v43 = vmax.f32 %v382_v34, 0.0 }
  0xf7   : > { %656 = vst.msk [vmem:[%s1086_s27 + $0x18] sm:$0xf] %vm649_vm1, %v847_v36  ;;  %v861_v44 = vpack.c.bf16 %v509_v37, %v509_v37  ;;  %v848_v45 = vpack.c.bf16 %v496_v38, %v496_v38  ;;  %v510_v46 = vmax.f32 %v446_v39, 0.0 }
  0xf8   : > { %672 = vst.msk [vmem:[%s1086_s27 + $0x58] sm:$0xf] %vm649_vm1, %v863_v40  ;;  %654 = vst.msk [vmem:[%s1086_s27 + $0x10] sm:$0xf] %vm649_vm1, %v845_v41  ;;  %v864_v47 = vpack.c.bf16 %v512_v42, %v512_v42  ;;  %v846_v48 = vpack.c.bf16 %v494_v43, %v494_v43  ;;  %v902_v50 = vpop.f32.mrb[8].mxu0 }
  0xf9   : > { %670 = vst.msk [vmem:[%s1086_s27 + $0x50] sm:$0xf] %vm649_vm1, %v861_v44  ;;  %657 = vst.msk [vmem:[%s1086_s27 + $0x1c] sm:$0xf] %vm649_vm1, %v848_v45  ;;  %v862_v51 = vpack.c.bf16 %v510_v46, %v510_v46  ;;  %v403_v52 = vadd.f32 %v902_v50, %v1075_v49  ;;  %v918_v53 = vpop.f32.mrb[8].mxu1  ;;  %v394_v54 = vpop.f32.mrb[9].mxu0 }
  0xfa   : > { %673 = vst.msk [vmem:[%s1086_s27 + $0x5c] sm:$0xf] %vm649_vm1, %v864_v47  ;;  %655 = vst.msk [vmem:[%s1086_s27 + $0x14] sm:$0xf] %vm649_vm1, %v846_v48  ;;  %v467_v55 = vadd.f32 %v918_v53, %v1075_v49  ;;  %v395_v56 = vadd.f32 %v1075_v49, %v394_v54  ;;  %v458_v57 = vpop.f32.mrb[9].mxu1  ;;  %v903_v58 = vpop.f32.mrb[10].mxu0 }
  0xfb   : > { %671 = vst.msk [vmem:[%s1086_s27 + $0x54] sm:$0xf] %vm649_vm1, %v862_v51  ;;  %v499_v59 = vmax.f32 %v403_v52, 0.0  ;;  %v459_v60 = vadd.f32 %v1075_v49, %v458_v57  ;;  %v406_v61 = vadd.f32 %v903_v58, %v1075_v49  ;;  %v919_v62 = vpop.f32.mrb[10].mxu1  ;;  %v397_v63 = vpop.f32.mrb[11].mxu0 }
  0xfc   : > { %v515_v0 = vmax.f32 %v467_v55, 0.0  ;;  %v497_v1 = vmax.f32 %v395_v56, 0.0  ;;  %v470_v2 = vadd.f32 %v919_v62, %v1075_v49  ;;  %v398_v3 = vadd.f32 %v1075_v49, %v397_v63  ;;  %v461_v4 = vpop.f32.mrb[11].mxu1 }
  0xfd   : > { %v851_v5 = vpack.c.bf16 %v499_v59, %v499_v59  ;;  %v513_v6 = vmax.f32 %v459_v60, 0.0  ;;  %v500_v7 = vmax.f32 %v406_v61, 0.0  ;;  %v462_v8 = vadd.f32 %v1075_v49, %v461_v4 }
  0xfe   : > { %v867_v9 = vpack.c.bf16 %v515_v0, %v515_v0  ;;  %v849_v10 = vpack.c.bf16 %v497_v1, %v497_v1  ;;  %v516_v11 = vmax.f32 %v470_v2, 0.0  ;;  %v498_v12 = vmax.f32 %v398_v3, 0.0 }
  0xff   : > { %660 = vst.msk [vmem:[%s1086_s27 + $0x28] sm:$0xf] %vm649_vm1, %v851_v5  ;;  %v865_v13 = vpack.c.bf16 %v513_v6, %v513_v6  ;;  %v852_v14 = vpack.c.bf16 %v500_v7, %v500_v7  ;;  %v514_v15 = vmax.f32 %v462_v8, 0.0 }
 0x100   : > { %676 = vst.msk [vmem:[%s1086_s27 + $0x68] sm:$0xf] %vm649_vm1, %v867_v9  ;;  %658 = vst.msk [vmem:[%s1086_s27 + $0x20] sm:$0xf] %vm649_vm1, %v849_v10  ;;  %v868_v16 = vpack.c.bf16 %v516_v11, %v516_v11  ;;  %v850_v17 = vpack.c.bf16 %v498_v12, %v498_v12  ;;  %v906_v18 = vpop.f32.mrb[12].mxu0 }
 0x101   : > { %674 = vst.msk [vmem:[%s1086_s27 + $0x60] sm:$0xf] %vm649_vm1, %v865_v13  ;;  %661 = vst.msk [vmem:[%s1086_s27 + $0x2c] sm:$0xf] %vm649_vm1, %v852_v14  ;;  %v866_v19 = vpack.c.bf16 %v514_v15, %v514_v15  ;;  %v419_v20 = vadd.f32 %v906_v18, %v1075_v49  ;;  %v922_v21 = vpop.f32.mrb[12].mxu1  ;;  %v410_v22 = vpop.f32.mrb[13].mxu0 }
 0x102   : > { %677 = vst.msk [vmem:[%s1086_s27 + $0x6c] sm:$0xf] %vm649_vm1, %v868_v16  ;;  %659 = vst.msk [vmem:[%s1086_s27 + $0x24] sm:$0xf] %vm649_vm1, %v850_v17  ;;  %v483_v23 = vadd.f32 %v922_v21, %v1075_v49  ;;  %v411_v24 = vadd.f32 %v1075_v49, %v410_v22  ;;  %v474_v25 = vpop.f32.mrb[13].mxu1  ;;  %v907_v26 = vpop.f32.mrb[14].mxu0 }
 0x103   : > { %675 = vst.msk [vmem:[%s1086_s27 + $0x64] sm:$0xf] %vm649_vm1, %v866_v19  ;;  %v503_v27 = vmax.f32 %v419_v20, 0.0  ;;  %v475_v28 = vadd.f32 %v1075_v49, %v474_v25  ;;  %v422_v29 = vadd.f32 %v907_v26, %v1075_v49  ;;  %v923_v30 = vpop.f32.mrb[14].mxu1  ;;  %v413_v31 = vpop.f32.mrb[15].mxu0 }
 0x104   : > { %v519_v32 = vmax.f32 %v483_v23, 0.0  ;;  %v501_v33 = vmax.f32 %v411_v24, 0.0  ;;  %v486_v34 = vadd.f32 %v923_v30, %v1075_v49  ;;  %v414_v35 = vadd.f32 %v1075_v49, %v413_v31  ;;  %v477_v36 = vpop.f32.mrb[15].mxu1 }
 0x105   : > { %v855_v37 = vpack.c.bf16 %v503_v27, %v503_v27  ;;  %v517_v38 = vmax.f32 %v475_v28, 0.0  ;;  %v504_v39 = vmax.f32 %v422_v29, 0.0  ;;  %v478_v40 = vadd.f32 %v1075_v49, %v477_v36 }
 0x106   : > { %v871_v41 = vpack.c.bf16 %v519_v32, %v519_v32  ;;  %v853_v42 = vpack.c.bf16 %v501_v33, %v501_v33  ;;  %v520_v43 = vmax.f32 %v486_v34, 0.0  ;;  %v502_v44 = vmax.f32 %v414_v35, 0.0 }
 0x107   : > { %664 = vst.msk [vmem:[%s1086_s27 + $0x38] sm:$0xf] %vm649_vm1, %v855_v37  ;;  %v869_v45 = vpack.c.bf16 %v517_v38, %v517_v38  ;;  %v856_v46 = vpack.c.bf16 %v504_v39, %v504_v39  ;;  %v518_v47 = vmax.f32 %v478_v40, 0.0 }
 0x108   : > { %680 = vst.msk [vmem:[%s1086_s27 + $0x78] sm:$0xf] %vm649_vm1, %v871_v41  ;;  %662 = vst.msk [vmem:[%s1086_s27 + $0x30] sm:$0xf] %vm649_vm1, %v853_v42  ;;  %v872_v48 = vpack.c.bf16 %v520_v43, %v520_v43  ;;  %v854_v50 = vpack.c.bf16 %v502_v44, %v502_v44 }
 0x109   : > { %678 = vst.msk [vmem:[%s1086_s27 + $0x70] sm:$0xf] %vm649_vm1, %v869_v45  ;;  %665 = vst.msk [vmem:[%s1086_s27 + $0x3c] sm:$0xf] %vm649_vm1, %v856_v46  ;;  %v870_v49 = vpack.c.bf16 %v518_v47, %v518_v47 }
 0x10a   : > { %681 = vst.msk [vmem:[%s1086_s27 + $0x7c] sm:$0xf] %vm649_vm1, %v872_v48  ;;  %663 = vst.msk [vmem:[%s1086_s27 + $0x34] sm:$0xf] %vm649_vm1, %v854_v50 }
 0x10b   : > { %679 = vst.msk [vmem:[%s1086_s27 + $0x74] sm:$0xf] %vm649_vm1, %v870_v49 }
 0x10c PF: > { %s13_s14 = sadd.s32 1, %s973_s14   ;;  %s1192_s12 = smov %s969_s13 }
 0x10d   : > { %p10_p5 = scmp.ge.s32.totalorder %s13_s14, 4   ;;  %s1193_s13 = smov %s1195_s15 }
 0x10f   :  { %12 = sbr.rel (!%p10_p5) target bundleno = 2 (0x2), region = 62 }

// kernel: bottleneck_forward.7
= control target key start
LH: loop header
LB: loop body
LE: loop exit
PB: predicated region body
PF: predicated region fallthrough
CT: control target
= control target key end

     0   :  { %s771_s12 = smov 0   ;;  %s773_s13 = smov 0   ;;  %s967_s0 = inlined_call_operand.vmem [shape: f32[2,16,16,16], index: 0, kind: input, shape index: {}]   ;;  %s968_s1 = inlined_call_operand.vmem [shape: bf16[16,32], index: 1, kind: input, shape index: {}]   ;;  %s969_s2 = inlined_call_operand.vmem [shape: f32[1,32], index: 2, kind: input, shape index: {}]   ;;  %s970_s3 = inlined_call_operand.vmem [shape: f32[2,16,16,32], index: 3, kind: output, shape index: {}]  }
   0x1   :  { %s775_s14 = smov 0  }
   0x2 LB: > { %s25_s15 = sadd.s32 1, %s745_s13  ;;  %p622_p0 = scmp.ge.s32.totalorder %s749_s14, 1  ;;  %s749_s14 = sphi %s775_s14, %s13_s14   ;;  %s745_s13 = sphi %s773_s13, %s972_s13   ;;  %s741_s12 = sphi %s771_s12, %s971_s12  }
   0x3   : > { %p27_p1 = scmp.ge.s32.totalorder %s25_s15, 2  ;;  %p159_p2 = scmp.lt.s32.totalorder %s749_s14, 3 }
   0x5   : > { %s974_s15 = smov (%p27_p1, %s25_s15), 0  ;;  %p160_p3 = pnand %p622_p0, %p159_p2 }
   0x6   : > { %v726_v0 = vld [vmem:[%s968_s1] sm:$0xff] (!%p160_p3)   ;;  %p194_p4 = scmp.lt.s32.totalorder (!%p160_p3), %s741_s12, 1  ;;  %vm279_vm0 = vcmask (!%p160_p3), 130048   ;;  %vm489_vm1 = vcmask (!%p160_p3), 261120  }
   0x7   : > { %163 = sbr.rel (%p160_p3) target bundleno = 264 (0x108), region = 32  ;;  %666 = vmatprep.subr.bf16.mxu0 (!%p160_p3), %v726_v0  ;;  %700 = vmatprep.subr.bf16.mxu1 (!%p160_p3), %v726_v0  ;;  %v853_v49 = vld [vmem:[%s969_s2] ss:$0 sm:$0xff] (!%p160_p3) }
   0x8   : > { %667 = vmatpush3.bf16.msra.mxu0 (!%p160_p3), %v726_v0  ;;  %701 = vmatpush3.bf16.msra.mxu1 (!%p160_p3), %v726_v0 }
   0xe   : > { %s976_s12 = smov (!%p194_p4, %s741_s12), 1 }
   0xf   : > { %s647_s18 = sshll.u32 %s976_s12, 8 }
  0x10   : > { %s800_s21 = scalar_lea.vmem %s967_s0, %s647_s18  ;;  %s860_s26 = scalar_lea.vmem %s970_s3, %s647_s18 }
  0x11   : > { %v216_v1 = vld [vmem:[%s800_s21] sm:$0xff]  ;;  %v217_v2 = vld [vmem:[%s800_s21 + $0x8] sm:$0xff]  ;;  %v218_v6 = vld [vmem:[%s800_s21 + $0x10] sm:$0xff] }
  0x12   : > { %v232_v3 = vld [vmem:[%s800_s21 + $0x80] sm:$0xff]  ;;  %v248_v4 = vpack.c.bf16 %v217_v2, %v216_v1  ;;  %v233_v5 = vld [vmem:[%s800_s21 + $0x88] sm:$0xff]  ;;  %v219_v7 = vld [vmem:[%s800_s21 + $0x18] sm:$0xff] }
  0x13   : > { %v256_v8 = vpack.c.bf16 %v233_v5, %v232_v3  ;;  %v249_v9 = vpack.c.bf16 %v219_v7, %v218_v6  ;;  %v234_v10 = vld [vmem:[%s800_s21 + $0x90] sm:$0xff]  ;;  %v235_v11 = vld [vmem:[%s800_s21 + $0x98] sm:$0xff]  ;;  %v220_v12 = vld [vmem:[%s800_s21 + $0x20] sm:$0xff] }
  0x14   : > { %668 = vmatprep.mubr.msk.bf16.mxu0 %vm279_vm0, %v248_v4  ;;  %v257_v13 = vpack.c.bf16 %v235_v11, %v234_v10  ;;  %v221_v14 = vld [vmem:[%s800_s21 + $0x28] sm:$0xff]  ;;  %v236_v15 = vld [vmem:[%s800_s21 + $0xa0] sm:$0xff]  ;;  %v222_v19 = vld [vmem:[%s800_s21 + $0x30] sm:$0xff] }
  0x15   : > { %v237_v16 = vld [vmem:[%s800_s21 + $0xa8] sm:$0xff]  ;;  %684 = vmatprep.mubr.msk.bf16.mxu1 %vm279_vm0, %v256_v8  ;;  %669 = vmatmul.mubr.msk.bf16.vlgmr.msra.gmra.mrb[0].mxu0 %vm279_vm0, %v249_v9  ;;  %v250_v17 = vpack.c.bf16 %v221_v14, %v220_v12  ;;  %v223_v20 = vld [vmem:[%s800_s21 + $0x38] sm:$0xff]  ;;  %v238_v21 = vld [vmem:[%s800_s21 + $0xb0] sm:$0xff] }
  0x16   : > { %v258_v18 = vpack.c.bf16 %v237_v16, %v236_v15  ;;  %685 = vmatmul.mubr.msk.bf16.vlgmr.msra.gmra.mrb[0].mxu1 %vm279_vm0, %v257_v13  ;;  %v239_v22 = vld [vmem:[%s800_s21 + $0xb8] sm:$0xff]  ;;  %v224_v23 = vld [vmem:[%s800_s21 + $0x40] sm:$0xff]  ;;  %v225_v24 = vld [vmem:[%s800_s21 + $0x48] sm:$0xff]  ;;  %v251_v27 = vpack.c.bf16 %v223_v20, %v222_v19 }
  0x17   : > { %672 = vmatprep.mubr.msk.bf16.mxu0 %vm279_vm0, %v250_v17  ;;  %v240_v25 = vld [vmem:[%s800_s21 + $0xc0] sm:$0xff]  ;;  %v241_v26 = vld [vmem:[%s800_s21 + $0xc8] sm:$0xff]  ;;  %v259_v28 = vpack.c.bf16 %v239_v22, %v238_v21  ;;  %v252_v29 = vpack.c.bf16 %v225_v24, %v224_v23  ;;  %v226_v31 = vld [vmem:[%s800_s21 + $0x50] sm:$0xff] }
  0x18   : > { %688 = vmatprep.mubr.msk.bf16.mxu1 %vm279_vm0, %v258_v18  ;;  %v260_v30 = vpack.c.bf16 %v241_v26, %v240_v25  ;;  %v227_v32 = vld [vmem:[%s800_s21 + $0x58] sm:$0xff]  ;;  %v242_v33 = vld [vmem:[%s800_s21 + $0xd0] sm:$0xff]  ;;  %v228_v35 = vld [vmem:[%s800_s21 + $0x60] sm:$0xff] }
  0x19   : > { %v243_v34 = vld [vmem:[%s800_s21 + $0xd8] sm:$0xff]  ;;  %v229_v36 = vld [vmem:[%s800_s21 + $0x68] sm:$0xff]  ;;  %v244_v37 = vld [vmem:[%s800_s21 + $0xe0] sm:$0xff]  ;;  %v253_v39 = vpack.c.bf16 %v227_v32, %v226_v31 }
  0x1a   : > { %v245_v38 = vld [vmem:[%s800_s21 + $0xe8] sm:$0xff]  ;;  %v261_v40 = vpack.c.bf16 %v243_v34, %v242_v33  ;;  %v254_v41 = vpack.c.bf16 %v229_v36, %v228_v35  ;;  %v230_v43 = vld [vmem:[%s800_s21 + $0x70] sm:$0xff]  ;;  %v231_v44 = vld [vmem:[%s800_s21 + $0x78] sm:$0xff] }
  0x1b   : > { %v262_v42 = vpack.c.bf16 %v245_v38, %v244_v37  ;;  %v246_v45 = vld [vmem:[%s800_s21 + $0xf0] sm:$0xff]  ;;  %v247_v46 = vld [vmem:[%s800_s21 + $0xf8] sm:$0xff]  ;;  %v255_v47 = vpack.c.bf16 %v231_v44, %v230_v43 }
  0x1c   : > { %v263_v48 = vpack.c.bf16 %v247_v46, %v246_v45 }
  0x1d   : > { %673 = vmatmul.mubr.msk.bf16.gmra.mrb[4].mxu0 %vm279_vm0, %v251_v27 }
  0x1e   : > { %689 = vmatmul.mubr.msk.bf16.gmra.mrb[4].mxu1 %vm279_vm0, %v259_v28  ;;  %676 = vmatprep.mubr.msk.bf16.mxu0 %vm279_vm0, %v252_v29 }
  0x1f   : > { %692 = vmatprep.mubr.msk.bf16.mxu1 %vm279_vm0, %v260_v30 }
  0x25   : > { %677 = vmatmul.mubr.msk.bf16.gmra.mrb[8].mxu0 %vm279_vm0, %v253_v39 }
  0x26   : > { %693 = vmatmul.mubr.msk.bf16.gmra.mrb[8].mxu1 %vm279_vm0, %v261_v40  ;;  %680 = vmatprep.mubr.msk.bf16.mxu0 %vm279_vm0, %v254_v41 }
  0x27   : > { %696 = vmatprep.mubr.msk.bf16.mxu1 %vm279_vm0, %v262_v42 }
  0x2d   : > { %681 = vmatmul.mubr.msk.bf16.gmra.mrb[12].mxu0 %vm279_vm0, %v255_v47 }
  0x2e   : > { %697 = vmatmul.mubr.msk.bf16.gmra.mrb[12].mxu1 %vm279_vm0, %v263_v48 }
  0xe8   : > { %v670_v50 = vpop.f32.mrb[0].mxu0 }
  0xe9   : > { %v371_v51 = vadd.f32 %v670_v50, %v853_v49  ;;  %v686_v52 = vpop.f32.mrb[0].mxu1  ;;  %v362_v53 = vpop.f32.mrb[1].mxu0 }
  0xea   : > { %v435_v54 = vadd.f32 %v686_v52, %v853_v49  ;;  %v363_v55 = vadd.f32 %v853_v49, %v362_v53  ;;  %v426_v56 = vpop.f32.mrb[1].mxu1  ;;  %v671_v57 = vpop.f32.mrb[2].mxu0 }
  0xeb   : > { %492 = vst.msk [vmem:[%s860_s26 + $0x10] sm:$0xff] %vm489_vm1, %v371_v51  ;;  %v427_v58 = vadd.f32 %v853_v49, %v426_v56  ;;  %v374_v59 = vadd.f32 %v671_v57, %v853_v49  ;;  %v687_v60 = vpop.f32.mrb[2].mxu1  ;;  %v365_v61 = vpop.f32.mrb[3].mxu0 }
  0xec   : > { %508 = vst.msk [vmem:[%s860_s26 + $0x90] sm:$0xff] %vm489_vm1, %v435_v54  ;;  %490 = vst.msk [vmem:[%s860_s26] sm:$0xff] %vm489_vm1, %v363_v55  ;;  %v438_v62 = vadd.f32 %v687_v60, %v853_v49  ;;  %v366_v63 = vadd.f32 %v853_v49, %v365_v61  ;;  %v429_v0 = vpop.f32.mrb[3].mxu1 }
  0xed   : > { %506 = vst.msk [vmem:[%s860_s26 + $0x80] sm:$0xff] %vm489_vm1, %v427_v58  ;;  %493 = vst.msk [vmem:[%s860_s26 + $0x18] sm:$0xff] %vm489_vm1, %v374_v59  ;;  %v430_v1 = vadd.f32 %v853_v49, %v429_v0 }
  0xee   : > { %509 = vst.msk [vmem:[%s860_s26 + $0x98] sm:$0xff] %vm489_vm1, %v438_v62  ;;  %491 = vst.msk [vmem:[%s860_s26 + $0x8] sm:$0xff] %vm489_vm1, %v366_v63 }
  0xef   : > { %507 = vst.msk [vmem:[%s860_s26 + $0x88] sm:$0xff] %vm489_vm1, %v430_v1 }
  0xf0   : > { %v674_v2 = vpop.f32.mrb[4].mxu0 }
  0xf1   : > { %v387_v3 = vadd.f32 %v674_v2, %v853_v49  ;;  %v690_v4 = vpop.f32.mrb[4].mxu1  ;;  %v378_v5 = vpop.f32.mrb[5].mxu0 }
  0xf2   : > { %v451_v6 = vadd.f32 %v690_v4, %v853_v49  ;;  %v379_v7 = vadd.f32 %v853_v49, %v378_v5  ;;  %v442_v8 = vpop.f32.mrb[5].mxu1  ;;  %v675_v9 = vpop.f32.mrb[6].mxu0 }
  0xf3   : > { %496 = vst.msk [vmem:[%s860_s26 + $0x30] sm:$0xff] %vm489_vm1, %v387_v3  ;;  %v443_v10 = vadd.f32 %v853_v49, %v442_v8  ;;  %v390_v11 = vadd.f32 %v675_v9, %v853_v49  ;;  %v691_v12 = vpop.f32.mrb[6].mxu1  ;;  %v381_v13 = vpop.f32.mrb[7].mxu0 }
  0xf4   : > { %512 = vst.msk [vmem:[%s860_s26 + $0xb0] sm:$0xff] %vm489_vm1, %v451_v6  ;;  %494 = vst.msk [vmem:[%s860_s26 + $0x20] sm:$0xff] %vm489_vm1, %v379_v7  ;;  %v454_v14 = vadd.f32 %v691_v12, %v853_v49  ;;  %v382_v15 = vadd.f32 %v853_v49, %v381_v13  ;;  %v445_v16 = vpop.f32.mrb[7].mxu1 }
  0xf5   : > { %510 = vst.msk [vmem:[%s860_s26 + $0xa0] sm:$0xff] %vm489_vm1, %v443_v10  ;;  %497 = vst.msk [vmem:[%s860_s26 + $0x38] sm:$0xff] %vm489_vm1, %v390_v11  ;;  %v446_v17 = vadd.f32 %v853_v49, %v445_v16 }
  0xf6   : > { %513 = vst.msk [vmem:[%s860_s26 + $0xb8] sm:$0xff] %vm489_vm1, %v454_v14  ;;  %495 = vst.msk [vmem:[%s860_s26 + $0x28] sm:$0xff] %vm489_vm1, %v382_v15 }
  0xf7   : > { %511 = vst.msk [vmem:[%s860_s26 + $0xa8] sm:$0xff] %vm489_vm1, %v446_v17 }
  0xf8   : > { %v678_v18 = vpop.f32.mrb[8].mxu0 }
  0xf9   : > { %v403_v19 = vadd.f32 %v678_v18, %v853_v49  ;;  %v694_v20 = vpop.f32.mrb[8].mxu1  ;;  %v394_v21 = vpop.f32.mrb[9].mxu0 }
  0xfa   : > { %v467_v22 = vadd.f32 %v694_v20, %v853_v49  ;;  %v395_v23 = vadd.f32 %v853_v49, %v394_v21  ;;  %v458_v24 = vpop.f32.mrb[9].mxu1  ;;  %v679_v25 = vpop.f32.mrb[10].mxu0 }
  0xfb   : > { %500 = vst.msk [vmem:[%s860_s26 + $0x50] sm:$0xff] %vm489_vm1, %v403_v19  ;;  %v459_v26 = vadd.f32 %v853_v49, %v458_v24  ;;  %v406_v27 = vadd.f32 %v679_v25, %v853_v49  ;;  %v695_v28 = vpop.f32.mrb[10].mxu1  ;;  %v397_v29 = vpop.f32.mrb[11].mxu0 }
  0xfc   : > { %516 = vst.msk [vmem:[%s860_s26 + $0xd0] sm:$0xff] %vm489_vm1, %v467_v22  ;;  %498 = vst.msk [vmem:[%s860_s26 + $0x40] sm:$0xff] %vm489_vm1, %v395_v23  ;;  %v470_v30 = vadd.f32 %v695_v28, %v853_v49  ;;  %v398_v31 = vadd.f32 %v853_v49, %v397_v29  ;;  %v461_v32 = vpop.f32.mrb[11].mxu1 }
  0xfd   : > { %514 = vst.msk [vmem:[%s860_s26 + $0xc0] sm:$0xff] %vm489_vm1, %v459_v26  ;;  %501 = vst.msk [vmem:[%s860_s26 + $0x58] sm:$0xff] %vm489_vm1, %v406_v27  ;;  %v462_v33 = vadd.f32 %v853_v49, %v461_v32 }
  0xfe   : > { %517 = vst.msk [vmem:[%s860_s26 + $0xd8] sm:$0xff] %vm489_vm1, %v470_v30  ;;  %499 = vst.msk [vmem:[%s860_s26 + $0x48] sm:$0xff] %vm489_vm1, %v398_v31 }
  0xff   : > { %515 = vst.msk [vmem:[%s860_s26 + $0xc8] sm:$0xff] %vm489_vm1, %v462_v33 }
 0x100   : > { %v682_v34 = vpop.f32.mrb[12].mxu0 }
 0x101   : > { %v419_v35 = vadd.f32 %v682_v34, %v853_v49  ;;  %v698_v36 = vpop.f32.mrb[12].mxu1  ;;  %v410_v37 = vpop.f32.mrb[13].mxu0 }
 0x102   : > { %v483_v38 = vadd.f32 %v698_v36, %v853_v49  ;;  %v411_v39 = vadd.f32 %v853_v49, %v410_v37  ;;  %v474_v40 = vpop.f32.mrb[13].mxu1  ;;  %v683_v41 = vpop.f32.mrb[14].mxu0 }
 0x103   : > { %504 = vst.msk [vmem:[%s860_s26 + $0x70] sm:$0xff] %vm489_vm1, %v419_v35  ;;  %v475_v42 = vadd.f32 %v853_v49, %v474_v40  ;;  %v422_v43 = vadd.f32 %v683_v41, %v853_v49  ;;  %v699_v44 = vpop.f32.mrb[14].mxu1  ;;  %v413_v45 = vpop.f32.mrb[15].mxu0 }
 0x104   : > { %520 = vst.msk [vmem:[%s860_s26 + $0xf0] sm:$0xff] %vm489_vm1, %v483_v38  ;;  %502 = vst.msk [vmem:[%s860_s26 + $0x60] sm:$0xff] %vm489_vm1, %v411_v39  ;;  %v486_v46 = vadd.f32 %v699_v44, %v853_v49  ;;  %v414_v47 = vadd.f32 %v853_v49, %v413_v45  ;;  %v477_v48 = vpop.f32.mrb[15].mxu1 }
 0x105   : > { %518 = vst.msk [vmem:[%s860_s26 + $0xe0] sm:$0xff] %vm489_vm1, %v475_v42  ;;  %505 = vst.msk [vmem:[%s860_s26 + $0x78] sm:$0xff] %vm489_vm1, %v422_v43  ;;  %v478_v50 = vadd.f32 %v853_v49, %v477_v48 }
 0x106   : > { %521 = vst.msk [vmem:[%s860_s26 + $0xf8] sm:$0xff] %vm489_vm1, %v486_v46  ;;  %503 = vst.msk [vmem:[%s860_s26 + $0x68] sm:$0xff] %vm489_vm1, %v414_v47 }
 0x107   : > { %519 = vst.msk [vmem:[%s860_s26 + $0xe8] sm:$0xff] %vm489_vm1, %v478_v50 }
 0x108 PF: > { %s13_s14 = sadd.s32 1, %s749_s14   ;;  %s971_s12 = smov %s745_s13 }
 0x109   : > { %p10_p5 = scmp.ge.s32.totalorder %s13_s14, 4   ;;  %s972_s13 = smov %s974_s15 }
 0x10b   :  { %12 = sbr.rel (!%p10_p5) target bundleno = 2 (0x2), region = 62 }

// kernel: bottleneck_forward.8
= control target key start
LH: loop header
LB: loop body
LE: loop exit
PB: predicated region body
PF: predicated region fallthrough
CT: control target
= control target key end

     0   :  { %s1597_s27 = smov 0   ;;  %s1599_s28 = smov 0   ;;  %s1949_s0 = inlined_call_operand.vmem [shape: bf16[2,256,8], index: 0, kind: input, shape index: {}]   ;;  %s1950_s1 = inlined_call_operand.vmem [shape: bf16[8,32], index: 1, kind: input, shape index: {}]   ;;  %s1951_s2 = inlined_call_operand.vmem [shape: f32[1,32], index: 2, kind: input, shape index: {}]   ;;  %s1952_s3 = inlined_call_operand.vmem [shape: f32[32,2], index: 3, kind: input, shape index: {}]   ;;  %s1953_s4 = inlined_call_operand.vmem [shape: f32[1,2], index: 4, kind: input, shape index: {}]   ;;  %s1954_s5 = inlined_call_operand.vmem [shape: f32[2,32], index: 5, kind: input, shape index: {}]   ;;  %s1955_s6 = inlined_call_operand.vmem [shape: f32[1,32], index: 6, kind: input, shape index: {}]   ;;  %s1956_s7 = inlined_call_operand.vmem [shape: f32[2,256,32], index: 7, kind: output, shape index: {0}]   ;;  %s1957_s8 = inlined_call_operand.vmem [shape: f32[2,1,32], index: 8, kind: output, shape index: {1}]  }
   0x1   :  { %s1601_s29 = smov 0  }
   0x2 LB: > { %s31_s30 = sadd.s32 1, %s1542_s28  ;;  %p1310_p0 = scmp.ge.s32.totalorder %s1546_s29, 1  ;;  %s1546_s29 = sphi %s1601_s29, %s19_s29   ;;  %s1542_s28 = sphi %s1599_s28, %s1959_s28   ;;  %s1538_s27 = sphi %s1597_s27, %s1958_s27  }
   0x3   : > { %p33_p1 = scmp.ge.s32.totalorder %s31_s30, 2  ;;  %p286_p2 = scmp.lt.s32.totalorder %s1546_s29, 3 }
   0x5   : > { %s1961_s30 = smov (%p33_p1, %s31_s30), 0  ;;  %p287_p3 = pnand %p1310_p0, %p286_p2 }
   0x6   : > { %v394_v0 = vld [vmem:[%s1950_s1] sm:$0xf] (!%p287_p3)  ;;  %vm531_vm0 = vcmask (!%p287_p3), 1043456   ;;  %p332_p4 = scmp.lt.s32.totalorder (!%p287_p3), %s1538_s27, 1  ;;  %vm482_vm1 = vcmask (!%p287_p3), 64512   ;;  %vm359_vm2 = vcmask (!%p287_p3), 253952  }
   0x7   : > { %290 = sbr.rel (%p287_p3) target bundleno = 1004 (0x3ec), region = 48  ;;  %1474 = vmatprep.subr.msk.bf16.mxu0 (!%p287_p3), %vm531_vm0, %v394_v0  ;;  %v533_v1 = vsel (!%p287_p3), %vm531_vm0, %v394_v0, 0  ;;  %1475 = vmatprep.subr.msk.bf16.mxu1 (!%p287_p3), %vm531_vm0, %v394_v0  ;;  %v1548_v18 = vmov (!%p287_p3), -inf   ;;  %v1549_v19 = vmov (!%p287_p3), 0.0   ;;  %v879_v20 = vld [vmem:[%s1952_s3] sm:$0xff] (!%p287_p3)  ;;  %v880_v21 = vld [vmem:[%s1952_s3 + $0x8] sm:$0xff] (!%p287_p3) }
   0x8   : > { %1391 = vmatpush3.bf16.msra.mxu0 (!%p287_p3), %v533_v1  ;;  %1469 = vmatpush3.bf16.msra.mxu1 (!%p287_p3), %v533_v1  ;;  %361 = vst.msk [vmem:[#allocation3] sm:$0x1] (!%p287_p3), %vm359_vm2, %v1548_v18  ;;  %360 = vst.msk [vmem:[#allocation2] sm:$0x1] (!%p287_p3), %vm359_vm2, %v1549_v19  ;;  %v881_v22 = vld [vmem:[%s1952_s3 + $0x10] sm:$0xff] (!%p287_p3)  ;;  %v1550_v23 = vmov (!%p287_p3), 0.0|0.0   ;;  %v1671_v24 = vpack.c.bf16 (!%p287_p3), %v880_v21, %v879_v20 }
   0x9   : > { %1456 = vmatprep.subr.bf16.mxu1 (!%p287_p3), %v1550_v23  ;;  %v882_v25 = vld [vmem:[%s1952_s3 + $0x18] sm:$0xff] (!%p287_p3)  ;;  %vm1551_vm3 = vmmov (!%p287_p3), 0   ;;  %v1688_v27 = vld [vmem:[%s1951_s2] ss:$0 sm:$0xff] (!%p287_p3)  ;;  %vm696_vm4 = vcmask (!%p287_p3), 261120   ;;  %vm964_vm5 = vcmask (!%p287_p3), 1041408  }
   0xa   : > { %v1677_v26 = vpack.c.bf16 (!%p287_p3), %v882_v25, %v881_v22  ;;  %vm960_vm6 = vcmask (!%p287_p3), 15360  }
   0xe   : > { %s1963_s27 = smov (!%p332_p4, %s1538_s27), 1 }
   0xf   : > { %s1357_s11 = sshll.u32 %s1963_s27, 7  ;;  %s1358_s23 = sshll.u32 %s1963_s27, 8 }
  0x10   : > { %s1624_s14 = scalar_lea.vmem %s1949_s0, %s1357_s11  ;;  %s1693_s10 = scalar_lea.vmem %s1956_s7, %s1358_s23 }
  0x11   : > { %v1504_v2 = vld [vmem:[%s1624_s14] sm:$0xff]   ;;  %v1505_v3 = vld [vmem:[%s1624_s14 + $0x8] sm:$0xff]   ;;  %v1506_v4 = vld [vmem:[%s1624_s14 + $0x10] sm:$0xff]   ;;  %s353_s19 = scalar_lea.vmem %s1957_s8, %s1963_s27 }
  0x12   : > { %1392 = vmatprep.mubr.msk.bf16.mxu0 %vm482_vm1, %v1504_v2  ;;  %v1507_v5 = vld [vmem:[%s1624_s14 + $0x18] sm:$0xff]   ;;  %v1508_v6 = vld [vmem:[%s1624_s14 + $0x20] sm:$0xff]   ;;  %v1515_v8 = vld [vmem:[%s1624_s14 + $0x68] sm:$0xff]  }
  0x13   : > { %1393 = vmatmul.mubr.msk.bf16.vlgmr.msra.gmra.mrb[0].mxu0 %vm482_vm1, %v1505_v3  ;;  %v1514_v7 = vld [vmem:[%s1624_s14 + $0x60] sm:$0xff]   ;;  %v1518_v9 = vld [vmem:[%s1624_s14 + $0x70] sm:$0xff]   ;;  %v1509_v10 = vld [vmem:[%s1624_s14 + $0x28] sm:$0xff]  }
  0x14   : > { %1396 = vmatprep.mubr.msk.bf16.mxu0 %vm482_vm1, %v1506_v4  ;;  %1416 = vmatprep.mubr.msk.bf16.mxu1 %vm482_vm1, %v1514_v7  ;;  %v1510_v11 = vld [vmem:[%s1624_s14 + $0x30] sm:$0xff]   ;;  %v1519_v12 = vld [vmem:[%s1624_s14 + $0x78] sm:$0xff]   ;;  %v1512_v14 = vld [vmem:[%s1624_s14 + $0x40] sm:$0xff]  }
  0x15   : > { %1417 = vmatmul.mubr.msk.bf16.vlgmr.msra.gmra.mrb[0].mxu1 %vm482_vm1, %v1515_v8  ;;  %v1511_v13 = vld [vmem:[%s1624_s14 + $0x38] sm:$0xff]   ;;  %v1513_v15 = vld [vmem:[%s1624_s14 + $0x48] sm:$0xff]   ;;  %v1516_v16 = vld [vmem:[%s1624_s14 + $0x50] sm:$0xff]  }
  0x16   : > { %1420 = vmatprep.mubr.msk.bf16.mxu1 %vm482_vm1, %v1518_v9  ;;  %v1517_v17 = vld [vmem:[%s1624_s14 + $0x58] sm:$0xff]   ;;  %1458 = vmatpush3.bf16.msra.mxu1 %v1671_v24 }
  0x17   : > { %1459 = vmatprep.subr.bf16.mxu1 %v1550_v23 }
  0x1a   : > { %1461 = vmatpush3.bf16.msra.mxu1 %v1677_v26 }
  0x1b   : > { %1397 = vmatmul.mubr.msk.bf16.gmra.mrb[4].mxu0 %vm482_vm1, %v1507_v5  ;;  %1435 = vmatprep.subr.mxu1 %v1549_v19 }
  0x1c   : > { %1400 = vmatprep.mubr.msk.bf16.mxu0 %vm482_vm1, %v1508_v6 }
  0x1d   : > { %1421 = vmatmul.mubr.msk.bf16.gmra.mrb[4].mxu1 %vm482_vm1, %v1519_v12 }
  0x1e   : > { %1432 = vmatprep.mubr.msk.f32.mxu1 %vm1551_vm3, %v1549_v19 }
  0x23   : > { %1401 = vmatmul.mubr.msk.bf16.gmra.mrb[8].mxu0 %vm482_vm1, %v1509_v10 }
  0x24   : > { %1404 = vmatprep.mubr.msk.bf16.mxu0 %vm482_vm1, %v1510_v11 }
  0x2b   : > { %1405 = vmatmul.mubr.msk.bf16.gmra.mrb[12].mxu0 %vm482_vm1, %v1511_v13 }
  0x2c   : > { %1408 = vmatprep.mubr.msk.bf16.mxu0 %vm482_vm1, %v1512_v14 }
  0x33   : > { %1409 = vmatmul.mubr.msk.bf16.gmra.mrb[16].mxu0 %vm482_vm1, %v1513_v15 }
  0x34   : > { %1412 = vmatprep.mubr.msk.bf16.mxu0 %vm482_vm1, %v1516_v16 }
  0x3b   : > { %1413 = vmatmul.mubr.msk.bf16.gmra.mrb[20].mxu0 %vm482_vm1, %v1517_v17 }
  0xe6   : > { %v1394_v28 = vpop.f32.mrb[0].mxu0 }
  0xe7   : > { %v578_v29 = vadd.f32 %v1394_v28, %v1688_v27  ;;  %v569_v30 = vpop.f32.mrb[1].mxu0 }
  0xe8   : > { %v570_v31 = vadd.f32 %v1688_v27, %v569_v30  ;;  %v1395_v32 = vpop.f32.mrb[2].mxu0  ;;  %v1418_v49 = vpop.f32.mrb[0].mxu1 }
  0xe9   : > { %699 = vst.msk [vmem:[%s1693_s10 + $0x10] sm:$0xff] %vm696_vm4, %v578_v29  ;;  %v581_v33 = vadd.f32 %v1395_v32, %v1688_v27  ;;  %v572_v34 = vpop.f32.mrb[3].mxu0  ;;  %v733_v39 = vsel %vm696_vm4, %v578_v29, 0.0  ;;  %v805_v44 = vsel %vm696_vm4, %v578_v29, -inf  ;;  %v665_v55 = vpop.f32.mrb[1].mxu1  ;;  %v1734_v5 = vadd.f32 %v1418_v49, %v1688_v27 }
  0xea   : > { %697 = vst.msk [vmem:[%s1693_s10] sm:$0xff] %vm696_vm4, %v570_v31  ;;  %v573_v35 = vadd.f32 %v1688_v27, %v572_v34  ;;  %v730_v36 = vsel %vm696_vm4, %v570_v31, 0.0  ;;  %v803_v45 = vsel %vm696_vm4, %v570_v31, -inf  ;;  %v1419_v60 = vpop.f32.mrb[2].mxu1  ;;  %v1737_v8 = vadd.f32 %v1688_v27, %v665_v55 }
  0xeb   : > { %700 = vst.msk [vmem:[%s1693_s10 + $0x18] sm:$0xff] %vm696_vm4, %v581_v33  ;;  %v735_v46 = vsel %vm696_vm4, %v581_v33, 0.0  ;;  %v806_v50 = vsel %vm696_vm4, %v581_v33, -inf  ;;  %v668_v1 = vpop.f32.mrb[3].mxu1  ;;  %v1740_v9 = vadd.f32 %v1419_v60, %v1688_v27  ;;  %723 = vst.msk [vmem:[%s1693_s10 + $0xd0] sm:$0xff] %vm696_vm4, %v1734_v5 }
  0xec   : > { %698 = vst.msk [vmem:[%s1693_s10 + $0x8] sm:$0xff] %vm696_vm4, %v573_v35  ;;  %v731_v37 = vsel %vm696_vm4, %v573_v35, 0.0  ;;  %v804_v61 = vsel %vm696_vm4, %v573_v35, -inf  ;;  %v1747_v12 = vadd.f32 %v1688_v27, %v668_v1  ;;  %721 = vst.msk [vmem:[%s1693_s10 + $0xc0] sm:$0xff] %vm696_vm4, %v1737_v8 }
  0xed   : > { %v732_v38 = vadd.f32 %v731_v37, %v730_v36  ;;  %724 = vst.msk [vmem:[%s1693_s10 + $0xd8] sm:$0xff] %vm696_vm4, %v1740_v9 }
  0xee   : > { %v1398_v40 = vpop.f32.mrb[4].mxu0  ;;  %722 = vst.msk [vmem:[%s1693_s10 + $0xc8] sm:$0xff] %vm696_vm4, %v1747_v12 }
  0xef   : > { %v734_v41 = vadd.f32 %v733_v39, %v732_v38  ;;  %v594_v42 = vadd.f32 %v1398_v40, %v1688_v27  ;;  %v585_v43 = vpop.f32.mrb[5].mxu0 }
  0xf0   : > { %v586_v47 = vadd.f32 %v1688_v27, %v585_v43  ;;  %v1399_v48 = vpop.f32.mrb[6].mxu0  ;;  %v1422_v20 = vpop.f32.mrb[4].mxu1 }
  0xf1   : > { %703 = vst.msk [vmem:[%s1693_s10 + $0x30] sm:$0xff] %vm696_vm4, %v594_v42  ;;  %v811_v51 = vsel %vm696_vm4, %v594_v42, -inf  ;;  %v736_v52 = vadd.f32 %v735_v46, %v734_v41  ;;  %v597_v53 = vadd.f32 %v1399_v48, %v1688_v27  ;;  %v588_v54 = vpop.f32.mrb[7].mxu0  ;;  %v741_v10 = vsel %vm696_vm4, %v594_v42, 0.0  ;;  %v681_v29 = vpop.f32.mrb[5].mxu1 }
  0xf2   : > { %v812_v56 = vmax.f32 %v805_v44, %v811_v51  ;;  %701 = vst.msk [vmem:[%s1693_s10 + $0x20] sm:$0xff] %vm696_vm4, %v586_v47  ;;  %v737_v57 = vsel %vm696_vm4, %v586_v47, 0.0  ;;  %v807_v58 = vsel %vm696_vm4, %v586_v47, -inf  ;;  %v589_v59 = vadd.f32 %v1688_v27, %v588_v54  ;;  %v1423_v34 = vpop.f32.mrb[6].mxu1 }
  0xf3   : > { %v738_v62 = vadd.f32 %v737_v57, %v736_v52  ;;  %v808_v63 = vmax.f32 %v803_v45, %v807_v58  ;;  %704 = vst.msk [vmem:[%s1693_s10 + $0x38] sm:$0xff] %vm696_vm4, %v597_v53  ;;  %v813_v0 = vsel %vm696_vm4, %v597_v53, -inf  ;;  %v743_v16 = vsel %vm696_vm4, %v597_v53, 0.0  ;;  %v684_v38 = vpop.f32.mrb[7].mxu1 }
  0xf4   : > { %v814_v2 = vmax.f32 %v806_v50, %v813_v0  ;;  %702 = vst.msk [vmem:[%s1693_s10 + $0x28] sm:$0xff] %vm696_vm4, %v589_v59  ;;  %v739_v3 = vsel %vm696_vm4, %v589_v59, 0.0  ;;  %v809_v4 = vsel %vm696_vm4, %v589_v59, -inf  ;;  %v1786_v44 = vadd.f32 %v1422_v20, %v1688_v27 }
  0xf5   : > { %v740_v6 = vadd.f32 %v739_v3, %v738_v62  ;;  %v810_v7 = vmax.f32 %v804_v61, %v809_v4  ;;  %v1789_v45 = vadd.f32 %v1688_v27, %v681_v29  ;;  %v1793_v48 = vadd.f32 %v1423_v34, %v1688_v27 }
  0xf6   : > { %v1402_v11 = vpop.f32.mrb[8].mxu0  ;;  %v1796_v49 = vadd.f32 %v1688_v27, %v684_v38  ;;  %727 = vst.msk [vmem:[%s1693_s10 + $0xf0] sm:$0xff] %vm696_vm4, %v1786_v44 }
  0xf7   : > { %v742_v13 = vadd.f32 %v741_v10, %v740_v6  ;;  %v610_v14 = vadd.f32 %v1402_v11, %v1688_v27  ;;  %v601_v15 = vpop.f32.mrb[9].mxu0  ;;  %725 = vst.msk [vmem:[%s1693_s10 + $0xe0] sm:$0xff] %vm696_vm4, %v1789_v45  ;;  %728 = vst.msk [vmem:[%s1693_s10 + $0xf8] sm:$0xff] %vm696_vm4, %v1793_v48 }
  0xf8   : > { %v602_v17 = vadd.f32 %v1688_v27, %v601_v15  ;;  %v1403_v18 = vpop.f32.mrb[10].mxu0  ;;  %726 = vst.msk [vmem:[%s1693_s10 + $0xe8] sm:$0xff] %vm696_vm4, %v1796_v49 }
  0xf9   : > { %707 = vst.msk [vmem:[%s1693_s10 + $0x50] sm:$0xff] %vm696_vm4, %v610_v14  ;;  %v819_v21 = vsel %vm696_vm4, %v610_v14, -inf  ;;  %v744_v22 = vadd.f32 %v743_v16, %v742_v13  ;;  %v613_v25 = vadd.f32 %v1403_v18, %v1688_v27  ;;  %v604_v28 = vpop.f32.mrb[11].mxu0  ;;  %v749_v46 = vsel %vm696_vm4, %v610_v14, 0.0 }
  0xfa   : > { %v1765_v30 = vmax.f32 %v812_v56, %v819_v21  ;;  %705 = vst.msk [vmem:[%s1693_s10 + $0x40] sm:$0xff] %vm696_vm4, %v602_v17  ;;  %v745_v31 = vsel %vm696_vm4, %v602_v17, 0.0  ;;  %v815_v32 = vsel %vm696_vm4, %v602_v17, -inf  ;;  %v605_v33 = vadd.f32 %v1688_v27, %v604_v28 }
  0xfb   : > { %v746_v35 = vadd.f32 %v745_v31, %v744_v22  ;;  %v1772_v36 = vmax.f32 %v808_v63, %v815_v32  ;;  %708 = vst.msk [vmem:[%s1693_s10 + $0x58] sm:$0xff] %vm696_vm4, %v613_v25  ;;  %v821_v37 = vsel %vm696_vm4, %v613_v25, -inf  ;;  %v751_v53 = vsel %vm696_vm4, %v613_v25, 0.0 }
  0xfc   : > { %v1777_v39 = vmax.f32 %v814_v2, %v821_v37  ;;  %706 = vst.msk [vmem:[%s1693_s10 + $0x48] sm:$0xff] %vm696_vm4, %v605_v33  ;;  %v747_v40 = vsel %vm696_vm4, %v605_v33, 0.0  ;;  %v817_v41 = vsel %vm696_vm4, %v605_v33, -inf }
  0xfd   : > { %v748_v42 = vadd.f32 %v747_v40, %v746_v35  ;;  %v1783_v43 = vmax.f32 %v810_v7, %v817_v41 }
  0xfe   : > { %v1406_v47 = vpop.f32.mrb[12].mxu0 }
  0xff   : > { %v750_v50 = vadd.f32 %v749_v46, %v748_v42  ;;  %v626_v51 = vadd.f32 %v1406_v47, %v1688_v27  ;;  %v617_v52 = vpop.f32.mrb[13].mxu0  ;;  %v851_v47 = vsel %vm696_vm4, %v1734_v5, -inf }
 0x100   : > { %v618_v54 = vadd.f32 %v1688_v27, %v617_v52  ;;  %v1407_v55 = vpop.f32.mrb[14].mxu0 }
 0x101   : > { %711 = vst.msk [vmem:[%s1693_s10 + $0x70] sm:$0xff] %vm696_vm4, %v626_v51  ;;  %v827_v56 = vsel %vm696_vm4, %v626_v51, -inf  ;;  %v752_v57 = vadd.f32 %v751_v53, %v750_v50  ;;  %v629_v58 = vadd.f32 %v1407_v55, %v1688_v27  ;;  %v620_v59 = vpop.f32.mrb[15].mxu0  ;;  %v757_v11 = vsel %vm696_vm4, %v626_v51, 0.0 }
 0x102   : > { %v828_v60 = vmax.f32 %v1765_v30, %v827_v56  ;;  %709 = vst.msk [vmem:[%s1693_s10 + $0x60] sm:$0xff] %vm696_vm4, %v618_v54  ;;  %v753_v61 = vsel %vm696_vm4, %v618_v54, 0.0  ;;  %v823_v62 = vsel %vm696_vm4, %v618_v54, -inf  ;;  %v621_v63 = vadd.f32 %v1688_v27, %v620_v59 }
 0x103   : > { %v754_v0 = vadd.f32 %v753_v61, %v752_v57  ;;  %v824_v1 = vmax.f32 %v1772_v36, %v823_v62  ;;  %712 = vst.msk [vmem:[%s1693_s10 + $0x78] sm:$0xff] %vm696_vm4, %v629_v58  ;;  %v829_v2 = vsel %vm696_vm4, %v629_v58, -inf  ;;  %v759_v17 = vsel %vm696_vm4, %v629_v58, 0.0 }
 0x104   : > { %v830_v3 = vmax.f32 %v1777_v39, %v829_v2  ;;  %710 = vst.msk [vmem:[%s1693_s10 + $0x68] sm:$0xff] %vm696_vm4, %v621_v63  ;;  %v755_v4 = vsel %vm696_vm4, %v621_v63, 0.0  ;;  %v825_v6 = vsel %vm696_vm4, %v621_v63, -inf  ;;  %v847_v51 = vsel %vm696_vm4, %v1737_v8, -inf }
 0x105   : > { %v756_v7 = vadd.f32 %v755_v4, %v754_v0  ;;  %v826_v10 = vmax.f32 %v1783_v43, %v825_v6  ;;  %v853_v55 = vsel %vm696_vm4, %v1740_v9, -inf  ;;  %v849_v56 = vsel %vm696_vm4, %v1747_v12, -inf }
 0x106   : > { %v1410_v13 = vpop.f32.mrb[16].mxu0  ;;  %v859_v61 = vsel %vm696_vm4, %v1786_v44, -inf  ;;  %v855_v6 = vsel %vm696_vm4, %v1789_v45, -inf }
 0x107   : > { %v758_v14 = vadd.f32 %v757_v11, %v756_v7  ;;  %v642_v15 = vadd.f32 %v1410_v13, %v1688_v27  ;;  %v633_v16 = vpop.f32.mrb[17].mxu0 }
 0x108   : > { %v634_v18 = vadd.f32 %v1688_v27, %v633_v16  ;;  %v1411_v20 = vpop.f32.mrb[18].mxu0  ;;  %v861_v16 = vsel %vm696_vm4, %v1793_v48, -inf }
 0x109   : > { %715 = vst.msk [vmem:[%s1693_s10 + $0x90] sm:$0xff] %vm696_vm4, %v642_v15  ;;  %v835_v21 = vsel %vm696_vm4, %v642_v15, -inf  ;;  %v760_v22 = vadd.f32 %v759_v17, %v758_v14  ;;  %v645_v25 = vadd.f32 %v1411_v20, %v1688_v27  ;;  %v636_v28 = vpop.f32.mrb[19].mxu0  ;;  %v765_v41 = vsel %vm696_vm4, %v642_v15, 0.0 }
 0x10a   : > { %v836_v29 = vmax.f32 %v828_v60, %v835_v21  ;;  %713 = vst.msk [vmem:[%s1693_s10 + $0x80] sm:$0xff] %vm696_vm4, %v634_v18  ;;  %v761_v30 = vsel %vm696_vm4, %v634_v18, 0.0  ;;  %v831_v31 = vsel %vm696_vm4, %v634_v18, -inf  ;;  %v637_v32 = vadd.f32 %v1688_v27, %v636_v28 }
 0x10b   : > { %v762_v33 = vadd.f32 %v761_v30, %v760_v22  ;;  %v832_v34 = vmax.f32 %v824_v1, %v831_v31  ;;  %716 = vst.msk [vmem:[%s1693_s10 + $0x98] sm:$0xff] %vm696_vm4, %v645_v25  ;;  %v837_v35 = vsel %vm696_vm4, %v645_v25, -inf  ;;  %v767_v52 = vsel %vm696_vm4, %v645_v25, 0.0 }
 0x10c   : > { %v838_v36 = vmax.f32 %v830_v3, %v837_v35  ;;  %714 = vst.msk [vmem:[%s1693_s10 + $0x88] sm:$0xff] %vm696_vm4, %v637_v32  ;;  %v763_v37 = vsel %vm696_vm4, %v637_v32, 0.0  ;;  %v833_v38 = vsel %vm696_vm4, %v637_v32, -inf  ;;  %v857_v21 = vsel %vm696_vm4, %v1796_v49, -inf }
 0x10d   : > { %v764_v39 = vadd.f32 %v763_v37, %v762_v33  ;;  %v834_v40 = vmax.f32 %v826_v10, %v833_v38  ;;  %v779_v37 = vsel %vm696_vm4, %v1747_v12, 0.0  ;;  %v787_v12 = vsel %vm696_vm4, %v1796_v49, 0.0 }
 0x10e   : > { %v1414_v42 = vpop.f32.mrb[20].mxu0 }
 0x10f   : > { %v766_v43 = vadd.f32 %v765_v41, %v764_v39  ;;  %v658_v46 = vadd.f32 %v1414_v42, %v1688_v27  ;;  %v649_v50 = vpop.f32.mrb[21].mxu0 }
 0x110   : > { %v650_v53 = vadd.f32 %v1688_v27, %v649_v50  ;;  %v1415_v54 = vpop.f32.mrb[22].mxu0 }
 0x111   : > { %719 = vst.msk [vmem:[%s1693_s10 + $0xb0] sm:$0xff] %vm696_vm4, %v658_v46  ;;  %v843_v57 = vsel %vm696_vm4, %v658_v46, -inf  ;;  %v768_v58 = vadd.f32 %v767_v52, %v766_v43  ;;  %v661_v59 = vadd.f32 %v1415_v54, %v1688_v27  ;;  %v652_v60 = vpop.f32.mrb[23].mxu0  ;;  %v773_v17 = vsel %vm696_vm4, %v658_v46, 0.0 }
 0x112   : > { %v844_v62 = vmax.f32 %v836_v29, %v843_v57  ;;  %717 = vst.msk [vmem:[%s1693_s10 + $0xa0] sm:$0xff] %vm696_vm4, %v650_v53  ;;  %v769_v63 = vsel %vm696_vm4, %v650_v53, 0.0  ;;  %v839_v0 = vsel %vm696_vm4, %v650_v53, -inf  ;;  %v653_v1 = vadd.f32 %v1688_v27, %v652_v60 }
 0x113   : > { %v770_v2 = vadd.f32 %v769_v63, %v768_v58  ;;  %v840_v3 = vmax.f32 %v832_v34, %v839_v0  ;;  %720 = vst.msk [vmem:[%s1693_s10 + $0xb8] sm:$0xff] %vm696_vm4, %v661_v59  ;;  %v845_v4 = vsel %vm696_vm4, %v661_v59, -inf  ;;  %v777_v29 = vsel %vm696_vm4, %v1737_v8, 0.0  ;;  %v729_v63 = vld [vmem:[#allocation2] sm:$0x1] }
 0x114   : > { %v852_v7 = vmax.f32 %v844_v62, %v851_v47  ;;  %v846_v10 = vmax.f32 %v838_v36, %v845_v4  ;;  %718 = vst.msk [vmem:[%s1693_s10 + $0xa8] sm:$0xff] %vm696_vm4, %v653_v1  ;;  %v771_v11 = vsel %vm696_vm4, %v653_v1, 0.0  ;;  %v841_v13 = vsel %vm696_vm4, %v653_v1, -inf }
 0x115   : > { %v848_v14 = vmax.f32 %v840_v3, %v847_v51  ;;  %v772_v15 = vadd.f32 %v771_v11, %v770_v2  ;;  %v842_v27 = vmax.f32 %v834_v40, %v841_v13  ;;  %v775_v30 = vsel %vm696_vm4, %v661_v59, 0.0  ;;  %v883_v3 = vld [vmem:[%s1953_s4] sm:$0x1] }
 0x116   : > { %v854_v18 = vmax.f32 %v846_v10, %v853_v55  ;;  %v860_v20 = vmax.f32 %v852_v7, %v859_v61  ;;  %v781_v40 = vsel %vm696_vm4, %v1734_v5, 0.0  ;;  %v783_v8 = vsel %vm696_vm4, %v1740_v9, 0.0 }
 0x117   : > { %v774_v22 = vadd.f32 %v773_v17, %v772_v15  ;;  %v850_v25 = vmax.f32 %v842_v27, %v849_v56  ;;  %v856_v28 = vmax.f32 %v848_v14, %v855_v6  ;;  %v785_v43 = vsel %vm696_vm4, %v1789_v45, 0.0  ;;  %v802_v56 = vld [vmem:[#allocation3] sm:$0x1] }
 0x118   : > { %v862_v31 = vmax.f32 %v854_v18, %v861_v16  ;;  %v789_v5 = vsel %vm696_vm4, %v1786_v44, 0.0  ;;  %v791_v9 = vsel %vm696_vm4, %v1793_v48, 0.0  ;;  %v958_v48 = vld [vmem:[%s1954_s5] sm:$0x3] }
 0x119   : > { %v776_v32 = vadd.f32 %v775_v30, %v774_v22  ;;  %v858_v33 = vmax.f32 %v850_v25, %v857_v21 }
 0x11a   : > { %v864_v34 = vmax.f32 %v860_v20, %v862_v31 }
 0x11b   : > { %v778_v35 = vadd.f32 %v777_v29, %v776_v32  ;;  %v863_v36 = vmax.f32 %v856_v28, %v858_v33 }
 0x11d   : > { %v780_v38 = vadd.f32 %v779_v37, %v778_v35  ;;  %v865_v39 = vmax.f32 %v863_v36, %v864_v34 }
 0x11f   : > { %v782_v41 = vadd.f32 %v781_v40, %v780_v38  ;;  %v866_v42 = vrot.slane %v865_v39, 4 }
 0x121   : > { %v784_v46 = vadd.f32 %v783_v8, %v782_v41  ;;  %v867_v47 = vmax.f32 %v865_v39, %v866_v42 }
 0x123   : > { %v786_v50 = vadd.f32 %v785_v43, %v784_v46  ;;  %v868_v51 = vrot.slane %v867_v47, 2 }
 0x125   : > { %v788_v52 = vadd.f32 %v787_v12, %v786_v50  ;;  %v869_v53 = vmax.f32 %v867_v47, %v868_v51 }
 0x127   : > { %v790_v54 = vadd.f32 %v789_v5, %v788_v52  ;;  %v870_v55 = vrot.slane %v869_v53, 1 }
 0x129   : > { %v792_v57 = vadd.f32 %v791_v9, %v790_v54  ;;  %v871_v45 = vmax.f32 %v869_v53, %v870_v55 }
 0x12b   : > { %v793_v58 = vrot.slane %v792_v57, 4  ;;  %v872_v59 = vmax.f32 %v802_v56, %v871_v45 }
 0x12d   : > { %v794_v60 = vadd.f32 %v793_v58, %v792_v57  ;;  %873 = vst.msk [vmem:[#allocation3] sm:$0x1] %vm359_vm2, %v872_v59 }
 0x12f   : > { %v795_v61 = vrot.slane %v794_v60, 2 }
 0x131   : > { %v796_v49 = vadd.f32 %v795_v61, %v794_v60 }
 0x133   : > { %v797_v62 = vrot.slane %v796_v49, 1 }
 0x134   : > { %v1038_v11 = vld [vmem:[#allocation3] sm:$0x1] }
 0x135   : > { %v798_v0 = vadd.f32 %v797_v62, %v796_v49 }
 0x137   : > { %v799_v1 = vadd.f32 %v798_v0, %v729_v63 }
 0x139   : > { %801 = vst.msk [vmem:[#allocation2] sm:$0x1] %vm359_vm2, %v799_v1 }
 0x140   : > { %v877_v44 = vld [vmem:[#allocation2] sm:$0x1] }
 0x141   : > { %v878_v2 = vmul.f32 0.00390625, %v877_v44 }
 0x143   : > { %1433 = vmatmul.mubr.msk.f32.vlgmr.msra.gmra.mrb[8].mxu1 %vm696_vm4, %v878_v2 }
 0x144   : > { %1437 = vmatprep.mubr.msk.f32.mxu1 %vm1551_vm3, %v1549_v19  ;;  %1436 = vmatpush3.msk.msra.mxu1 %vm964_vm5, %v958_v48 }
 0x145   : > { %1462 = vmatprep.subr.bf16.mxu1 %v1550_v23 }
 0x216   : > { %v953_v4 = vpop.f32.mrb[8].mxu1 }
 0x217   : > { %v954_v6 = vadd.f32 %v953_v4, %v883_v3  ;;  %v1434_v7 = vpop.f32.mrb[9].mxu1 }
 0x219   : > { %v957_v10 = vmax.f32 %v954_v6, 0.0 }
 0x21b   : > { %1438 = vmatmul.mubr.msk.f32.vlgmr.msra.gmra.mrb[10].mxu1 %vm960_vm6, %v957_v10 }
 0x21c   : > { %1464 = vmatpush3.bf16.msra.mxu1 %v1671_v24  ;;  %1448 = vmatprep.mubr.msk.f32.mxu1 %vm1551_vm3, %v1549_v19 }
 0x21d   : > { %1465 = vmatprep.subr.bf16.mxu1 %v1550_v23  ;;  %v959_v23 = vld [vmem:[%s1955_s6] sm:$0x1] }
 0x220   : > { %1467 = vmatpush3.bf16.msra.mxu1 %v1677_v26  ;;  %v1470_v26 = vadd.f32 %v959_v23, %v959_v23 }
 0x221   : > { %1451 = vmatprep.subr.mxu1 %v1549_v19 }
 0x223   : > { %1449 = vmatmul.mubr.msk.f32.vlgmr.msra.gmra.mrb[12].mxu1 %vm696_vm4, %v1038_v11 }
 0x224   : > { %1452 = vmatpush3.msk.msra.mxu1 %vm964_vm5, %v958_v48  ;;  %1453 = vmatprep.mubr.msk.f32.mxu1 %vm1551_vm3, %v1549_v19 }
 0x2f6   : > { %v1108_v13 = vpop.f32.mrb[12].mxu1 }
 0x2f7   : > { %v1109_v24 = vadd.f32 %v1108_v13, %v883_v3  ;;  %v1450_v14 = vpop.f32.mrb[13].mxu1 }
 0x2f9   : > { %v1112_v15 = vmax.f32 %v1109_v24, 0.0 }
 0x2fb   : > { %1454 = vmatmul.mubr.msk.f32.vlgmr.msra.gmra.mrb[10].mxu1 %vm960_vm6, %v1112_v15 }
 0x3ce   : > { %v1182_v27 = vpop.f32.mrb[10].mxu1 }
 0x3cf   : > { %v1471_v16 = vadd.f32 %v1470_v26, %v1182_v27  ;;  %v1455_v17 = vpop.f32.mrb[11].mxu1 }
 0x3d1   : > { %v1354_v18 = vmul.f32 -1.442695, %v1471_v16 }
 0x3d3   : > { %1520 = vpow2.f32 %v1354_v18 }
 0x3dd   : > { %v1521_v20 = vpop.eup %1520 }
 0x3de   : > { %v1190_v21 = vadd.f32 1.0, %v1521_v20 }
 0x3e0   : > { %1522 = vrcp.f32 %v1190_v21 }
 0x3ea   : > { %v1523_v19 = vpop.eup %1522 }
 0x3eb   : > { %1193 = vst.msk [vmem:[%s353_s19] sm:$0x1] %vm359_vm2, %v1523_v19 }
 0x3ec PF: > { %s19_s29 = sadd.s32 1, %s1546_s29   ;;  %s1958_s27 = smov %s1542_s28 }
 0x3ed   : > { %p16_p5 = scmp.ge.s32.totalorder %s19_s29, 4   ;;  %s1959_s28 = smov %s1961_s30 }
 0x3ef   :  { %18 = sbr.rel (!%p16_p5) target bundleno = 2 (0x2), region = 98 }

// kernel: bottleneck_forward.6
= control target key start
LH: loop header
LB: loop body
LE: loop exit
PB: predicated region body
PF: predicated region fallthrough
CT: control target
= control target key end

     0   :  { %s3643_s12 = smov 0   ;;  %s4500_s0 = inlined_call_operand.vmem [shape: bf16[2,16,16,8], index: 0, kind: input, shape index: {}]   ;;  %s4501_s1 = inlined_call_operand.vmem [shape: bf16[72,8], index: 1, kind: input, shape index: {}]   ;;  %s4502_s2 = inlined_call_operand.vmem [shape: f32[1,8], index: 2, kind: input, shape index: {}]   ;;  %s4503_s3 = inlined_call_operand.vmem [shape: bf16[2,256,8], index: 3, kind: output, shape index: {}]  }
   0x1 LB: > { %s3044_s13 = sadd.s32 4294967295, %s3612_s12   ;;  %p3048_p0 = scmp.ge.s32.totalorder %s3612_s12, 1  ;;  %s3612_s12 = sphi %s3643_s12, %s13_s12  }
   0x2   : > { %p137_p1 = scmp.lt.s32.totalorder %s3612_s12, 3 }
   0x4   : > { %p138_p2 = pnand %p3048_p0, %p137_p1 }
   0x5   : > { %p3651_p3 = scmp.lt.s32.totalorder (!%p138_p2), %s3044_s13, 1  ;;  %vm172_vm0 = vcmask (!%p138_p2), 588800   ;;  %v3614_v0 = vmov (!%p138_p2), 0   ;;  %s3615_s19 = smov (!%p138_p2), 8   ;;  %vm415_vm1 = vcmask (!%p138_p2), 64512   ;;  %vm613_vm4 = vcmask (!%p138_p2), 130112  }
   0x6   : > { %141 = sbr.rel (%p138_p2) target bundleno = 599 (0x257), region = 32  ;;  %182 = vst.msk [vmem:[#allocation2 + $0x48] sm:$0xff] (!%p138_p2), %vm172_vm0, %v3614_v0  ;;  %173 = vst.msk [vmem:[#allocation2] sm:$0xff] (!%p138_p2), %vm172_vm0, %v3614_v0  ;;  %s3616_s20 = smov (!%p138_p2), 16   ;;  %vm416_vm2 = vsmask.f32 (!%p138_p2), 7938 }
   0x7   : > { %174 = vst.msk [vmem:[#allocation2 + $0x8] sm:$0xff] (!%p138_p2), %vm172_vm0, %v3614_v0  ;;  %175 = vst.msk [vmem:[#allocation2 + $0x10] sm:$0xff] (!%p138_p2), %vm172_vm0, %v3614_v0  ;;  %s3617_s21 = smov (!%p138_p2), 24   ;;  %s3618_s22 = smov (!%p138_p2), 32   ;;  %vm885_vm5 = vsmask.f32 (!%p138_p2), 7424 }
   0x8   : > { %176 = vst.msk [vmem:[#allocation2 + $0x18] sm:$0xff] (!%p138_p2), %vm172_vm0, %v3614_v0  ;;  %177 = vst.msk [vmem:[#allocation2 + $0x20] sm:$0xff] (!%p138_p2), %vm172_vm0, %v3614_v0  ;;  %s3619_s23 = smov (!%p138_p2), 40   ;;  %s3620_s24 = smov (!%p138_p2), 48   ;;  %vm884_vm6 = vcmask (!%p138_p2), 195712   ;;  %vm1204_vm7 = vcmask (!%p138_p2), 261312  }
   0x9   : > { %178 = vst.msk [vmem:[#allocation2 + $0x28] sm:$0xff] (!%p138_p2), %vm172_vm0, %v3614_v0  ;;  %179 = vst.msk [vmem:[#allocation2 + $0x30] sm:$0xff] (!%p138_p2), %vm172_vm0, %v3614_v0  ;;  %s3621_s25 = smov (!%p138_p2), 56   ;;  %vm1414_vm10 = vcmask (!%p138_p2), 326912   ;;  %s3622_s26 = smov (!%p138_p2), 64   ;;  %vm2631_vm11 = vcmask (!%p138_p2), 1043456  }
   0xa   : > { %180 = vst.msk [vmem:[#allocation2 + $0x38] sm:$0xff] (!%p138_p2), %vm172_vm0, %v3614_v0  ;;  %181 = vst.msk [vmem:[#allocation2 + $0x40] sm:$0xff] (!%p138_p2), %vm172_vm0, %v3614_v0  ;;  %vm1703_vm12 = vcmask (!%p138_p2), 392512   ;;  %vm2009_vm13 = vcmask (!%p138_p2), 458112  }
   0xb   : > { %183 = vst.msk [vmem:[#allocation2 + $0x50] sm:$0xff] (!%p138_p2), %vm172_vm0, %v3614_v0  ;;  %184 = vst.msk [vmem:[#allocation2 + $0x58] sm:$0xff] (!%p138_p2), %vm172_vm0, %v3614_v0 }
   0xc   : > { %185 = vst.msk [vmem:[#allocation2 + $0x60] sm:$0xff] (!%p138_p2), %vm172_vm0, %v3614_v0  ;;  %186 = vst.msk [vmem:[#allocation2 + $0x68] sm:$0xff] (!%p138_p2), %vm172_vm0, %v3614_v0 }
   0xd   : > { %187 = vst.msk [vmem:[#allocation2 + $0x70] sm:$0xff] %vm172_vm0, %v3614_v0  ;;  %188 = vst.msk [vmem:[#allocation2 + $0x78] sm:$0xff] %vm172_vm0, %v3614_v0  ;;  %s4518_s13 = smov (!%p3651_p3, %s3044_s13), 1 }
   0xe   : > { %s3337_s15 = sshll.u32 %s4518_s13, 7  ;;  %vm3772_vm3 = vmand %vm415_vm1, %vm416_vm2  ;;  %vm2206_vm1 = vcmask 523712  }
   0xf   : > { %s3681_s18 = scalar_lea.vmem %s4500_s0, %s3337_s15  ;;  %vm3941_vm8 = vmand %vm884_vm6, %vm885_vm5  ;;  %s4402_s17 = scalar_lea.vmem %s4503_s3, %s3337_s15 }
  0x10   : > { %v3463_v1 = vld [vmem:[%s3681_s18 + $0x40] sm:$0xff]   ;;  %v3464_v2 = vld [vmem:[%s3681_s18 + $0x38] sm:$0xff]   ;;  %v3465_v3 = vld [vmem:[%s3681_s18 + $0x8] sm:$0xff]  }
  0x11   : > { %584 = vrot.lane.b32.xlu1 %v3463_v1, %s3615_s19  ;;  %582 = vrot.lane.b32.xlu0 %v3464_v2, %s3615_s19  ;;  %v3466_v4 = vld [vmem:[%s3681_s18] sm:$0xff]   ;;  %v3467_v5 = vld [vmem:[%s3681_s18 + $0x50] sm:$0xff]   ;;  %vm3953_vm9 = vmand %vm1204_vm7, %vm416_vm2 }
  0x12   : > { %v3469_v6 = vld [vmem:[%s3681_s18 + $0x38] sm:$0xff]   ;;  %v3468_v7 = vld [vmem:[%s3681_s18 + $0x48] sm:$0xff]   ;;  %v3471_v10 = vld [vmem:[%s3681_s18 + $0x40] sm:$0xff]  }
  0x13   : > { %v784_v8 = vshrl.u32 %v3469_v6, 16  ;;  %v786_v9 = vshll.u32 %v3469_v6, 16  ;;  %v3472_v12 = vld [vmem:[%s3681_s18] sm:$0xff]   ;;  %v3470_v13 = vld [vmem:[%s3681_s18 + $0x10] sm:$0xff]   ;;  %v791_v14 = vshrl.u32 %v3471_v10, 16  ;;  %v793_v15 = vshll.u32 %v3471_v10, 16  ;;  %vm4190_vm14 = vmand %vm1703_vm12, %vm885_vm5 }
  0x14   : > { %v735_v17 = vshrl.u32 %v3472_v12, 16  ;;  %v737_v18 = vshll.u32 %v3472_v12, 16  ;;  %v3475_v20 = vld [vmem:[%s3681_s18 + $0x48] sm:$0xff]   ;;  %v3473_v26 = vld [vmem:[%s3681_s18 + $0x58] sm:$0xff]   ;;  %v3479_v30 = vld [vmem:[%s3681_s18 + $0x50] sm:$0xff]  }
  0x15   : > { %570 = vrot.lane.b32.xlu1 %v3465_v3, %s3615_s19  ;;  %568 = vrot.lane.b32.xlu0 %v3466_v4, %s3615_s19  ;;  %v788_v11 = vrot.slane %v786_v9, 1  ;;  %v795_v19 = vrot.slane %v793_v15, 1  ;;  %v3476_v22 = vld [vmem:[%s3681_s18 + $0x8] sm:$0xff]   ;;  %v800_v24 = vshll.u32 %v3475_v20, 16  ;;  %v3474_v28 = vld [vmem:[%s3681_s18 + $0x18] sm:$0xff]   ;;  %v798_v29 = vshrl.u32 %v3475_v20, 16  ;;  %vm4198_vm15 = vmand %vm2009_vm13, %vm416_vm2 }
  0x16   : > { %v739_v21 = vrot.slane %v737_v18, 1  ;;  %v744_v27 = vshll.u32 %v3476_v22, 16  ;;  %v3480_v32 = vld [vmem:[%s3681_s18 + $0x10] sm:$0xff]   ;;  %v742_v33 = vshrl.u32 %v3476_v22, 16  ;;  %v807_v35 = vshll.u32 %v3479_v30, 16  ;;  %v3481_v38 = vld [vmem:[%s3681_s18 + $0x40] sm:$0xff]  }
  0x17   : > { %v789_v16 = vor.u32 %v788_v11, %v784_v8  ;;  %v796_v23 = vor.u32 %v795_v19, %v791_v14  ;;  %v802_v31 = vrot.slane %v800_v24, 1  ;;  %v751_v37 = vshll.u32 %v3480_v32, 16  ;;  %v3482_v40 = vld [vmem:[%s3681_s18] sm:$0xff]   ;;  %v3483_v46 = vld [vmem:[%s3681_s18 + $0x48] sm:$0xff]   ;;  %v3491_v4 = vld [vmem:[%s3681_s18 + $0x58] sm:$0xff]  }
  0x18   : > { %v740_v25 = vor.u32 %v739_v21, %v735_v17  ;;  %v746_v34 = vrot.slane %v744_v27, 1  ;;  %v3477_v41 = vld [vmem:[%s3681_s18 + $0x60] sm:$0xff]   ;;  %v805_v43 = vshrl.u32 %v3479_v30, 16  ;;  %v809_v44 = vrot.slane %v807_v35, 1  ;;  %v3484_v50 = vld [vmem:[%s3681_s18 + $0x8] sm:$0xff]   ;;  %v3492_v6 = vld [vmem:[%s3681_s18 + $0x18] sm:$0xff]  }
  0x19   : > { %588 = vrot.lane.b32.xlu1 %v3467_v5, %s3615_s19  ;;  %586 = vrot.lane.b32.xlu0 %v3468_v7, %s3615_s19  ;;  %v803_v36 = vor.u32 %v802_v31, %v798_v29  ;;  %v3478_v42 = vld [vmem:[%s3681_s18 + $0x20] sm:$0xff]   ;;  %v749_v45 = vshrl.u32 %v3480_v32, 16  ;;  %v753_v47 = vrot.slane %v751_v37, 1  ;;  %v1101_v48 = vshrl.u32 %v3481_v38, 16  ;;  %v3487_v7 = vld [vmem:[%s3681_s18 + $0x48] sm:$0xff]  }
  0x1a   : > { %v747_v39 = vor.u32 %v746_v34, %v742_v33  ;;  %v1045_v49 = vshrl.u32 %v3482_v40, 16  ;;  %v1104_v51 = vshll.u32 %v3481_v38, 16  ;;  %v1048_v52 = vshll.u32 %v3482_v40, 16  ;;  %v3485_v3 = vld [vmem:[%s3681_s18 + $0x40] sm:$0xff]   ;;  %v3488_v10 = vld [vmem:[%s3681_s18 + $0x8] sm:$0xff]   ;;  %v3497_v21 = vld [vmem:[%s3681_s18 + $0x18] sm:$0xff]  }
  0x1b   : > { %v810_v53 = vor.u32 %v809_v44, %v805_v43  ;;  %v1103_v54 = vrot.slane %v1101_v48, 7  ;;  %v1108_v55 = vshrl.u32 %v3483_v46, 16  ;;  %v754_v56 = vor.u32 %v753_v47, %v749_v45  ;;  %v3486_v5 = vld [vmem:[%s3681_s18] sm:$0xff]   ;;  %v3489_v12 = vld [vmem:[%s3681_s18 + $0x68] sm:$0xff]   ;;  %v3500_v32 = vld [vmem:[%s3681_s18 + $0x58] sm:$0xff]  }
  0x1c   : > { %v1047_v57 = vrot.slane %v1045_v49, 7  ;;  %v1052_v58 = vshrl.u32 %v3484_v50, 16  ;;  %v1111_v61 = vshll.u32 %v3483_v46, 16  ;;  %v1055_v0 = vshll.u32 %v3484_v50, 16  ;;  %v3493_v9 = vld [vmem:[%s3681_s18 + $0x20] sm:$0xff]   ;;  %v3490_v17 = vld [vmem:[%s3681_s18 + $0x28] sm:$0xff]  }
  0x1d   : > { %853 = vrot.lane.b32.xlu1 %v789_v16, %s3616_s20  ;;  %572 = vrot.lane.b32.xlu0 %v3470_v13, %s3615_s19  ;;  %v1106_v59 = vor.u32 %v1104_v51, %v1103_v54  ;;  %v1110_v60 = vrot.slane %v1108_v55, 7  ;;  %v814_v8 = vshll.u32 %v3491_v4, 16  ;;  %v758_v11 = vshll.u32 %v3492_v6, 16  ;;  %v3495_v16 = vld [vmem:[%s3681_s18 + $0x10] sm:$0xff]   ;;  %v3496_v20 = vld [vmem:[%s3681_s18 + $0x60] sm:$0xff]  }
  0x1e   : > { %v1050_v62 = vor.u32 %v1048_v52, %v1047_v57  ;;  %v1054_v63 = vrot.slane %v1052_v58, 7  ;;  %v812_v13 = vshrl.u32 %v3491_v4, 16  ;;  %v765_v15 = vshll.u32 %v3493_v9, 16  ;;  %v3501_v35 = vld [vmem:[%s3681_s18] sm:$0xff]   ;;  %v3757_v48 = vld [vmem:[%s3681_s18 + $0x8] sm:$0xff]   ;;  %v3499_v57 = vld [vmem:[%s3681_s18 + $0x10] sm:$0xff]  }
  0x1f   : > { %v1113_v1 = vor.u32 %v1111_v61, %v1110_v60  ;;  %v816_v14 = vrot.slane %v814_v8, 1  ;;  %v756_v18 = vshrl.u32 %v3492_v6, 16  ;;  %v760_v19 = vrot.slane %v758_v11, 1  ;;  %v3753_v46 = vld [vmem:[%s3681_s18 + $0x40] sm:$0xff]   ;;  %v3522_v61 = vld [vmem:[%s3681_s18 + $0x38] sm:$0xff]   ;;  %v442_v6 = vld [vmem:[#allocation2 + $0x48] sm:$0xff] }
  0x20   : > { %v1057_v2 = vor.u32 %v1055_v0, %v1054_v63  ;;  %v763_v22 = vshrl.u32 %v3493_v9, 16  ;;  %v1066_v29 = vshrl.u32 %v3497_v21, 16  ;;  %v1062_v30 = vshll.u32 %v3495_v16, 16  ;;  %v3783_v8 = vld [vmem:[%s3681_s18 + $0x30] sm:$0xff]   ;;  %v3525_v11 = vld [vmem:[%s3681_s18 + $0x8] sm:$0xff]  }
  0x21   : > { %855 = vrot.lane.b32.xlu1 %v796_v23, %s3616_s20  ;;  %839 = vrot.lane.b32.xlu0 %v740_v25, %s3616_s20  ;;  %v3498_v23 = vld [vmem:[%s3681_s18 + $0x50] sm:$0xff]   ;;  %v817_v24 = vor.u32 %v816_v14, %v812_v13  ;;  %v767_v25 = vrot.slane %v765_v15, 1  ;;  %v761_v27 = vor.u32 %v760_v19, %v756_v18  ;;  %v819_v37 = vshrl.u32 %v3496_v20, 16 }
  0x22   : > { %v1115_v31 = vshrl.u32 %v3498_v23, 16  ;;  %v1068_v40 = vrot.slane %v1066_v29, 7  ;;  %v1122_v43 = vshrl.u32 %v3500_v32, 16  ;;  %v1546_v45 = vshll.u32 %v3501_v35, 16  ;;  %v3502_v13 = vld [vmem:[%s3681_s18 + $0x50] sm:$0xff]  }
  0x23   : > { %v768_v33 = vor.u32 %v767_v25, %v763_v22  ;;  %v1125_v51 = vshll.u32 %v3500_v32, 16  ;;  %v1544_v52 = vshrl.u32 %v3501_v35, 16  ;;  %v1553_v58 = vshll.u32 %v3757_v48, 16  ;;  %v421_v32 = vld [vmem:[#allocation2 + $0x10] sm:$0xff] }
  0x24   : > { %v1124_v50 = vrot.slane %v1122_v43, 7  ;;  %v1548_v55 = vrot.slane %v1546_v45, 1  ;;  %v1600_v4 = vshrl.u32 %v3753_v46, 16  ;;  %v3530_v45 = vld [vmem:[%s3681_s18 + $0x48] sm:$0xff]   ;;  %vm2477_vm2 = vcmask 589312  }
  0x25   : > { %590 = vrot.lane.b32.xlu1 %v3473_v26, %s3615_s19  ;;  %574 = vrot.lane.b32.xlu0 %v3474_v28, %s3615_s19  ;;  %v1059_v26 = vshrl.u32 %v3495_v16, 16  ;;  %v821_v28 = vshll.u32 %v3496_v20, 16  ;;  %v1555_v15 = vrot.slane %v1553_v58, 1  ;;  %v439_v16 = vld [vmem:[#allocation2 + $0x40] sm:$0xff] }
  0x27   : > { %v1061_v34 = vrot.slane %v1059_v26, 7  ;;  %v823_v38 = vrot.slane %v821_v28, 1  ;;  %v3503_v26 = vld [vmem:[%s3681_s18 + $0x18] sm:$0xff]  }
  0x29   : > { %857 = vrot.lane.b32.xlu1 %v803_v36, %s3616_s20  ;;  %841 = vrot.lane.b32.xlu0 %v747_v39, %s3616_s20  ;;  %v3494_v36 = vld [vmem:[%s3681_s18 + $0x30] sm:$0xff]   ;;  %v1069_v39 = vshll.u32 %v3497_v21, 16  ;;  %v1064_v44 = vor.u32 %v1062_v30, %v1061_v34  ;;  %v824_v47 = vor.u32 %v823_v38, %v819_v37  ;;  %v302_v21 = vshrl.u32 %v3525_v11, 16 }
  0x2a   : > { %v779_v30 = vshll.u32 %v3783_v8, 16 }
  0x2b   : > { %v1071_v49 = vor.u32 %v1069_v39, %v1068_v40  ;;  %v304_v29 = vrot.slane %v302_v21, 7  ;;  %v777_v39 = vshrl.u32 %v3783_v8, 16  ;;  %v3807_v40 = vld [vmem:[%s3681_s18 + $0x60] sm:$0xff]  }
  0x2d   : > { %592 = vrot.lane.b32.xlu1 %v3477_v41, %s3615_s19  ;;  %576 = vrot.lane.b32.xlu0 %v3478_v42, %s3615_s19  ;;  %v1118_v41 = vshll.u32 %v3498_v23, 16  ;;  %v1117_v42 = vrot.slane %v1115_v31, 7  ;;  %v305_v23 = vshll.u32 %v3525_v11, 16  ;;  %v3800_v31 = vld [vmem:[%s3681_s18 + $0x68] sm:$0xff]  }
  0x2f   : > { %v1120_v54 = vor.u32 %v1118_v41, %v1117_v42  ;;  %v307_v35 = vor.u32 %v305_v23, %v304_v29  ;;  %v3529_v42 = vld [vmem:[%s3681_s18 + $0x50] sm:$0xff]  }
  0x31   : > { %859 = vrot.lane.b32.xlu1 %v810_v53, %s3616_s20  ;;  %843 = vrot.lane.b32.xlu0 %v754_v56, %s3616_s20  ;;  %v3521_v53 = vld [vmem:[%s3681_s18 + $0x40] sm:$0xff]   ;;  %v1602_v56 = vshll.u32 %v3753_v46, 16  ;;  %v781_v46 = vrot.slane %v779_v30, 1 }
  0x32   : > { %v354_v60 = vshll.u32 %v3521_v53, 16 }
  0x33   : > { %v1604_v14 = vrot.slane %v1602_v56, 1  ;;  %v828_v56 = vshll.u32 %v3800_v31, 16 }
  0x35   : > { %1172 = vrot.lane.b32.xlu1 %v1106_v59, %s3617_s21  ;;  %1156 = vrot.lane.b32.xlu0 %v1050_v62, %s3617_s21  ;;  %v351_v59 = vshrl.u32 %v3521_v53, 16  ;;  %v3768_v62 = vld [vmem:[%s3681_s18 + $0x28] sm:$0xff]   ;;  %v1605_v37 = vor.u32 %v1604_v14, %v1600_v4  ;;  %v361_v53 = vshll.u32 %v3530_v45, 16 }
  0x36   : > { %v770_v18 = vshrl.u32 %v3768_v62, 16  ;;  %v772_v22 = vshll.u32 %v3768_v62, 16  ;;  %v1132_v62 = vshll.u32 %v3807_v40, 16 }
  0x37   : > { %v353_v0 = vrot.slane %v351_v59, 7  ;;  %v3533_v59 = vld [vmem:[%s3681_s18 + $0x10] sm:$0xff]  }
  0x38   : > { %v774_v38 = vrot.slane %v772_v22, 1  ;;  %v3538_v22 = vld [vmem:[%s3681_s18 + $0x58] sm:$0xff]  }
  0x39   : > { %1174 = vrot.lane.b32.xlu1 %v1113_v1, %s3617_s21  ;;  %1158 = vrot.lane.b32.xlu0 %v1057_v2, %s3617_s21  ;;  %v344_v1 = vshrl.u32 %v3522_v61, 16  ;;  %v347_v2 = vshll.u32 %v3522_v61, 16  ;;  %v356_v9 = vor.u32 %v354_v60, %v353_v0  ;;  %v448_v60 = vld [vmem:[#allocation2 + $0x58] sm:$0xff] }
  0x3a   : > { %v775_v4 = vor.u32 %v774_v38, %v770_v18  ;;  %v3518_v38 = vld [vmem:[%s3681_s18 + $0x10] sm:$0xff]  }
  0x3b   : > { %v443_v19 = vsel %vm3772_vm3, %v356_v9, %v442_v6  ;;  %v309_v6 = vshrl.u32 %v3533_v59, 16  ;;  %v830_v9 = vrot.slane %v828_v56, 1 }
  0x3c   : > { %444 = vst [vmem:[#allocation2 + $0x48] sm:$0xff] %v443_v19 }
  0x3d   : > { %1382 = vrot.lane.b32.xlu1 %v3485_v3, %s3618_s22  ;;  %1366 = vrot.lane.b32.xlu0 %v3486_v5, %s3618_s22  ;;  %v1127_v3 = vor.u32 %v1125_v51, %v1124_v50  ;;  %v3779_v5 = vld [vmem:[%s3681_s18 + $0x48] sm:$0xff]   ;;  %v368_v50 = vshll.u32 %v3529_v42, 16  ;;  %v311_v14 = vrot.slane %v309_v6, 7 }
  0x3e   : > { %v1607_v34 = vshrl.u32 %v3779_v5, 16  ;;  %v3527_v6 = vld [vmem:[%s3681_s18 + $0x48] sm:$0xff]  }
  0x41   : > { %1384 = vrot.lane.b32.xlu1 %v3487_v7, %s3618_s22  ;;  %1368 = vrot.lane.b32.xlu0 %v3488_v10, %s3618_s22  ;;  %v1551_v7 = vshrl.u32 %v3757_v48, 16  ;;  %v346_v10 = vrot.slane %v344_v1, 7  ;;  %v3513_v1 = vld [vmem:[%s3681_s18 + $0x68] sm:$0xff]  }
  0x42   : > { %v1136_v19 = vshrl.u32 %v3513_v1, 16  ;;  %v1139_v29 = vshll.u32 %v3513_v1, 16  ;;  %v454_v1 = vld [vmem:[#allocation2 + $0x68] sm:$0xff] }
  0x43   : > { %v349_v20 = vor.u32 %v347_v2, %v346_v10  ;;  %v1556_v51 = vor.u32 %v1555_v15, %v1551_v7  ;;  %v312_v7 = vshll.u32 %v3533_v59, 16  ;;  %v3514_v10 = vld [vmem:[%s3681_s18 + $0x28] sm:$0xff]   ;;  %v3516_v59 = vld [vmem:[%s3681_s18 + $0x20] sm:$0xff]  }
  0x44   : > { %v1083_v30 = vshll.u32 %v3514_v10, 16 }
  0x45   : > { %594 = vrot.lane.b32.xlu1 %v3489_v12, %s3615_s19  ;;  %578 = vrot.lane.b32.xlu0 %v3490_v17, %s3615_s19  ;;  %v1549_v12 = vor.u32 %v1548_v55, %v1544_v52  ;;  %v3526_v17 = vld [vmem:[%s3681_s18] sm:$0xff]   ;;  %v440_v28 = vsel %vm3772_vm3, %v349_v20, %v439_v16  ;;  %v358_v52 = vshrl.u32 %v3530_v45, 16  ;;  %v826_v55 = vshrl.u32 %v3800_v31, 16  ;;  %v424_v16 = vld [vmem:[#allocation2 + $0x18] sm:$0xff]  ;;  %v3838_v20 = vld [vmem:[%s3681_s18 + $0x50] sm:$0xff]  }
  0x46   : > { %v298_v25 = vshll.u32 %v3526_v17, 16  ;;  %441 = vst [vmem:[#allocation2 + $0x40] sm:$0xff] %v440_v28  ;;  %v314_v21 = vor.u32 %v312_v7, %v311_v14  ;;  %v375_v28 = vshll.u32 %v3538_v22, 16  ;;  %v3544_v45 = vld [vmem:[%s3681_s18 + $0x60] sm:$0xff]   ;;  %v3528_v14 = vld [vmem:[%s3681_s18 + $0x8] sm:$0xff]  }
  0x47   : > { %v360_v61 = vrot.slane %v358_v52, 7  ;;  %v831_v23 = vor.u32 %v830_v9, %v826_v55  ;;  %v382_v56 = vshll.u32 %v3544_v45, 16 }
  0x49   : > { %861 = vrot.lane.b32.xlu1 %v817_v24, %s3616_s20  ;;  %845 = vrot.lane.b32.xlu0 %v761_v27, %s3616_s20  ;;  %v295_v24 = vshrl.u32 %v3526_v17, 16  ;;  %v1609_v27 = vshll.u32 %v3779_v5, 16  ;;  %v363_v5 = vor.u32 %v361_v53, %v360_v61  ;;  %v782_v17 = vor.u32 %v781_v46, %v777_v39  ;;  %v451_v39 = vld [vmem:[#allocation2 + $0x60] sm:$0xff]  ;;  %v3523_v61 = vld [vmem:[%s3681_s18 + $0x58] sm:$0xff]  }
  0x4a   : > { %v379_v53 = vshrl.u32 %v3544_v45, 16 }
  0x4b   : > { %v1611_v43 = vrot.slane %v1609_v27, 1  ;;  %v372_v27 = vshrl.u32 %v3538_v22, 16  ;;  %v3532_v22 = vld [vmem:[%s3681_s18 + $0x10] sm:$0xff]  }
  0x4d   : > { %847 = vrot.lane.b32.xlu1 %v768_v33, %s3616_s20  ;;  %580 = vrot.lane.b32.xlu0 %v3494_v36, %s3615_s19  ;;  %v297_v33 = vrot.slane %v295_v24, 7  ;;  %v418_v36 = vld [vmem:[#allocation2 + $0x8] sm:$0xff]  ;;  %v1612_v8 = vor.u32 %v1611_v43, %v1607_v34  ;;  %v1080_v24 = vshrl.u32 %v3514_v10, 16  ;;  %v1138_v34 = vrot.slane %v1136_v19, 7  ;;  %v427_v43 = vld [vmem:[#allocation2 + $0x20] sm:$0xff] }
  0x4e   : > { %v1623_v10 = vshll.u32 %v3523_v61, 16  ;;  %v1621_v19 = vshrl.u32 %v3523_v61, 16 }
  0x4f   : > { %v300_v41 = vor.u32 %v298_v25, %v297_v33  ;;  %v3539_v25 = vld [vmem:[%s3681_s18 + $0x18] sm:$0xff]   ;;  %v1141_v46 = vor.u32 %v1139_v29, %v1138_v34  ;;  %v1867_v29 = vshrl.u32 %v3532_v22, 16 }
  0x50   : > { %v316_v31 = vshrl.u32 %v3539_v25, 16 }
  0x51   : > { %1160 = vrot.lane.b32.xlu1 %v1064_v44, %s3617_s21  ;;  %863 = vrot.lane.b32.xlu0 %v824_v47, %s3616_s20  ;;  %v422_v44 = vsel %vm3772_vm3, %v307_v35, %v421_v32  ;;  %v3814_v47 = vld [vmem:[%s3681_s18 + $0x20] sm:$0xff]   ;;  %v419_v48 = vsel %vm3772_vm3, %v300_v41, %v418_v36  ;;  %v319_v32 = vshll.u32 %v3539_v25, 16  ;;  %v374_v35 = vrot.slane %v372_v27, 7 }
  0x52   : > { %423 = vst [vmem:[#allocation2 + $0x10] sm:$0xff] %v422_v44  ;;  %420 = vst [vmem:[#allocation2 + $0x8] sm:$0xff] %v419_v48  ;;  %v1073_v0 = vshrl.u32 %v3814_v47, 16  ;;  %v1616_v41 = vshll.u32 %v3838_v20, 16 }
  0x54   : > { %v1075_v18 = vrot.slane %v1073_v0, 7  ;;  %v1618_v55 = vrot.slane %v1616_v41, 1  ;;  %v381_v0 = vrot.slane %v379_v53, 7  ;;  %v1870_v41 = vshll.u32 %v3532_v22, 16 }
  0x55   : > { %1162 = vrot.lane.b32.xlu1 %v1071_v49, %s3617_s21  ;;  %1176 = vrot.lane.b32.xlu0 %v1120_v54, %s3617_s21  ;;  %v365_v49 = vshrl.u32 %v3529_v42, 16  ;;  %v3506_v54 = vld [vmem:[%s3681_s18 + $0x58] sm:$0xff]   ;;  %v377_v42 = vor.u32 %v375_v28, %v374_v35  ;;  %v3558_v35 = vld [vmem:[%s3681_s18 + $0x68] sm:$0xff]  }
  0x57   : > { %v367_v58 = vrot.slane %v365_v49, 7  ;;  %v452_v48 = vsel %vm3772_vm3, %v377_v42, %v451_v39  ;;  %v3545_v49 = vld [vmem:[%s3681_s18 + $0x20] sm:$0xff]   ;;  %v3559_v39 = vld [vmem:[%s3681_s18 + $0x28] sm:$0xff]   ;;  %v386_v42 = vshrl.u32 %v3558_v35, 16 }
  0x58   : > { %453 = vst [vmem:[#allocation2 + $0x60] sm:$0xff] %v452_v48  ;;  %v330_v45 = vshrl.u32 %v3559_v39, 16  ;;  %v3540_v48 = vld [vmem:[%s3681_s18 + $0x70] sm:$0xff]  }
  0x59   : > { %1370 = vrot.lane.b32.xlu1 %v3499_v57, %s3618_s22  ;;  %1178 = vrot.lane.b32.xlu0 %v1127_v3, %s3617_s21  ;;  %v1129_v57 = vshrl.u32 %v3807_v40, 16  ;;  %v370_v2 = vor.u32 %v368_v50, %v367_v58  ;;  %v445_v3 = vld [vmem:[#allocation2 + $0x50] sm:$0xff]  ;;  %v318_v40 = vrot.slane %v316_v31, 7  ;;  %v326_v58 = vshll.u32 %v3545_v49, 16 }
  0x5a   : > { %v332_v53 = vrot.slane %v330_v45, 7 }
  0x5b   : > { %v449_v11 = vsel %vm3772_vm3, %v370_v2, %v448_v60  ;;  %v1131_v15 = vrot.slane %v1129_v57, 7  ;;  %v321_v44 = vor.u32 %v319_v32, %v318_v40  ;;  %v323_v57 = vshrl.u32 %v3545_v49, 16  ;;  %v3541_v49 = vld [vmem:[%s3681_s18 + $0x30] sm:$0xff]  }
  0x5c   : > { %450 = vst [vmem:[#allocation2 + $0x58] sm:$0xff] %v449_v11  ;;  %v1558_v60 = vshrl.u32 %v3518_v38, 16  ;;  %v1863_v32 = vshll.u32 %v3528_v14, 16  ;;  %v1869_v40 = vrot.slane %v1867_v29, 7 }
  0x5d   : > { %1655 = vrot.lane.b32.xlu1 %v1549_v12, %s3619_s23  ;;  %1386 = vrot.lane.b32.xlu0 %v3502_v13, %s3618_s22  ;;  %v1076_v12 = vshll.u32 %v3814_v47, 16  ;;  %v446_v13 = vsel %vm3772_vm3, %v363_v5, %v445_v3  ;;  %v1134_v33 = vor.u32 %v1132_v62, %v1131_v15  ;;  %v1614_v47 = vshrl.u32 %v3838_v20, 16  ;;  %v3524_v62 = vld [vmem:[%s3681_s18 + $0x18] sm:$0xff]   ;;  %v430_v5 = vld [vmem:[#allocation2 + $0x28] sm:$0xff] }
  0x5e   : > { %447 = vst [vmem:[#allocation2 + $0x50] sm:$0xff] %v446_v13  ;;  %v428_v52 = vsel %vm3772_vm3, %v321_v44, %v427_v43  ;;  %v325_v2 = vrot.slane %v323_v57, 7  ;;  %v1567_v13 = vshll.u32 %v3524_v62, 16  ;;  %v1916_v15 = vshrl.u32 %v3527_v6, 16 }
  0x5f   : > { %v1078_v36 = vor.u32 %v1076_v12, %v1075_v18  ;;  %429 = vst [vmem:[#allocation2 + $0x20] sm:$0xff] %v428_v52  ;;  %v1619_v9 = vor.u32 %v1618_v55, %v1614_v47  ;;  %v3520_v18 = vld [vmem:[%s3681_s18 + $0x28] sm:$0xff]   ;;  %v1625_v20 = vrot.slane %v1623_v10, 1  ;;  %v389_v43 = vshll.u32 %v3558_v35, 16  ;;  %v457_v52 = vld [vmem:[#allocation2 + $0x70] sm:$0xff]  ;;  %v436_v10 = vld [vmem:[#allocation2 + $0x38] sm:$0xff] }
  0x60   : > { %v328_v7 = vor.u32 %v326_v58, %v325_v2  ;;  %v1918_v25 = vrot.slane %v1916_v15, 7  ;;  %v1872_v57 = vor.u32 %v1870_v41, %v1869_v40  ;;  %v3547_v40 = vld [vmem:[%s3681_s18 + $0x70] sm:$0xff]  }
  0x61   : > { %1372 = vrot.lane.b32.xlu1 %v3503_v26, %s3618_s22  ;;  %1671 = vrot.lane.b32.xlu0 %v1605_v37, %s3619_s23  ;;  %v425_v26 = vsel %vm3772_vm3, %v314_v21, %v424_v16  ;;  %v1082_v37 = vrot.slane %v1080_v24, 7  ;;  %v3531_v16 = vld [vmem:[%s3681_s18 + $0x50] sm:$0xff]   ;;  %v1565_v21 = vshrl.u32 %v3524_v62, 16  ;;  %v1860_v24 = vshrl.u32 %v3528_v14, 16 }
  0x62   : > { %426 = vst [vmem:[#allocation2 + $0x18] sm:$0xff] %v425_v26  ;;  %v431_v11 = vsel %vm3772_vm3, %v328_v7, %v430_v5  ;;  %v1919_v26 = vshll.u32 %v3527_v6, 16  ;;  %v1923_v27 = vshrl.u32 %v3531_v16, 16  ;;  %v1626_v28 = vor.u32 %v1625_v20, %v1621_v19  ;;  %v3543_v7 = vld [vmem:[%s3681_s18 + $0x38] sm:$0xff]  }
  0x63   : > { %v1085_v50 = vor.u32 %v1083_v30, %v1082_v37  ;;  %432 = vst [vmem:[#allocation2 + $0x28] sm:$0xff] %v431_v11  ;;  %v1862_v31 = vrot.slane %v1860_v24, 7  ;;  %v1926_v34 = vshll.u32 %v3531_v16, 16  ;;  %v1143_v5 = vshrl.u32 %v3540_v48, 16  ;;  %v3546_v16 = vld [vmem:[%s3681_s18 + $0x20] sm:$0xff]  }
  0x64   : > { %v1921_v37 = vor.u32 %v1919_v26, %v1918_v25  ;;  %v1087_v6 = vshrl.u32 %v3541_v49, 16  ;;  %v1090_v19 = vshll.u32 %v3541_v49, 16  ;;  %v1094_v20 = vshrl.u32 %v3543_v7, 16  ;;  %v3549_v26 = vld [vmem:[%s3681_s18 + $0x60] sm:$0xff]  }
  0x65   : > { %1657 = vrot.lane.b32.xlu1 %v1556_v51, %s3619_s23  ;;  %1388 = vrot.lane.b32.xlu0 %v3506_v54, %s3618_s22  ;;  %v1560_v51 = vshll.u32 %v3518_v38, 16  ;;  %v3515_v54 = vld [vmem:[%s3681_s18 + $0x60] sm:$0xff]   ;;  %v1925_v38 = vrot.slane %v1923_v27, 7  ;;  %v1865_v44 = vor.u32 %v1863_v32, %v1862_v31  ;;  %v1145_v15 = vrot.slane %v1143_v5, 7  ;;  %v3542_v32 = vld [vmem:[%s3681_s18 + $0x30] sm:$0xff]  }
  0x66   : > { %v1574_v25 = vshll.u32 %v3546_v16, 16  ;;  %v1097_v29 = vshll.u32 %v3543_v7, 16  ;;  %v1630_v35 = vshll.u32 %v3549_v26, 16  ;;  %v1628_v45 = vshrl.u32 %v3549_v26, 16 }
  0x67   : > { %v1562_v3 = vrot.slane %v1560_v51, 1 }
  0x69   : > { %849 = vrot.lane.b32.xlu1 %v775_v4, %s3616_s20  ;;  %1673 = vrot.lane.b32.xlu0 %v1612_v8, %s3619_s23  ;;  %v384_v4 = vor.u32 %v382_v56, %v381_v0  ;;  %v1563_v12 = vor.u32 %v1562_v3, %v1558_v60  ;;  %v433_v56 = vld [vmem:[#allocation2 + $0x30] sm:$0xff]  ;;  %v3534_v3 = vld [vmem:[%s3681_s18 + $0x48] sm:$0xff]  }
  0x6b   : > { %v455_v8 = vsel %vm3772_vm3, %v384_v4, %v454_v1  ;;  %v3535_v4 = vld [vmem:[%s3681_s18 + $0x8] sm:$0xff]  }
  0x6c   : > { %456 = vst [vmem:[#allocation2 + $0x68] sm:$0xff] %v455_v8 }
  0x6d   : > { %851 = vrot.lane.b32.xlu1 %v782_v17, %s3616_s20  ;;  %865 = vrot.lane.b32.xlu0 %v831_v23, %s3616_s20  ;;  %v3519_v17 = vld [vmem:[%s3681_s18 + $0x68] sm:$0xff]   ;;  %v1569_v23 = vrot.slane %v1567_v13, 1  ;;  %v1146_v13 = vshll.u32 %v3540_v48, 16  ;;  %v3548_v48 = vld [vmem:[%s3681_s18 + $0x70] sm:$0xff]  }
  0x6f   : > { %v1570_v30 = vor.u32 %v1569_v23, %v1565_v21  ;;  %v1148_v24 = vor.u32 %v1146_v13, %v1145_v15 }
  0x71   : > { %1180 = vrot.lane.b32.xlu1 %v1134_v33, %s3617_s21  ;;  %1164 = vrot.lane.b32.xlu0 %v1078_v36, %s3617_s21 }
  0x75   : > { %1182 = vrot.lane.b32.xlu1 %v1141_v46, %s3617_s21  ;;  %1166 = vrot.lane.b32.xlu0 %v1085_v50, %s3617_s21  ;;  %v333_v46 = vshll.u32 %v3559_v39, 16  ;;  %v388_v50 = vrot.slane %v386_v42, 7 }
  0x77   : > { %v391_v55 = vor.u32 %v389_v43, %v388_v50  ;;  %v335_v58 = vor.u32 %v333_v46, %v332_v53  ;;  %v3552_v43 = vld [vmem:[%s3681_s18 + $0x18] sm:$0xff]   ;;  %v1632_v46 = vrot.slane %v1630_v35, 1  ;;  %v3563_v35 = vld [vmem:[%s3681_s18 + $0x48] sm:$0xff]  }
  0x79   : > { %1390 = vrot.lane.b32.xlu1 %v3515_v54, %s3618_s22  ;;  %1374 = vrot.lane.b32.xlu0 %v3516_v59, %s3618_s22  ;;  %v1928_v54 = vor.u32 %v1926_v34, %v1925_v38  ;;  %v3564_v59 = vld [vmem:[%s3681_s18 + $0x30] sm:$0xff]   ;;  %v458_v61 = vsel %vm3772_vm3, %v391_v55, %v457_v52  ;;  %v434_v0 = vsel %vm3772_vm3, %v335_v58, %v433_v56  ;;  %v1576_v34 = vrot.slane %v1574_v25, 1  ;;  %v3555_v56 = vld [vmem:[%s3681_s18 + $0x58] sm:$0xff]  }
  0x7a   : > { %459 = vst [vmem:[#allocation2 + $0x70] sm:$0xff] %v458_v61  ;;  %v337_v1 = vshrl.u32 %v3564_v59, 16  ;;  %v340_v2 = vshll.u32 %v3564_v59, 16  ;;  %435 = vst [vmem:[#allocation2 + $0x30] sm:$0xff] %v434_v0  ;;  %v1206_v61 = vld [vmem:[#allocation2] sm:$0xff] }
  0x7c   : > { %v339_v8 = vrot.slane %v337_v1, 7  ;;  %v3551_v1 = vld [vmem:[%s3681_s18 + $0x38] sm:$0xff]  }
  0x7d   : > { %1675 = vrot.lane.b32.xlu1 %v1619_v9, %s3619_s23  ;;  %1659 = vrot.lane.b32.xlu0 %v1563_v12, %s3619_s23  ;;  %v3536_v12 = vld [vmem:[%s3681_s18 + $0x50] sm:$0xff]  }
  0x7e   : > { %v342_v14 = vor.u32 %v340_v2, %v339_v8  ;;  %v1930_v8 = vshrl.u32 %v3555_v56, 16 }
  0x80   : > { %v437_v21 = vsel %vm3772_vm3, %v342_v14, %v436_v10 }
  0x81   : > { %1392 = vrot.lane.b32.xlu1 %v3519_v17, %s3618_s22  ;;  %1376 = vrot.lane.b32.xlu0 %v3520_v18, %s3618_s22  ;;  %v3537_v17 = vld [vmem:[%s3681_s18 + $0x10] sm:$0xff]   ;;  %v1089_v18 = vrot.slane %v1087_v6, 7  ;;  %438 = vst [vmem:[#allocation2 + $0x38] sm:$0xff] %v437_v21 }
  0x83   : > { %v585_v33 = vpop.permute.xlu1 %584  ;;  %v583_v36 = vpop.permute.xlu0 %582  ;;  %v1092_v27 = vor.u32 %v1090_v19, %v1089_v18 }
  0x84   : > { %622 = vst.msk [vmem:[#allocation2 + $0x48] sm:$0xff] %vm613_vm4, %v585_v33  ;;  %621 = vst.msk [vmem:[#allocation2 + $0x40] sm:$0xff] %vm613_vm4, %v583_v36  ;;  %v1572_v33 = vshrl.u32 %v3546_v16, 16  ;;  %v3550_v36 = vld [vmem:[%s3681_s18 + $0x28] sm:$0xff]   ;;  %v1933_v16 = vshll.u32 %v3555_v56, 16 }
  0x85   : > { %1677 = vrot.lane.b32.xlu1 %v1626_v28, %s3619_s23  ;;  %1661 = vrot.lane.b32.xlu0 %v1570_v30, %s3619_s23  ;;  %v1096_v28 = vrot.slane %v1094_v20, 7  ;;  %v1581_v42 = vshll.u32 %v3550_v36, 16  ;;  %v1579_v50 = vshrl.u32 %v3550_v36, 16  ;;  %v3560_v20 = vld [vmem:[%s3681_s18 + $0x8] sm:$0xff]  }
  0x86   : > { %v1577_v41 = vor.u32 %v1576_v34, %v1572_v33  ;;  %v2330_v33 = vshll.u32 %v3560_v20, 16 }
  0x87   : > { %v571_v47 = vpop.permute.xlu1 %570  ;;  %v569_v51 = vpop.permute.xlu0 %568  ;;  %v1583_v53 = vrot.slane %v1581_v42, 1 }
  0x88   : > { %615 = vst.msk [vmem:[#allocation2 + $0x10] sm:$0xff] %vm613_vm4, %v571_v47  ;;  %614 = vst.msk [vmem:[#allocation2 + $0x8] sm:$0xff] %vm613_vm4, %v569_v51  ;;  %v3554_v51 = vld [vmem:[%s3681_s18 + $0x20] sm:$0xff]   ;;  %v2332_v42 = vrot.slane %v2330_v33, 1 }
  0x89   : > { %1980 = vrot.lane.b32.xlu1 %v1921_v37, %s3620_s24  ;;  %1964 = vrot.lane.b32.xlu0 %v1865_v44, %s3620_s24  ;;  %v1099_v37 = vor.u32 %v1097_v29, %v1096_v28  ;;  %v3553_v44 = vld [vmem:[%s3681_s18 + $0x68] sm:$0xff]   ;;  %v1584_v0 = vor.u32 %v1583_v53, %v1579_v50  ;;  %v1884_v15 = vshll.u32 %v3554_v51, 16  ;;  %v3567_v50 = vld [vmem:[%s3681_s18 + $0x30] sm:$0xff]   ;;  %v2384_v53 = vshrl.u32 %v3563_v35, 16 }
  0x8a   : > { %v1637_v55 = vshll.u32 %v3553_v44, 16  ;;  %v1635_v6 = vshrl.u32 %v3553_v44, 16 }
  0x8b   : > { %v589_v60 = vpop.permute.xlu1 %588  ;;  %v587_v62 = vpop.permute.xlu0 %586  ;;  %v908_v5 = vld [vmem:[#allocation2 + $0x40] sm:$0xff]  ;;  %v911_v21 = vld [vmem:[#allocation2 + $0x48] sm:$0xff] }
  0x8c   : > { %624 = vst.msk [vmem:[#allocation2 + $0x58] sm:$0xff] %vm613_vm4, %v589_v60  ;;  %623 = vst.msk [vmem:[#allocation2 + $0x50] sm:$0xff] %vm613_vm4, %v587_v62  ;;  %v1881_v62 = vshrl.u32 %v3554_v51, 16  ;;  %v1639_v7 = vrot.slane %v1637_v55, 1  ;;  %v3561_v51 = vld [vmem:[%s3681_s18 + $0x58] sm:$0xff]   ;;  %v3568_v55 = vld [vmem:[%s3681_s18 + $0x50] sm:$0xff]  }
  0x8d   : > { %1982 = vrot.lane.b32.xlu1 %v1928_v54, %s3620_s24  ;;  %1966 = vrot.lane.b32.xlu0 %v1872_v57, %s3620_s24  ;;  %v1874_v54 = vshrl.u32 %v3552_v43, 16  ;;  %v1633_v57 = vor.u32 %v1632_v46, %v1628_v45  ;;  %v2386_v45 = vshll.u32 %v3563_v35, 16  ;;  %v3604_v35 = vld [vmem:[%s4501_s1 + $0x18] sm:$0xff]  }
  0x8e   : > { %v1883_v14 = vrot.slane %v1881_v62, 7  ;;  %v4002_v62 = vld [vmem:[%s3681_s18 + $0x70] sm:$0xff]  }
  0x8f   : > { %v3904_v9 = vpop.permute.xlu1 %853  ;;  %v573_v11 = vpop.permute.xlu0 %572  ;;  %v1876_v2 = vrot.slane %v1874_v54, 7  ;;  %v887_v26 = vld [vmem:[#allocation2 + $0x8] sm:$0xff]  ;;  %v2388_v54 = vrot.slane %v2386_v45, 1 }
  0x90   : > { %616 = vst.msk [vmem:[#allocation2 + $0x18] sm:$0xff] %vm613_vm4, %v573_v11  ;;  %v909_v10 = vsel %vm3941_vm8, %v3904_v9, %v908_v5  ;;  %v1640_v9 = vor.u32 %v1639_v7, %v1635_v6  ;;  %v3602_v5 = vld [vmem:[%s4501_s1 + $0x8] sm:$0xff]   ;;  %v2393_v7 = vshll.u32 %v3568_v55, 16 }
  0x91   : > { %2177 = vrot.lane.b32.xlu1 %v3534_v3, %s3621_s25  ;;  %2161 = vrot.lane.b32.xlu0 %v3535_v4, %s3621_s25  ;;  %v1877_v3 = vshll.u32 %v3552_v43, 16  ;;  %v3557_v4 = vld [vmem:[%s3681_s18 + $0x60] sm:$0xff]   ;;  %v3565_v43 = vld [vmem:[%s3681_s18 + $0x10] sm:$0xff]   ;;  %v2389_v6 = vor.u32 %v2388_v54, %v2384_v53 }
  0x92   : > { %v1937_v19 = vshrl.u32 %v3557_v4, 16 }
  0x93   : > { %v3914_v22 = vpop.permute.xlu1 %855  ;;  %v3916_v23 = vpop.permute.xlu0 %839  ;;  %v1879_v18 = vor.u32 %v1877_v3, %v1876_v2  ;;  %v1588_v2 = vshll.u32 %v3567_v50, 16  ;;  %v3600_v3 = vld [vmem:[%s3681_s18 + $0x70] sm:$0xff]  }
  0x94   : > { %v912_v25 = vsel %vm3941_vm8, %v3914_v22, %v911_v21  ;;  %v888_v28 = vsel %vm3941_vm8, %v3916_v23, %v887_v26  ;;  %v1886_v22 = vor.u32 %v1884_v15, %v1883_v14  ;;  %v1939_v34 = vrot.slane %v1937_v19, 7  ;;  %v3566_v21 = vld [vmem:[%s3681_s18 + $0x60] sm:$0xff]   ;;  %v4033_v26 = vld [vmem:[%s3681_s18 + $0x38] sm:$0xff]  }
  0x95   : > { %2179 = vrot.lane.b32.xlu1 %v3536_v12, %s3621_s25  ;;  %2163 = vrot.lane.b32.xlu0 %v3537_v17, %s3621_s25  ;;  %v1586_v14 = vshrl.u32 %v3567_v50, 16  ;;  %v1593_v50 = vshrl.u32 %v4033_v26, 16 }
  0x97   : > { %v591_v30 = vpop.permute.xlu1 %590  ;;  %v575_v31 = vpop.permute.xlu0 %574  ;;  %v893_v53 = vld [vmem:[#allocation2 + $0x18] sm:$0xff] }
  0x98   : > { %625 = vst.msk [vmem:[#allocation2 + $0x60] sm:$0xff] %vm613_vm4, %v591_v30  ;;  %617 = vst.msk [vmem:[#allocation2 + $0x20] sm:$0xff] %vm613_vm4, %v575_v31 }
  0x99   : > { %1184 = vrot.lane.b32.xlu1 %v1148_v24, %s3617_s21  ;;  %1168 = vrot.lane.b32.xlu0 %v1092_v27, %s3617_s21  ;;  %v1932_v24 = vrot.slane %v1930_v8, 7  ;;  %v4015_v8 = vld [vmem:[%s3681_s18 + $0x70] sm:$0xff]  }
  0x9b   : > { %v3927_v38 = vpop.permute.xlu1 %857  ;;  %v3929_v39 = vpop.permute.xlu0 %841  ;;  %v1935_v23 = vor.u32 %v1933_v16, %v1932_v24  ;;  %v1590_v16 = vrot.slane %v1588_v2, 1  ;;  %v2395_v24 = vrot.slane %v2393_v7, 1  ;;  %v3577_v7 = vld [vmem:[%s3681_s18 + $0x18] sm:$0xff]  }
  0x9d   : > { %1378 = vrot.lane.b32.xlu1 %v3542_v32, %s3618_s22  ;;  %1170 = vrot.lane.b32.xlu0 %v1099_v37, %s3617_s21  ;;  %v1940_v32 = vshll.u32 %v3557_v4, 16  ;;  %v3601_v4 = vld [vmem:[%s4501_s1] sm:$0xff]  }
  0x9e   : > { %3392 = vmatprep.subr.bf16.mxu0 %v3601_v4  ;;  %3434 = vmatprep.subr.bf16.mxu1 %v3601_v4 }
  0x9f   : > { %v593_v47 = vpop.permute.xlu1 %592  ;;  %v577_v49 = vpop.permute.xlu0 %576  ;;  %v1942_v44 = vor.u32 %v1940_v32, %v1939_v34  ;;  %3393 = vmatpush3.bf16.msra.mxu0 %v3601_v4  ;;  %3439 = vmatpush3.bf16.msra.mxu1 %v3601_v4 }
  0xa0   : > { %626 = vst.msk [vmem:[#allocation2 + $0x68] sm:$0xff] %vm613_vm4, %v593_v47  ;;  %618 = vst.msk [vmem:[#allocation2 + $0x28] sm:$0xff] %vm613_vm4, %v577_v49  ;;  %v2337_v49 = vshll.u32 %v3565_v43, 16  ;;  %3394 = vmatprep.subr.bf16.mxu0 %v3602_v5  ;;  %3435 = vmatprep.subr.bf16.mxu1 %v3602_v5 }
  0xa1   : > { %1663 = vrot.lane.b32.xlu1 %v1577_v41, %s3619_s23  ;;  %1394 = vrot.lane.b32.xlu0 %v3547_v40, %s3618_s22  ;;  %v3556_v40 = vld [vmem:[%s3681_s18 + $0x18] sm:$0xff]   ;;  %v2328_v41 = vshrl.u32 %v3560_v20, 16  ;;  %v3603_v20 = vld [vmem:[%s4501_s1 + $0x10] sm:$0xff]  }
  0xa3   : > { %v3949_v58 = vpop.permute.xlu1 %859  ;;  %v3957_v60 = vpop.permute.xlu0 %843  ;;  %3395 = vmatpush3.bf16.msra.mxu0 %v3602_v5  ;;  %3440 = vmatpush3.bf16.msra.mxu1 %v3602_v5 }
  0xa4   : > { %3396 = vmatprep.subr.bf16.mxu0 %v3603_v20  ;;  %3436 = vmatprep.subr.bf16.mxu1 %v3603_v20 }
  0xa5   : > { %596 = vrot.lane.b32.xlu1 %v3548_v48, %s3615_s19  ;;  %1679 = vrot.lane.b32.xlu0 %v1633_v57, %s3619_s23  ;;  %v2333_v48 = vor.u32 %v2332_v42, %v2328_v41  ;;  %v3562_v57 = vld [vmem:[%s3681_s18 + $0x20] sm:$0xff]   ;;  %v1595_v42 = vshll.u32 %v4033_v26, 16 }
  0xa7   : > { %v1173_v11 = vpop.permute.xlu1 %1172  ;;  %v1157_v13 = vpop.permute.xlu0 %1156  ;;  %3397 = vmatpush3.bf16.msra.mxu0 %v3603_v20  ;;  %3441 = vmatpush3.bf16.msra.mxu1 %v3603_v20 }
  0xa8   : > { %v1231_v12 = vsel %vm3953_vm9, %v1173_v11, %v909_v10  ;;  %v1207_v17 = vsel %vm3953_vm9, %v1157_v13, %v1206_v61  ;;  %v393_v11 = vshrl.u32 %v3600_v3, 16  ;;  %3398 = vmatprep.subr.bf16.mxu0 %v3604_v35  ;;  %3437 = vmatprep.subr.bf16.mxu1 %v3604_v35 }
  0xa9   : > { %1232 = vst [vmem:[#allocation2 + $0x40] sm:$0xff] %v1231_v12  ;;  %1665 = vrot.lane.b32.xlu1 %v1584_v0, %s3619_s23  ;;  %1208 = vst [vmem:[#allocation2] sm:$0xff] %v1207_v17  ;;  %1380 = vrot.lane.b32.xlu0 %v3551_v1, %s3618_s22  ;;  %v2335_v0 = vshrl.u32 %v3565_v43, 16  ;;  %v2339_v1 = vrot.slane %v2337_v49, 1  ;;  %v396_v12 = vshll.u32 %v3600_v3, 16  ;;  %v835_v17 = vshll.u32 %v4002_v62, 16 }
  0xaa   : > { %v395_v19 = vrot.slane %v393_v11, 7  ;;  %v4053_v43 = vld [vmem:[%s3681_s18 + $0x68] sm:$0xff]  }
  0xab   : > { %v1175_v27 = vpop.permute.xlu1 %1174  ;;  %v1159_v30 = vpop.permute.xlu0 %1158  ;;  %v2340_v15 = vor.u32 %v2339_v1, %v2335_v0  ;;  %v837_v32 = vrot.slane %v835_v17, 1  ;;  %3399 = vmatpush3.bf16.msra.mxu0 %v3604_v35  ;;  %3442 = vmatpush3.bf16.msra.mxu1 %v3604_v35 }
  0xac   : > { %v1234_v29 = vsel %vm3953_vm9, %v1175_v27, %v912_v25  ;;  %v1210_v31 = vsel %vm3953_vm9, %v1159_v30, %v888_v28  ;;  %v1644_v25 = vshll.u32 %v4015_v8, 16  ;;  %v460_v27 = vld [vmem:[#allocation2 + $0x78] sm:$0xff] }
  0xad   : > { %1235 = vst [vmem:[#allocation2 + $0x48] sm:$0xff] %v1234_v29  ;;  %1968 = vrot.lane.b32.xlu1 %v1879_v18, %s3620_s24  ;;  %1211 = vst [vmem:[#allocation2 + $0x8] sm:$0xff] %v1210_v31  ;;  %1681 = vrot.lane.b32.xlu0 %v1640_v9, %s3619_s23  ;;  %v4024_v18 = vld [vmem:[%s3681_s18 + $0x28] sm:$0xff]   ;;  %v2391_v9 = vshrl.u32 %v3568_v55, 16  ;;  %v398_v29 = vor.u32 %v396_v12, %v395_v19  ;;  %v833_v31 = vshrl.u32 %v4002_v62, 16  ;;  %v1597_v55 = vrot.slane %v1595_v42, 1 }
  0xae   : > { %v1888_v33 = vshrl.u32 %v4024_v18, 16  ;;  %v1646_v41 = vrot.slane %v1644_v25, 1  ;;  %v894_v62 = vsel %vm3941_vm8, %v3957_v60, %v893_v53  ;;  %v1947_v12 = vshll.u32 %v4053_v43, 16  ;;  %v3580_v25 = vld [vmem:[%s3681_s18 + $0x58] sm:$0xff]  }
  0xaf   : > { %v1383_v36 = vpop.permute.xlu1 %1382  ;;  %v1367_v37 = vpop.permute.xlu0 %1366  ;;  %v461_v34 = vsel %vm3772_vm3, %v398_v29, %v460_v27  ;;  %v3575_v29 = vld [vmem:[%s3681_s18 + $0x28] sm:$0xff]   ;;  %v3586_v53 = vld [vmem:[%s3681_s18 + $0x78] sm:$0xff]   ;;  %vm4281_vm3 = vmand %vm2477_vm2, %vm885_vm5 }
  0xb0   : > { %1423 = vst.msk [vmem:[#allocation2 + $0x40] sm:$0xff] %vm1414_vm10, %v1383_v36  ;;  %1415 = vst.msk [vmem:[#allocation2] sm:$0xff] %vm1414_vm10, %v1367_v37  ;;  %v890_v36 = vld [vmem:[#allocation2 + $0x10] sm:$0xff]  ;;  %v2396_v37 = vor.u32 %v2395_v24, %v2391_v9  ;;  %v1890_v49 = vrot.slane %v1888_v33, 7  ;;  %v2400_v33 = vshll.u32 %v3580_v25, 16 }
  0xb1   : > { %1970 = vrot.lane.b32.xlu1 %v1886_v22, %s3620_s24  ;;  %1984 = vrot.lane.b32.xlu0 %v1935_v23, %s3620_s24  ;;  %v1591_v22 = vor.u32 %v1590_v16, %v1586_v14  ;;  %v4042_v23 = vld [vmem:[%s3681_s18 + $0x30] sm:$0xff]   ;;  %462 = vst [vmem:[#allocation2 + $0x78] sm:$0xff] %v461_v34  ;;  %v891_v63 = vsel %vm3941_vm8, %v3929_v39, %v890_v36 }
  0xb2   : > { %v1895_v39 = vshrl.u32 %v4042_v23, 16  ;;  %v1898_v4 = vshll.u32 %v4042_v23, 16  ;;  %v2402_v42 = vrot.slane %v2400_v33, 1 }
  0xb3   : > { %v1385_v46 = vpop.permute.xlu1 %1384  ;;  %v1369_v47 = vpop.permute.xlu0 %1368 }
  0xb4   : > { %1424 = vst.msk [vmem:[#allocation2 + $0x48] sm:$0xff] %vm1414_vm10, %v1385_v46  ;;  %1416 = vst.msk [vmem:[#allocation2 + $0x8] sm:$0xff] %vm1414_vm10, %v1369_v47  ;;  %v1891_v47 = vshll.u32 %v4024_v18, 16 }
  0xb5   : > { %2165 = vrot.lane.b32.xlu1 %v3556_v40, %s3621_s25  ;;  %1986 = vrot.lane.b32.xlu0 %v1942_v44, %s3620_s24  ;;  %v1642_v40 = vshrl.u32 %v4015_v8, 16  ;;  %v1598_v8 = vor.u32 %v1597_v55, %v1593_v50  ;;  %v3585_v50 = vld [vmem:[%s3681_s18 + $0x78] sm:$0xff]  }
  0xb6   : > { %v1893_v60 = vor.u32 %v1891_v47, %v1890_v49 }
  0xb7   : > { %v595_v56 = vpop.permute.xlu1 %594  ;;  %v579_v61 = vpop.permute.xlu0 %578  ;;  %v1647_v54 = vor.u32 %v1646_v41, %v1642_v40  ;;  %v3578_v40 = vld [vmem:[%s3681_s18 + $0x68] sm:$0xff]   ;;  %v2398_v41 = vshrl.u32 %v3580_v25, 16 }
  0xb8   : > { %627 = vst.msk [vmem:[#allocation2 + $0x70] sm:$0xff] %vm613_vm4, %v595_v56  ;;  %619 = vst.msk [vmem:[#allocation2 + $0x30] sm:$0xff] %vm613_vm4, %v579_v61  ;;  %v1944_v56 = vshrl.u32 %v4053_v43, 16  ;;  %v914_v61 = vld [vmem:[#allocation2 + $0x50] sm:$0xff]  ;;  %v3584_v43 = vld [vmem:[%s3681_s18 + $0x60] sm:$0xff]  }
  0xb9   : > { %2432 = vrot.lane.b32.xlu1 %v2333_v48, %s3622_s26  ;;  %2181 = vrot.lane.b32.xlu0 %v3561_v51, %s3621_s25  ;;  %v838_v48 = vor.u32 %v837_v32, %v833_v31  ;;  %v3605_v51 = vld [vmem:[%s4501_s1 + $0x20] ss:$0 sps:$4 sm:$0xff]   ;;  %v915_v1 = vsel %vm3941_vm8, %v3927_v38, %v914_v61 }
  0xba   : > { %3444 = vmatprep.subr.msk.bf16.mxu0 %vm2631_vm11, %v3605_v51  ;;  %v2633_v38 = vsel %vm2631_vm11, %v3605_v51, 0  ;;  %v1946_v11 = vrot.slane %v1944_v56, 7  ;;  %3445 = vmatprep.subr.msk.bf16.mxu1 %vm2631_vm11, %v3605_v51  ;;  %v2407_v51 = vshll.u32 %v3584_v43, 16 }
  0xbb   : > { %v4017_v10 = vpop.permute.xlu1 %861  ;;  %v4019_v13 = vpop.permute.xlu0 %845  ;;  %3401 = vmatpush3.bf16.msra.mxu0 %v2633_v38  ;;  %3443 = vmatpush3.bf16.msra.mxu1 %v2633_v38  ;;  %v1153_v38 = vshll.u32 %v3585_v50, 16 }
  0xbc   : > { %v1949_v9 = vor.u32 %v1947_v12, %v1946_v11  ;;  %v920_v11 = vld [vmem:[#allocation2 + $0x60] sm:$0xff] }
  0xbd   : > { %2167 = vrot.lane.b32.xlu1 %v3562_v57, %s3621_s25  ;;  %2448 = vrot.lane.b32.xlu0 %v2389_v6, %s3622_s26  ;;  %v3576_v57 = vld [vmem:[%s3681_s18 + $0x70] sm:$0xff]   ;;  %v1897_v6 = vrot.slane %v1895_v39, 7  ;;  %v2403_v39 = vor.u32 %v2402_v42, %v2398_v41 }
  0xbe   : > { %v1951_v14 = vshrl.u32 %v3576_v57, 16  ;;  %v3593_v41 = vld [vmem:[%s3681_s18 + $0x30] sm:$0xff]  }
  0xbf   : > { %v4035_v28 = vpop.permute.xlu1 %847  ;;  %v581_v30 = vpop.permute.xlu0 %580  ;;  %v1900_v20 = vor.u32 %v1898_v4, %v1897_v6  ;;  %v3588_v4 = vld [vmem:[%s3681_s18 + $0x40] sm:$0xff]  }
  0xc0   : > { %620 = vst.msk [vmem:[#allocation2 + $0x38] sm:$0xff] %vm613_vm4, %v581_v30  ;;  %v1953_v24 = vrot.slane %v1951_v14, 7  ;;  %v2342_v30 = vshrl.u32 %v3577_v7, 16 }
  0xc1   : > { %2434 = vrot.lane.b32.xlu1 %v2340_v15, %s3622_s26  ;;  %2183 = vrot.lane.b32.xlu0 %v3566_v21, %s3621_s25  ;;  %v917_v15 = vld [vmem:[#allocation2 + $0x58] sm:$0xff]  ;;  %v2344_v21 = vshll.u32 %v3577_v7, 16 }
  0xc2   : > { %v918_v17 = vsel %vm3941_vm8, %v3949_v58, %v917_v15  ;;  %v1954_v58 = vshll.u32 %v3576_v57, 16  ;;  %v1961_v15 = vshll.u32 %v3586_v53, 16 }
  0xc3   : > { %v1161_v44 = vpop.permute.xlu1 %1160  ;;  %v4060_v46 = vpop.permute.xlu0 %863  ;;  %v2346_v31 = vrot.slane %v2344_v21, 1 }
  0xc4   : > { %v1213_v45 = vsel %vm3953_vm9, %v1161_v44, %v891_v63  ;;  %v1956_v32 = vor.u32 %v1954_v58, %v1953_v24 }
  0xc5   : > { %1214 = vst [vmem:[#allocation2 + $0x10] sm:$0xff] %v1213_v45  ;;  %1667 = vrot.lane.b32.xlu1 %v1591_v22, %s3619_s23  ;;  %2450 = vrot.lane.b32.xlu0 %v2396_v37, %s3622_s26  ;;  %v3581_v22 = vld [vmem:[%s3681_s18 + $0x20] sm:$0xff]   ;;  %v2347_v35 = vor.u32 %v2346_v31, %v2342_v30  ;;  %v3583_v37 = vld [vmem:[%s3681_s18 + $0x38] sm:$0xff]   ;;  %v899_v31 = vld [vmem:[#allocation2 + $0x28] sm:$0xff] }
  0xc6   : > { %v2351_v36 = vshll.u32 %v3581_v22, 16  ;;  %v3579_v45 = vld [vmem:[%s3681_s18 + $0x30] sm:$0xff]   ;;  %v2349_v47 = vshrl.u32 %v3581_v22, 16  ;;  %v1902_v49 = vshrl.u32 %v3583_v37, 16  ;;  %v1905_v61 = vshll.u32 %v3583_v37, 16  ;;  %v3592_v30 = vld [vmem:[%s3681_s18 + $0x68] sm:$0xff]  }
  0xc7   : > { %v1163_v0 = vpop.permute.xlu1 %1162  ;;  %v1177_v3 = vpop.permute.xlu0 %1176  ;;  %v900_v33 = vsel %vm3941_vm8, %v4035_v28, %v899_v31  ;;  %v3587_v37 = vld [vmem:[%s3681_s18 + $0x38] sm:$0xff]   ;;  %v2414_v42 = vshll.u32 %v3592_v30, 16  ;;  %v1705_v31 = vld [vmem:[#allocation2] sm:$0xff] }
  0xc8   : > { %v1216_v2 = vsel %vm3953_vm9, %v1163_v0, %v894_v62  ;;  %v1237_v5 = vsel %vm3953_vm9, %v1177_v3, %v915_v1  ;;  %v1904_v57 = vrot.slane %v1902_v49, 7  ;;  %v1150_v62 = vshrl.u32 %v3585_v50, 16  ;;  %v3582_v0 = vld [vmem:[%s3681_s18 + $0x70] sm:$0xff]   ;;  %v3590_v49 = vld [vmem:[%s3681_s18 + $0x78] sm:$0xff]  }
  0xc9   : > { %1217 = vst [vmem:[#allocation2 + $0x18] sm:$0xff] %v1216_v2  ;;  %867 = vrot.lane.b32.xlu1 %v838_v48, %s3616_s20  ;;  %1238 = vst [vmem:[#allocation2 + $0x50] sm:$0xff] %v1237_v5  ;;  %1683 = vrot.lane.b32.xlu0 %v1647_v54, %s3619_s23  ;;  %v2353_v48 = vrot.slane %v2351_v36, 1  ;;  %v2405_v1 = vshrl.u32 %v3584_v43, 16  ;;  %v2409_v2 = vrot.slane %v2407_v51, 1  ;;  %v1958_v3 = vshrl.u32 %v3586_v53, 16 }
  0xca   : > { %v1907_v6 = vor.u32 %v1905_v61, %v1904_v57  ;;  %v1152_v7 = vrot.slane %v1150_v62, 7  ;;  %v2412_v50 = vshrl.u32 %v3592_v30, 16  ;;  %v3596_v51 = vld [vmem:[%s3681_s18 + $0x70] sm:$0xff]   ;;  %v3591_v57 = vld [vmem:[%s3681_s18 + $0x78] sm:$0xff]   ;;  %v2363_v61 = vshrl.u32 %v3593_v41, 16 }
  0xcb   : > { %v1371_v16 = vpop.permute.xlu1 %1370  ;;  %v1179_v18 = vpop.permute.xlu0 %1178  ;;  %v2354_v56 = vor.u32 %v2353_v48, %v2349_v47  ;;  %v2410_v12 = vor.u32 %v2409_v2, %v2405_v1  ;;  %v1960_v14 = vrot.slane %v1958_v3, 7  ;;  %v2365_v47 = vshll.u32 %v3593_v41, 16  ;;  %v3595_v48 = vld [vmem:[%s3681_s18 + $0x38] sm:$0xff]  }
  0xcc   : > { %1417 = vst.msk [vmem:[#allocation2 + $0x10] sm:$0xff] %vm1414_vm10, %v1371_v16  ;;  %v1240_v19 = vsel %vm3953_vm9, %v1179_v18, %v918_v17  ;;  %v1909_v16 = vshrl.u32 %v3588_v4, 16  ;;  %v921_v17 = vsel %vm3941_vm8, %v4017_v10, %v920_v11  ;;  %v896_v18 = vld [vmem:[#allocation2 + $0x20] sm:$0xff]  ;;  %v1155_v58 = vor.u32 %v1153_v38, %v1152_v7  ;;  %v923_v10 = vld [vmem:[#allocation2 + $0x68] sm:$0xff]  ;;  %v3597_v1 = vld [vmem:[%s3681_s18 + $0x78] sm:$0xff]  }
  0xcd   : > { %1972 = vrot.lane.b32.xlu1 %v1893_v60, %s3620_s24  ;;  %1241 = vst [vmem:[#allocation2 + $0x58] sm:$0xff] %v1240_v19  ;;  %1669 = vrot.lane.b32.xlu0 %v1598_v8, %s3619_s23  ;;  %v3589_v8 = vld [vmem:[%s3681_s18 + $0x28] sm:$0xff]   ;;  %v924_v22 = vsel %vm3941_vm8, %v4060_v46, %v923_v10  ;;  %v2367_v62 = vrot.slane %v2365_v47, 1  ;;  %v2421_v3 = vshll.u32 %v3596_v51, 16  ;;  %v1729_v10 = vld [vmem:[#allocation2 + $0x40] sm:$0xff] }
  0xce   : > { %v2358_v25 = vshll.u32 %v3589_v8, 16 }
  0xcf   : > { %v4099_v26 = vpop.permute.xlu1 %1655  ;;  %v1387_v27 = vpop.permute.xlu0 %1386  ;;  %v2368_v38 = vor.u32 %v2367_v62, %v2363_v61 }
  0xd0   : > { %1425 = vst.msk [vmem:[#allocation2 + $0x50] sm:$0xff] %vm1414_vm10, %v1387_v27  ;;  %v1963_v27 = vor.u32 %v1961_v15, %v1960_v14  ;;  %v2360_v46 = vrot.slane %v2358_v25, 1  ;;  %v3594_v14 = vld [vmem:[%s3681_s18 + $0x40] sm:$0xff]   ;;  %v2419_v15 = vshrl.u32 %v3596_v51, 16  ;;  %v902_v51 = vld [vmem:[#allocation2 + $0x30] sm:$0xff] }
  0xd1   : > { %1974 = vrot.lane.b32.xlu1 %v1900_v20, %s3620_s24  ;;  %1988 = vrot.lane.b32.xlu0 %v1949_v9, %s3620_s24  ;;  %v897_v20 = vsel %vm3941_vm8, %v4019_v13, %v896_v18  ;;  %v1911_v13 = vrot.slane %v1909_v16, 7  ;;  %v2423_v16 = vrot.slane %v2421_v3, 1  ;;  %v3599_v18 = vld [vmem:[%s3681_s18 + $0x40] sm:$0xff]   ;;  %v905_v3 = vld [vmem:[#allocation2 + $0x38] sm:$0xff] }
  0xd2   : > { %v2379_v30 = vshll.u32 %v3599_v18, 16 }
  0xd3   : > { %v1373_v23 = vpop.permute.xlu1 %1372  ;;  %v4107_v34 = vpop.permute.xlu0 %1671 }
  0xd4   : > { %1418 = vst.msk [vmem:[#allocation2 + $0x18] sm:$0xff] %vm1414_vm10, %v1373_v23  ;;  %v2381_v41 = vrot.slane %v2379_v30, 1 }
  0xd5   : > { %2169 = vrot.lane.b32.xlu1 %v3575_v29, %s3621_s25  ;;  %1990 = vrot.lane.b32.xlu0 %v1956_v32, %s3620_s24  ;;  %v1912_v29 = vshll.u32 %v3588_v4, 16  ;;  %v3598_v4 = vld [vmem:[%s3681_s18 + $0x78] sm:$0xff]  }
  0xd7   : > { %v4114_v63 = vpop.permute.xlu1 %1657  ;;  %v1389_v44 = vpop.permute.xlu0 %1388  ;;  %v1914_v28 = vor.u32 %v1912_v29, %v1911_v13  ;;  %v2426_v13 = vshrl.u32 %v3598_v4, 16 }
  0xd8   : > { %1426 = vst.msk [vmem:[#allocation2 + $0x58] sm:$0xff] %vm1414_vm10, %v1389_v44 }
  0xd9   : > { %2436 = vrot.lane.b32.xlu1 %v2347_v35, %s3622_s26  ;;  %2185 = vrot.lane.b32.xlu0 %v3578_v40, %s3621_s25  ;;  %v2356_v40 = vshrl.u32 %v3589_v8, 16  ;;  %v2370_v8 = vshrl.u32 %v3595_v48, 16 }
  0xdb   : > { %v4122_v54 = vpop.permute.xlu1 %849  ;;  %v4124_v55 = vpop.permute.xlu0 %1673 }
  0xdc   : > { %v903_v62 = vsel %vm3941_vm8, %v4122_v54, %v902_v51 }
  0xdd   : > { %2171 = vrot.lane.b32.xlu1 %v3579_v45, %s3621_s25  ;;  %2452 = vrot.lane.b32.xlu0 %v2403_v39, %s3622_s26  ;;  %v2361_v45 = vor.u32 %v2360_v46, %v2356_v40  ;;  %v2416_v39 = vrot.slane %v2414_v42, 1  ;;  %v1732_v40 = vld [vmem:[#allocation2 + $0x48] sm:$0xff]  ;;  %v2377_v46 = vshrl.u32 %v3599_v18, 16 }
  0xdf   : > { %v4130_v5 = vpop.permute.xlu1 %851  ;;  %v4132_v60 = vpop.permute.xlu0 %865  ;;  %v2417_v2 = vor.u32 %v2416_v39, %v2412_v50  ;;  %v926_v39 = vld [vmem:[#allocation2 + $0x70] sm:$0xff]  ;;  %v1738_v30 = vld [vmem:[#allocation2 + $0x58] sm:$0xff] }
  0xe1   : > { %2438 = vrot.lane.b32.xlu1 %v2354_v56, %s3622_s26  ;;  %2187 = vrot.lane.b32.xlu0 %v3582_v0, %s3621_s25  ;;  %v2372_v0 = vshll.u32 %v3595_v48, 16 }
  0xe3   : > { %v1181_v19 = vpop.permute.xlu1 %1180  ;;  %v1165_v9 = vpop.permute.xlu0 %1164  ;;  %v2374_v11 = vrot.slane %v2372_v0, 1 }
  0xe4   : > { %v1243_v21 = vsel %vm3953_vm9, %v1181_v19, %v921_v17  ;;  %v1219_v24 = vsel %vm3953_vm9, %v1165_v9, %v897_v20  ;;  %v2428_v17 = vshll.u32 %v3598_v4, 16  ;;  %v4392_v20 = vld [vmem:[%s4502_s2] ss:$0 sm:$0xff] }
  0xe5   : > { %1244 = vst [vmem:[#allocation2 + $0x60] sm:$0xff] %v1243_v21  ;;  %1976 = vrot.lane.b32.xlu1 %v1907_v6, %s3620_s24  ;;  %1220 = vst [vmem:[#allocation2 + $0x20] sm:$0xff] %v1219_v24  ;;  %2454 = vrot.lane.b32.xlu0 %v2410_v12, %s3622_s26  ;;  %v1651_v12 = vshll.u32 %v3597_v1, 16  ;;  %v2375_v24 = vor.u32 %v2374_v11, %v2370_v8 }
  0xe6   : > { %v2430_v29 = vrot.slane %v2428_v17, 1 }
  0xe7   : > { %v1183_v32 = vpop.permute.xlu1 %1182  ;;  %v1167_v35 = vpop.permute.xlu0 %1166  ;;  %v1653_v25 = vrot.slane %v1651_v12, 1 }
  0xe8   : > { %v1246_v23 = vsel %vm3953_vm9, %v1183_v32, %v924_v22  ;;  %v1222_v36 = vsel %vm3953_vm9, %v1167_v35, %v900_v33  ;;  %v1730_v22 = vsel %vm4190_vm14, %v4107_v34, %v1729_v10  ;;  %v1706_v33 = vsel %vm4190_vm14, %v4099_v26, %v1705_v31 }
  0xe9   : > { %1247 = vst [vmem:[#allocation2 + $0x68] sm:$0xff] %v1246_v23  ;;  %1186 = vrot.lane.b32.xlu1 %v1155_v58, %s3617_s21  ;;  %1223 = vst [vmem:[#allocation2 + $0x28] sm:$0xff] %v1222_v36  ;;  %1992 = vrot.lane.b32.xlu0 %v1963_v27, %s3620_s24  ;;  %v1649_v58 = vshrl.u32 %v3597_v1, 16  ;;  %v2424_v27 = vor.u32 %v2423_v16, %v2419_v15  ;;  %v2431_v34 = vor.u32 %v2430_v29, %v2426_v13 }
  0xea   : > { %v1733_v26 = vsel %vm4190_vm14, %v4124_v55, %v1732_v40  ;;  %v2382_v55 = vor.u32 %v2381_v41, %v2377_v46 }
  0xeb   : > { %v1391_v43 = vpop.permute.xlu1 %1390  ;;  %v1375_v44 = vpop.permute.xlu0 %1374 }
  0xec   : > { %1427 = vst.msk [vmem:[#allocation2 + $0x60] sm:$0xff] %vm1414_vm10, %v1391_v43  ;;  %1419 = vst.msk [vmem:[#allocation2 + $0x20] sm:$0xff] %vm1414_vm10, %v1375_v44 }
  0xed   : > { %2173 = vrot.lane.b32.xlu1 %v3587_v37, %s3621_s25  ;;  %1978 = vrot.lane.b32.xlu0 %v1914_v28, %s3620_s24  ;;  %v1654_v37 = vor.u32 %v1653_v25, %v1649_v58  ;;  %v1708_v28 = vld [vmem:[#allocation2 + $0x8] sm:$0xff]  ;;  %v1735_v58 = vld [vmem:[#allocation2 + $0x50] sm:$0xff] }
  0xee   : > { %v1709_v43 = vsel %vm4190_vm14, %v4114_v63, %v1708_v28 }
  0xef   : > { %v4171_v53 = vpop.permute.xlu1 %1675  ;;  %v4173_v56 = vpop.permute.xlu0 %1659 }
  0xf1   : > { %2440 = vrot.lane.b32.xlu1 %v2361_v45, %s3622_s26  ;;  %2189 = vrot.lane.b32.xlu0 %v3590_v49, %s3621_s25 }
  0xf3   : > { %v1393_v6 = vpop.permute.xlu1 %1392  ;;  %v1377_v7 = vpop.permute.xlu0 %1376 }
  0xf4   : > { %1428 = vst.msk [vmem:[#allocation2 + $0x68] sm:$0xff] %vm1414_vm10, %v1393_v6  ;;  %1420 = vst.msk [vmem:[#allocation2 + $0x28] sm:$0xff] %vm1414_vm10, %v1377_v7 }
  0xf5   : > { %1396 = vrot.lane.b32.xlu1 %v3591_v57, %s3618_s22  ;;  %2456 = vrot.lane.b32.xlu0 %v2417_v2, %s3622_s26  ;;  %v927_v57 = vsel %vm3941_vm8, %v4132_v60, %v926_v39  ;;  %v906_v60 = vsel %vm3941_vm8, %v4130_v5, %v905_v3 }
  0xf7   : > { %v4186_v19 = vpop.permute.xlu1 %1677  ;;  %v4194_v21 = vpop.permute.xlu0 %1661 }
  0xf9   : > { %2442 = vrot.lane.b32.xlu1 %v2368_v38, %s3622_s26  ;;  %2175 = vrot.lane.b32.xlu0 %v3594_v14, %s3621_s25  ;;  %v1711_v14 = vld [vmem:[#allocation2 + $0x10] sm:$0xff] }
  0xfa   : > { %v1712_v15 = vsel %vm4190_vm14, %v4173_v56, %v1711_v14 }
  0xfb   : > { %v1981_v32 = vpop.permute.xlu1 %1980  ;;  %v1965_v35 = vpop.permute.xlu0 %1964  ;;  %v1720_v51 = vld [vmem:[#allocation2 + $0x28] sm:$0xff] }
  0xfc   : > { %v2036_v23 = vsel %vm4198_vm15, %v1981_v32, %v1730_v22  ;;  %v2012_v36 = vsel %vm4198_vm15, %v1965_v35, %v1706_v33 }
  0xfd   : > { %2037 = vst [vmem:[#allocation2 + $0x40] sm:$0xff] %v2036_v23  ;;  %2444 = vrot.lane.b32.xlu1 %v2375_v24, %s3622_s26  ;;  %2013 = vst [vmem:[#allocation2] sm:$0xff] %v2012_v36  ;;  %2458 = vrot.lane.b32.xlu0 %v2424_v27, %s3622_s26  ;;  %v1714_v24 = vld [vmem:[#allocation2 + $0x18] sm:$0xff]  ;;  %v1736_v27 = vsel %vm4190_vm14, %v4171_v53, %v1735_v58 }
  0xfe   : > { %v1715_v25 = vsel %vm4190_vm14, %v4194_v21, %v1714_v24  ;;  %v1739_v21 = vsel %vm4190_vm14, %v4186_v19, %v1738_v30 }
  0xff   : > { %v1983_v42 = vpop.permute.xlu1 %1982  ;;  %v1967_v45 = vpop.permute.xlu0 %1966 }
 0x100   : > { %v2039_v44 = vsel %vm4198_vm15, %v1983_v42, %v1733_v26  ;;  %v2015_v47 = vsel %vm4198_vm15, %v1967_v45, %v1709_v43 }
 0x101   : > { %2040 = vst [vmem:[#allocation2 + $0x48] sm:$0xff] %v2039_v44  ;;  %1685 = vrot.lane.b32.xlu1 %v1654_v37, %s3619_s23  ;;  %2016 = vst [vmem:[#allocation2 + $0x8] sm:$0xff] %v2015_v47  ;;  %2460 = vrot.lane.b32.xlu0 %v2431_v34, %s3622_s26 }
 0x103   : > { %v2178_v48 = vpop.permute.xlu1 %2177  ;;  %v2162_v49 = vpop.permute.xlu0 %2161 }
 0x104   : > { %2215 = vst.msk [vmem:[#allocation2 + $0x40] sm:$0xff] %vm2206_vm1, %v2178_v48  ;;  %2207 = vst.msk [vmem:[#allocation2] sm:$0xff] %vm2206_vm1, %v2162_v49  ;;  %v1717_v48 = vld [vmem:[#allocation2 + $0x20] sm:$0xff] }
 0x105   : > { %2446 = vrot.lane.b32.xlu0 %v2382_v55, %s3622_s26 }
 0x107   : > { %v2180_v63 = vpop.permute.xlu1 %2179  ;;  %v2164_v50 = vpop.permute.xlu0 %2163 }
 0x108   : > { %2216 = vst.msk [vmem:[#allocation2 + $0x48] sm:$0xff] %vm2206_vm1, %v2180_v63  ;;  %2208 = vst.msk [vmem:[#allocation2 + $0x8] sm:$0xff] %vm2206_vm1, %v2164_v50 }
 0x10b   : > { %v1185_v61 = vpop.permute.xlu1 %1184  ;;  %v1169_v1 = vpop.permute.xlu0 %1168  ;;  %v2479_v23 = vld [vmem:[#allocation2] sm:$0xff] }
 0x10c   : > { %v1249_v0 = vsel %vm3953_vm9, %v1185_v61, %v927_v57  ;;  %v1225_v2 = vsel %vm3953_vm9, %v1169_v1, %v903_v62  ;;  %v2503_v40 = vld [vmem:[#allocation2 + $0x40] sm:$0xff] }
 0x10d   : > { %1250 = vst [vmem:[#allocation2 + $0x70] sm:$0xff] %v1249_v0  ;;  %1226 = vst [vmem:[#allocation2 + $0x30] sm:$0xff] %v1225_v2  ;;  %v1741_v57 = vld [vmem:[#allocation2 + $0x60] sm:$0xff] }
 0x10f   : > { %v1379_v4 = vpop.permute.xlu1 %1378  ;;  %v1171_v6 = vpop.permute.xlu0 %1170  ;;  %v2482_v41 = vld [vmem:[#allocation2 + $0x8] sm:$0xff] }
 0x110   : > { %1421 = vst.msk [vmem:[#allocation2 + $0x30] sm:$0xff] %vm1414_vm10, %v1379_v4  ;;  %v1228_v54 = vsel %vm3953_vm9, %v1171_v6, %v906_v60  ;;  %v2506_v44 = vld [vmem:[#allocation2 + $0x48] sm:$0xff] }
 0x111   : > { %1229 = vst [vmem:[#allocation2 + $0x38] sm:$0xff] %v1228_v54  ;;  %v1744_v4 = vld [vmem:[#allocation2 + $0x68] sm:$0xff] }
 0x113   : > { %v4248_v7 = vpop.permute.xlu1 %1663  ;;  %v1395_v38 = vpop.permute.xlu0 %1394 }
 0x114   : > { %1429 = vst.msk [vmem:[#allocation2 + $0x70] sm:$0xff] %vm1414_vm10, %v1395_v38  ;;  %v1718_v49 = vsel %vm4190_vm14, %v4248_v7, %v1717_v48 }
 0x117   : > { %v597_v8 = vpop.permute.xlu1 %596  ;;  %v4252_v11 = vpop.permute.xlu0 %1679 }
 0x118   : > { %628 = vst.msk [vmem:[#allocation2 + $0x78] sm:$0xff] %vm613_vm4, %v597_v8  ;;  %v1742_v0 = vsel %vm4190_vm14, %v4252_v11, %v1741_v57 }
 0x11b   : > { %v4254_v12 = vpop.permute.xlu1 %1665  ;;  %v1381_v5 = vpop.permute.xlu0 %1380 }
 0x11c   : > { %1422 = vst.msk [vmem:[#allocation2 + $0x38] sm:$0xff] %vm1414_vm10, %v1381_v5  ;;  %v1721_v61 = vsel %vm4190_vm14, %v4254_v12, %v1720_v51 }
 0x11f   : > { %v1969_v16 = vpop.permute.xlu1 %1968  ;;  %v4262_v18 = vpop.permute.xlu0 %1681 }
 0x120   : > { %v2018_v17 = vsel %vm4198_vm15, %v1969_v16, %v1712_v15  ;;  %v1745_v6 = vsel %vm4190_vm14, %v4262_v18, %v1744_v4 }
 0x121   : > { %2019 = vst [vmem:[#allocation2 + $0x10] sm:$0xff] %v2018_v17 }
 0x123   : > { %v1971_v10 = vpop.permute.xlu1 %1970  ;;  %v1985_v13 = vpop.permute.xlu0 %1984 }
 0x124   : > { %v2021_v56 = vsel %vm4198_vm15, %v1971_v10, %v1715_v25  ;;  %v2042_v29 = vsel %vm4198_vm15, %v1985_v13, %v1736_v27  ;;  %v1723_v25 = vld [vmem:[#allocation2 + $0x30] sm:$0xff] }
 0x125   : > { %2022 = vst [vmem:[#allocation2 + $0x18] sm:$0xff] %v2021_v56  ;;  %2043 = vst [vmem:[#allocation2 + $0x50] sm:$0xff] %v2042_v29 }
 0x127   : > { %v2166_v31 = vpop.permute.xlu1 %2165  ;;  %v1987_v22 = vpop.permute.xlu0 %1986 }
 0x128   : > { %2209 = vst.msk [vmem:[#allocation2 + $0x10] sm:$0xff] %vm2206_vm1, %v2166_v31  ;;  %v2045_v53 = vsel %vm4198_vm15, %v1987_v22, %v1739_v21  ;;  %v929_v31 = vld [vmem:[#allocation2 + $0x78] sm:$0xff]  ;;  %v1747_v22 = vld [vmem:[#allocation2 + $0x70] sm:$0xff] }
 0x129   : > { %2046 = vst [vmem:[#allocation2 + $0x58] sm:$0xff] %v2045_v53 }
 0x12b   : > { %v2433_v33 = vpop.permute.xlu1 %2432  ;;  %v2182_v36 = vpop.permute.xlu0 %2181 }
 0x12c   : > { %v2480_v35 = vsel %vm4281_vm3, %v2433_v33, %v2479_v23  ;;  %2217 = vst.msk [vmem:[#allocation2 + $0x50] sm:$0xff] %vm2206_vm1, %v2182_v36 }
 0x12d   : > { %2481 = vst [vmem:[#allocation2] sm:$0xff] %v2480_v35  ;;  %3402 = vmatprep.mubr.msk.bf16.mxu0 %vm172_vm0, %v2480_v35 }
 0x12f   : > { %v2168_v19 = vpop.permute.xlu1 %2167  ;;  %v2449_v37 = vpop.permute.xlu0 %2448  ;;  %v2485_v8 = vld [vmem:[#allocation2 + $0x10] sm:$0xff] }
 0x130   : > { %2210 = vst.msk [vmem:[#allocation2 + $0x18] sm:$0xff] %vm2206_vm1, %v2168_v19  ;;  %v2504_v34 = vsel %vm4281_vm3, %v2449_v37, %v2503_v40  ;;  %v1726_v19 = vld [vmem:[#allocation2 + $0x38] sm:$0xff] }
 0x131   : > { %2505 = vst [vmem:[#allocation2 + $0x40] sm:$0xff] %v2504_v34  ;;  %3418 = vmatprep.mubr.msk.bf16.mxu1 %vm172_vm0, %v2504_v34 }
 0x133   : > { %v2435_v46 = vpop.permute.xlu1 %2434  ;;  %v2184_v26 = vpop.permute.xlu0 %2183  ;;  %v2509_v15 = vld [vmem:[#allocation2 + $0x50] sm:$0xff] }
 0x134   : > { %v2483_v28 = vsel %vm4281_vm3, %v2435_v46, %v2482_v41  ;;  %2218 = vst.msk [vmem:[#allocation2 + $0x58] sm:$0xff] %vm2206_vm1, %v2184_v26 }
 0x135   : > { %2484 = vst [vmem:[#allocation2 + $0x8] sm:$0xff] %v2483_v28  ;;  %3403 = vmatmul.mubr.msk.bf16.vlgmr.msra.gmra.mrb[0].mxu0 %vm172_vm0, %v2483_v28 }
 0x137   : > { %v1668_v42 = vpop.permute.xlu1 %1667  ;;  %v2451_v43 = vpop.permute.xlu0 %2450  ;;  %v2488_v18 = vld [vmem:[#allocation2 + $0x18] sm:$0xff] }
 0x138   : > { %v2507_v45 = vsel %vm4281_vm3, %v2451_v43, %v2506_v44  ;;  %v1724_v10 = vsel %vm4190_vm14, %v1668_v42, %v1723_v25 }
 0x139   : > { %2508 = vst [vmem:[#allocation2 + $0x48] sm:$0xff] %v2507_v45  ;;  %3419 = vmatmul.mubr.msk.bf16.vlgmr.msra.gmra.mrb[0].mxu1 %vm172_vm0, %v2507_v45 }
 0x13b   : > { %v4300_v47 = vpop.permute.xlu1 %867  ;;  %v4302_v55 = vpop.permute.xlu0 %1683  ;;  %v2512_v29 = vld [vmem:[#allocation2 + $0x58] sm:$0xff] }
 0x13c   : > { %v930_v21 = vsel %vm3941_vm8, %v4300_v47, %v929_v31  ;;  %v1748_v33 = vsel %vm4190_vm14, %v4302_v55, %v1747_v22 }
 0x13f   : > { %v1973_v63 = vpop.permute.xlu1 %1972  ;;  %v4309_v39 = vpop.permute.xlu0 %1669 }
 0x140   : > { %v2024_v50 = vsel %vm4198_vm15, %v1973_v63, %v1718_v49  ;;  %v1727_v52 = vsel %vm4190_vm14, %v4309_v39, %v1726_v19 }
 0x141   : > { %2025 = vst [vmem:[#allocation2 + $0x20] sm:$0xff] %v2024_v50 }
 0x143   : > { %v1975_v62 = vpop.permute.xlu1 %1974  ;;  %v1989_v2 = vpop.permute.xlu0 %1988 }
 0x144   : > { %v2027_v1 = vsel %vm4198_vm15, %v1975_v62, %v1721_v61  ;;  %v2048_v3 = vsel %vm4198_vm15, %v1989_v2, %v1742_v0 }
 0x145   : > { %2028 = vst [vmem:[#allocation2 + $0x28] sm:$0xff] %v2027_v1  ;;  %2049 = vst [vmem:[#allocation2 + $0x60] sm:$0xff] %v2048_v3 }
 0x147   : > { %v2170_v60 = vpop.permute.xlu1 %2169  ;;  %v1991_v54 = vpop.permute.xlu0 %1990 }
 0x148   : > { %2211 = vst.msk [vmem:[#allocation2 + $0x20] sm:$0xff] %vm2206_vm1, %v2170_v60  ;;  %v2051_v7 = vsel %vm4198_vm15, %v1991_v54, %v1745_v6 }
 0x149   : > { %2052 = vst [vmem:[#allocation2 + $0x68] sm:$0xff] %v2051_v7 }
 0x14b   : > { %v2437_v38 = vpop.permute.xlu1 %2436  ;;  %v2186_v12 = vpop.permute.xlu0 %2185 }
 0x14c   : > { %v2486_v11 = vsel %vm4281_vm3, %v2437_v38, %v2485_v8  ;;  %2219 = vst.msk [vmem:[#allocation2 + $0x60] sm:$0xff] %vm2206_vm1, %v2186_v12 }
 0x14d   : > { %2487 = vst [vmem:[#allocation2 + $0x10] sm:$0xff] %v2486_v11  ;;  %3406 = vmatprep.mubr.msk.bf16.mxu0 %vm172_vm0, %v2486_v11 }
 0x14f   : > { %v2172_v5 = vpop.permute.xlu1 %2171  ;;  %v2453_v14 = vpop.permute.xlu0 %2452  ;;  %v2491_v46 = vld [vmem:[#allocation2 + $0x20] sm:$0xff] }
 0x150   : > { %2212 = vst.msk [vmem:[#allocation2 + $0x28] sm:$0xff] %vm2206_vm1, %v2172_v5  ;;  %v2510_v16 = vsel %vm4281_vm3, %v2453_v14, %v2509_v15 }
 0x151   : > { %2511 = vst [vmem:[#allocation2 + $0x50] sm:$0xff] %v2510_v16  ;;  %3422 = vmatprep.mubr.msk.bf16.mxu1 %vm172_vm0, %v2510_v16 }
 0x153   : > { %v2439_v17 = vpop.permute.xlu1 %2438  ;;  %v2188_v58 = vpop.permute.xlu0 %2187  ;;  %v2515_v43 = vld [vmem:[#allocation2 + $0x60] sm:$0xff] }
 0x154   : > { %v2489_v24 = vsel %vm4281_vm3, %v2439_v17, %v2488_v18  ;;  %2220 = vst.msk [vmem:[#allocation2 + $0x68] sm:$0xff] %vm2206_vm1, %v2188_v58 }
 0x155   : > { %2490 = vst [vmem:[#allocation2 + $0x18] sm:$0xff] %v2489_v24  ;;  %3407 = vmatmul.mubr.msk.bf16.gmra.mrb[4].mxu0 %vm172_vm0, %v2489_v24 }
 0x157   : > { %v1977_v27 = vpop.permute.xlu1 %1976  ;;  %v2455_v13 = vpop.permute.xlu0 %2454  ;;  %v2494_v45 = vld [vmem:[#allocation2 + $0x28] sm:$0xff] }
 0x158   : > { %v2030_v56 = vsel %vm4198_vm15, %v1977_v27, %v1724_v10  ;;  %v2513_v30 = vsel %vm4281_vm3, %v2455_v13, %v2512_v29 }
 0x159   : > { %2031 = vst [vmem:[#allocation2 + $0x30] sm:$0xff] %v2030_v56  ;;  %2514 = vst [vmem:[#allocation2 + $0x58] sm:$0xff] %v2513_v30  ;;  %3423 = vmatmul.mubr.msk.bf16.gmra.mrb[4].mxu1 %vm172_vm0, %v2513_v30 }
 0x15b   : > { %v1187_v53 = vpop.permute.xlu1 %1186  ;;  %v1993_v35 = vpop.permute.xlu0 %1992  ;;  %v2518_v39 = vld [vmem:[#allocation2 + $0x68] sm:$0xff] }
 0x15c   : > { %v1252_v23 = vsel %vm3953_vm9, %v1187_v53, %v930_v21  ;;  %v2054_v36 = vsel %vm4198_vm15, %v1993_v35, %v1748_v33 }
 0x15d   : > { %1253 = vst [vmem:[#allocation2 + $0x78] sm:$0xff] %v1252_v23  ;;  %2055 = vst [vmem:[#allocation2 + $0x70] sm:$0xff] %v2054_v36 }
 0x15f   : > { %v2174_v37 = vpop.permute.xlu1 %2173  ;;  %v1979_v40 = vpop.permute.xlu0 %1978 }
 0x160   : > { %2213 = vst.msk [vmem:[#allocation2 + $0x30] sm:$0xff] %vm2206_vm1, %v2174_v37  ;;  %v2033_v34 = vsel %vm4198_vm15, %v1979_v40, %v1727_v52 }
 0x161   : > { %2034 = vst [vmem:[#allocation2 + $0x38] sm:$0xff] %v2033_v34 }
 0x163   : > { %v2441_v59 = vpop.permute.xlu1 %2440  ;;  %v2190_v28 = vpop.permute.xlu0 %2189 }
 0x164   : > { %v2492_v41 = vsel %vm4281_vm3, %v2441_v59, %v2491_v46  ;;  %2221 = vst.msk [vmem:[#allocation2 + $0x70] sm:$0xff] %vm2206_vm1, %v2190_v28 }
 0x165   : > { %2493 = vst [vmem:[#allocation2 + $0x20] sm:$0xff] %v2492_v41  ;;  %3410 = vmatprep.mubr.msk.bf16.mxu0 %vm172_vm0, %v2492_v41 }
 0x167   : > { %v1397_v26 = vpop.permute.xlu1 %1396  ;;  %v2457_v42 = vpop.permute.xlu0 %2456  ;;  %v2497_v49 = vld [vmem:[#allocation2 + $0x30] sm:$0xff] }
 0x168   : > { %1430 = vst.msk [vmem:[#allocation2 + $0x78] sm:$0xff] %vm1414_vm10, %v1397_v26  ;;  %v2516_v9 = vsel %vm4281_vm3, %v2457_v42, %v2515_v43 }
 0x169   : > { %2517 = vst [vmem:[#allocation2 + $0x60] sm:$0xff] %v2516_v9  ;;  %3426 = vmatprep.mubr.msk.bf16.mxu1 %vm172_vm0, %v2516_v9 }
 0x16b   : > { %v2443_v44 = vpop.permute.xlu1 %2442  ;;  %v2176_v55 = vpop.permute.xlu0 %2175  ;;  %v2521_v1 = vld [vmem:[#allocation2 + $0x70] sm:$0xff] }
 0x16c   : > { %v2495_v47 = vsel %vm4281_vm3, %v2443_v44, %v2494_v45  ;;  %2214 = vst.msk [vmem:[#allocation2 + $0x38] sm:$0xff] %vm2206_vm1, %v2176_v55 }
 0x16d   : > { %2496 = vst [vmem:[#allocation2 + $0x28] sm:$0xff] %v2495_v47  ;;  %3411 = vmatmul.mubr.msk.bf16.gmra.mrb[8].mxu0 %vm172_vm0, %v2495_v47 }
 0x16f   : > { %v2445_v48 = vpop.permute.xlu1 %2444  ;;  %v2459_v50 = vpop.permute.xlu0 %2458  ;;  %v1750_v57 = vld [vmem:[#allocation2 + $0x78] sm:$0xff] }
 0x170   : > { %v2498_v63 = vsel %vm4281_vm3, %v2445_v48, %v2497_v49  ;;  %v2519_v51 = vsel %vm4281_vm3, %v2459_v50, %v2518_v39 }
 0x171   : > { %2499 = vst [vmem:[#allocation2 + $0x30] sm:$0xff] %v2498_v63  ;;  %3414 = vmatprep.mubr.msk.bf16.mxu0 %vm172_vm0, %v2498_v63  ;;  %2520 = vst [vmem:[#allocation2 + $0x68] sm:$0xff] %v2519_v51  ;;  %3427 = vmatmul.mubr.msk.bf16.gmra.mrb[8].mxu1 %vm172_vm0, %v2519_v51 }
 0x173   : > { %v1686_v61 = vpop.permute.xlu1 %1685  ;;  %v2461_v0 = vpop.permute.xlu0 %2460  ;;  %v2500_v4 = vld [vmem:[#allocation2 + $0x38] sm:$0xff] }
 0x174   : > { %v1751_v62 = vsel %vm4190_vm14, %v1686_v61, %v1750_v57  ;;  %v2522_v2 = vsel %vm4281_vm3, %v2461_v0, %v2521_v1 }
 0x175   : > { %1752 = vst [vmem:[#allocation2 + $0x78] sm:$0xff] %v1751_v62  ;;  %2523 = vst [vmem:[#allocation2 + $0x70] sm:$0xff] %v2522_v2  ;;  %3430 = vmatprep.mubr.msk.bf16.mxu1 %vm172_vm0, %v2522_v2 }
 0x177   : > { %v2447_v3 = vpop.permute.xlu0 %2446 }
 0x178   : > { %v2501_v60 = vsel %vm4281_vm3, %v2447_v3, %v2500_v4 }
 0x179   : > { %2502 = vst [vmem:[#allocation2 + $0x38] sm:$0xff] %v2501_v60  ;;  %3415 = vmatmul.mubr.msk.bf16.gmra.mrb[12].mxu0 %vm172_vm0, %v2501_v60  ;;  %3431 = vmatmul.mubr.msk.bf16.gmra.mrb[12].mxu1 %vm172_vm0, %v1751_v62  ;;  %vm2956_vm0 = vcmask 60416  }
 0x208   : > { %v3404_v6 = vpop.f32.mrb[0].mxu0 }
 0x209   : > { %v2678_v54 = vadd.f32 %v3404_v6, %v4392_v20  ;;  %v2669_v7 = vpop.f32.mrb[1].mxu0 }
 0x20a   : > { %v2670_v38 = vadd.f32 %v4392_v20, %v2669_v7  ;;  %v3405_v8 = vpop.f32.mrb[2].mxu0 }
 0x20b   : > { %v2798_v11 = vmax.f32 %v2678_v54, 0.0  ;;  %v2681_v32 = vadd.f32 %v3405_v8, %v4392_v20  ;;  %v2672_v12 = vpop.f32.mrb[3].mxu0 }
 0x20c   : > { %v2796_v5 = vmax.f32 %v2670_v38, 0.0  ;;  %v2673_v14 = vadd.f32 %v4392_v20, %v2672_v12  ;;  %v3420_v17 = vpop.f32.mrb[0].mxu1 }
 0x20d   : > { %v3341_v15 = vpack.c.bf16 %v2798_v11, %v2798_v11  ;;  %v2799_v16 = vmax.f32 %v2681_v32, 0.0  ;;  %v2742_v58 = vadd.f32 %v3420_v17, %v4392_v20  ;;  %v2733_v25 = vpop.f32.mrb[1].mxu1 }
 0x20e   : > { %v3339_v18 = vpack.c.bf16 %v2796_v5, %v2796_v5  ;;  %v2797_v24 = vmax.f32 %v2673_v14, 0.0  ;;  %v2734_v27 = vadd.f32 %v4392_v20, %v2733_v25  ;;  %v3421_v56 = vpop.f32.mrb[2].mxu1 }
 0x20f   : > { %2959 = vst.msk [vmem:[%s4402_s17 + $0x8] sm:$0xf] %vm2956_vm0, %v3341_v15  ;;  %v3342_v10 = vpack.c.bf16 %v2799_v16, %v2799_v16  ;;  %v2814_v29 = vmax.f32 %v2742_v58, 0.0  ;;  %v2745_v30 = vadd.f32 %v3421_v56, %v4392_v20  ;;  %v2736_v31 = vpop.f32.mrb[3].mxu1 }
 0x210   : > { %2957 = vst.msk [vmem:[%s4402_s17] sm:$0xf] %vm2956_vm0, %v3339_v18  ;;  %v3340_v13 = vpack.c.bf16 %v2797_v24, %v2797_v24  ;;  %v2812_v21 = vmax.f32 %v2734_v27, 0.0  ;;  %v2737_v22 = vadd.f32 %v4392_v20, %v2736_v31 }
 0x211   : > { %2960 = vst.msk [vmem:[%s4402_s17 + $0xc] sm:$0xf] %vm2956_vm0, %v3342_v10  ;;  %v3357_v53 = vpack.c.bf16 %v2814_v29, %v2814_v29  ;;  %v2815_v33 = vmax.f32 %v2745_v30, 0.0 }
 0x212   : > { %2958 = vst.msk [vmem:[%s4402_s17 + $0x4] sm:$0xf] %vm2956_vm0, %v3340_v13  ;;  %v3355_v23 = vpack.c.bf16 %v2812_v21, %v2812_v21  ;;  %v2813_v35 = vmax.f32 %v2737_v22, 0.0 }
 0x213   : > { %2975 = vst.msk [vmem:[%s4402_s17 + $0x48] sm:$0xf] %vm2956_vm0, %v3357_v53  ;;  %v3358_v36 = vpack.c.bf16 %v2815_v33, %v2815_v33 }
 0x214   : > { %2973 = vst.msk [vmem:[%s4402_s17 + $0x40] sm:$0xf] %vm2956_vm0, %v3355_v23  ;;  %v3356_v19 = vpack.c.bf16 %v2813_v35, %v2813_v35 }
 0x215   : > { %2976 = vst.msk [vmem:[%s4402_s17 + $0x4c] sm:$0xf] %vm2956_vm0, %v3358_v36 }
 0x216   : > { %2974 = vst.msk [vmem:[%s4402_s17 + $0x44] sm:$0xf] %vm2956_vm0, %v3356_v19 }
 0x228   : > { %v3408_v37 = vpop.f32.mrb[4].mxu0 }
 0x229   : > { %v2694_v52 = vadd.f32 %v3408_v37, %v4392_v20  ;;  %v2685_v40 = vpop.f32.mrb[5].mxu0 }
 0x22a   : > { %v2686_v34 = vadd.f32 %v4392_v20, %v2685_v40  ;;  %v3409_v59 = vpop.f32.mrb[6].mxu0 }
 0x22b   : > { %v2802_v46 = vmax.f32 %v2694_v52, 0.0  ;;  %v2697_v41 = vadd.f32 %v3409_v59, %v4392_v20  ;;  %v2688_v28 = vpop.f32.mrb[7].mxu0 }
 0x22c   : > { %v2800_v26 = vmax.f32 %v2686_v34, 0.0  ;;  %v2689_v42 = vadd.f32 %v4392_v20, %v2688_v28  ;;  %v3424_v44 = vpop.f32.mrb[4].mxu1 }
 0x22d   : > { %v3345_v43 = vpack.c.bf16 %v2802_v46, %v2802_v46  ;;  %v2803_v9 = vmax.f32 %v2697_v41, 0.0  ;;  %v2758_v55 = vadd.f32 %v3424_v44, %v4392_v20  ;;  %v2749_v48 = vpop.f32.mrb[5].mxu1 }
 0x22e   : > { %v3343_v45 = vpack.c.bf16 %v2800_v26, %v2800_v26  ;;  %v2801_v47 = vmax.f32 %v2689_v42, 0.0  ;;  %v2750_v63 = vadd.f32 %v4392_v20, %v2749_v48  ;;  %v3425_v50 = vpop.f32.mrb[6].mxu1 }
 0x22f   : > { %2963 = vst.msk [vmem:[%s4402_s17 + $0x18] sm:$0xf] %vm2956_vm0, %v3345_v43  ;;  %v3346_v49 = vpack.c.bf16 %v2803_v9, %v2803_v9  ;;  %v2818_v51 = vmax.f32 %v2758_v55, 0.0  ;;  %v2761_v57 = vadd.f32 %v3425_v50, %v4392_v20  ;;  %v2752_v61 = vpop.f32.mrb[7].mxu1 }
 0x230   : > { %2961 = vst.msk [vmem:[%s4402_s17 + $0x10] sm:$0xf] %vm2956_vm0, %v3343_v45  ;;  %v3344_v39 = vpack.c.bf16 %v2801_v47, %v2801_v47  ;;  %v2816_v62 = vmax.f32 %v2750_v63, 0.0  ;;  %v2753_v0 = vadd.f32 %v4392_v20, %v2752_v61 }
 0x231   : > { %2964 = vst.msk [vmem:[%s4402_s17 + $0x1c] sm:$0xf] %vm2956_vm0, %v3346_v49  ;;  %v3361_v1 = vpack.c.bf16 %v2818_v51, %v2818_v51  ;;  %v2819_v2 = vmax.f32 %v2761_v57, 0.0 }
 0x232   : > { %2962 = vst.msk [vmem:[%s4402_s17 + $0x14] sm:$0xf] %vm2956_vm0, %v3344_v39  ;;  %v3359_v3 = vpack.c.bf16 %v2816_v62, %v2816_v62  ;;  %v2817_v4 = vmax.f32 %v2753_v0, 0.0 }
 0x233   : > { %2979 = vst.msk [vmem:[%s4402_s17 + $0x58] sm:$0xf] %vm2956_vm0, %v3361_v1  ;;  %v3362_v60 = vpack.c.bf16 %v2819_v2, %v2819_v2 }
 0x234   : > { %2977 = vst.msk [vmem:[%s4402_s17 + $0x50] sm:$0xf] %vm2956_vm0, %v3359_v3  ;;  %v3360_v6 = vpack.c.bf16 %v2817_v4, %v2817_v4 }
 0x235   : > { %2980 = vst.msk [vmem:[%s4402_s17 + $0x5c] sm:$0xf] %vm2956_vm0, %v3362_v60 }
 0x236   : > { %2978 = vst.msk [vmem:[%s4402_s17 + $0x54] sm:$0xf] %vm2956_vm0, %v3360_v6 }
 0x240   : > { %v3412_v54 = vpop.f32.mrb[8].mxu0 }
 0x241   : > { %v2710_v7 = vadd.f32 %v3412_v54, %v4392_v20  ;;  %v2701_v38 = vpop.f32.mrb[9].mxu0 }
 0x242   : > { %v2702_v8 = vadd.f32 %v4392_v20, %v2701_v38  ;;  %v3413_v11 = vpop.f32.mrb[10].mxu0 }
 0x243   : > { %v2806_v32 = vmax.f32 %v2710_v7, 0.0  ;;  %v2713_v12 = vadd.f32 %v3413_v11, %v4392_v20  ;;  %v2704_v5 = vpop.f32.mrb[11].mxu0 }
 0x244   : > { %v2804_v14 = vmax.f32 %v2702_v8, 0.0  ;;  %v2705_v15 = vadd.f32 %v4392_v20, %v2704_v5  ;;  %v3428_v18 = vpop.f32.mrb[8].mxu1 }
 0x245   : > { %v3349_v16 = vpack.c.bf16 %v2806_v32, %v2806_v32  ;;  %v2807_v17 = vmax.f32 %v2713_v12, 0.0  ;;  %v2774_v25 = vadd.f32 %v3428_v18, %v4392_v20  ;;  %v2765_v10 = vpop.f32.mrb[9].mxu1 }
 0x246   : > { %v3347_v24 = vpack.c.bf16 %v2804_v14, %v2804_v14  ;;  %v2805_v58 = vmax.f32 %v2705_v15, 0.0  ;;  %v2766_v56 = vadd.f32 %v4392_v20, %v2765_v10  ;;  %v3429_v13 = vpop.f32.mrb[10].mxu1 }
 0x247   : > { %2967 = vst.msk [vmem:[%s4402_s17 + $0x28] sm:$0xf] %vm2956_vm0, %v3349_v16  ;;  %v3350_v27 = vpack.c.bf16 %v2807_v17, %v2807_v17  ;;  %v2822_v30 = vmax.f32 %v2774_v25, 0.0  ;;  %v2777_v31 = vadd.f32 %v3429_v13, %v4392_v20  ;;  %v2768_v21 = vpop.f32.mrb[11].mxu1 }
 0x248   : > { %2965 = vst.msk [vmem:[%s4402_s17 + $0x20] sm:$0xf] %vm2956_vm0, %v3347_v24  ;;  %v3348_v29 = vpack.c.bf16 %v2805_v58, %v2805_v58  ;;  %v2820_v22 = vmax.f32 %v2766_v56, 0.0  ;;  %v2769_v53 = vadd.f32 %v4392_v20, %v2768_v21 }
 0x249   : > { %2968 = vst.msk [vmem:[%s4402_s17 + $0x2c] sm:$0xf] %vm2956_vm0, %v3350_v27  ;;  %v3365_v33 = vpack.c.bf16 %v2822_v30, %v2822_v30  ;;  %v2823_v23 = vmax.f32 %v2777_v31, 0.0 }
 0x24a   : > { %2966 = vst.msk [vmem:[%s4402_s17 + $0x24] sm:$0xf] %vm2956_vm0, %v3348_v29  ;;  %v3363_v35 = vpack.c.bf16 %v2820_v22, %v2820_v22  ;;  %v2821_v36 = vmax.f32 %v2769_v53, 0.0 }
 0x24b   : > { %2983 = vst.msk [vmem:[%s4402_s17 + $0x68] sm:$0xf] %vm2956_vm0, %v3365_v33  ;;  %v3366_v19 = vpack.c.bf16 %v2823_v23, %v2823_v23 }
 0x24c   : > { %2981 = vst.msk [vmem:[%s4402_s17 + $0x60] sm:$0xf] %vm2956_vm0, %v3363_v35  ;;  %v3364_v37 = vpack.c.bf16 %v2821_v36, %v2821_v36  ;;  %v3416_v52 = vpop.f32.mrb[12].mxu0  ;;  %v3432_v40 = vpop.f32.mrb[12].mxu1 }
 0x24d   : > { %2984 = vst.msk [vmem:[%s4402_s17 + $0x6c] sm:$0xf] %vm2956_vm0, %v3366_v19  ;;  %v2726_v34 = vadd.f32 %v3416_v52, %v4392_v20  ;;  %v2790_v59 = vadd.f32 %v3432_v40, %v4392_v20  ;;  %v2717_v46 = vpop.f32.mrb[13].mxu0  ;;  %v2781_v41 = vpop.f32.mrb[13].mxu1 }
 0x24e   : > { %2982 = vst.msk [vmem:[%s4402_s17 + $0x64] sm:$0xf] %vm2956_vm0, %v3364_v37  ;;  %v2718_v28 = vadd.f32 %v4392_v20, %v2717_v46  ;;  %v2782_v26 = vadd.f32 %v4392_v20, %v2781_v41  ;;  %v3417_v42 = vpop.f32.mrb[14].mxu0  ;;  %v3433_v43 = vpop.f32.mrb[14].mxu1 }
 0x24f   : > { %v2810_v9 = vmax.f32 %v2726_v34, 0.0  ;;  %v2826_v44 = vmax.f32 %v2790_v59, 0.0  ;;  %v2729_v45 = vadd.f32 %v3417_v42, %v4392_v20  ;;  %v2793_v47 = vadd.f32 %v3433_v43, %v4392_v20  ;;  %v2720_v55 = vpop.f32.mrb[15].mxu0  ;;  %v2784_v48 = vpop.f32.mrb[15].mxu1 }
 0x250   : > { %v2808_v49 = vmax.f32 %v2718_v28, 0.0  ;;  %v2824_v63 = vmax.f32 %v2782_v26, 0.0  ;;  %v2721_v50 = vadd.f32 %v4392_v20, %v2720_v55  ;;  %v2785_v39 = vadd.f32 %v4392_v20, %v2784_v48 }
 0x251   : > { %v3353_v51 = vpack.c.bf16 %v2810_v9, %v2810_v9  ;;  %v3369_v57 = vpack.c.bf16 %v2826_v44, %v2826_v44  ;;  %v2811_v61 = vmax.f32 %v2729_v45, 0.0  ;;  %v2827_v62 = vmax.f32 %v2793_v47, 0.0 }
 0x252   : > { %v3351_v0 = vpack.c.bf16 %v2808_v49, %v2808_v49  ;;  %v3367_v1 = vpack.c.bf16 %v2824_v63, %v2824_v63  ;;  %v2809_v2 = vmax.f32 %v2721_v50, 0.0  ;;  %v2825_v3 = vmax.f32 %v2785_v39, 0.0 }
 0x253   : > { %2971 = vst.msk [vmem:[%s4402_s17 + $0x38] sm:$0xf] %vm2956_vm0, %v3353_v51  ;;  %2987 = vst.msk [vmem:[%s4402_s17 + $0x78] sm:$0xf] %vm2956_vm0, %v3369_v57  ;;  %v3354_v4 = vpack.c.bf16 %v2811_v61, %v2811_v61  ;;  %v3370_v60 = vpack.c.bf16 %v2827_v62, %v2827_v62 }
 0x254   : > { %2969 = vst.msk [vmem:[%s4402_s17 + $0x30] sm:$0xf] %vm2956_vm0, %v3351_v0  ;;  %2985 = vst.msk [vmem:[%s4402_s17 + $0x70] sm:$0xf] %vm2956_vm0, %v3367_v1  ;;  %v3352_v20 = vpack.c.bf16 %v2809_v2, %v2809_v2  ;;  %v3368_v6 = vpack.c.bf16 %v2825_v3, %v2825_v3 }
 0x255   : > { %2972 = vst.msk [vmem:[%s4402_s17 + $0x3c] sm:$0xf] %vm2956_vm0, %v3354_v4  ;;  %2988 = vst.msk [vmem:[%s4402_s17 + $0x7c] sm:$0xf] %vm2956_vm0, %v3370_v60 }
 0x256   : > { %2970 = vst.msk [vmem:[%s4402_s17 + $0x34] sm:$0xf] %vm2956_vm0, %v3352_v20  ;;  %2986 = vst.msk [vmem:[%s4402_s17 + $0x74] sm:$0xf] %vm2956_vm0, %v3368_v6 }
 0x257 PF: > { %s13_s12 = sadd.s32 1, %s3612_s12  }
 0x258   : > { %p10_p4 = scmp.ge.s32.totalorder %s13_s12, 4  }
 0x25a   :  { %12 = sbr.rel (!%p10_p4) target bundleno = 1 (0x1), region = 64 }

// kernel: bottleneck_forward.9
= control target key start
LH: loop header
LB: loop body
LE: loop exit
PB: predicated region body
PF: predicated region fallthrough
CT: control target
= control target key end

     0   :  { %s4851_s0 = inlined_call_operand.vmem [shape: f32[2,16,16,32], index: 0, kind: input, shape index: {}]   ;;  %s4852_s1 = inlined_call_operand.vmem [shape: f32[2,1,32], index: 1, kind: input, shape index: {}]   ;;  %s4853_s2 = inlined_call_operand.vmem [shape: f32[2,16,16,32], index: 2, kind: input, shape index: {}]   ;;  %s4854_s3 = inlined_call_operand.vmem [shape: f32[2,7,7], index: 3, kind: input, shape index: {}]   ;;  %s4855_s4 = inlined_call_operand.<no memory space> [shape: f32[1], index: 4, kind: input, shape index: {}]   ;;  %s4856_s5 = inlined_call_operand.hbm [shape: f32[2,16,16,32], index: 5, kind: output, shape index: {}]  }
   0x1   :  { %4907 = sst [smem:[#allocation23_spill]] %s4851_s0 }
   0x2   :  { %4908 = sst [smem:[#allocation24_spill]] %s4852_s1 }
   0x3   :  { %4909 = sst [smem:[#allocation25_spill]] %s4854_s3 }
   0x4   :  { %10 = sst [smem:[#allocation3]] %s4855_s4 }
   0x5   :  { %11 = vsyncpa [#allocation6], 0 }
   0x6   :  { %12 = vsyncpa [#allocation5], 0 }
   0x7   :  { %14 = vsyncpa [#allocation5 + $0x1], 0  ;;  %s3046_s20 = smov 0   ;;  %s3048_s21 = smov 0  }
   0x8   :  { %s3050_s22 = smov 0   ;;  %s3052_s23 = smov 0  }
   0x9 LB: > { %4910 = sst [smem:[#allocation10_spill]] %s2986_s20  ;;  %s3067_s4 = sadd.s32 4294967295, %s2998_s23   ;;  %s2998_s23 = sphi %s3052_s23, %s4971_s23   ;;  %s2994_s22 = sphi %s3050_s22, %s4973_s22   ;;  %s2990_s21 = sphi %s3048_s21, %s4975_s21   ;;  %s2986_s20 = sphi %s3046_s20, %s4974_s20  }
   0xa   : > { %4911 = sst [smem:[#allocation11_spill]] %s2994_s22  ;;  %s2729_s24 = sadd.s32 4294967294, %s2998_s23  }
   0xb   : > { %s3071_s25 = sadd.s32 1, %s2998_s23   ;;  %s147_s26 = sadd.s32 1, %s2994_s22 }
   0xc   : > { %4912 = sst [smem:[#allocation12_spill]] %s3071_s25  ;;  %s144_s27 = ssub.s32 %s2998_s23, %s3071_s25 }
   0xd   : > { %p157_p0 = scmp.ne.s32.totalorder %s2994_s22, %s2990_s21  ;;  %p145_p1 = scmp.eq.s32.totalorder %s144_s27, 0 }
   0xe   : > { %p158_p2 = scmp.eq.s32.totalorder %s3067_s4, 1  ;;  %p163_p3 = scmp.ne.s32.totalorder %s2990_s21, %s2986_s20 }
   0xf   : > { %p164_p4 = scmp.eq.s32.totalorder %s2729_s24, 1  ;;  %p2730_p7 = scmp.ge.s32.totalorder %s2998_s23, 1 }
  0x10   : > { %s3082_s28 = scalar_select %p145_p1, %s2994_s22, %s147_s26  }
  0x11   : > { %p3084_p5 = por %p158_p2, %p157_p0  ;;  %p3088_p6 = por %p164_p4, %p163_p3 }
  0x12   : > { %4913 = sst [smem:[#allocation13_spill]] %s3082_s28  ;;  %p171_p8 = scmp.lt.s32.totalorder %s2998_s23, 3 }
  0x13   : > { %s4915_s30 = scalar_select %p3088_p6, 1, 0 }
  0x14   : > { %p2862_p9 = scmp.eq.s32.totalorder %s3067_s4, 0  ;;  %p3095_p10 = pnand %p2730_p7, %p171_p8 }
  0x15   : > { %4916 = sst [smem:[#allocation14_spill]] %s4915_s30  ;;  %s4918_s3 = sld [smem:[#allocation25_spill]] }
  0x16   : > { %p2854_p11 = pneg %p3095_p10 }
  0x18   : > { %p3106_p12 = pnand %p2862_p9, %p2854_p11 }
  0x1a   : > { %p2919_p0 = pneg %p3106_p12 }
  0x1b   : > { %s183_s9 = sshll.u32 %s4918_s3, 4  ;;  %s184_s9 = int_to_ptr.vmem [resolvable:$true] %s183_s9 }
  0x1c   : > { %s2917_s11 = scalar_lea.vmem %s184_s9, 256  ;;  %p2925_p3 = scmp.lt.s32.totalorder %s184_s9, %s184_s9 }
  0x1d   : > { %p2918_p13 = scmp.ne.s32.totalorder %s184_s9, %s2917_s11  ;;  %p2926_p4 = scmp.lt.s32.totalorder %s2917_s11, %s2917_s11 }
  0x1f   : > { %p2920_p1 = pnand %p2919_p0, %p2918_p13  ;;  %p2927_p7 = por %p2926_p4, %p2925_p3 }
  0x21   : > { %p2921_p2 = pneg %p2920_p1 }
  0x23   : > { %p2928_p8 = pnand %p2927_p7, %p2921_p2 }
  0x25   : > { %2931 = shalt.err (!%p2928_p8)
}
  0x26   : > { %s3000_s12 = smov [#allocation4]   ;;  %s3001_s13 = smov 128  }
  0x27   : > { %s3002_s14 = smov 8   ;;  %224 = sbr.rel (%p3095_p10) target bundleno = 922 (0x39a), region = 40 }
  0x28   : > { %2857 = dma.vmem_to_smem (!%p3106_p12), %s184_s9, 256, %s3000_s12, [#allocation6], %s3001_s13, %s3001_s13, %s3002_s14  }
  0x2e   : > { %2977 = dma.done.wait (%p2862_p9), [#allocation6], 256  }
  0x2f   : > { %2979 = vsyncadd (%p2862_p9), [#allocation6], 4294967040 }
  0x30   : > { %230 = sfence }
  0x31   : > { %p261_p11 = scmp.lt.s32.totalorder %s3067_s4, 1  ;;  %s4920_s1 = sld [smem:[#allocation24_spill]]  ;;  %vm353_vm0 = vcmask 261120   ;;  %vm345_vm1 = vcmask 179200   ;;  %vm348_vm2 = vcmask 177152   ;;  %vm494_vm3 = vcmask 154712  }
  0x32   : > { %s4921_s0 = sld [smem:[#allocation23_spill]]  ;;  %vm631_vm4 = vcmask 1041409   ;;  %vm633_vm5 = vcmask 1042434   ;;  %vm635_vm6 = vcmask 1043459   ;;  %vm637_vm7 = vcmask 1044484   ;;  %s3432_s6 = sld [smem:[#allocation4 + $0x1]] }
  0x33   : > { %s3122_s15 = scalar_select %p261_p11, %s3067_s4, 1  ;;  %vm639_vm8 = vcmask 1045509   ;;  %vm641_vm9 = vcmask 1046534   ;;  %vm643_vm10 = vcmask 1047559   ;;  %vm654_vm11 = vcmask 154648  }
  0x34   : > { %s3436_s7 = sld [smem:[#allocation4 + $0x3]]  ;;  %s3439_s8 = sld [smem:[#allocation4 + $0x4]] }
  0x35   : > { %s4857_s16 = sshll.u32 %s3122_s15, 8  ;;  %s3447_s9 = sld [smem:[#allocation4 + $0x5]] }
  0x36   : > { %s4870_s10 = smov 127   ;;  %s3454_s11 = sld [smem:[#allocation4 + $0x6]] }
  0x37   : > { %s268_s19 = scalar_lea.vmem %s4920_s1, %s3122_s15  ;;  %s4868_s12 = smov 125  }
  0x38   : > { %s3134_s27 = scalar_lea.vmem %s4921_s0, %s4857_s16  ;;  %v3136_v0 = vld [vmem:[%s268_s19] ss:$0 sm:$0xff]  ;;  %s3463_s13 = sld [smem:[#allocation4 + $0x81]] }
  0x39   : > { %v276_v1 = vld [vmem:[%s3134_s27 + $0x10] sm:$0xff]  ;;  %v274_v2 = vld [vmem:[%s3134_s27] sm:$0xff]  ;;  %v277_v3 = vld [vmem:[%s3134_s27 + $0x18] sm:$0xff]  ;;  %s4866_s14 = smov 124   ;;  %s3481_s17 = sld [smem:[#allocation4 + $0x82]] }
  0x3a   : > { %v3142_v4 = vmul.f32 %v3136_v0, %v276_v1  ;;  %v3145_v5 = vmul.f32 %v3136_v0, %v274_v2  ;;  %v3148_v6 = vmul.f32 %v3136_v0, %v277_v3  ;;  %v275_v7 = vld [vmem:[%s3134_s27 + $0x8] sm:$0xff]  ;;  %v278_v10 = vld [vmem:[%s3134_s27 + $0x20] sm:$0xff]  ;;  %v281_v17 = vld [vmem:[%s3134_s27 + $0x38] sm:$0xff]  ;;  %s4860_s18 = smov 123   ;;  %s3499_s19 = sld [smem:[#allocation4 + $0x83]] }
  0x3b   : > { %v3152_v8 = vmul.f32 %v3136_v0, %v275_v7  ;;  %v279_v9 = vld [vmem:[%s3134_s27 + $0x28] sm:$0xff]  ;;  %v3168_v16 = vmul.f32 %v3136_v0, %v278_v10  ;;  %v280_v18 = vld [vmem:[%s3134_s27 + $0x30] sm:$0xff]  ;;  %v3177_v21 = vmul.f32 %v3136_v0, %v281_v17  ;;  %v282_v24 = vld [vmem:[%s3134_s27 + $0x40] sm:$0xff]  ;;  %s4858_s24 = smov 122   ;;  %s3514_s26 = sld [smem:[#allocation4 + $0x84]] }
  0x3c   : > { %v360_v11 = vsel %vm353_vm0, %v3142_v4, -inf  ;;  %v354_v12 = vsel %vm353_vm0, %v3145_v5, -inf  ;;  %v363_v13 = vsel %vm353_vm0, %v3148_v6, -inf  ;;  %v3165_v15 = vmul.f32 %v3136_v0, %v279_v9  ;;  %v283_v23 = vld [vmem:[%s3134_s27 + $0x48] sm:$0xff]  ;;  %v285_v29 = vld [vmem:[%s3134_s27 + $0x58] sm:$0xff]  ;;  %v284_v30 = vld [vmem:[%s3134_s27 + $0x50] sm:$0xff] }
  0x3d   : > { %361 = vmax.xlane.f32.xlu1 %v360_v11  ;;  %355 = vmax.xlane.f32.xlu0 %v354_v12  ;;  %v357_v14 = vsel %vm353_vm0, %v3152_v8, -inf  ;;  %v366_v20 = vsel %vm353_vm0, %v3168_v16, -inf  ;;  %v3180_v22 = vmul.f32 %v3136_v0, %v280_v18  ;;  %v375_v25 = vsel %vm353_vm0, %v3177_v21, -inf  ;;  %v287_v35 = vld [vmem:[%s3134_s27 + $0x68] sm:$0xff]  ;;  %v286_v36 = vld [vmem:[%s3134_s27 + $0x60] sm:$0xff]  ;;  %v289_v41 = vld [vmem:[%s3134_s27 + $0x78] sm:$0xff] }
  0x3e   : > { %v369_v19 = vsel %vm353_vm0, %v3165_v15, -inf  ;;  %v3189_v27 = vmul.f32 %v3136_v0, %v283_v23  ;;  %v3192_v28 = vmul.f32 %v3136_v0, %v282_v24  ;;  %v3201_v33 = vmul.f32 %v3136_v0, %v285_v29  ;;  %v288_v42 = vld [vmem:[%s3134_s27 + $0x70] sm:$0xff]  ;;  %v291_v47 = vld [vmem:[%s3134_s27 + $0x88] sm:$0xff]  ;;  %v290_v48 = vld [vmem:[%s3134_s27 + $0x80] sm:$0xff]  ;;  %s4862_s16 = smov 126   ;;  %s3593_s0 = sld [smem:[#allocation4 + $0x104]] }
  0x3f   : > { %v372_v26 = vsel %vm353_vm0, %v3180_v22, -inf  ;;  %v3204_v34 = vmul.f32 %v3136_v0, %v284_v30  ;;  %v3213_v39 = vmul.f32 %v3136_v0, %v287_v35  ;;  %v3216_v40 = vmul.f32 %v3136_v0, %v286_v36  ;;  %v293_v53 = vld [vmem:[%s3134_s27 + $0x98] sm:$0xff]  ;;  %v292_v54 = vld [vmem:[%s3134_s27 + $0x90] sm:$0xff]  ;;  %v295_v59 = vld [vmem:[%s3134_s27 + $0xa8] sm:$0xff]  ;;  %s4933_s1 = smov 127   ;;  %s4934_s3 = smov 125  }
  0x40   : > { %v381_v31 = vsel %vm353_vm0, %v3189_v27, -inf  ;;  %v378_v32 = vsel %vm353_vm0, %v3192_v28, -inf  ;;  %v387_v37 = vsel %vm353_vm0, %v3201_v33, -inf  ;;  %v3225_v45 = vmul.f32 %v3136_v0, %v289_v41  ;;  %v294_v60 = vld [vmem:[%s3134_s27 + $0xa0] sm:$0xff]  ;;  %v297_v2 = vld [vmem:[%s3134_s27 + $0xb8] sm:$0xff]  ;;  %v296_v3 = vld [vmem:[%s3134_s27 + $0xb0] sm:$0xff] }
  0x41   : > { %364 = vmax.xlane.f32.xlu1 %v363_v13  ;;  %358 = vmax.xlane.f32.xlu0 %v357_v14  ;;  %v384_v38 = vsel %vm353_vm0, %v3204_v34, -inf  ;;  %v393_v43 = vsel %vm353_vm0, %v3213_v39, -inf  ;;  %v390_v44 = vsel %vm353_vm0, %v3216_v40, -inf  ;;  %v3228_v46 = vmul.f32 %v3136_v0, %v288_v42  ;;  %v299_v12 = vld [vmem:[%s3134_s27 + $0xc8] sm:$0xff]  ;;  %v298_v13 = vld [vmem:[%s3134_s27 + $0xc0] sm:$0xff]  ;;  %v300_v23 = vld [vmem:[%s3134_s27 + $0xd0] sm:$0xff] }
  0x42   : > { %v399_v49 = vsel %vm353_vm0, %v3225_v45, -inf  ;;  %v3237_v51 = vmul.f32 %v3136_v0, %v291_v47  ;;  %v3240_v52 = vmul.f32 %v3136_v0, %v290_v48  ;;  %v3249_v57 = vmul.f32 %v3136_v0, %v293_v53  ;;  %v305_v41 = vld [vmem:[%s3134_s27 + $0xf8] sm:$0xff]  ;;  %v304_v42 = vld [vmem:[%s3134_s27 + $0xf0] sm:$0xff]  ;;  %s4935_s28 = smov 124   ;;  %s3638_s22 = sld [smem:[#allocation4 + $0x181]] }
  0x43   : > { %v396_v50 = vsel %vm353_vm0, %v3228_v46, -inf  ;;  %v3252_v58 = vmul.f32 %v3136_v0, %v292_v54  ;;  %v3261_v63 = vmul.f32 %v3136_v0, %v295_v59  ;;  %v3264_v1 = vmul.f32 %v3136_v0, %v294_v60  ;;  %s3926_s25 = sld [smem:[#allocation3]]  ;;  %s3935_s30 = sld [smem:[#allocation4 + $0x304]] }
  0x44   : > { %v405_v55 = vsel %vm353_vm0, %v3237_v51, -inf  ;;  %v402_v56 = vsel %vm353_vm0, %v3240_v52, -inf  ;;  %v411_v61 = vsel %vm353_vm0, %v3249_v57, -inf  ;;  %v3273_v10 = vmul.f32 %v3136_v0, %v297_v2  ;;  %s4142_s20 = sld [smem:[#allocation4 + $0x486]] }
  0x45   : > { %370 = vmax.xlane.f32.xlu1 %v369_v19  ;;  %367 = vmax.xlane.f32.xlu0 %v366_v20  ;;  %v408_v62 = vsel %vm353_vm0, %v3252_v58, -inf  ;;  %v417_v7 = vsel %vm353_vm0, %v3261_v63, -inf  ;;  %v414_v9 = vsel %vm353_vm0, %v3264_v1, -inf  ;;  %v3276_v11 = vmul.f32 %v3136_v0, %v296_v3  ;;  %v301_v20 = vld [vmem:[%s3134_s27 + $0xd8] sm:$0xff] }
  0x46   : > { %v423_v14 = vsel %vm353_vm0, %v3273_v10, -inf  ;;  %v3285_v18 = vmul.f32 %v3136_v0, %v299_v12  ;;  %v3288_v19 = vmul.f32 %v3136_v0, %v298_v13  ;;  %v3003_v24 = vmov 0.0  }
  0x47   : > { %v420_v17 = vsel %vm353_vm0, %v3276_v11, -inf  ;;  %346 = vst.msk [vmem:[#allocation2] sm:$0xff] %vm345_vm1, %v3003_v24  ;;  %347 = vst.msk [vmem:[#allocation2 + $0x8] sm:$0xff] %vm345_vm1, %v3003_v24  ;;  %v3297_v29 = vmul.f32 %v3136_v0, %v301_v20  ;;  %v3300_v30 = vmul.f32 %v3136_v0, %v300_v23  ;;  %v3321_v47 = vmul.f32 %v3136_v0, %v305_v41 }
  0x48   : > { %4922 = vst [vmem:[#allocation15_spill] sm:$0xff] %v3285_v18  ;;  %4923 = vst [vmem:[#allocation16_spill] sm:$0xff] %v3288_v19  ;;  %v3324_v48 = vmul.f32 %v3136_v0, %v304_v42  ;;  %v660_v53 = vsel %vm353_vm0, %v3152_v8, 0.0  ;;  %v657_v54 = vsel %vm353_vm0, %v3145_v5, 0.0  ;;  %v669_v59 = vsel %vm353_vm0, %v3168_v16, 0.0 }
  0x49   : > { %376 = vmax.xlane.f32.xlu1 %v375_v25  ;;  %373 = vmax.xlane.f32.xlu0 %v372_v26  ;;  %350 = vst.msk [vmem:[#allocation2 + $0x18] sm:$0xff] %vm345_vm1, %v3003_v24  ;;  %351 = vst.msk [vmem:[#allocation2 + $0x20] sm:$0xff] %vm345_vm1, %v3003_v24  ;;  %v429_v25 = vsel %vm353_vm0, %v3285_v18, -inf  ;;  %v426_v26 = vsel %vm353_vm0, %v3288_v19, -inf  ;;  %v435_v35 = vsel %vm353_vm0, %v3297_v29, -inf  ;;  %v432_v36 = vsel %vm353_vm0, %v3300_v30, -inf }
  0x4a   : > { %4924 = vst [vmem:[#allocation17_spill] sm:$0xff] %v3297_v29  ;;  %4925 = vst [vmem:[#allocation18_spill] sm:$0xff] %v3300_v30  ;;  %v678_v60 = vsel %vm353_vm0, %v3177_v21, 0.0  ;;  %v681_v2 = vsel %vm353_vm0, %v3192_v28, 0.0  ;;  %v690_v3 = vsel %vm353_vm0, %v3201_v33, 0.0  ;;  %v693_v12 = vsel %vm353_vm0, %v3216_v40, 0.0 }
  0x4b   : > { %4928 = vst [vmem:[#allocation21_spill] sm:$0xff] %v3321_v47  ;;  %4929 = vst [vmem:[#allocation22_spill] sm:$0xff] %v3324_v48  ;;  %v702_v13 = vsel %vm353_vm0, %v3225_v45, 0.0  ;;  %v705_v20 = vsel %vm353_vm0, %v3240_v52, 0.0  ;;  %v714_v23 = vsel %vm353_vm0, %v3249_v57, 0.0  ;;  %v738_v41 = vsel %vm353_vm0, %v3297_v29, 0.0 }
  0x4c   : > { %349 = vst.msk [vmem:[#allocation2 + $0x10] sm:$0x3f] %vm348_vm2, %v3003_v24  ;;  %352 = vst.msk [vmem:[#allocation2 + $0x28] sm:$0x3f] %vm348_vm2, %v3003_v24  ;;  %v711_v24 = vsel %vm353_vm0, %v3252_v58, 0.0  ;;  %v735_v42 = vsel %vm353_vm0, %v3300_v30, 0.0 }
  0x4d   : > { %382 = vmax.xlane.f32.xlu1 %v381_v31  ;;  %379 = vmax.xlane.f32.xlu0 %v378_v32  ;;  %v303_v31 = vld [vmem:[%s3134_s27 + $0xe8] sm:$0xff]  ;;  %v302_v32 = vld [vmem:[%s3134_s27 + $0xe0] sm:$0xff]  ;;  %s3523_s27 = sld [smem:[#allocation4 + $0x85]] }
  0x51   : > { %388 = vmax.xlane.f32.xlu1 %v387_v37  ;;  %385 = vmax.xlane.f32.xlu0 %v384_v38  ;;  %v3309_v37 = vmul.f32 %v3136_v0, %v303_v31  ;;  %v3312_v38 = vmul.f32 %v3136_v0, %v302_v32  ;;  %v666_v0 = vsel %vm353_vm0, %v3148_v6, 0.0  ;;  %v726_v31 = vsel %vm353_vm0, %v3273_v10, 0.0 }
  0x52   : > { %v723_v32 = vsel %vm353_vm0, %v3276_v11, 0.0 }
  0x53   : > { %4926 = vst [vmem:[#allocation19_spill] sm:$0xff] %v3309_v37  ;;  %4927 = vst [vmem:[#allocation20_spill] sm:$0xff] %v3312_v38 }
  0x55   : > { %394 = vmax.xlane.f32.xlu1 %v393_v43  ;;  %391 = vmax.xlane.f32.xlu0 %v390_v44  ;;  %v441_v43 = vsel %vm353_vm0, %v3309_v37, -inf  ;;  %v438_v44 = vsel %vm353_vm0, %v3312_v38, -inf }
  0x59   : > { %400 = vmax.xlane.f32.xlu1 %v399_v49  ;;  %397 = vmax.xlane.f32.xlu0 %v396_v50  ;;  %v447_v49 = vsel %vm353_vm0, %v3321_v47, -inf  ;;  %v444_v50 = vsel %vm353_vm0, %v3324_v48, -inf }
  0x5d   : > { %406 = vmax.xlane.f32.xlu1 %v405_v55  ;;  %403 = vmax.xlane.f32.xlu0 %v402_v56  ;;  %v663_v55 = vsel %vm353_vm0, %v3142_v4, 0.0  ;;  %v672_v56 = vsel %vm353_vm0, %v3165_v15, 0.0 }
  0x61   : > { %412 = vmax.xlane.f32.xlu1 %v411_v61  ;;  %409 = vmax.xlane.f32.xlu0 %v408_v62  ;;  %v675_v61 = vsel %vm353_vm0, %v3180_v22, 0.0  ;;  %v684_v62 = vsel %vm353_vm0, %v3189_v27, 0.0 }
  0x65   : > { %418 = vmax.xlane.f32.xlu1 %v417_v7  ;;  %415 = vmax.xlane.f32.xlu0 %v414_v9  ;;  %v687_v7 = vsel %vm353_vm0, %v3204_v34, 0.0  ;;  %v696_v9 = vsel %vm353_vm0, %v3213_v39, 0.0 }
  0x69   : > { %424 = vmax.xlane.f32.xlu1 %v423_v14  ;;  %421 = vmax.xlane.f32.xlu0 %v420_v17  ;;  %v699_v14 = vsel %vm353_vm0, %v3228_v46, 0.0  ;;  %v708_v17 = vsel %vm353_vm0, %v3237_v51, 0.0 }
  0x6d   : > { %430 = vmax.xlane.f32.xlu1 %v429_v25  ;;  %427 = vmax.xlane.f32.xlu0 %v426_v26  ;;  %v720_v25 = vsel %vm353_vm0, %v3261_v63, 0.0  ;;  %v717_v26 = vsel %vm353_vm0, %v3264_v1, 0.0 }
  0x71   : > { %436 = vmax.xlane.f32.xlu1 %v435_v35  ;;  %433 = vmax.xlane.f32.xlu0 %v432_v36  ;;  %v732_v35 = vsel %vm353_vm0, %v3285_v18, 0.0  ;;  %v729_v36 = vsel %vm353_vm0, %v3288_v19, 0.0 }
  0x75   : > { %442 = vmax.xlane.f32.xlu1 %v441_v43  ;;  %439 = vmax.xlane.f32.xlu0 %v438_v44  ;;  %v744_v43 = vsel %vm353_vm0, %v3309_v37, 0.0  ;;  %v741_v44 = vsel %vm353_vm0, %v3312_v38, 0.0 }
  0x79   : > { %448 = vmax.xlane.f32.xlu1 %v447_v49  ;;  %445 = vmax.xlane.f32.xlu0 %v444_v50  ;;  %v750_v49 = vsel %vm353_vm0, %v3321_v47, 0.0  ;;  %v747_v50 = vsel %vm353_vm0, %v3324_v48, 0.0 }
  0x7d   : > { %661 = vadd.xlane.f32.xlu1 %v660_v53  ;;  %658 = vadd.xlane.f32.xlu0 %v657_v54 }
  0x81   : > { %667 = vadd.xlane.f32.xlu1 %v666_v0  ;;  %664 = vadd.xlane.f32.xlu0 %v663_v55 }
  0x85   : > { %673 = vadd.xlane.f32.xlu1 %v672_v56  ;;  %670 = vadd.xlane.f32.xlu0 %v669_v59  ;;  %v482_v56 = vlaneseq }
  0x89   : > { %679 = vadd.xlane.f32.xlu1 %v678_v60  ;;  %676 = vadd.xlane.f32.xlu0 %v675_v61  ;;  %v483_v61 = vand.u32 127, %v482_v56 }
  0x8d   : > { %685 = vadd.xlane.f32.xlu1 %v684_v62  ;;  %682 = vadd.xlane.f32.xlu0 %v681_v2  ;;  %v489_v62 = vadd.s32 4294967285, %v483_v61 }
  0x91   : > { %691 = vadd.xlane.f32.xlu1 %v690_v3  ;;  %688 = vadd.xlane.f32.xlu0 %v687_v7  ;;  %v484_v7 = vadd.s32 4294967293, %v483_v61 }
  0x95   : > { %697 = vadd.xlane.f32.xlu1 %v696_v9  ;;  %694 = vadd.xlane.f32.xlu0 %v693_v12  ;;  %v3394_v9 = vshrl.u32 %v482_v56, 7 }
  0x97   : > { %v3397_v12 = vsub.s32 %v489_v62, %v3394_v9 }
  0x99   : > { %703 = vadd.xlane.f32.xlu1 %v702_v13  ;;  %700 = vadd.xlane.f32.xlu0 %v699_v14 }
  0x9d   : > { %709 = vadd.xlane.f32.xlu1 %v708_v17  ;;  %706 = vadd.xlane.f32.xlu0 %v705_v20  ;;  %v3400_v17 = vsub.s32 %v484_v7, %v3394_v9 }
  0xa1   : > { %715 = vadd.xlane.f32.xlu1 %v714_v23  ;;  %712 = vadd.xlane.f32.xlu0 %v711_v24 }
  0xa5   : > { %721 = vadd.xlane.f32.xlu1 %v720_v25  ;;  %718 = vadd.xlane.f32.xlu0 %v717_v26 }
  0xa9   : > { %727 = vadd.xlane.f32.xlu1 %v726_v31  ;;  %724 = vadd.xlane.f32.xlu0 %v723_v32 }
  0xad   : > { %733 = vadd.xlane.f32.xlu1 %v732_v35  ;;  %730 = vadd.xlane.f32.xlu0 %v729_v36 }
  0xb1   : > { %739 = vadd.xlane.f32.xlu1 %v738_v41  ;;  %736 = vadd.xlane.f32.xlu0 %v735_v42 }
  0xb5   : > { %745 = vadd.xlane.f32.xlu1 %v744_v43  ;;  %742 = vadd.xlane.f32.xlu0 %v741_v44 }
  0xb9   : > { %751 = vadd.xlane.f32.xlu1 %v750_v49  ;;  %748 = vadd.xlane.f32.xlu0 %v747_v50 }
  0xca   : > { %v362_v53 = vpop.xlane.xlu1 %361  ;;  %v356_v54 = vpop.xlane.xlu0 %355 }
  0xcb   : > { %v499_v32 = vrot.slane %v362_v53, %v3400_v17  ;;  %v488_v35 = vrot.slane %v356_v54, %v3400_v17 }
  0xce   : > { %v365_v0 = vpop.xlane.xlu1 %364  ;;  %v359_v55 = vpop.xlane.xlu0 %358 }
  0xcf   : > { %v503_v20 = vrot.slane %v365_v0, %v3397_v12  ;;  %v493_v23 = vrot.slane %v359_v55, %v3397_v12 }
  0xd1   : > { %v504_v44 = vsel %vm494_vm3, %v503_v20, %v499_v32  ;;  %v495_v49 = vsel %vm494_vm3, %v493_v23, %v488_v35 }
  0xd2   : > { %v371_v59 = vpop.xlane.xlu1 %370  ;;  %v368_v60 = vpop.xlane.xlu0 %367  ;;  %v632_v61 = vsel %vm631_vm4, %v504_v44, %v495_v49  ;;  %v993_v44 = vstv %s3432_s6  ;;  %s3563_s6 = sld [smem:[#allocation4 + $0x102]] }
  0xd3   : > { %v512_v24 = vrot.slane %v371_v59, %v3397_v12  ;;  %v508_v25 = vrot.slane %v368_v60, %v3400_v17 }
  0xd5   : > { %v513_v53 = vsel %vm494_vm3, %v512_v24, %v508_v25 }
  0xd6   : > { %v377_v2 = vpop.xlane.xlu1 %376  ;;  %v374_v3 = vpop.xlane.xlu0 %373 }
  0xd7   : > { %v521_v36 = vrot.slane %v377_v2, %v3397_v12  ;;  %v517_v41 = vrot.slane %v374_v3, %v3400_v17  ;;  %v634_v2 = vsel %vm633_vm5, %v513_v53, %v632_v61 }
  0xd9   : > { %v522_v56 = vsel %vm494_vm3, %v521_v36, %v517_v41 }
  0xda   : > { %v383_v13 = vpop.xlane.xlu1 %382  ;;  %v380_v14 = vpop.xlane.xlu0 %379  ;;  %v636_v7 = vsel %vm635_vm6, %v522_v56, %v634_v2 }
  0xdb   : > { %v530_v42 = vrot.slane %v383_v13, %v3397_v12  ;;  %v526_v43 = vrot.slane %v380_v14, %v3400_v17 }
  0xdd   : > { %v531_v62 = vsel %vm494_vm3, %v530_v42, %v526_v43 }
  0xde   : > { %v389_v26 = vpop.xlane.xlu1 %388  ;;  %v386_v31 = vpop.xlane.xlu0 %385  ;;  %v638_v23 = vsel %vm637_vm7, %v531_v62, %v636_v7 }
  0xdf   : > { %v539_v50 = vrot.slane %v389_v26, %v3397_v12  ;;  %v535_v0 = vrot.slane %v386_v31, %v3400_v17 }
  0xe1   : > { %v540_v3 = vsel %vm494_vm3, %v539_v50, %v535_v0 }
  0xe2   : > { %v395_v54 = vpop.xlane.xlu1 %394  ;;  %v392_v55 = vpop.xlane.xlu0 %391  ;;  %v640_v26 = vsel %vm639_vm8, %v540_v3, %v638_v23 }
  0xe3   : > { %v548_v59 = vrot.slane %v395_v54, %v3397_v12  ;;  %v544_v60 = vrot.slane %v392_v55, %v3400_v17  ;;  %v1021_v54 = vstv %s3436_s7  ;;  %s3608_s7 = sld [smem:[#allocation4 + $0x105]] }
  0xe5   : > { %v549_v13 = vsel %vm494_vm3, %v548_v59, %v544_v60  ;;  %v1035_v60 = vstv %s3439_s8  ;;  %s3624_s8 = sld [smem:[#allocation4 + $0x106]] }
  0xe6   : > { %v401_v14 = vpop.xlane.xlu1 %400  ;;  %v398_v20 = vpop.xlane.xlu0 %397  ;;  %v642_v31 = vsel %vm641_vm9, %v549_v13, %v640_v26  ;;  %v1049_v13 = vstv %s3447_s9  ;;  %s3651_s9 = sld [smem:[#allocation4 + $0x182]] }
  0xe7   : > { %v557_v24 = vrot.slane %v401_v14, %v3397_v12  ;;  %v553_v25 = vrot.slane %v398_v20, %v3400_v17 }
  0xe9   : > { %v558_v32 = vsel %vm494_vm3, %v557_v24, %v553_v25 }
  0xea   : > { %v644_v35 = vsel %vm643_vm10, %v558_v32, %v642_v31  ;;  %v407_v36 = vpop.xlane.xlu1 %406  ;;  %v404_v41 = vpop.xlane.xlu0 %403 }
  0xeb   : > { %655 = vst.msk [vmem:[#allocation2 + $0x3] sm:$0xff] %vm654_vm11, %v644_v35  ;;  %v566_v25 = vrot.slane %v407_v36, %v3397_v12  ;;  %v562_v26 = vrot.slane %v404_v41, %v3400_v17 }
  0xee   : > { %v413_v42 = vpop.xlane.xlu1 %412  ;;  %v410_v43 = vpop.xlane.xlu0 %409 }
  0xef   : > { %v575_v3 = vrot.slane %v413_v42, %v3397_v12  ;;  %v571_v7 = vrot.slane %v410_v43, %v3400_v17 }
  0xf2   : > { %v3441_v49 = vld [vmem:[#allocation2] sm:$0xff]  ;;  %v419_v50 = vpop.xlane.xlu1 %418  ;;  %v416_v0 = vpop.xlane.xlu0 %415 }
  0xf3   : > { %v994_v53 = vmul.f32 %v993_v44, %v3441_v49  ;;  %v1022_v59 = vmul.f32 %v1021_v54, %v3441_v49  ;;  %v1036_v2 = vmul.f32 %v1035_v60, %v3441_v49  ;;  %v584_v14 = vrot.slane %v419_v50, %v3397_v12 }
  0xf4   : > { %v580_v20 = vrot.slane %v416_v0, %v3400_v17  ;;  %v1050_v43 = vmul.f32 %v1049_v13, %v3441_v49  ;;  %v576_v50 = vsel %vm494_vm3, %v575_v3, %v571_v7 }
  0xf5   : > { %998 = vrot.lane.b32.xlu0 %v994_v53, %s4870_s10  ;;  %v1063_v53 = vstv %s3454_s11  ;;  %s3665_s11 = sld [smem:[#allocation4 + $0x183]] }
  0xf6   : > { %v425_v55 = vpop.xlane.xlu1 %424  ;;  %v422_v56 = vpop.xlane.xlu0 %421  ;;  %v585_v41 = vsel %vm494_vm3, %v584_v14, %v580_v20  ;;  %v1064_v14 = vmul.f32 %v1063_v53, %v3441_v49  ;;  %v3494_v20 = vld [vmem:[#allocation2 + $0x1] sm:$0xff] }
  0xf7   : > { %v593_v31 = vrot.slane %v425_v55, %v3397_v12  ;;  %v589_v32 = vrot.slane %v422_v56, %v3400_v17 }
  0xf9   : > { %1026 = vrot.lane.b32.xlu0 %v1022_v59, %s4868_s12  ;;  %v567_v59 = vsel %vm494_vm3, %v566_v25, %v562_v26  ;;  %v1085_v25 = vstv %s3463_s13  ;;  %s3685_s13 = sld [smem:[#allocation4 + $0x184]] }
  0xfa   : > { %v431_v61 = vpop.xlane.xlu1 %430  ;;  %v428_v62 = vpop.xlane.xlu0 %427  ;;  %v645_v3 = vsel %vm631_vm4, %v576_v50, %v567_v59 }
  0xfb   : > { %v602_v35 = vrot.slane %v431_v61, %v3397_v12  ;;  %v598_v42 = vrot.slane %v428_v62, %v3400_v17  ;;  %v594_v61 = vsel %vm494_vm3, %v593_v31, %v589_v32 }
  0xfd   : > { %1040 = vrot.lane.b32.xlu0 %v1036_v2, %s4866_s14  ;;  %v603_v7 = vsel %vm494_vm3, %v602_v35, %v598_v42 }
  0xfe   : > { %v437_v23 = vpop.xlane.xlu1 %436  ;;  %v434_v24 = vpop.xlane.xlu0 %433 }
  0xff   : > { %v611_v0 = vrot.slane %v437_v23, %v3397_v12  ;;  %v607_v36 = vrot.slane %v434_v24, %v3400_v17  ;;  %v646_v23 = vsel %vm633_vm5, %v585_v41, %v645_v3  ;;  %v4865_v3 = vstv %s3499_s19 }
 0x100   : > { %v647_v26 = vsel %vm635_vm6, %v594_v61, %v646_v23 }
 0x101   : > { %1054 = vrot.lane.b32.xlu0 %v1050_v43, %s4860_s18  ;;  %v612_v24 = vsel %vm494_vm3, %v611_v0, %v607_v36  ;;  %v648_v42 = vsel %vm637_vm7, %v603_v7, %v647_v26  ;;  %v1086_v36 = vmul.f32 %v1085_v25, %v3494_v20  ;;  %s3532_s18 = sld [smem:[#allocation4 + $0x86]] }
 0x102   : > { %v443_v55 = vpop.xlane.xlu1 %442  ;;  %v440_v56 = vpop.xlane.xlu0 %439  ;;  %v649_v0 = vsel %vm639_vm8, %v612_v24, %v648_v42 }
 0x103   : > { %v620_v62 = vrot.slane %v443_v55, %v3397_v12  ;;  %v616_v2 = vrot.slane %v440_v56, %v3400_v17  ;;  %v1099_v56 = vstv %s3481_s17  ;;  %s3702_s17 = sld [smem:[#allocation4 + $0x185]] }
 0x105   : > { %v621_v31 = vsel %vm494_vm3, %v620_v62, %v616_v2  ;;  %1068 = vrot.lane.b32.xlu0 %v1064_v14, %s4858_s24  ;;  %v1100_v2 = vmul.f32 %v1099_v56, %v3494_v20  ;;  %s3526_s24 = sld [smem:[#allocation4 + $0x2]] }
 0x106   : > { %v449_v32 = vpop.xlane.xlu1 %448  ;;  %v446_v35 = vpop.xlane.xlu0 %445  ;;  %v650_v41 = vsel %vm641_vm9, %v621_v31, %v649_v0 }
 0x107   : > { %v629_v43 = vrot.slane %v449_v32, %v3397_v12  ;;  %v625_v50 = vrot.slane %v446_v35, %v3400_v17  ;;  %v1114_v32 = vmul.f32 %v4865_v3, %v3494_v20  ;;  %v4864_v35 = vstv %s3514_s26 }
 0x109   : > { %v630_v55 = vsel %vm494_vm3, %v629_v43, %v625_v50  ;;  %1090 = vrot.lane.b32.xlu0 %v1086_v36, %s4870_s10 }
 0x10a   : > { %v651_v59 = vsel %vm643_vm10, %v630_v55, %v650_v41  ;;  %v662_v61 = vpop.xlane.xlu1 %661  ;;  %v659_v62 = vpop.xlane.xlu0 %658 }
 0x10b   : > { %656 = vst.msk [vmem:[#allocation2 + $0xb] sm:$0xff] %vm654_vm11, %v651_v59  ;;  %v755_v7 = vmul.f32 0.03125, %v662_v61  ;;  %v754_v14 = vmul.f32 0.03125, %v659_v62  ;;  %v1128_v59 = vmul.f32 %v4864_v35, %v3494_v20  ;;  %v1141_v62 = vstv %s3523_s27  ;;  %s3766_s27 = sld [smem:[#allocation4 + $0x203]] }
 0x10d   : > { %1104 = vrot.lane.b32.xlu0 %v1100_v2, %s4862_s16  ;;  %v825_v42 = vrot.slane %v755_v7, %v3397_v12  ;;  %v821_v43 = vrot.slane %v754_v14, %v3400_v17  ;;  %s3544_s16 = sld [smem:[#allocation4 + $0x101]] }
 0x10e   : > { %v668_v23 = vpop.xlane.xlu1 %667  ;;  %v665_v24 = vpop.xlane.xlu0 %664 }
 0x10f   : > { %v757_v26 = vmul.f32 0.03125, %v668_v23  ;;  %v756_v31 = vmul.f32 0.03125, %v665_v24  ;;  %v826_v2 = vsel %vm494_vm3, %v825_v42, %v821_v43  ;;  %v1142_v42 = vmul.f32 %v1141_v62, %v3494_v20 }
 0x111   : > { %1118 = vrot.lane.b32.xlu0 %v1114_v32, %s4868_s12  ;;  %v834_v41 = vrot.slane %v757_v26, %v3397_v12  ;;  %v830_v55 = vrot.slane %v756_v31, %v3400_v17  ;;  %v1007_v26 = vstv %s3526_s24  ;;  %s4930_s24 = smov 123   ;;  %s3580_s12 = sld [smem:[#allocation4 + $0x103]] }
 0x112   : > { %v674_v50 = vpop.xlane.xlu1 %673  ;;  %v671_v0 = vpop.xlane.xlu0 %670  ;;  %v3537_v36 = vld [vmem:[#allocation2 + $0x8] sm:$0xff] }
 0x113   : > { %v759_v61 = vmul.f32 0.03125, %v674_v50  ;;  %v758_v7 = vmul.f32 0.03125, %v671_v0  ;;  %v995_v14 = vmul.f32 %v993_v44, %v3537_v36  ;;  %v835_v31 = vsel %vm494_vm3, %v834_v41, %v830_v55  ;;  %v3986_v38 = vld [vmem:[#allocation2 + $0xd] sm:$0xff] }
 0x114   : > { %v4872_v0 = vstv %s3532_s18  ;;  %v962_v41 = vsel %vm631_vm4, %v835_v31, %v826_v2 }
 0x115   : > { %1132 = vrot.lane.b32.xlu0 %v1128_v59, %s4866_s14  ;;  %v843_v32 = vrot.slane %v759_v61, %v3397_v12  ;;  %v839_v50 = vrot.slane %v758_v7, %v3400_v17  ;;  %1000 = vrot.lane.b32.xlu1 %v995_v14, %s4870_s10  ;;  %v1008_v59 = vmul.f32 %v1007_v26, %v3441_v49  ;;  %s4931_s14 = smov 126   ;;  %s4932_s10 = smov 122  }
 0x116   : > { %v680_v23 = vpop.xlane.xlu1 %679  ;;  %v677_v24 = vpop.xlane.xlu0 %676 }
 0x117   : > { %v761_v35 = vmul.f32 0.03125, %v680_v23  ;;  %v760_v3 = vmul.f32 0.03125, %v677_v24  ;;  %v844_v55 = vsel %vm494_vm3, %v843_v32, %v839_v50  ;;  %v3574_v24 = vld [vmem:[#allocation2 + $0x2] sm:$0xff] }
 0x118   : > { %v963_v2 = vsel %vm633_vm5, %v844_v55, %v962_v41 }
 0x119   : > { %v852_v44 = vrot.slane %v761_v35, %v3397_v12  ;;  %v848_v43 = vrot.slane %v760_v3, %v3400_v17  ;;  %1146 = vrot.lane.b32.xlu0 %v1142_v42, %s4930_s24  ;;  %1012 = vrot.lane.b32.xlu1 %v1008_v59, %s4931_s14  ;;  %v1156_v3 = vmul.f32 %v4872_v0, %v3494_v20  ;;  %v1177_v35 = vstv %s3544_s16  ;;  %s3777_s16 = sld [smem:[#allocation4 + $0x204]] }
 0x11a   : > { %v686_v61 = vpop.xlane.xlu1 %685  ;;  %v683_v7 = vpop.xlane.xlu0 %682  ;;  %v1009_v42 = vmul.f32 %v1007_v26, %v3537_v36  ;;  %v1191_v26 = vstv %s3563_s6  ;;  %s3788_s6 = sld [smem:[#allocation4 + $0x205]] }
 0x11b   : > { %v763_v14 = vmul.f32 0.03125, %v686_v61  ;;  %v762_v23 = vmul.f32 0.03125, %v683_v7  ;;  %v853_v31 = vsel %vm494_vm3, %v852_v44, %v848_v43  ;;  %v1178_v43 = vmul.f32 %v1177_v35, %v3574_v24 }
 0x11c   : > { %v964_v41 = vsel %vm635_vm6, %v853_v31, %v963_v2 }
 0x11d   : > { %v861_v32 = vrot.slane %v763_v14, %v3397_v12  ;;  %v857_v50 = vrot.slane %v762_v23, %v3400_v17  ;;  %1160 = vrot.lane.b32.xlu0 %v1156_v3, %s4932_s10  ;;  %1014 = vrot.lane.b32.xlu1 %v1009_v42, %s4931_s14  ;;  %v1023_v23 = vmul.f32 %v1021_v54, %v3537_v36  ;;  %v1205_v54 = vstv %s3580_s12  ;;  %s3799_s12 = sld [smem:[#allocation4 + $0x206]] }
 0x11e   : > { %v692_v59 = vpop.xlane.xlu1 %691  ;;  %v689_v61 = vpop.xlane.xlu0 %688 }
 0x11f   : > { %v765_v7 = vmul.f32 0.03125, %v692_v59  ;;  %v764_v0 = vmul.f32 0.03125, %v689_v61  ;;  %v862_v44 = vsel %vm494_vm3, %v861_v32, %v857_v50 }
 0x120   : > { %v965_v31 = vsel %vm637_vm7, %v862_v44, %v964_v41  ;;  %v1037_v41 = vmul.f32 %v1035_v60, %v3537_v36  ;;  %v1219_v60 = vstv %s3593_s0  ;;  %s3810_s0 = sld [smem:[#allocation4 + $0x281]] }
 0x121   : > { %v870_v55 = vrot.slane %v765_v7, %v3397_v12  ;;  %v866_v14 = vrot.slane %v764_v0, %v3400_v17  ;;  %1182 = vrot.lane.b32.xlu0 %v1178_v43, %s4933_s1  ;;  %1028 = vrot.lane.b32.xlu1 %v1023_v23, %s4934_s3  ;;  %v1192_v0 = vmul.f32 %v1191_v26, %v3574_v24 }
 0x122   : > { %v698_v3 = vpop.xlane.xlu1 %697  ;;  %v695_v2 = vpop.xlane.xlu0 %694 }
 0x123   : > { %v871_v32 = vsel %vm494_vm3, %v870_v55, %v866_v14  ;;  %v767_v50 = vmul.f32 0.03125, %v698_v3  ;;  %v766_v42 = vmul.f32 0.03125, %v695_v2  ;;  %v1206_v3 = vmul.f32 %v1205_v54, %v3574_v24 }
 0x124   : > { %v966_v7 = vsel %vm639_vm8, %v871_v32, %v965_v31 }
 0x125   : > { %v879_v59 = vrot.slane %v767_v50, %v3397_v12  ;;  %v875_v61 = vrot.slane %v766_v42, %v3400_v17  ;;  %1196 = vrot.lane.b32.xlu0 %v1192_v0, %s4931_s14  ;;  %1042 = vrot.lane.b32.xlu1 %v1037_v41, %s4935_s28  ;;  %v1051_v50 = vmul.f32 %v1049_v13, %v3537_v36  ;;  %v4875_v41 = vstv %s3608_s7 }
 0x126   : > { %v704_v44 = vpop.xlane.xlu1 %703  ;;  %v701_v43 = vpop.xlane.xlu0 %700 }
 0x127   : > { %v880_v55 = vsel %vm494_vm3, %v879_v59, %v875_v61  ;;  %v769_v14 = vmul.f32 0.03125, %v704_v44  ;;  %v768_v23 = vmul.f32 0.03125, %v701_v43  ;;  %v1065_v43 = vmul.f32 %v1063_v53, %v3537_v36 }
 0x128   : > { %v967_v2 = vsel %vm641_vm9, %v880_v55, %v966_v7  ;;  %v1220_v7 = vmul.f32 %v1219_v60, %v3574_v24 }
 0x129   : > { %v888_v31 = vrot.slane %v769_v14, %v3397_v12  ;;  %v884_v32 = vrot.slane %v768_v23, %v3400_v17  ;;  %1210 = vrot.lane.b32.xlu0 %v1206_v3, %s4934_s3  ;;  %1056 = vrot.lane.b32.xlu1 %v1051_v50, %s4930_s24  ;;  %v3644_v23 = vld [vmem:[#allocation2 + $0x9] sm:$0xff] }
 0x12a   : > { %v710_v42 = vpop.xlane.xlu1 %709  ;;  %v707_v0 = vpop.xlane.xlu0 %706 }
 0x12b   : > { %v889_v59 = vsel %vm494_vm3, %v888_v31, %v884_v32  ;;  %v771_v44 = vmul.f32 0.03125, %v710_v42  ;;  %v770_v13 = vmul.f32 0.03125, %v707_v0  ;;  %v1234_v31 = vmul.f32 %v4875_v41, %v3574_v24 }
 0x12c   : > { %v968_v61 = vsel %vm643_vm10, %v889_v59, %v967_v2  ;;  %v4874_v32 = vstv %s3624_s8  ;;  %v1087_v42 = vmul.f32 %v1085_v25, %v3644_v23  ;;  %v4876_v25 = vstv %s3638_s22 }
 0x12d   : > { %979 = vst.msk [vmem:[#allocation2 + $0x1b] sm:$0xff] %vm654_vm11, %v968_v61  ;;  %1224 = vrot.lane.b32.xlu0 %v1220_v7, %s4935_s28  ;;  %1070 = vrot.lane.b32.xlu1 %v1065_v43, %s4932_s10  ;;  %v897_v50 = vrot.slane %v771_v44, %v3397_v12  ;;  %v893_v53 = vrot.slane %v770_v13, %v3400_v17  ;;  %v3667_v13 = vld [vmem:[#allocation2 + $0x3] sm:$0xff] }
 0x12e   : > { %v716_v55 = vpop.xlane.xlu1 %715  ;;  %v713_v14 = vpop.xlane.xlu0 %712  ;;  %v1248_v44 = vmul.f32 %v4874_v32, %v3574_v24 }
 0x12f   : > { %v773_v3 = vmul.f32 0.03125, %v716_v55  ;;  %v772_v2 = vmul.f32 0.03125, %v713_v14 }
 0x131   : > { %1238 = vrot.lane.b32.xlu0 %v1234_v31, %s4930_s24  ;;  %v906_v61 = vrot.slane %v773_v3, %v3397_v12  ;;  %v902_v7 = vrot.slane %v772_v2, %v3400_v17  ;;  %1092 = vrot.lane.b32.xlu1 %v1087_v42, %s4933_s1  ;;  %v1101_v2 = vmul.f32 %v1099_v56, %v3644_v23 }
 0x132   : > { %v722_v0 = vpop.xlane.xlu1 %721  ;;  %v719_v59 = vpop.xlane.xlu0 %718 }
 0x133   : > { %v775_v43 = vmul.f32 0.03125, %v722_v0  ;;  %v774_v55 = vmul.f32 0.03125, %v719_v59  ;;  %v898_v0 = vsel %vm494_vm3, %v897_v50, %v893_v53  ;;  %v907_v59 = vsel %vm494_vm3, %v906_v61, %v902_v7 }
 0x134   : > { %v969_v50 = vsel %vm631_vm4, %v907_v59, %v898_v0  ;;  %v4936_v61 = vstv %s3499_s19  ;;  %s3717_s19 = sld [smem:[#allocation4 + $0x186]]  ;;  %v4012_v29 = vld [vmem:[#allocation2 + $0x18] sm:$0xff] }
 0x135   : > { %v915_v14 = vrot.slane %v775_v43, %v3397_v12  ;;  %v911_v3 = vrot.slane %v774_v55, %v3400_v17  ;;  %1252 = vrot.lane.b32.xlu0 %v1248_v44, %s4932_s10  ;;  %1106 = vrot.lane.b32.xlu1 %v1101_v2, %s4931_s14  ;;  %v1270_v43 = vmul.f32 %v4876_v25, %v3667_v13  ;;  %v4877_v44 = vstv %s3651_s9 }
 0x136   : > { %v728_v31 = vpop.xlane.xlu1 %727  ;;  %v725_v42 = vpop.xlane.xlu0 %724  ;;  %v1115_v7 = vmul.f32 %v4936_v61, %v3644_v23 }
 0x137   : > { %v777_v32 = vmul.f32 0.03125, %v728_v31  ;;  %v776_v41 = vmul.f32 0.03125, %v725_v42  ;;  %v916_v53 = vsel %vm494_vm3, %v915_v14, %v911_v3 }
 0x138   : > { %v970_v0 = vsel %vm633_vm5, %v916_v53, %v969_v50 }
 0x139   : > { %v924_v55 = vrot.slane %v777_v32, %v3397_v12  ;;  %v920_v56 = vrot.slane %v776_v41, %v3400_v17  ;;  %1274 = vrot.lane.b32.xlu0 %v1270_v43, %s4933_s1  ;;  %1120 = vrot.lane.b32.xlu1 %v1115_v7, %s4934_s3  ;;  %v1284_v41 = vmul.f32 %v4877_v44, %v3667_v13  ;;  %v1297_v32 = vstv %s3665_s11  ;;  %s3875_s11 = sld [smem:[#allocation4 + $0x286]] }
 0x13a   : > { %v734_v2 = vpop.xlane.xlu1 %733  ;;  %v731_v31 = vpop.xlane.xlu0 %730  ;;  %v4937_v43 = vstv %s3514_s26  ;;  %s3732_s26 = sld [smem:[#allocation4 + $0x201]] }
 0x13b   : > { %v779_v42 = vmul.f32 0.03125, %v734_v2  ;;  %v778_v25 = vmul.f32 0.03125, %v731_v31  ;;  %v925_v14 = vsel %vm494_vm3, %v924_v55, %v920_v56  ;;  %v1129_v61 = vmul.f32 %v4937_v43, %v3644_v23 }
 0x13c   : > { %v971_v50 = vsel %vm635_vm6, %v925_v14, %v970_v0 }
 0x13d   : > { %v933_v3 = vrot.slane %v779_v42, %v3397_v12  ;;  %v929_v59 = vrot.slane %v778_v25, %v3400_v17  ;;  %1288 = vrot.lane.b32.xlu0 %v1284_v41, %s4931_s14  ;;  %1134 = vrot.lane.b32.xlu1 %v1129_v61, %s4935_s28  ;;  %v1298_v25 = vmul.f32 %v1297_v32, %v3667_v13  ;;  %v1311_v42 = vstv %s3685_s13  ;;  %s3888_s13 = sld [smem:[#allocation4 + $0x301]] }
 0x13e   : > { %v740_v7 = vpop.xlane.xlu1 %739  ;;  %v737_v2 = vpop.xlane.xlu0 %736  ;;  %v1143_v41 = vmul.f32 %v1141_v62, %v3644_v23 }
 0x13f   : > { %v781_v31 = vmul.f32 0.03125, %v740_v7  ;;  %v780_v44 = vmul.f32 0.03125, %v737_v2  ;;  %v934_v55 = vsel %vm494_vm3, %v933_v3, %v929_v59 }
 0x140   : > { %v972_v3 = vsel %vm637_vm7, %v934_v55, %v971_v50  ;;  %v4938_v50 = vstv %s3532_s18  ;;  %s3750_s18 = sld [smem:[#allocation4 + $0x202]] }
 0x141   : > { %v942_v56 = vrot.slane %v781_v31, %v3397_v12  ;;  %v938_v53 = vrot.slane %v780_v44, %v3400_v17  ;;  %1302 = vrot.lane.b32.xlu0 %v1298_v25, %s4934_s3  ;;  %1148 = vrot.lane.b32.xlu1 %v1143_v41, %s4930_s24  ;;  %v1312_v44 = vmul.f32 %v1311_v42, %v3667_v13  ;;  %v1325_v31 = vstv %s3702_s17  ;;  %s3903_s17 = sld [smem:[#allocation4 + $0x302]] }
 0x142   : > { %v746_v0 = vpop.xlane.xlu1 %745  ;;  %v743_v14 = vpop.xlane.xlu0 %742  ;;  %v1157_v55 = vmul.f32 %v4938_v50, %v3644_v23  ;;  %v1361_v50 = vstv %s3732_s26  ;;  %s3920_s26 = sld [smem:[#allocation4 + $0x303]] }
 0x143   : > { %v943_v59 = vsel %vm494_vm3, %v942_v56, %v938_v53  ;;  %v783_v43 = vmul.f32 0.03125, %v746_v0  ;;  %v782_v61 = vmul.f32 0.03125, %v743_v14  ;;  %v3739_v53 = vld [vmem:[#allocation2 + $0xa] sm:$0xff] }
 0x144   : > { %v973_v62 = vsel %vm639_vm8, %v943_v59, %v972_v3  ;;  %v1326_v3 = vmul.f32 %v1325_v31, %v3667_v13 }
 0x145   : > { %v951_v7 = vrot.slane %v783_v43, %v3397_v12  ;;  %v947_v2 = vrot.slane %v782_v61, %v3400_v17  ;;  %1316 = vrot.lane.b32.xlu0 %v1312_v44, %s4935_s28  ;;  %1162 = vrot.lane.b32.xlu1 %v1157_v55, %s4932_s10  ;;  %v1339_v44 = vstv %s3717_s19  ;;  %s3909_s19 = sld [smem:[#allocation4]] }
 0x146   : > { %v752_v25 = vpop.xlane.xlu1 %751  ;;  %v749_v56 = vpop.xlane.xlu0 %748 }
 0x147   : > { %v952_v41 = vsel %vm494_vm3, %v951_v7, %v947_v2  ;;  %v785_v0 = vmul.f32 0.03125, %v752_v25  ;;  %v784_v14 = vmul.f32 0.03125, %v749_v56  ;;  %v1179_v7 = vmul.f32 %v1177_v35, %v3739_v53 }
 0x148   : > { %v974_v59 = vsel %vm641_vm9, %v952_v41, %v973_v62  ;;  %v1193_v35 = vmul.f32 %v1191_v26, %v3739_v53  ;;  %v1375_v25 = vstv %s3750_s18  ;;  %v1207_v56 = vmul.f32 %v1205_v54, %v3739_v53  ;;  %s3949_s18 = sld [smem:[#allocation4 + $0x305]] }
 0x149   : > { %v960_v43 = vrot.slane %v785_v0, %v3397_v12  ;;  %v956_v61 = vrot.slane %v784_v14, %v3400_v17  ;;  %1330 = vrot.lane.b32.xlu0 %v1326_v3, %s4930_s24  ;;  %1184 = vrot.lane.b32.xlu1 %v1179_v7, %s4933_s1  ;;  %v1340_v12 = vmul.f32 %v1339_v44, %v3667_v13  ;;  %v3762_v17 = vld [vmem:[#allocation2 + $0x4] sm:$0xff]  ;;  %v1389_v41 = vstv %s3766_s27  ;;  %s3964_s27 = sld [smem:[#allocation4 + $0x306]] }
 0x14a   : > { %v1362_v55 = vmul.f32 %v1361_v50, %v3762_v17  ;;  %v1376_v26 = vmul.f32 %v1375_v25, %v3762_v17  ;;  %v1221_v0 = vmul.f32 %v1219_v60, %v3739_v53  ;;  %v1390_v54 = vmul.f32 %v1389_v41, %v3762_v17 }
 0x14b   : > { %v961_v2 = vsel %vm494_vm3, %v960_v43, %v956_v61  ;;  %v1403_v14 = vstv %s3777_s16  ;;  %v4939_v3 = vstv %s3608_s7  ;;  %v4890_v43 = vstv %s3788_s6  ;;  %s3823_s7 = sld [smem:[#allocation4 + $0x282]]  ;;  %s3980_s16 = sld [smem:[#allocation4 + $0x401]] }
 0x14c   : > { %v975_v62 = vsel %vm643_vm10, %v961_v2, %v974_v59  ;;  %v1235_v59 = vmul.f32 %v4939_v3, %v3739_v53  ;;  %v1404_v60 = vmul.f32 %v1403_v14, %v3762_v17  ;;  %v4940_v61 = vstv %s3624_s8  ;;  %v3816_v2 = vld [vmem:[#allocation2 + $0xb] sm:$0xff]  ;;  %s3836_s8 = sld [smem:[#allocation4 + $0x283]] }
 0x14d   : > { %980 = vst.msk [vmem:[#allocation2 + $0x23] sm:$0xff] %vm654_vm11, %v975_v62  ;;  %1344 = vrot.lane.b32.xlu0 %v1340_v12, %s4932_s10  ;;  %1198 = vrot.lane.b32.xlu1 %v1193_v35, %s4931_s14  ;;  %v1249_v7 = vmul.f32 %v4940_v61, %v3739_v53  ;;  %v1418_v62 = vmul.f32 %v4890_v43, %v3762_v17  ;;  %v4889_v12 = vstv %s3799_s12  ;;  %v4941_v35 = vstv %s3638_s22  ;;  %s3849_s22 = sld [smem:[#allocation4 + $0x284]] }
 0x14e   : > { %v4898_v47 = vstv %s3949_s18 }
 0x14f   : > { %v4900_v37 = vstv %s3964_s27 }
 0x151   : > { %1366 = vrot.lane.b32.xlu0 %v1362_v55, %s4933_s1  ;;  %1212 = vrot.lane.b32.xlu1 %v1207_v56, %s4934_s3  ;;  %v1271_v55 = vmul.f32 %v4941_v35, %v3816_v2  ;;  %v1432_v56 = vmul.f32 %v4889_v12, %v3762_v17  ;;  %v4885_v61 = vstv %s3823_s7  ;;  %v4895_v12 = vstv %s3935_s30 }
 0x155   : > { %1380 = vrot.lane.b32.xlu0 %v1376_v26, %s4931_s14  ;;  %1226 = vrot.lane.b32.xlu1 %v1221_v0, %s4935_s28  ;;  %v3833_v26 = vld [vmem:[#allocation2 + $0x5] sm:$0xff]  ;;  %v4887_v0 = vstv %s3810_s0 }
 0x156   : > { %v1468_v35 = vmul.f32 %v4885_v61, %v3833_v26 }
 0x159   : > { %1394 = vrot.lane.b32.xlu0 %v1390_v54, %s4934_s3  ;;  %1240 = vrot.lane.b32.xlu1 %v1235_v59, %s4930_s24  ;;  %v4942_v54 = vstv %s3651_s9  ;;  %s3862_s9 = sld [smem:[#allocation4 + $0x285]] }
 0x15a   : > { %v1285_v3 = vmul.f32 %v4942_v54, %v3816_v2 }
 0x15d   : > { %1408 = vrot.lane.b32.xlu0 %v1404_v60, %s4935_s28  ;;  %1254 = vrot.lane.b32.xlu1 %v1249_v7, %s4932_s10  ;;  %v1454_v60 = vmul.f32 %v4887_v0, %v3833_v26  ;;  %v1299_v7 = vmul.f32 %v1297_v32, %v3816_v2 }
 0x161   : > { %1422 = vrot.lane.b32.xlu0 %v1418_v62, %s4930_s24  ;;  %1276 = vrot.lane.b32.xlu1 %v1271_v55, %s4933_s1  ;;  %v4880_v55 = vstv %s3836_s8 }
 0x162   : > { %v1482_v54 = vmul.f32 %v4880_v55, %v3833_v26  ;;  %v4886_v55 = vstv %s3888_s13 }
 0x165   : > { %1436 = vrot.lane.b32.xlu0 %v1432_v56, %s4932_s10  ;;  %1290 = vrot.lane.b32.xlu1 %v1285_v3, %s4931_s14  ;;  %v1313_v56 = vmul.f32 %v1311_v42, %v3816_v2  ;;  %v4878_v3 = vstv %s3849_s22 }
 0x167   : > { %v3843_v59 = vpop.permute.xlu0 %998 }
 0x169   : > { %1458 = vrot.lane.b32.xlu0 %v1454_v60, %s4933_s1  ;;  %1304 = vrot.lane.b32.xlu1 %v1299_v7, %s4934_s3  ;;  %v1327_v60 = vmul.f32 %v1325_v31, %v3816_v2  ;;  %v1496_v7 = vmul.f32 %v4878_v3, %v3833_v26  ;;  %v4883_v3 = vstv %s3875_s11 }
 0x16b   : > { %v3856_v62 = vpop.permute.xlu0 %1026 }
 0x16d   : > { %1472 = vrot.lane.b32.xlu0 %v1468_v35, %s4931_s14  ;;  %1318 = vrot.lane.b32.xlu1 %v1313_v56, %s4935_s28  ;;  %v4879_v35 = vstv %s3862_s9  ;;  %v1341_v56 = vmul.f32 %v1339_v44, %v3816_v2 }
 0x16f   : > { %v3869_v32 = vpop.permute.xlu0 %1040 }
 0x171   : > { %1486 = vrot.lane.b32.xlu0 %v1482_v54, %s4934_s3  ;;  %1332 = vrot.lane.b32.xlu1 %v1327_v60, %s4930_s24  ;;  %v3894_v54 = vld [vmem:[#allocation2 + $0xc] sm:$0xff]  ;;  %v1510_v60 = vmul.f32 %v4879_v35, %v3833_v26 }
 0x172   : > { %v3917_v35 = vld [vmem:[#allocation2 + $0x6] sm:$0xff]  ;;  %v1405_v0 = vmul.f32 %v1403_v14, %v3894_v54  ;;  %v4943_v14 = vstv %s3788_s6  ;;  %s3996_s6 = sld [smem:[#allocation4 + $0x402]] }
 0x173   : > { %v3882_v42 = vpop.permute.xlu0 %1054  ;;  %v1419_v48 = vmul.f32 %v4943_v14, %v3894_v54 }
 0x175   : > { %1500 = vrot.lane.b32.xlu0 %v1496_v7, %s4935_s28  ;;  %1346 = vrot.lane.b32.xlu1 %v1341_v56, %s4932_s10  ;;  %v1363_v7 = vmul.f32 %v1361_v50, %v3894_v54  ;;  %v1524_v56 = vmul.f32 %v4883_v3, %v3833_v26  ;;  %v1377_v50 = vmul.f32 %v1375_v25, %v3894_v54  ;;  %v4888_v3 = vstv %s3903_s17 }
 0x176   : > { %v1391_v25 = vmul.f32 %v1389_v41, %v3894_v54  ;;  %v1560_v61 = vmul.f32 %v4888_v3, %v3917_v35 }
 0x177   : > { %v3897_v31 = vpop.permute.xlu0 %1068 }
 0x178   : > { %v1651_v18 = vstv %s3996_s6  ;;  %s4208_s6 = sld [smem:[#allocation4 + $0x505]] }
 0x179   : > { %1514 = vrot.lane.b32.xlu0 %v1510_v60, %s4930_s24  ;;  %1368 = vrot.lane.b32.xlu1 %v1363_v7, %s4933_s1  ;;  %v1546_v7 = vmul.f32 %v4886_v55, %v3917_v35  ;;  %v4892_v55 = vstv %s3920_s26 }
 0x17a   : > { %v1574_v3 = vmul.f32 %v4892_v55, %v3917_v35 }
 0x17b   : > { %v3912_v44 = vpop.permute.xlu0 %1090 }
 0x17d   : > { %1528 = vrot.lane.b32.xlu0 %v1524_v56, %s4932_s10  ;;  %1382 = vrot.lane.b32.xlu1 %v1377_v50, %s4931_s14  ;;  %v987_v56 = vstv %s3909_s19  ;;  %s4082_s19 = sld [smem:[#allocation4 + $0x180]] }
 0x17e   : > { %v988_v41 = vmul.f32 %v987_v56, %v3441_v49 }
 0x17f   : > { %v3929_v60 = vpop.permute.xlu0 %1104 }
 0x181   : > { %1550 = vrot.lane.b32.xlu0 %v1546_v7, %s4933_s1  ;;  %1396 = vrot.lane.b32.xlu1 %v1391_v25, %s4934_s3  ;;  %v982_v7 = vstv %s3926_s25  ;;  %s3970_s25 = sld [smem:[#allocation4 + $0x80]] }
 0x182   : > { %v990_v49 = vadd.f32 %v988_v41, %v982_v7 }
 0x183   : > { %v3943_v50 = vpop.permute.xlu0 %1118 }
 0x184   : > { %v1004_v55 = vadd.f32 %v3843_v59, %v990_v49  ;;  %v1602_v59 = vmul.f32 %v4898_v47, %v3917_v35 }
 0x185   : > { %1564 = vrot.lane.b32.xlu0 %v1560_v61, %s4931_s14  ;;  %1410 = vrot.lane.b32.xlu1 %v1405_v0, %s4935_s28  ;;  %v1588_v61 = vmul.f32 %v4895_v12, %v3917_v35 }
 0x187   : > { %v3958_v25 = vpop.permute.xlu0 %1132  ;;  %v1001_v43 = vpop.permute.xlu1 %1000 }
 0x189   : > { %1578 = vrot.lane.b32.xlu0 %v1574_v3, %s4934_s3  ;;  %1424 = vrot.lane.b32.xlu1 %v1419_v48, %s4930_s24  ;;  %v4944_v3 = vstv %s3799_s12  ;;  %s4015_s12 = sld [smem:[#allocation4 + $0x403]] }
 0x18a   : > { %v1433_v41 = vmul.f32 %v4944_v3, %v3894_v54 }
 0x18b   : > { %v3973_v0 = vpop.permute.xlu0 %1146  ;;  %v1013_v14 = vpop.permute.xlu1 %1012 }
 0x18c   : > { %v1018_v48 = vadd.f32 %v1013_v14, %v1004_v55  ;;  %v989_v55 = vmul.f32 %v987_v56, %v3537_v36 }
 0x18d   : > { %1592 = vrot.lane.b32.xlu0 %v1588_v61, %s4935_s28  ;;  %1438 = vrot.lane.b32.xlu1 %v1433_v41, %s4932_s10  ;;  %v4945_v61 = vstv %s3810_s0  ;;  %v1079_v41 = vstv %s3970_s25  ;;  %s4028_s0 = sld [smem:[#allocation4 + $0x404]]  ;;  %s4103_s25 = sld [smem:[#allocation4 + $0x483]] }
 0x18e   : > { %v1032_v49 = vadd.f32 %v3856_v62, %v1018_v48  ;;  %v1455_v30 = vmul.f32 %v4945_v61, %v3986_v38  ;;  %v1616_v62 = vmul.f32 %v4900_v37, %v3917_v35  ;;  %v1637_v61 = vstv %s3980_s16  ;;  %s4197_s16 = sld [smem:[#allocation4 + $0x504]] }
 0x18f   : > { %v3989_v12 = vpop.permute.xlu0 %1160  ;;  %v1015_v3 = vpop.permute.xlu1 %1014 }
 0x190   : > { %v1046_v14 = vadd.f32 %v3869_v32, %v1032_v49  ;;  %v4946_v32 = vstv %s3823_s7  ;;  %s4030_s7 = sld [smem:[#allocation4 + $0x100]] }
 0x191   : > { %1606 = vrot.lane.b32.xlu0 %v1602_v59, %s4930_s24  ;;  %1460 = vrot.lane.b32.xlu1 %v1455_v30, %s4933_s1  ;;  %v1469_v56 = vmul.f32 %v4946_v32, %v3986_v38  ;;  %v1080_v30 = vmul.f32 %v1079_v41, %v3494_v20  ;;  %v991_v59 = vadd.f32 %v989_v55, %v982_v7  ;;  %v4947_v7 = vstv %s3836_s8  ;;  %s4043_s8 = sld [smem:[#allocation4 + $0x405]] }
 0x192   : > { %v1060_v48 = vadd.f32 %v3882_v42, %v1046_v14  ;;  %v1638_v14 = vmul.f32 %v1637_v61, %v4012_v29 }
 0x193   : > { %v4006_v47 = vpop.permute.xlu0 %1182  ;;  %v1029_v36 = vpop.permute.xlu1 %1028  ;;  %v1005_v37 = vadd.f32 %v1001_v43, %v991_v59 }
 0x194   : > { %v1074_v49 = vadd.f32 %v3897_v31, %v1060_v48  ;;  %v1483_v31 = vmul.f32 %v4947_v7, %v3986_v38  ;;  %v1652_v48 = vmul.f32 %v1651_v18, %v4012_v29  ;;  %v1679_v7 = vstv %s4028_s0  ;;  %s4235_s0 = sld [smem:[#allocation4 + $0x581]] }
 0x195   : > { %1620 = vrot.lane.b32.xlu0 %v1616_v62, %s4932_s10  ;;  %1474 = vrot.lane.b32.xlu1 %v1469_v56, %s4931_s14  ;;  %v1019_v62 = vadd.f32 %v1015_v3, %v1005_v37 }
 0x196   : > { %v1082_v19 = vadd.f32 %v1080_v30, %v1074_v49  ;;  %v1665_v30 = vstv %s4015_s12  ;;  %s4221_s12 = sld [smem:[#allocation4 + $0x506]] }
 0x197   : > { %v1197_v42 = vpop.permute.xlu0 %1196  ;;  %v1043_v20 = vpop.permute.xlu1 %1042  ;;  %v1033_v56 = vadd.f32 %v1029_v36, %v1019_v62  ;;  %v1081_v62 = vmul.f32 %v1079_v41, %v3644_v23 }
 0x198   : > { %v1096_v55 = vadd.f32 %v3912_v44, %v1082_v19  ;;  %v4948_v19 = vstv %s3849_s22  ;;  %s4056_s22 = sld [smem:[#allocation4 + $0x406]] }
 0x199   : > { %1642 = vrot.lane.b32.xlu0 %v1638_v14, %s4933_s1  ;;  %1488 = vrot.lane.b32.xlu1 %v1483_v31, %s4934_s3  ;;  %v1497_v44 = vmul.f32 %v4948_v19, %v3986_v38  ;;  %v1047_v3 = vadd.f32 %v1043_v20, %v1033_v56  ;;  %v1171_v31 = vstv %s4030_s7  ;;  %v1680_v56 = vmul.f32 %v1679_v7, %v4012_v29  ;;  %s4210_s7 = sld [smem:[#allocation4 + $0x280]] }
 0x19a   : > { %v1110_v32 = vadd.f32 %v3929_v60, %v1096_v55  ;;  %v1666_v60 = vmul.f32 %v1665_v30, %v4012_v29 }
 0x19b   : > { %v1211_v43 = vpop.permute.xlu0 %1210  ;;  %v1057_v59 = vpop.permute.xlu1 %1056 }
 0x19c   : > { %v1124_v37 = vadd.f32 %v3943_v50, %v1110_v32  ;;  %v1061_v14 = vadd.f32 %v1057_v59, %v1047_v3  ;;  %v4949_v50 = vstv %s3862_s9  ;;  %v1172_v59 = vmul.f32 %v1171_v31, %v3574_v24  ;;  %s4074_s9 = sld [smem:[#allocation4 + $0x481]] }
 0x19d   : > { %1656 = vrot.lane.b32.xlu0 %v1652_v48, %s4931_s14  ;;  %1502 = vrot.lane.b32.xlu1 %v1497_v44, %s4935_s28  ;;  %v1511_v20 = vmul.f32 %v4949_v50, %v3986_v38  ;;  %v4951_v50 = vstv %s3888_s13  ;;  %s4115_s13 = sld [smem:[#allocation4 + $0x484]] }
 0x19e   : > { %v1138_v36 = vadd.f32 %v3958_v25, %v1124_v37  ;;  %v1693_v37 = vstv %s4043_s8  ;;  %s4252_s8 = sld [smem:[#allocation4 + $0x582]] }
 0x19f   : > { %v1225_v49 = vpop.permute.xlu0 %1224  ;;  %v1071_v55 = vpop.permute.xlu1 %1070 }
 0x1a0   : > { %v1152_v48 = vadd.f32 %v3973_v0, %v1138_v36  ;;  %v1075_v32 = vadd.f32 %v1071_v55, %v1061_v14  ;;  %v4950_v0 = vstv %s3875_s11  ;;  %v1707_v14 = vstv %s4056_s22  ;;  %s4090_s11 = sld [smem:[#allocation4 + $0x482]]  ;;  %s4265_s22 = sld [smem:[#allocation4 + $0x583]] }
 0x1a1   : > { %1670 = vrot.lane.b32.xlu0 %v1666_v60, %s4934_s3  ;;  %1516 = vrot.lane.b32.xlu1 %v1511_v20, %s4930_s24  ;;  %v1525_v41 = vmul.f32 %v4950_v0, %v3986_v38  ;;  %v4080_v60 = vld [vmem:[#allocation2 + $0xe] sm:$0xff]  ;;  %v4952_v0 = vstv %s3903_s17  ;;  %s4129_s17 = sld [smem:[#allocation4 + $0x485]] }
 0x1a2   : > { %v1166_v19 = vadd.f32 %v3989_v12, %v1152_v48  ;;  %v1083_v44 = vadd.f32 %v1081_v62, %v1075_v32  ;;  %v1694_v12 = vmul.f32 %v1693_v37, %v4012_v29  ;;  %v1547_v20 = vmul.f32 %v4951_v50, %v4080_v60 }
 0x1a3   : > { %v1239_v25 = vpop.permute.xlu0 %1238  ;;  %v1093_v23 = vpop.permute.xlu1 %1092  ;;  %v1708_v32 = vmul.f32 %v1707_v14, %v4012_v29 }
 0x1a4   : > { %v1174_v3 = vadd.f32 %v1172_v59, %v1166_v19  ;;  %v4903_v59 = vstv %s4074_s9 }
 0x1a5   : > { %1684 = vrot.lane.b32.xlu0 %v1680_v56, %s4935_s28  ;;  %1530 = vrot.lane.b32.xlu1 %v1525_v41, %s4932_s10  ;;  %v4100_v56 = vld [vmem:[#allocation2 + $0x19] sm:$0xff]  ;;  %v1561_v41 = vmul.f32 %v4952_v0, %v4080_v60  ;;  %v4953_v0 = vstv %s3920_s26  ;;  %s4131_s26 = sld [smem:[#allocation4 + $0x200]] }
 0x1a6   : > { %v1188_v36 = vadd.f32 %v4006_v47, %v1174_v3  ;;  %v1263_v3 = vstv %s4082_s19  ;;  %s4287_s19 = sld [smem:[#allocation4 + $0x585]] }
 0x1a7   : > { %v1253_v24 = vpop.permute.xlu0 %1252  ;;  %v1107_v55 = vpop.permute.xlu1 %1106 }
 0x1a8   : > { %v1202_v62 = vadd.f32 %v1197_v42, %v1188_v36  ;;  %v1097_v36 = vadd.f32 %v1093_v23, %v1083_v44 }
 0x1a9   : > { %1698 = vrot.lane.b32.xlu0 %v1694_v12, %s4930_s24  ;;  %1552 = vrot.lane.b32.xlu1 %v1547_v20, %s4933_s1  ;;  %v1743_v20 = vstv %s4090_s11  ;;  %s4293_s11 = sld [smem:[#allocation4 + $0x300]] }
 0x1aa   : > { %v1216_v47 = vadd.f32 %v1211_v43, %v1202_v62  ;;  %v1730_v43 = vmul.f32 %v4903_v59, %v4100_v56  ;;  %v1757_v59 = vstv %s4103_s25  ;;  %s4300_s25 = sld [smem:[#allocation4 + $0x586]] }
 0x1ab   : > { %v1275_v48 = vpop.permute.xlu0 %1274  ;;  %v1121_v19 = vpop.permute.xlu1 %1120 }
 0x1ac   : > { %v1230_v42 = vadd.f32 %v1225_v49, %v1216_v47  ;;  %v1264_v49 = vmul.f32 %v1263_v3, %v3667_v13  ;;  %v1111_v47 = vadd.f32 %v1107_v55, %v1097_v36 }
 0x1ad   : > { %1712 = vrot.lane.b32.xlu0 %v1708_v32, %s4932_s10  ;;  %1566 = vrot.lane.b32.xlu1 %v1561_v41, %s4931_s14  ;;  %v1575_v32 = vmul.f32 %v4953_v0, %v4080_v60 }
 0x1ae   : > { %v1244_v50 = vadd.f32 %v1239_v25, %v1230_v42  ;;  %v1744_v25 = vmul.f32 %v1743_v20, %v4100_v56  ;;  %v1125_v42 = vadd.f32 %v1121_v19, %v1111_v47  ;;  %v1758_v19 = vmul.f32 %v1757_v59, %v4100_v56 }
 0x1af   : > { %v1289_v12 = vpop.permute.xlu0 %1288  ;;  %v1135_v62 = vpop.permute.xlu1 %1134 }
 0x1b0   : > { %v1258_v41 = vadd.f32 %v1253_v24, %v1244_v50  ;;  %v4954_v24 = vstv %s3935_s30  ;;  %v1139_v36 = vadd.f32 %v1135_v62, %v1125_v42  ;;  %v1173_v62 = vmul.f32 %v1171_v31, %v3739_v53  ;;  %s4156_s30 = sld [smem:[#allocation4 + $0x501]] }
 0x1b1   : > { %1734 = vrot.lane.b32.xlu0 %v1730_v43, %s4933_s1  ;;  %1580 = vrot.lane.b32.xlu1 %v1575_v32, %s4934_s3  ;;  %v1589_v55 = vmul.f32 %v4954_v24, %v4080_v60  ;;  %v4956_v53 = vstv %s3964_s27  ;;  %s4186_s27 = sld [smem:[#allocation4 + $0x503]] }
 0x1b2   : > { %v1266_v23 = vadd.f32 %v1264_v49, %v1258_v41  ;;  %v1771_v49 = vstv %s4115_s13  ;;  %v4955_v41 = vstv %s3949_s18  ;;  %v1617_v31 = vmul.f32 %v4956_v53, %v4080_v60  ;;  %s4173_s18 = sld [smem:[#allocation4 + $0x502]]  ;;  %s4314_s13 = sld [smem:[#allocation4 + $0x601]] }
 0x1b3   : > { %v1303_v44 = vpop.permute.xlu0 %1302  ;;  %v1149_v13 = vpop.permute.xlu1 %1148  ;;  %v1772_v42 = vmul.f32 %v1771_v49, %v4100_v56 }
 0x1b4   : > { %v1280_v43 = vadd.f32 %v1275_v48, %v1266_v23  ;;  %v1153_v32 = vadd.f32 %v1149_v13, %v1139_v36  ;;  %v1603_v48 = vmul.f32 %v4955_v41, %v4080_v60  ;;  %v1799_v41 = vstv %s4142_s20  ;;  %s4331_s20 = sld [smem:[#allocation4 + $0x602]] }
 0x1b5   : > { %1748 = vrot.lane.b32.xlu0 %v1744_v25, %s4931_s14  ;;  %1594 = vrot.lane.b32.xlu1 %v1589_v55, %s4935_s28  ;;  %v1785_v55 = vstv %s4129_s17  ;;  %s4344_s17 = sld [smem:[#allocation4 + $0x603]] }
 0x1b6   : > { %v1294_v0 = vadd.f32 %v1289_v12, %v1280_v43  ;;  %v1355_v43 = vstv %s4131_s26  ;;  %s4355_s26 = sld [smem:[#allocation4 + $0x604]] }
 0x1b7   : > { %v1317_v50 = vpop.permute.xlu0 %1316  ;;  %v1163_v47 = vpop.permute.xlu1 %1162 }
 0x1b8   : > { %v1308_v25 = vadd.f32 %v1303_v44, %v1294_v0  ;;  %v1167_v23 = vadd.f32 %v1163_v47, %v1153_v32  ;;  %v1356_v32 = vmul.f32 %v1355_v43, %v3762_v17  ;;  %v1800_v17 = vmul.f32 %v1799_v41, %v4100_v56 }
 0x1b9   : > { %1762 = vrot.lane.b32.xlu0 %v1758_v19, %s4934_s3  ;;  %1608 = vrot.lane.b32.xlu1 %v1603_v48, %s4930_s24  ;;  %v4163_v19 = vld [vmem:[#allocation2 + $0x20] sm:$0xff] }
 0x1ba   : > { %v1175_v13 = vadd.f32 %v1173_v62, %v1167_v23  ;;  %v1322_v24 = vadd.f32 %v1317_v50, %v1308_v25  ;;  %v1786_v50 = vmul.f32 %v1785_v55, %v4100_v56  ;;  %v1639_v62 = vmul.f32 %v1637_v61, %v4163_v19 }
 0x1bb   : > { %v1331_v12 = vpop.permute.xlu0 %1330  ;;  %v1185_v36 = vpop.permute.xlu1 %1184  ;;  %v1653_v61 = vmul.f32 %v1651_v18, %v4163_v19 }
 0x1bc   : > { %v1336_v44 = vadd.f32 %v1331_v12, %v1322_v24  ;;  %v4183_v12 = vld [vmem:[#allocation2 + $0x1a] sm:$0xff] }
 0x1bd   : > { %1776 = vrot.lane.b32.xlu0 %v1772_v42, %s4935_s28  ;;  %1622 = vrot.lane.b32.xlu1 %v1617_v31, %s4932_s10  ;;  %v1821_v42 = vstv %s4156_s30  ;;  %s4366_s30 = sld [smem:[#allocation4 + $0x605]] }
 0x1be   : > { %v1822_v31 = vmul.f32 %v1821_v42, %v4183_v12 }
 0x1bf   : > { %v1345_v0 = vpop.permute.xlu0 %1344  ;;  %v1199_v48 = vpop.permute.xlu1 %1198 }
 0x1c0   : > { %v1350_v47 = vadd.f32 %v1345_v0, %v1336_v44  ;;  %v1189_v44 = vadd.f32 %v1185_v36, %v1175_v13  ;;  %v1835_v0 = vstv %s4173_s18  ;;  %v1849_v13 = vstv %s4186_s27  ;;  %s4372_s18 = sld [smem:[#allocation4 + $0x400]]  ;;  %s4379_s27 = sld [smem:[#allocation4 + $0x606]] }
 0x1c1   : > { %1790 = vrot.lane.b32.xlu0 %v1786_v50, %s4930_s24  ;;  %1644 = vrot.lane.b32.xlu1 %v1639_v62, %s4933_s1  ;;  %v1836_v62 = vmul.f32 %v1835_v0, %v4183_v12  ;;  %v1681_v36 = vmul.f32 %v1679_v7, %v4163_v19 }
 0x1c2   : > { %v1358_v25 = vadd.f32 %v1356_v32, %v1350_v47  ;;  %v1667_v32 = vmul.f32 %v1665_v30, %v4163_v19  ;;  %v1203_v18 = vadd.f32 %v1199_v48, %v1189_v44 }
 0x1c3   : > { %v1367_v23 = vpop.permute.xlu0 %1366  ;;  %v1213_v24 = vpop.permute.xlu1 %1212 }
 0x1c4   : > { %v1372_v48 = vadd.f32 %v1367_v23, %v1358_v25  ;;  %v1695_v25 = vmul.f32 %v1693_v37, %v4163_v19  ;;  %v1265_v23 = vmul.f32 %v1263_v3, %v3816_v2  ;;  %v1447_v37 = vstv %s4210_s7  ;;  %s4423_s7 = sld [smem:[#allocation4 + $0x683]] }
 0x1c5   : > { %1804 = vrot.lane.b32.xlu0 %v1800_v17, %s4932_s10  ;;  %1658 = vrot.lane.b32.xlu1 %v1653_v61, %s4931_s14  ;;  %v1217_v17 = vadd.f32 %v1213_v24, %v1203_v18  ;;  %v1850_v24 = vmul.f32 %v1849_v13, %v4183_v12  ;;  %v1863_v18 = vstv %s4197_s16  ;;  %v1709_v2 = vmul.f32 %v1707_v14, %v4163_v19  ;;  %s4393_s16 = sld [smem:[#allocation4 + $0x681]] }
 0x1c7   : > { %v1381_v53 = vpop.permute.xlu0 %1380  ;;  %v1227_v50 = vpop.permute.xlu1 %1226 }
 0x1c8   : > { %v1231_v61 = vadd.f32 %v1227_v50, %v1217_v17  ;;  %v1386_v44 = vadd.f32 %v1381_v53, %v1372_v48  ;;  %v1864_v17 = vmul.f32 %v1863_v18, %v4183_v12  ;;  %v1877_v48 = vstv %s4208_s6  ;;  %s4410_s6 = sld [smem:[#allocation4 + $0x682]] }
 0x1c9   : > { %1826 = vrot.lane.b32.xlu0 %v1822_v31, %s4933_s1  ;;  %1672 = vrot.lane.b32.xlu1 %v1667_v32, %s4934_s3 }
 0x1cb   : > { %v1395_v47 = vpop.permute.xlu0 %1394  ;;  %v1241_v30 = vpop.permute.xlu1 %1240 }
 0x1cc   : > { %v1245_v32 = vadd.f32 %v1241_v30, %v1231_v61  ;;  %v1400_v50 = vadd.f32 %v1395_v47, %v1386_v44  ;;  %v4242_v47 = vld [vmem:[#allocation2 + $0x21] sm:$0xff]  ;;  %v1448_v44 = vmul.f32 %v1447_v37, %v3833_v26 }
 0x1cd   : > { %1840 = vrot.lane.b32.xlu0 %v1836_v62, %s4931_s14  ;;  %1686 = vrot.lane.b32.xlu1 %v1681_v36, %s4935_s28 }
 0x1cf   : > { %v1409_v31 = vpop.permute.xlu0 %1408  ;;  %v1255_v7 = vpop.permute.xlu1 %1254 }
 0x1d0   : > { %v1259_v62 = vadd.f32 %v1255_v7, %v1245_v32  ;;  %v1414_v36 = vadd.f32 %v1409_v31, %v1400_v50  ;;  %v1878_v31 = vmul.f32 %v1877_v48, %v4183_v12  ;;  %v1891_v7 = vstv %s4221_s12  ;;  %s4434_s12 = sld [smem:[#allocation4 + $0x684]] }
 0x1d1   : > { %1854 = vrot.lane.b32.xlu0 %v1850_v24, %s4934_s3  ;;  %1700 = vrot.lane.b32.xlu1 %v1695_v25, %s4930_s24  ;;  %v4957_v25 = vstv %s4074_s9  ;;  %v1892_v26 = vmul.f32 %v1891_v7, %v4183_v12  ;;  %s4276_s9 = sld [smem:[#allocation4 + $0x584]] }
 0x1d2   : > { %v1267_v30 = vadd.f32 %v1265_v23, %v1259_v62  ;;  %v1731_v23 = vmul.f32 %v4957_v25, %v4242_v47  ;;  %v1759_v25 = vmul.f32 %v1757_v59, %v4242_v47  ;;  %v1773_v59 = vmul.f32 %v1771_v49, %v4242_v47 }
 0x1d3   : > { %v1423_v53 = vpop.permute.xlu0 %1422  ;;  %v1277_v61 = vpop.permute.xlu1 %1276 }
 0x1d4   : > { %v1428_v3 = vadd.f32 %v1423_v53, %v1414_v36  ;;  %v4262_v53 = vld [vmem:[#allocation2 + $0x1b] sm:$0xff] }
 0x1d5   : > { %1868 = vrot.lane.b32.xlu0 %v1864_v17, %s4935_s28  ;;  %1714 = vrot.lane.b32.xlu1 %v1709_v2, %s4932_s10  ;;  %v1913_v17 = vstv %s4235_s0  ;;  %v1745_v2 = vmul.f32 %v1743_v20, %v4242_v47  ;;  %s4445_s0 = sld [smem:[#allocation4 + $0x685]] }
 0x1d7   : > { %v1437_v24 = vpop.permute.xlu0 %1436  ;;  %v1291_v14 = vpop.permute.xlu1 %1290 }
 0x1d8   : > { %v1442_v32 = vadd.f32 %v1437_v24, %v1428_v3  ;;  %v1914_v24 = vmul.f32 %v1913_v17, %v4262_v53 }
 0x1d9   : > { %1882 = vrot.lane.b32.xlu0 %v1878_v31, %s4930_s24  ;;  %1736 = vrot.lane.b32.xlu1 %v1731_v23, %s4933_s1  ;;  %v1281_v31 = vadd.f32 %v1277_v61, %v1267_v30  ;;  %v1941_v30 = vstv %s4265_s22  ;;  %s4458_s22 = sld [smem:[#allocation4 + $0x686]] }
 0x1da   : > { %v1450_v50 = vadd.f32 %v1448_v44, %v1442_v32  ;;  %v4905_v44 = vstv %s4252_s8 }
 0x1db   : > { %v1459_v62 = vpop.permute.xlu0 %1458  ;;  %v1305_v36 = vpop.permute.xlu1 %1304  ;;  %v1295_v20 = vadd.f32 %v1291_v14, %v1281_v31 }
 0x1dc   : > { %v1464_v14 = vadd.f32 %v1459_v62, %v1450_v50  ;;  %v1787_v50 = vmul.f32 %v1785_v55, %v4242_v47  ;;  %v1357_v62 = vmul.f32 %v1355_v43, %v3894_v54  ;;  %v1801_v54 = vmul.f32 %v1799_v41, %v4242_v47 }
 0x1dd   : > { %1896 = vrot.lane.b32.xlu0 %v1892_v26, %s4932_s10  ;;  %1750 = vrot.lane.b32.xlu1 %v1745_v2, %s4931_s14  ;;  %v1928_v26 = vmul.f32 %v4905_v44, %v4262_v53  ;;  %v1309_v2 = vadd.f32 %v1305_v36, %v1295_v20  ;;  %v1942_v36 = vmul.f32 %v1941_v30, %v4262_v53  ;;  %v1955_v44 = vstv %s4276_s9  ;;  %s4472_s9 = sld [smem:[#allocation4 + $0x701]] }
 0x1de   : > { %v1539_v43 = vstv %s4293_s11  ;;  %v1983_v41 = vstv %s4300_s25  ;;  %s4502_s11 = sld [smem:[#allocation4 + $0x703]]  ;;  %s4513_s25 = sld [smem:[#allocation4 + $0x704]] }
 0x1df   : > { %v1473_v3 = vpop.permute.xlu0 %1472  ;;  %v1319_v32 = vpop.permute.xlu1 %1318 }
 0x1e1   : > { %1918 = vrot.lane.b32.xlu0 %v1914_v24, %s4933_s1  ;;  %1764 = vrot.lane.b32.xlu1 %v1759_v25, %s4934_s3  ;;  %v1323_v24 = vadd.f32 %v1319_v32, %v1309_v2  ;;  %v1478_v25 = vadd.f32 %v1473_v3, %v1464_v14  ;;  %v1956_v2 = vmul.f32 %v1955_v44, %v4262_v53  ;;  %v1969_v14 = vstv %s4287_s19  ;;  %s4489_s19 = sld [smem:[#allocation4 + $0x702]] }
 0x1e3   : > { %v1487_v23 = vpop.permute.xlu0 %1486  ;;  %v1333_v61 = vpop.permute.xlu1 %1332 }
 0x1e4   : > { %v1337_v20 = vadd.f32 %v1333_v61, %v1323_v24  ;;  %v1492_v32 = vadd.f32 %v1487_v23, %v1478_v25  ;;  %v4321_v24 = vld [vmem:[#allocation2 + $0x22] sm:$0xff]  ;;  %v1540_v25 = vmul.f32 %v1539_v43, %v3917_v35  ;;  %v1984_v35 = vmul.f32 %v1983_v41, %v4262_v53 }
 0x1e5   : > { %1932 = vrot.lane.b32.xlu0 %v1928_v26, %s4931_s14  ;;  %1778 = vrot.lane.b32.xlu1 %v1773_v59, %s4935_s28 }
 0x1e7   : > { %v1501_v31 = vpop.permute.xlu0 %1500  ;;  %v1347_v49 = vpop.permute.xlu1 %1346 }
 0x1e8   : > { %v1351_v26 = vadd.f32 %v1347_v49, %v1337_v20  ;;  %v1506_v59 = vadd.f32 %v1501_v31, %v1492_v32  ;;  %v1970_v31 = vmul.f32 %v1969_v14, %v4262_v53 }
 0x1e9   : > { %1946 = vrot.lane.b32.xlu0 %v1942_v36, %s4934_s3  ;;  %1792 = vrot.lane.b32.xlu1 %v1787_v50, %s4930_s24  ;;  %v1823_v50 = vmul.f32 %v1821_v42, %v4321_v24  ;;  %v1837_v42 = vmul.f32 %v1835_v0, %v4321_v24 }
 0x1ea   : > { %v1359_v61 = vadd.f32 %v1357_v62, %v1351_v26  ;;  %v4341_v26 = vld [vmem:[#allocation2 + $0x1c] sm:$0xff] }
 0x1eb   : > { %v1515_v3 = vpop.permute.xlu0 %1514  ;;  %v1369_v55 = vpop.permute.xlu1 %1368 }
 0x1ec   : > { %v1520_v23 = vadd.f32 %v1515_v3, %v1506_v59  ;;  %v2005_v3 = vstv %s4314_s13  ;;  %s4524_s13 = sld [smem:[#allocation4 + $0x705]] }
 0x1ed   : > { %1960 = vrot.lane.b32.xlu0 %v1956_v2, %s4935_s28  ;;  %1806 = vrot.lane.b32.xlu1 %v1801_v54, %s4932_s10  ;;  %v2006_v54 = vmul.f32 %v2005_v3, %v4341_v26 }
 0x1ef   : > { %v1529_v36 = vpop.permute.xlu0 %1528  ;;  %v1383_v49 = vpop.permute.xlu1 %1382 }
 0x1f0   : > { %v1534_v20 = vadd.f32 %v1529_v36, %v1520_v23  ;;  %v1373_v23 = vadd.f32 %v1369_v55, %v1359_v61  ;;  %v2019_v36 = vstv %s4331_s20  ;;  %v2033_v61 = vstv %s4344_s17  ;;  %s4530_s20 = sld [smem:[#allocation4 + $0x500]]  ;;  %s4537_s17 = sld [smem:[#allocation4 + $0x706]] }
 0x1f1   : > { %1974 = vrot.lane.b32.xlu0 %v1970_v31, %s4930_s24  ;;  %1828 = vrot.lane.b32.xlu1 %v1823_v50, %s4933_s1  ;;  %v2020_v50 = vmul.f32 %v2019_v36, %v4341_v26 }
 0x1f2   : > { %v1542_v62 = vadd.f32 %v1540_v25, %v1534_v20  ;;  %v1851_v25 = vmul.f32 %v1849_v13, %v4321_v24  ;;  %v1387_v0 = vadd.f32 %v1383_v49, %v1373_v23  ;;  %v1865_v13 = vmul.f32 %v1863_v18, %v4321_v24 }
 0x1f3   : > { %v1551_v32 = vpop.permute.xlu0 %1550  ;;  %v1397_v2 = vpop.permute.xlu1 %1396 }
 0x1f4   : > { %v1556_v49 = vadd.f32 %v1551_v32, %v1542_v62  ;;  %v1879_v62 = vmul.f32 %v1877_v48, %v4321_v24  ;;  %v1449_v32 = vmul.f32 %v1447_v37, %v3986_v38  ;;  %v1893_v38 = vmul.f32 %v1891_v7, %v4321_v24 }
 0x1f5   : > { %1988 = vrot.lane.b32.xlu0 %v1984_v35, %s4932_s10  ;;  %1842 = vrot.lane.b32.xlu1 %v1837_v42, %s4931_s14  ;;  %v1401_v35 = vadd.f32 %v1397_v2, %v1387_v0  ;;  %v2034_v2 = vmul.f32 %v2033_v61, %v4341_v26  ;;  %v2047_v0 = vstv %s4355_s26  ;;  %v1631_v37 = vstv %s4372_s18  ;;  %s4586_s26 = sld [smem:[#allocation4 + $0x580]]  ;;  %s258_s18 = sand.u32 1, %s2990_s21  }
 0x1f6   : > { %v2075_v7 = vstv %s4379_s27  ;;  %s2735_s27 = sshll.u32 %s258_s18, 8 }
 0x1f7   : > { %v1565_v59 = vpop.permute.xlu0 %1564  ;;  %v1411_v31 = vpop.permute.xlu1 %1410 }
 0x1f8   : > { %v1415_v42 = vadd.f32 %v1411_v31, %v1401_v35  ;;  %v1570_v23 = vadd.f32 %v1565_v59, %v1556_v49  ;;  %v2048_v35 = vmul.f32 %v2047_v0, %v4341_v26  ;;  %v2061_v49 = vstv %s4366_s30 }
 0x1f9   : > { %2010 = vrot.lane.b32.xlu0 %v2006_v54, %s4933_s1  ;;  %1856 = vrot.lane.b32.xlu1 %v1851_v25, %s4934_s3 }
 0x1fb   : > { %v1579_v20 = vpop.permute.xlu0 %1578  ;;  %v1425_v55 = vpop.permute.xlu1 %1424 }
 0x1fc   : > { %v1429_v25 = vadd.f32 %v1425_v55, %v1415_v42  ;;  %v1584_v31 = vadd.f32 %v1579_v20, %v1570_v23  ;;  %v4400_v42 = vld [vmem:[#allocation2 + $0x23] sm:$0xff]  ;;  %v1632_v23 = vmul.f32 %v1631_v37, %v4012_v29  ;;  %v2076_v29 = vmul.f32 %v2075_v7, %v4341_v26 }
 0x1fd   : > { %2024 = vrot.lane.b32.xlu0 %v2020_v50, %s4931_s14  ;;  %1870 = vrot.lane.b32.xlu1 %v1865_v13, %s4935_s28 }
 0x1ff   : > { %v1593_v54 = vpop.permute.xlu0 %1592  ;;  %v1439_v18 = vpop.permute.xlu1 %1438 }
 0x200   : > { %v1443_v50 = vadd.f32 %v1439_v18, %v1429_v25  ;;  %v1598_v13 = vadd.f32 %v1593_v54, %v1584_v31  ;;  %v2062_v54 = vmul.f32 %v2061_v49, %v4341_v26 }
 0x201   : > { %2038 = vrot.lane.b32.xlu0 %v2034_v2, %s4934_s3  ;;  %1884 = vrot.lane.b32.xlu1 %v1879_v62, %s4930_s24  ;;  %v1915_v62 = vmul.f32 %v1913_v17, %v4400_v42  ;;  %v4958_v17 = vstv %s4252_s8  ;;  %s4451_s8 = sld [smem:[#allocation4 + $0x480]] }
 0x202   : > { %v1451_v55 = vadd.f32 %v1449_v32, %v1443_v50  ;;  %v4420_v50 = vld [vmem:[#allocation2 + $0x1d] sm:$0xff] }
 0x203   : > { %v1607_v59 = vpop.permute.xlu0 %1606  ;;  %v1461_v48 = vpop.permute.xlu1 %1460 }
 0x204   : > { %v1612_v20 = vadd.f32 %v1607_v59, %v1598_v13  ;;  %v2097_v59 = vstv %s4393_s16  ;;  %v1929_v13 = vmul.f32 %v4958_v17, %v4400_v42  ;;  %s2847_s16 = sshll.u32 %s3067_s4, 12  ;;  %s4810_s4 = scalar_lea.sflag [#allocation5], %s258_s18 }
 0x205   : > { %2052 = vrot.lane.b32.xlu0 %v2048_v35, %s4935_s28  ;;  %1898 = vrot.lane.b32.xlu1 %v1893_v38, %s4932_s10 }
 0x207   : > { %v1621_v2 = vpop.permute.xlu0 %1620  ;;  %v1475_v18 = vpop.permute.xlu1 %1474 }
 0x208   : > { %v1626_v25 = vadd.f32 %v1621_v2, %v1612_v20  ;;  %v2098_v20 = vmul.f32 %v2097_v59, %v4420_v50  ;;  %v1465_v2 = vadd.f32 %v1461_v48, %v1451_v55  ;;  %v2125_v55 = vstv %s4423_s7 }
 0x209   : > { %2066 = vrot.lane.b32.xlu0 %v2062_v54, %s4930_s24  ;;  %1920 = vrot.lane.b32.xlu1 %v1915_v62, %s4933_s1  ;;  %v4906_v54 = vstv %s4410_s6 }
 0x20a   : > { %v1634_v32 = vadd.f32 %v1632_v23, %v1626_v25  ;;  %v1943_v25 = vmul.f32 %v1941_v30, %v4400_v42  ;;  %v1479_v62 = vadd.f32 %v1475_v18, %v1465_v2  ;;  %v2112_v17 = vmul.f32 %v4906_v54, %v4420_v50 }
 0x20b   : > { %v1643_v31 = vpop.permute.xlu0 %1642  ;;  %v1489_v35 = vpop.permute.xlu1 %1488  ;;  %v1957_v30 = vmul.f32 %v1955_v44, %v4400_v42  ;;  %v2139_v54 = vstv %s4434_s12 }
 0x20c   : > { %v1648_v18 = vadd.f32 %v1643_v31, %v1634_v32  ;;  %v1971_v32 = vmul.f32 %v1969_v14, %v4400_v42 }
 0x20d   : > { %2080 = vrot.lane.b32.xlu0 %v2076_v29, %s4932_s10  ;;  %1934 = vrot.lane.b32.xlu1 %v1929_v13, %s4931_s14  ;;  %v1493_v13 = vadd.f32 %v1489_v35, %v1479_v62  ;;  %v2126_v35 = vmul.f32 %v2125_v55, %v4420_v50 }
 0x20f   : > { %v1657_v38 = vpop.permute.xlu0 %1656  ;;  %v1503_v23 = vpop.permute.xlu1 %1502 }
 0x211   : > { %2102 = vrot.lane.b32.xlu0 %v2098_v20, %s4933_s1  ;;  %1948 = vrot.lane.b32.xlu1 %v1943_v25, %s4934_s3  ;;  %v1507_v20 = vadd.f32 %v1503_v23, %v1493_v13  ;;  %v1662_v25 = vadd.f32 %v1657_v38, %v1648_v18  ;;  %v1541_v23 = vmul.f32 %v1539_v43, %v4080_v60  ;;  %v2153_v18 = vstv %s4445_s0  ;;  %s4800_s0 = scalar_lea.hbm %s4856_s5, %s2847_s16 }
 0x212   : > { %v2140_v13 = vmul.f32 %v2139_v54, %v4420_v50  ;;  %v1985_v60 = vmul.f32 %v1983_v41, %v4400_v42  ;;  %v1723_v43 = vstv %s4451_s8  ;;  %v2167_v41 = vstv %s4458_s22  ;;  %s3010_s22 = smov [#allocation7]  }
 0x213   : > { %v1671_v29 = vpop.permute.xlu0 %1670  ;;  %v1517_v48 = vpop.permute.xlu1 %1516 }
 0x214   : > { %v1521_v62 = vadd.f32 %v1517_v48, %v1507_v20  ;;  %v1676_v31 = vadd.f32 %v1671_v29, %v1662_v25  ;;  %v4479_v20 = vld [vmem:[#allocation2 + $0x24] sm:$0xff]  ;;  %v1724_v25 = vmul.f32 %v1723_v43, %v4100_v56  ;;  %v2168_v56 = vmul.f32 %v2167_v41, %v4420_v50 }
 0x215   : > { %2116 = vrot.lane.b32.xlu0 %v2112_v17, %s4931_s14  ;;  %1962 = vrot.lane.b32.xlu1 %v1957_v30, %s4935_s28 }
 0x217   : > { %v1685_v2 = vpop.permute.xlu0 %1684  ;;  %v1531_v44 = vpop.permute.xlu1 %1530 }
 0x218   : > { %v1535_v17 = vadd.f32 %v1531_v44, %v1521_v62  ;;  %v1690_v30 = vadd.f32 %v1685_v2, %v1676_v31  ;;  %v2154_v2 = vmul.f32 %v2153_v18, %v4420_v50 }
 0x219   : > { %2130 = vrot.lane.b32.xlu0 %v2126_v35, %s4934_s3  ;;  %1976 = vrot.lane.b32.xlu1 %v1971_v32, %s4930_s24  ;;  %v2007_v32 = vmul.f32 %v2005_v3, %v4479_v20  ;;  %v2021_v3 = vmul.f32 %v2019_v36, %v4479_v20 }
 0x21a   : > { %v1543_v48 = vadd.f32 %v1541_v23, %v1535_v17  ;;  %v4499_v17 = vld [vmem:[#allocation2 + $0x1e] sm:$0xff] }
 0x21b   : > { %v1699_v38 = vpop.permute.xlu0 %1698  ;;  %v1553_v14 = vpop.permute.xlu1 %1552 }
 0x21c   : > { %v1704_v29 = vadd.f32 %v1699_v38, %v1690_v30  ;;  %v2189_v38 = vstv %s4472_s9  ;;  %s2936_s9 = sshll.u32 %s3010_s22, 4  ;;  %s2937_s9 = int_to_ptr.vmem [resolvable:$false] %s2936_s9 }
 0x21d   : > { %2144 = vrot.lane.b32.xlu0 %v2140_v13, %s4935_s28  ;;  %1990 = vrot.lane.b32.xlu1 %v1985_v60, %s4932_s10  ;;  %v2190_v60 = vmul.f32 %v2189_v38, %v4499_v17 }
 0x21f   : > { %v1713_v35 = vpop.permute.xlu0 %1712  ;;  %v1567_v44 = vpop.permute.xlu1 %1566 }
 0x220   : > { %v1718_v62 = vadd.f32 %v1713_v35, %v1704_v29  ;;  %v1557_v29 = vadd.f32 %v1553_v14, %v1543_v48  ;;  %v2203_v35 = vstv %s4489_s19  ;;  %v2217_v48 = vstv %s4502_s11  ;;  %s2938_s19 = scalar_lea.vmem %s2937_s9, 8192 }
 0x221   : > { %2158 = vrot.lane.b32.xlu0 %v2154_v2, %s4930_s24  ;;  %2012 = vrot.lane.b32.xlu1 %v2007_v32, %s4933_s1  ;;  %v2204_v32 = vmul.f32 %v2203_v35, %v4499_v17 }
 0x222   : > { %v1726_v31 = vadd.f32 %v1724_v25, %v1718_v62  ;;  %v2035_v25 = vmul.f32 %v2033_v61, %v4479_v20  ;;  %v1571_v36 = vadd.f32 %v1567_v44, %v1557_v29  ;;  %v2049_v61 = vmul.f32 %v2047_v0, %v4479_v20 }
 0x223   : > { %v1735_v23 = vpop.permute.xlu0 %1734  ;;  %v1581_v13 = vpop.permute.xlu1 %1580 }
 0x224   : > { %v1740_v44 = vadd.f32 %v1735_v23, %v1726_v31  ;;  %v2063_v31 = vmul.f32 %v2061_v49, %v4479_v20  ;;  %v2245_v49 = vstv %s4524_s13 }
 0x225   : > { %2172 = vrot.lane.b32.xlu0 %v2168_v56, %s4932_s10  ;;  %2026 = vrot.lane.b32.xlu1 %v2021_v3, %s4931_s14  ;;  %v1585_v56 = vadd.f32 %v1581_v13, %v1571_v36  ;;  %v2218_v13 = vmul.f32 %v2217_v48, %v4499_v17  ;;  %v2231_v36 = vstv %s4513_s25 }
 0x227   : > { %v1749_v30 = vpop.permute.xlu0 %1748  ;;  %v1595_v2 = vpop.permute.xlu1 %1594 }
 0x228   : > { %v1599_v3 = vadd.f32 %v1595_v2, %v1585_v56  ;;  %v1754_v29 = vadd.f32 %v1749_v30, %v1740_v44  ;;  %v2232_v56 = vmul.f32 %v2231_v36, %v4499_v17 }
 0x229   : > { %2194 = vrot.lane.b32.xlu0 %v2190_v60, %s4933_s1  ;;  %2040 = vrot.lane.b32.xlu1 %v2035_v25, %s4934_s3 }
 0x22b   : > { %v1763_v62 = vpop.permute.xlu0 %1762  ;;  %v1609_v14 = vpop.permute.xlu1 %1608 }
 0x22c   : > { %v1613_v25 = vadd.f32 %v1609_v14, %v1599_v3  ;;  %v1768_v23 = vadd.f32 %v1763_v62, %v1754_v29  ;;  %v2077_v62 = vmul.f32 %v2075_v7, %v4479_v20  ;;  %v4556_v3 = vld [vmem:[#allocation2 + $0x25] sm:$0xff]  ;;  %v2246_v29 = vmul.f32 %v2245_v49, %v4499_v17 }
 0x22d   : > { %2208 = vrot.lane.b32.xlu0 %v2204_v32, %s4931_s14  ;;  %2054 = vrot.lane.b32.xlu1 %v2049_v61, %s4935_s28  ;;  %v1633_v32 = vmul.f32 %v1631_v37, %v4163_v19  ;;  %v1815_v19 = vstv %s4530_s20  ;;  %v2259_v7 = vstv %s4537_s17 }
 0x22f   : > { %v1777_v60 = vpop.permute.xlu0 %1776  ;;  %v1623_v0 = vpop.permute.xlu1 %1622 }
 0x230   : > { %v1627_v2 = vadd.f32 %v1623_v0, %v1613_v25  ;;  %v1782_v61 = vadd.f32 %v1777_v60, %v1768_v23  ;;  %v1816_v60 = vmul.f32 %v1815_v19, %v4183_v12  ;;  %v4959_v12 = vstv %s4410_s6 }
 0x231   : > { %2222 = vrot.lane.b32.xlu0 %v2218_v13, %s4934_s3  ;;  %2068 = vrot.lane.b32.xlu1 %v2063_v31, %s4930_s24  ;;  %v2099_v31 = vmul.f32 %v2097_v59, %v4556_v3 }
 0x232   : > { %v1635_v14 = vadd.f32 %v1633_v32, %v1627_v2  ;;  %v2260_v32 = vmul.f32 %v2259_v7, %v4499_v17 }
 0x233   : > { %v1791_v30 = vpop.permute.xlu0 %1790  ;;  %v1645_v44 = vpop.permute.xlu1 %1644 }
 0x234   : > { %v1796_v37 = vadd.f32 %v1791_v30, %v1782_v61  ;;  %v1649_v59 = vadd.f32 %v1645_v44, %v1635_v14 }
 0x235   : > { %2236 = vrot.lane.b32.xlu0 %v2232_v56, %s4935_s28  ;;  %2082 = vrot.lane.b32.xlu1 %v2077_v62, %s4932_s10  ;;  %v2113_v56 = vmul.f32 %v4959_v12, %v4556_v3 }
 0x237   : > { %v1805_v13 = vpop.permute.xlu0 %1804  ;;  %v1659_v0 = vpop.permute.xlu1 %1658 }
 0x238   : > { %v1810_v25 = vadd.f32 %v1805_v13, %v1796_v37  ;;  %v2127_v37 = vmul.f32 %v2125_v55, %v4556_v3  ;;  %v1663_v13 = vadd.f32 %v1659_v0, %v1649_v59 }
 0x239   : > { %2250 = vrot.lane.b32.xlu0 %v2246_v29, %s4930_s24  ;;  %2104 = vrot.lane.b32.xlu1 %v2099_v31, %s4933_s1  ;;  %v2141_v31 = vmul.f32 %v2139_v54, %v4556_v3  ;;  %v1725_v54 = vmul.f32 %v1723_v43, %v4242_v47 }
 0x23a   : > { %v1818_v23 = vadd.f32 %v1816_v60, %v1810_v25 }
 0x23b   : > { %v1827_v2 = vpop.permute.xlu0 %1826  ;;  %v1673_v30 = vpop.permute.xlu1 %1672 }
 0x23c   : > { %v1677_v60 = vadd.f32 %v1673_v30, %v1663_v13  ;;  %v1907_v13 = vstv %s4586_s26 }
 0x23d   : > { %2264 = vrot.lane.b32.xlu0 %v2260_v32, %s4932_s10  ;;  %2118 = vrot.lane.b32.xlu1 %v2113_v56, %s4931_s14  ;;  %v1832_v32 = vadd.f32 %v1827_v2, %v1818_v23  ;;  %v2155_v56 = vmul.f32 %v2153_v18, %v4556_v3  ;;  %v4600_v18 = vld [vmem:[#allocation2 + $0x26] sm:$0xff] }
 0x23f   : > { %v1841_v61 = vpop.permute.xlu0 %1840  ;;  %v1687_v62 = vpop.permute.xlu1 %1686 }
 0x240   : > { %v1691_v14 = vadd.f32 %v1687_v62, %v1677_v60  ;;  %v1846_v55 = vadd.f32 %v1841_v61, %v1832_v32  ;;  %v2169_v61 = vmul.f32 %v2167_v41, %v4556_v3 }
 0x241   : > { %2132 = vrot.lane.b32.xlu1 %v2127_v37, %s4934_s3 }
 0x243   : > { %v1855_v29 = vpop.permute.xlu0 %1854  ;;  %v1701_v25 = vpop.permute.xlu1 %1700 }
 0x244   : > { %v1705_v0 = vadd.f32 %v1701_v25, %v1691_v14  ;;  %v1860_v30 = vadd.f32 %v1855_v29, %v1846_v55  ;;  %v1908_v29 = vmul.f32 %v1907_v13, %v4262_v53  ;;  %v2219_v53 = vmul.f32 %v2217_v48, %v4600_v18 }
 0x245   : > { %2146 = vrot.lane.b32.xlu1 %v2141_v31, %s4935_s28  ;;  %v2191_v31 = vmul.f32 %v2189_v38, %v4600_v18 }
 0x247   : > { %v1869_v44 = vpop.permute.xlu0 %1868  ;;  %v1715_v12 = vpop.permute.xlu1 %1714 }
 0x248   : > { %v1719_v59 = vadd.f32 %v1715_v12, %v1705_v0  ;;  %v1874_v62 = vadd.f32 %v1869_v44, %v1860_v30  ;;  %v2205_v44 = vmul.f32 %v2203_v35, %v4600_v18 }
 0x249   : > { %2160 = vrot.lane.b32.xlu1 %v2155_v56, %s4930_s24 }
 0x24a   : > { %v1727_v2 = vadd.f32 %v1725_v54, %v1719_v59  ;;  %v2233_v59 = vmul.f32 %v2231_v36, %v4600_v18 }
 0x24b   : > { %v1883_v23 = vpop.permute.xlu0 %1882  ;;  %v1737_v37 = vpop.permute.xlu1 %1736 }
 0x24c   : > { %v1888_v60 = vadd.f32 %v1883_v23, %v1874_v62  ;;  %v1741_v0 = vadd.f32 %v1737_v37, %v1727_v2 }
 0x24d   : > { %2174 = vrot.lane.b32.xlu1 %v2169_v61, %s4932_s10  ;;  %v2247_v61 = vmul.f32 %v2245_v49, %v4600_v18 }
 0x24f   : > { %v1897_v47 = vpop.permute.xlu0 %1896  ;;  %v1751_v25 = vpop.permute.xlu1 %1750 }
 0x250   : > { %v1902_v43 = vadd.f32 %v1897_v47, %v1888_v60  ;;  %v1755_v56 = vadd.f32 %v1751_v25, %v1741_v0  ;;  %v1817_v47 = vmul.f32 %v1815_v19, %v4321_v24 }
 0x251   : > { %2196 = vrot.lane.b32.xlu1 %v2191_v31, %s4933_s1  ;;  %s4621_s1 = sld [smem:[#allocation4 + $0x600]] }
 0x252   : > { %v1910_v32 = vadd.f32 %v1908_v29, %v1902_v43 }
 0x253   : > { %v1919_v41 = vpop.permute.xlu0 %1918  ;;  %v1765_v14 = vpop.permute.xlu1 %1764 }
 0x254   : > { %v1769_v30 = vadd.f32 %v1765_v14, %v1755_v56  ;;  %v1924_v35 = vadd.f32 %v1919_v41, %v1910_v32  ;;  %v2261_v32 = vmul.f32 %v2259_v7, %v4600_v18 }
 0x255   : > { %2210 = vrot.lane.b32.xlu1 %v2205_v44, %s4931_s14 }
 0x257   : > { %v1933_v55 = vpop.permute.xlu0 %1932  ;;  %v1779_v12 = vpop.permute.xlu1 %1778  ;;  %v1999_v41 = vstv %s4621_s1 }
 0x258   : > { %v1783_v23 = vadd.f32 %v1779_v12, %v1769_v30  ;;  %v1938_v48 = vadd.f32 %v1933_v55, %v1924_v35  ;;  %v2000_v55 = vmul.f32 %v1999_v41, %v4341_v26 }
 0x259   : > { %2224 = vrot.lane.b32.xlu1 %v2219_v53, %s4934_s3  ;;  %s4637_s3 = sld [smem:[#allocation4 + $0x680]] }
 0x25b   : > { %v1947_v38 = vpop.permute.xlu0 %1946  ;;  %v1793_v54 = vpop.permute.xlu1 %1792 }
 0x25c   : > { %v1797_v62 = vadd.f32 %v1793_v54, %v1783_v23  ;;  %v1952_v60 = vadd.f32 %v1947_v38, %v1938_v48 }
 0x25d   : > { %2238 = vrot.lane.b32.xlu1 %v2233_v59, %s4935_s28  ;;  %s4644_s28 = sld [smem:[#allocation4 + $0x700]] }
 0x25f   : > { %v1961_v2 = vpop.permute.xlu0 %1960  ;;  %v1807_v37 = vpop.permute.xlu1 %1806 }
 0x260   : > { %v1811_v36 = vadd.f32 %v1807_v37, %v1797_v62  ;;  %v1966_v25 = vadd.f32 %v1961_v2, %v1952_v60  ;;  %v1909_v60 = vmul.f32 %v1907_v13, %v4400_v42 }
 0x261   : > { %2252 = vrot.lane.b32.xlu1 %v2247_v61, %s4930_s24 }
 0x262   : > { %v1819_v29 = vadd.f32 %v1817_v47, %v1811_v36 }
 0x263   : > { %v1975_v43 = vpop.permute.xlu0 %1974  ;;  %v1829_v31 = vpop.permute.xlu1 %1828 }
 0x264   : > { %v1980_v14 = vadd.f32 %v1975_v43, %v1966_v25  ;;  %v1833_v56 = vadd.f32 %v1829_v31, %v1819_v29  ;;  %v2091_v25 = vstv %s4637_s3 }
 0x265   : > { %2266 = vrot.lane.b32.xlu1 %v2261_v32, %s4932_s10  ;;  %s4960_s10 = sshll.u32 %s3122_s15, 8  ;;  %s4677_s15 = scalar_lea.vmem [#allocation7], %s2735_s27 }
 0x266   : > { %s4664_s30 = scalar_lea.vmem %s4853_s2, %s4960_s10  ;;  %s2634_s6 = sshll.u32 %s4677_s15, 4  ;;  %s4802_s6 = int_to_ptr.vmem [resolvable:$true] %s2634_s6 }
 0x267   : > { %v1989_v44 = vpop.permute.xlu0 %1988  ;;  %v1843_v0 = vpop.permute.xlu1 %1842  ;;  %s2932_s8 = scalar_lea.vmem %s4802_s6, 4096  ;;  %p2939_p13 = scmp.lt.s32.totalorder %s4802_s6, %s2937_s9 }
 0x268   : > { %v1994_v49 = vadd.f32 %v1989_v44, %v1980_v14  ;;  %v1847_v30 = vadd.f32 %v1843_v0, %v1833_v56  ;;  %v2092_v44 = vmul.f32 %v2091_v25, %v4420_v50  ;;  %p2933_p9 = scmp.ne.s32.totalorder %s4802_s6, %s2932_s8  ;;  %p2940_p0 = scmp.lt.s32.totalorder %s2938_s19, %s2932_s8 }
 0x26a   : > { %v2002_v24 = vadd.f32 %v2000_v55, %v1994_v49  ;;  %p2934_p10 = pnand %p2933_p9, %p3084_p5  ;;  %p2941_p1 = por %p2940_p0, %p2939_p13 }
 0x26b   : > { %v2011_v19 = vpop.permute.xlu0 %2010  ;;  %v1857_v12 = vpop.permute.xlu1 %1856 }
 0x26c   : > { %v1861_v59 = vadd.f32 %v1857_v12, %v1847_v30  ;;  %v2016_v35 = vadd.f32 %v2011_v19, %v2002_v24  ;;  %p2935_p12 = pneg %p2934_p10 }
 0x26e   : > { %p2942_p2 = pnand %p2941_p1, %p2935_p12 }
 0x26f   : > { %v2025_v53 = vpop.permute.xlu0 %2024  ;;  %v1871_v38 = vpop.permute.xlu1 %1870 }
 0x270   : > { %v1875_v23 = vadd.f32 %v1871_v38, %v1861_v59  ;;  %v2030_v48 = vadd.f32 %v2025_v53, %v2016_v35 }
 0x273   : > { %v2039_v54 = vpop.permute.xlu0 %2038  ;;  %v1885_v7 = vpop.permute.xlu1 %1884 }
 0x274   : > { %v1889_v26 = vadd.f32 %v1885_v7, %v1875_v23  ;;  %v2044_v37 = vadd.f32 %v2039_v54, %v2030_v48  ;;  %v2001_v48 = vmul.f32 %v1999_v41, %v4479_v20 }
 0x277   : > { %v2053_v2 = vpop.permute.xlu0 %2052  ;;  %v1899_v62 = vpop.permute.xlu1 %1898 }
 0x278   : > { %v1903_v61 = vadd.f32 %v1899_v62, %v1889_v26  ;;  %v2058_v36 = vadd.f32 %v2053_v2, %v2044_v37 }
 0x27a   : > { %v1911_v43 = vadd.f32 %v1909_v60, %v1903_v61  ;;  %v2183_v60 = vstv %s4644_s28 }
 0x27b   : > { %v2067_v47 = vpop.permute.xlu0 %2066  ;;  %v1921_v29 = vpop.permute.xlu1 %1920 }
 0x27c   : > { %v2072_v31 = vadd.f32 %v2067_v47, %v2058_v36  ;;  %v1925_v12 = vadd.f32 %v1921_v29, %v1911_v43  ;;  %v2184_v29 = vmul.f32 %v2183_v60, %v4499_v17  ;;  %v2093_v17 = vmul.f32 %v2091_v25, %v4556_v3 }
 0x27f   : > { %v2081_v32 = vpop.permute.xlu0 %2080  ;;  %v1935_v49 = vpop.permute.xlu1 %1934 }
 0x280   : > { %v2086_v14 = vadd.f32 %v2081_v32, %v2072_v31  ;;  %v1939_v56 = vadd.f32 %v1935_v49, %v1925_v12 }
 0x282   : > { %v2094_v55 = vadd.f32 %v2092_v44, %v2086_v14 }
 0x283   : > { %v2103_v0 = vpop.permute.xlu0 %2102  ;;  %v1949_v24 = vpop.permute.xlu1 %1948 }
 0x284   : > { %v1953_v42 = vadd.f32 %v1949_v24, %v1939_v56  ;;  %v2108_v30 = vadd.f32 %v2103_v0, %v2094_v55 }
 0x287   : > { %v2117_v19 = vpop.permute.xlu0 %2116  ;;  %v1963_v53 = vpop.permute.xlu1 %1962 }
 0x288   : > { %v1967_v54 = vadd.f32 %v1963_v53, %v1953_v42  ;;  %v2122_v7 = vadd.f32 %v2117_v19, %v2108_v30 }
 0x28b   : > { %v2131_v38 = vpop.permute.xlu0 %2130  ;;  %v1977_v13 = vpop.permute.xlu1 %1976 }
 0x28c   : > { %v1981_v35 = vadd.f32 %v1977_v13, %v1967_v54  ;;  %v2136_v23 = vadd.f32 %v2131_v38, %v2122_v7 }
 0x28f   : > { %v2145_v59 = vpop.permute.xlu0 %2144  ;;  %v1991_v50 = vpop.permute.xlu1 %1990 }
 0x290   : > { %v1995_v2 = vadd.f32 %v1991_v50, %v1981_v35  ;;  %v2150_v62 = vadd.f32 %v2145_v59, %v2136_v23 }
 0x292   : > { %v2003_v37 = vadd.f32 %v2001_v48, %v1995_v2 }
 0x293   : > { %v2159_v26 = vpop.permute.xlu0 %2158  ;;  %v2013_v61 = vpop.permute.xlu1 %2012 }
 0x294   : > { %v2164_v47 = vadd.f32 %v2159_v26, %v2150_v62  ;;  %v2017_v55 = vadd.f32 %v2013_v61, %v2003_v37 }
 0x297   : > { %v2173_v36 = vpop.permute.xlu0 %2172  ;;  %v2027_v31 = vpop.permute.xlu1 %2026 }
 0x298   : > { %v2178_v43 = vadd.f32 %v2173_v36, %v2164_v47  ;;  %v2031_v24 = vadd.f32 %v2027_v31, %v2017_v55 }
 0x29a   : > { %v2186_v32 = vadd.f32 %v2184_v29, %v2178_v43 }
 0x29b   : > { %v2195_v14 = vpop.permute.xlu0 %2194  ;;  %v2041_v44 = vpop.permute.xlu1 %2040 }
 0x29c   : > { %v2045_v20 = vadd.f32 %v2041_v44, %v2031_v24  ;;  %v2200_v12 = vadd.f32 %v2195_v14, %v2186_v32  ;;  %v2286_v24 = vsub.s32 0, %v3394_v9 }
 0x29f   : > { %v2209_v49 = vpop.permute.xlu0 %2208  ;;  %v2055_v0 = vpop.permute.xlu1 %2054 }
 0x2a0   : > { %v2059_v53 = vadd.f32 %v2055_v0, %v2045_v20  ;;  %v2214_v38 = vadd.f32 %v2209_v49, %v2200_v12  ;;  %v2185_v49 = vmul.f32 %v2183_v60, %v4600_v18  ;;  %v2297_v12 = vsub.s32 1, %v3394_v9 }
 0x2a3   : > { %v2223_v19 = vpop.permute.xlu0 %2222  ;;  %v2069_v41 = vpop.permute.xlu1 %2068 }
 0x2a4   : > { %v2073_v42 = vadd.f32 %v2069_v41, %v2059_v53  ;;  %v2228_v30 = vadd.f32 %v2223_v19, %v2214_v38 }
 0x2a7   : > { %v2237_v56 = vpop.permute.xlu0 %2236  ;;  %v2083_v13 = vpop.permute.xlu1 %2082 }
 0x2a8   : > { %v2087_v54 = vadd.f32 %v2083_v13, %v2073_v42  ;;  %v2242_v7 = vadd.f32 %v2237_v56, %v2228_v30  ;;  %v2308_v42 = vsub.s32 2, %v3394_v9 }
 0x2aa   : > { %v2095_v35 = vadd.f32 %v2093_v17, %v2087_v54  ;;  %v2319_v54 = vsub.s32 3, %v3394_v9 }
 0x2ab   : > { %v2251_v59 = vpop.permute.xlu0 %2250  ;;  %v2105_v50 = vpop.permute.xlu1 %2104 }
 0x2ac   : > { %v2256_v23 = vadd.f32 %v2251_v59, %v2242_v7  ;;  %v2109_v61 = vadd.f32 %v2105_v50, %v2095_v35  ;;  %v2330_v50 = vsub.s32 4, %v3394_v9 }
 0x2af   : > { %v2265_v2 = vpop.permute.xlu0 %2264  ;;  %v2119_v26 = vpop.permute.xlu1 %2118 }
 0x2b0   : > { %v2270_v48 = vadd.f32 %v2265_v2, %v2256_v23  ;;  %v2123_v36 = vadd.f32 %v2119_v26, %v2109_v61  ;;  %v2352_v61 = vsub.s32 6, %v3394_v9 }
 0x2b2   : > { %v2838_v62 = vmul.f32 -1.442695, %v2270_v48 }
 0x2b3   : > { %v2133_v37 = vpop.permute.xlu1 %2132 }
 0x2b4   : > { %2909 = vpow2.f32 %v2838_v62  ;;  %v2137_v43 = vadd.f32 %v2133_v37, %v2123_v36  ;;  %v2341_v62 = vsub.s32 5, %v3394_v9  ;;  %v2363_v36 = vsub.s32 7, %v3394_v9 }
 0x2b7   : > { %v2147_v47 = vpop.permute.xlu1 %2146 }
 0x2b8   : > { %v2151_v32 = vadd.f32 %v2147_v47, %v2137_v43 }
 0x2bb   : > { %v2161_v29 = vpop.permute.xlu1 %2160 }
 0x2bc   : > { %v2165_v3 = vadd.f32 %v2161_v29, %v2151_v32 }
 0x2be   : > { %v2910_v31 = vpop.eup %2909 }
 0x2bf   : > { %v2278_v14 = vadd.f32 1.0, %v2910_v31  ;;  %v2175_v25 = vpop.permute.xlu1 %2174 }
 0x2c0   : > { %v2179_v44 = vadd.f32 %v2175_v25, %v2165_v3 }
 0x2c1   : > { %2911 = vrcp.f32 %v2278_v14 }
 0x2c2   : > { %v2187_v55 = vadd.f32 %v2185_v49, %v2179_v44 }
 0x2c3   : > { %v2197_v0 = vpop.permute.xlu1 %2196 }
 0x2c4   : > { %v2201_v56 = vadd.f32 %v2197_v0, %v2187_v55 }
 0x2c7   : > { %v2211_v19 = vpop.permute.xlu1 %2210 }
 0x2c8   : > { %v2215_v30 = vadd.f32 %v2211_v19, %v2201_v56 }
 0x2cb   : > { %v2912_v20 = vpop.eup %2911  ;;  %v2225_v53 = vpop.permute.xlu1 %2224 }
 0x2cc   : > { %v2287_v41 = vrot.slane %v2912_v20, %v2286_v24  ;;  %v2298_v38 = vrot.slane %v2912_v20, %v2297_v12  ;;  %v2229_v18 = vadd.f32 %v2225_v53, %v2215_v30  ;;  %v2309_v60 = vrot.slane %v2912_v20, %v2308_v42  ;;  %v2494_v30 = vld [vmem:[%s4664_s30 + $0x10] sm:$0xff] }
 0x2cd   : > { %v2320_v35 = vrot.slane %v2912_v20, %v2319_v54  ;;  %v2331_v26 = vrot.slane %v2912_v20, %v2330_v50  ;;  %v2342_v37 = vrot.slane %v2912_v20, %v2341_v62  ;;  %v2353_v47 = vrot.slane %v2912_v20, %v2352_v61 }
 0x2ce   : > { %2293 = vbcast.lane.b32.xlu1 %v2287_v41, 264  ;;  %2289 = vbcast.lane.b32.xlu0 %v2287_v41, 256  ;;  %v2364_v29 = vrot.slane %v2912_v20, %v2363_v36  ;;  %v2492_v20 = vld [vmem:[%s4664_s30] sm:$0xff] }
 0x2cf   : > { %v2239_v13 = vpop.permute.xlu1 %2238 }
 0x2d0   : > { %v2243_v59 = vadd.f32 %v2239_v13, %v2229_v18 }
 0x2d2   : > { %2304 = vbcast.lane.b32.xlu1 %v2298_v38, 264  ;;  %2300 = vbcast.lane.b32.xlu0 %v2298_v38, 256 }
 0x2d3   : > { %v2253_v17 = vpop.permute.xlu1 %2252 }
 0x2d4   : > { %v2257_v7 = vadd.f32 %v2253_v17, %v2243_v59 }
 0x2d6   : > { %2315 = vbcast.lane.b32.xlu1 %v2309_v60, 264  ;;  %2311 = vbcast.lane.b32.xlu0 %v2309_v60, 256 }
 0x2d7   : > { %v2267_v23 = vpop.permute.xlu1 %2266 }
 0x2d8   : > { %v2271_v2 = vadd.f32 %v2267_v23, %v2257_v7  ;;  %v2497_v7 = vld [vmem:[%s4664_s30 + $0x28] sm:$0xff] }
 0x2da   : > { %2326 = vbcast.lane.b32.xlu1 %v2320_v35, 264  ;;  %2322 = vbcast.lane.b32.xlu0 %v2320_v35, 256  ;;  %v2839_v48 = vmul.f32 -1.442695, %v2271_v2 }
 0x2dc   : > { %2913 = vpow2.f32 %v2839_v48 }
 0x2de   : > { %2337 = vbcast.lane.b32.xlu1 %v2331_v26, 264  ;;  %2333 = vbcast.lane.b32.xlu0 %v2331_v26, 256 }
 0x2e2   : > { %2348 = vbcast.lane.b32.xlu1 %v2342_v37, 264  ;;  %2344 = vbcast.lane.b32.xlu0 %v2342_v37, 256  ;;  %v2499_v37 = vld [vmem:[%s4664_s30 + $0x38] sm:$0xff] }
 0x2e6   : > { %2359 = vbcast.lane.b32.xlu1 %v2353_v47, 264  ;;  %2355 = vbcast.lane.b32.xlu0 %v2353_v47, 256  ;;  %v2914_v43 = vpop.eup %2913  ;;  %v2498_v47 = vld [vmem:[%s4664_s30 + $0x30] sm:$0xff] }
 0x2e7   : > { %v2279_v31 = vadd.f32 1.0, %v2914_v43 }
 0x2e9   : > { %2915 = vrcp.f32 %v2279_v31 }
 0x2ea   : > { %2370 = vbcast.lane.b32.xlu1 %v2364_v29, 264  ;;  %2366 = vbcast.lane.b32.xlu0 %v2364_v29, 256 }
 0x2f3   : > { %v2916_v32 = vpop.eup %2915 }
 0x2f4   : > { %v2375_v14 = vrot.slane %v2916_v32, %v2286_v24  ;;  %v2386_v3 = vrot.slane %v2916_v32, %v2297_v12  ;;  %v2397_v25 = vrot.slane %v2916_v32, %v2308_v42  ;;  %v2408_v9 = vrot.slane %v2916_v32, %v2319_v54  ;;  %v2493_v24 = vld [vmem:[%s4664_s30 + $0x8] sm:$0xff]  ;;  %v2495_v42 = vld [vmem:[%s4664_s30 + $0x18] sm:$0xff] }
 0x2f5   : > { %v2419_v44 = vrot.slane %v2916_v32, %v2330_v50  ;;  %v2430_v49 = vrot.slane %v2916_v32, %v2341_v62  ;;  %v2441_v55 = vrot.slane %v2916_v32, %v2352_v61  ;;  %v2452_v0 = vrot.slane %v2916_v32, %v2363_v36  ;;  %v2496_v50 = vld [vmem:[%s4664_s30 + $0x20] sm:$0xff] }
 0x2f6   : > { %2381 = vbcast.lane.b32.xlu1 %v2375_v14, 264  ;;  %2377 = vbcast.lane.b32.xlu0 %v2375_v14, 256  ;;  %v2501_v14 = vld [vmem:[%s4664_s30 + $0x48] sm:$0xff] }
 0x2fa   : > { %2392 = vbcast.lane.b32.xlu1 %v2386_v3, 264  ;;  %2388 = vbcast.lane.b32.xlu0 %v2386_v3, 256 }
 0x2fe   : > { %2403 = vbcast.lane.b32.xlu1 %v2397_v25, 264  ;;  %2399 = vbcast.lane.b32.xlu0 %v2397_v25, 256  ;;  %v2500_v25 = vld [vmem:[%s4664_s30 + $0x40] sm:$0xff] }
 0x302   : > { %2414 = vbcast.lane.b32.xlu1 %v2408_v9, 264  ;;  %2410 = vbcast.lane.b32.xlu0 %v2408_v9, 256 }
 0x306   : > { %2425 = vbcast.lane.b32.xlu1 %v2419_v44, 264  ;;  %2421 = vbcast.lane.b32.xlu0 %v2419_v44, 256 }
 0x30a   : > { %2436 = vbcast.lane.b32.xlu1 %v2430_v49, 264  ;;  %2432 = vbcast.lane.b32.xlu0 %v2430_v49, 256 }
 0x30e   : > { %2447 = vbcast.lane.b32.xlu1 %v2441_v55, 264  ;;  %2443 = vbcast.lane.b32.xlu0 %v2441_v55, 256 }
 0x312   : > { %2458 = vbcast.lane.b32.xlu1 %v2452_v0, 264  ;;  %2454 = vbcast.lane.b32.xlu0 %v2452_v0, 256 }
 0x340   : > { %v2294_v19 = vpop.permute.xlu1 %2293  ;;  %v2290_v41 = vpop.permute.xlu0 %2289 }
 0x341   : > { %v2461_v12 = vmul.f32 %v2294_v19, %v3152_v8  ;;  %v2460_v53 = vmul.f32 %v2290_v41, %v3145_v5 }
 0x343   : > { %v2525_v56 = vadd.f32 %v2493_v24, %v2461_v12  ;;  %v2524_v38 = vadd.f32 %v2492_v20, %v2460_v53  ;;  %v2503_v24 = vld [vmem:[%s4664_s30 + $0x58] sm:$0xff]  ;;  %v2502_v20 = vld [vmem:[%s4664_s30 + $0x50] sm:$0xff] }
 0x344   : > { %v2305_v13 = vpop.permute.xlu1 %2304  ;;  %v2301_v18 = vpop.permute.xlu0 %2300 }
 0x345   : > { %v2557_v60 = vmax.f32 %v2525_v56, 0.0  ;;  %v2556_v54 = vmax.f32 %v2524_v38, 0.0  ;;  %v2463_v17 = vmul.f32 %v2305_v13, %v3148_v6  ;;  %v2462_v59 = vmul.f32 %v2301_v18, %v3142_v4 }
 0x347   : > { %2589 = vst.msk [vmem:[%s4677_s15 + $0x8] sm:$0xff] %vm353_vm0, %v2557_v60  ;;  %2588 = vst.msk [vmem:[%s4677_s15] sm:$0xff] %vm353_vm0, %v2556_v54  ;;  %v2527_v5 = vadd.f32 %v2495_v42, %v2463_v17  ;;  %v2526_v8 = vadd.f32 %v2494_v30, %v2462_v59  ;;  %v2505_v42 = vld [vmem:[%s4664_s30 + $0x68] sm:$0xff]  ;;  %v2504_v30 = vld [vmem:[%s4664_s30 + $0x60] sm:$0xff] }
 0x348   : > { %v2316_v35 = vpop.permute.xlu1 %2315  ;;  %v2312_v6 = vpop.permute.xlu0 %2311 }
 0x349   : > { %v2559_v23 = vmax.f32 %v2527_v5, 0.0  ;;  %v2558_v4 = vmax.f32 %v2526_v8, 0.0  ;;  %v2465_v2 = vmul.f32 %v2316_v35, %v3165_v15  ;;  %v2464_v48 = vmul.f32 %v2312_v6, %v3168_v16  ;;  %v2507_v5 = vld [vmem:[%s4664_s30 + $0x78] sm:$0xff] }
 0x34b   : > { %2591 = vst.msk [vmem:[%s4677_s15 + $0x18] sm:$0xff] %vm353_vm0, %v2559_v23  ;;  %2590 = vst.msk [vmem:[%s4677_s15 + $0x10] sm:$0xff] %vm353_vm0, %v2558_v4  ;;  %v2529_v26 = vadd.f32 %v2497_v7, %v2465_v2  ;;  %v2528_v62 = vadd.f32 %v2496_v50, %v2464_v48  ;;  %v2506_v7 = vld [vmem:[%s4664_s30 + $0x70] sm:$0xff] }
 0x34c   : > { %v2327_v61 = vpop.permute.xlu1 %2326  ;;  %v2323_v36 = vpop.permute.xlu0 %2322 }
 0x34d   : > { %v2561_v43 = vmax.f32 %v2529_v26, 0.0  ;;  %v2560_v29 = vmax.f32 %v2528_v62, 0.0  ;;  %v2467_v15 = vmul.f32 %v2327_v61, %v3177_v21  ;;  %v2466_v16 = vmul.f32 %v2323_v36, %v3180_v22  ;;  %v2509_v26 = vld [vmem:[%s4664_s30 + $0x88] sm:$0xff] }
 0x34f   : > { %2593 = vst.msk [vmem:[%s4677_s15 + $0x28] sm:$0xff] %vm353_vm0, %v2561_v43  ;;  %2592 = vst.msk [vmem:[%s4677_s15 + $0x20] sm:$0xff] %vm353_vm0, %v2560_v29  ;;  %v2531_v31 = vadd.f32 %v2499_v37, %v2467_v15  ;;  %v2530_v32 = vadd.f32 %v2498_v47, %v2466_v16  ;;  %v2511_v43 = vld [vmem:[%s4664_s30 + $0x98] sm:$0xff]  ;;  %v2510_v15 = vld [vmem:[%s4664_s30 + $0x90] sm:$0xff] }
 0x350   : > { %v2338_v3 = vpop.permute.xlu1 %2337  ;;  %v2334_v9 = vpop.permute.xlu0 %2333 }
 0x351   : > { %v2563_v44 = vmax.f32 %v2531_v31, 0.0  ;;  %v2562_v49 = vmax.f32 %v2530_v32, 0.0  ;;  %v2469_v21 = vmul.f32 %v2338_v3, %v3189_v27  ;;  %v2468_v22 = vmul.f32 %v2334_v9, %v3192_v28 }
 0x353   : > { %2595 = vst.msk [vmem:[%s4677_s15 + $0x38] sm:$0xff] %vm353_vm0, %v2563_v44  ;;  %2594 = vst.msk [vmem:[%s4677_s15 + $0x30] sm:$0xff] %vm353_vm0, %v2562_v49  ;;  %v2533_v55 = vadd.f32 %v2501_v14, %v2469_v21  ;;  %v2532_v0 = vadd.f32 %v2500_v25, %v2468_v22  ;;  %v2513_v25 = vld [vmem:[%s4664_s30 + $0xa8] sm:$0xff]  ;;  %v2512_v44 = vld [vmem:[%s4664_s30 + $0xa0] sm:$0xff] }
 0x354   : > { %v2349_v19 = vpop.permute.xlu1 %2348  ;;  %v2345_v41 = vpop.permute.xlu0 %2344 }
 0x355   : > { %v2565_v12 = vmax.f32 %v2533_v55, 0.0  ;;  %v2564_v53 = vmax.f32 %v2532_v0, 0.0  ;;  %v2471_v27 = vmul.f32 %v2349_v19, %v3201_v33  ;;  %v2470_v28 = vmul.f32 %v2345_v41, %v3204_v34 }
 0x357   : > { %2597 = vst.msk [vmem:[%s4677_s15 + $0x48] sm:$0xff] %vm353_vm0, %v2565_v12  ;;  %2596 = vst.msk [vmem:[%s4677_s15 + $0x40] sm:$0xff] %vm353_vm0, %v2564_v53  ;;  %v2535_v56 = vadd.f32 %v2503_v24, %v2471_v27  ;;  %v2534_v38 = vadd.f32 %v2502_v20, %v2470_v28  ;;  %v2515_v24 = vld [vmem:[%s4664_s30 + $0xb8] sm:$0xff]  ;;  %v2514_v20 = vld [vmem:[%s4664_s30 + $0xb0] sm:$0xff] }
 0x358   : > { %v2360_v13 = vpop.permute.xlu1 %2359  ;;  %v2356_v18 = vpop.permute.xlu0 %2355 }
 0x359   : > { %v2567_v60 = vmax.f32 %v2535_v56, 0.0  ;;  %v2566_v54 = vmax.f32 %v2534_v38, 0.0  ;;  %v2473_v33 = vmul.f32 %v2360_v13, %v3213_v39  ;;  %v2472_v34 = vmul.f32 %v2356_v18, %v3216_v40  ;;  %v2517_v56 = vld [vmem:[%s4664_s30 + $0xc8] sm:$0xff] }
 0x35b   : > { %2599 = vst.msk [vmem:[%s4677_s15 + $0x58] sm:$0xff] %vm353_vm0, %v2567_v60  ;;  %2598 = vst.msk [vmem:[%s4677_s15 + $0x50] sm:$0xff] %vm353_vm0, %v2566_v54  ;;  %v2537_v17 = vadd.f32 %v2505_v42, %v2473_v33  ;;  %v2536_v59 = vadd.f32 %v2504_v30, %v2472_v34  ;;  %v2516_v42 = vld [vmem:[%s4664_s30 + $0xc0] sm:$0xff]  ;;  %v4961_v60 = vld [vmem:[#allocation15_spill] sm:$0xff] }
 0x35c   : > { %v2371_v8 = vpop.permute.xlu1 %2370  ;;  %v2367_v35 = vpop.permute.xlu0 %2366  ;;  %v4962_v54 = vld [vmem:[#allocation16_spill] sm:$0xff] }
 0x35d   : > { %v2569_v50 = vmax.f32 %v2537_v17, 0.0  ;;  %v2568_v6 = vmax.f32 %v2536_v59, 0.0  ;;  %v2475_v39 = vmul.f32 %v2371_v8, %v3225_v45  ;;  %v2474_v40 = vmul.f32 %v2367_v35, %v3228_v46  ;;  %v2508_v45 = vld [vmem:[%s4664_s30 + $0x80] sm:$0xff]  ;;  %v2519_v17 = vld [vmem:[%s4664_s30 + $0xd8] sm:$0xff] }
 0x35f   : > { %2601 = vst.msk [vmem:[%s4677_s15 + $0x68] sm:$0xff] %vm353_vm0, %v2569_v50  ;;  %2600 = vst.msk [vmem:[%s4677_s15 + $0x60] sm:$0xff] %vm353_vm0, %v2568_v6  ;;  %v2539_v23 = vadd.f32 %v2507_v5, %v2475_v39  ;;  %v2538_v4 = vadd.f32 %v2506_v7, %v2474_v40  ;;  %v2518_v5 = vld [vmem:[%s4664_s30 + $0xd0] sm:$0xff]  ;;  %v4963_v50 = vld [vmem:[#allocation17_spill] sm:$0xff] }
 0x360   : > { %v4964_v39 = vld [vmem:[#allocation18_spill] sm:$0xff] }
 0x361   : > { %v2571_v2 = vmax.f32 %v2539_v23, 0.0  ;;  %v2570_v48 = vmax.f32 %v2538_v4, 0.0 }
 0x363   : > { %2603 = vst.msk [vmem:[%s4677_s15 + $0x78] sm:$0xff] %vm353_vm0, %v2571_v2  ;;  %2602 = vst.msk [vmem:[%s4677_s15 + $0x70] sm:$0xff] %vm353_vm0, %v2570_v48  ;;  %v2521_v2 = vld [vmem:[%s4664_s30 + $0xe8] sm:$0xff] }
 0x368   : > { %v2382_v62 = vpop.permute.xlu1 %2381  ;;  %v2378_v46 = vpop.permute.xlu0 %2377 }
 0x369   : > { %v2477_v37 = vmul.f32 %v2382_v62, %v3237_v51  ;;  %v2476_v61 = vmul.f32 %v2378_v46, %v3240_v52 }
 0x36b   : > { %v2541_v47 = vadd.f32 %v2509_v26, %v2477_v37  ;;  %v2540_v36 = vadd.f32 %v2508_v45, %v2476_v61  ;;  %v2520_v26 = vld [vmem:[%s4664_s30 + $0xe0] sm:$0xff]  ;;  %v4965_v37 = vld [vmem:[#allocation19_spill] sm:$0xff] }
 0x36c   : > { %v2393_v29 = vpop.permute.xlu1 %2392  ;;  %v2389_v16 = vpop.permute.xlu0 %2388 }
 0x36d   : > { %v2573_v31 = vmax.f32 %v2541_v47, 0.0  ;;  %v2572_v32 = vmax.f32 %v2540_v36, 0.0  ;;  %v2479_v14 = vmul.f32 %v2393_v29, %v3249_v57  ;;  %v2478_v3 = vmul.f32 %v2389_v16, %v3252_v58  ;;  %v4966_v47 = vld [vmem:[#allocation20_spill] sm:$0xff] }
 0x36f   : > { %2605 = vst.msk [vmem:[%s4677_s15 + $0x88] sm:$0xff] %vm353_vm0, %v2573_v31  ;;  %2604 = vst.msk [vmem:[%s4677_s15 + $0x80] sm:$0xff] %vm353_vm0, %v2572_v32  ;;  %v2543_v51 = vadd.f32 %v2511_v43, %v2479_v14  ;;  %v2542_v52 = vadd.f32 %v2510_v15, %v2478_v3  ;;  %v2523_v15 = vld [vmem:[%s4664_s30 + $0xf8] sm:$0xff]  ;;  %v2522_v31 = vld [vmem:[%s4664_s30 + $0xf0] sm:$0xff] }
 0x370   : > { %v2404_v9 = vpop.permute.xlu1 %2403  ;;  %v2400_v49 = vpop.permute.xlu0 %2399 }
 0x371   : > { %v2575_v21 = vmax.f32 %v2543_v51, 0.0  ;;  %v2574_v22 = vmax.f32 %v2542_v52, 0.0  ;;  %v2481_v57 = vmul.f32 %v2404_v9, %v3261_v63  ;;  %v2480_v58 = vmul.f32 %v2400_v49, %v3264_v1  ;;  %v4967_v51 = vld [vmem:[#allocation21_spill] sm:$0xff] }
 0x373   : > { %2607 = vst.msk [vmem:[%s4677_s15 + $0x98] sm:$0xff] %vm353_vm0, %v2575_v21  ;;  %2606 = vst.msk [vmem:[%s4677_s15 + $0x90] sm:$0xff] %vm353_vm0, %v2574_v22  ;;  %v2545_v55 = vadd.f32 %v2513_v25, %v2481_v57  ;;  %v2544_v0 = vadd.f32 %v2512_v44, %v2480_v58  ;;  %v4968_v25 = vld [vmem:[#allocation22_spill] sm:$0xff] }
 0x374   : > { %v2415_v19 = vpop.permute.xlu1 %2414  ;;  %v2411_v41 = vpop.permute.xlu0 %2410 }
 0x375   : > { %v2577_v12 = vmax.f32 %v2545_v55, 0.0  ;;  %v2576_v53 = vmax.f32 %v2544_v0, 0.0  ;;  %v2483_v63 = vmul.f32 %v2415_v19, %v3273_v10  ;;  %v2482_v1 = vmul.f32 %v2411_v41, %v3276_v11 }
 0x377   : > { %2609 = vst.msk [vmem:[%s4677_s15 + $0xa8] sm:$0xff] %vm353_vm0, %v2577_v12  ;;  %2608 = vst.msk [vmem:[%s4677_s15 + $0xa0] sm:$0xff] %vm353_vm0, %v2576_v53  ;;  %v2547_v27 = vadd.f32 %v2515_v24, %v2483_v63  ;;  %v2546_v28 = vadd.f32 %v2514_v20, %v2482_v1 }
 0x378   : > { %v2426_v38 = vpop.permute.xlu1 %2425  ;;  %v2422_v13 = vpop.permute.xlu0 %2421 }
 0x379   : > { %v2579_v30 = vmax.f32 %v2547_v27, 0.0  ;;  %v2578_v18 = vmax.f32 %v2546_v28, 0.0  ;;  %v2485_v10 = vmul.f32 %v2426_v38, %v4961_v60  ;;  %v2484_v11 = vmul.f32 %v2422_v13, %v4962_v54 }
 0x37b   : > { %2611 = vst.msk [vmem:[%s4677_s15 + $0xb8] sm:$0xff] %vm353_vm0, %v2579_v30  ;;  %2610 = vst.msk [vmem:[%s4677_s15 + $0xb0] sm:$0xff] %vm353_vm0, %v2578_v18  ;;  %v2549_v33 = vadd.f32 %v2517_v56, %v2485_v10  ;;  %v2548_v34 = vadd.f32 %v2516_v42, %v2484_v11 }
 0x37c   : > { %v2437_v59 = vpop.permute.xlu1 %2436  ;;  %v2433_v8 = vpop.permute.xlu0 %2432 }
 0x37d   : > { %v2581_v7 = vmax.f32 %v2549_v33, 0.0  ;;  %v2580_v35 = vmax.f32 %v2548_v34, 0.0  ;;  %v2487_v6 = vmul.f32 %v2437_v59, %v4963_v50  ;;  %v2486_v40 = vmul.f32 %v2433_v8, %v4964_v39 }
 0x37f   : > { %2613 = vst.msk [vmem:[%s4677_s15 + $0xc8] sm:$0xff] %vm353_vm0, %v2581_v7  ;;  %2612 = vst.msk [vmem:[%s4677_s15 + $0xc0] sm:$0xff] %vm353_vm0, %v2580_v35  ;;  %v2551_v23 = vadd.f32 %v2519_v17, %v2487_v6  ;;  %v2550_v4 = vadd.f32 %v2518_v5, %v2486_v40 }
 0x380   : > { %v2448_v48 = vpop.permute.xlu1 %2447  ;;  %v2444_v62 = vpop.permute.xlu0 %2443 }
 0x381   : > { %v2583_v45 = vmax.f32 %v2551_v23, 0.0  ;;  %v2582_v46 = vmax.f32 %v2550_v4, 0.0  ;;  %v2489_v61 = vmul.f32 %v2448_v48, %v4965_v37  ;;  %v2488_v36 = vmul.f32 %v2444_v62, %v4966_v47 }
 0x383   : > { %2615 = vst.msk [vmem:[%s4677_s15 + $0xd8] sm:$0xff] %vm353_vm0, %v2583_v45  ;;  %2614 = vst.msk [vmem:[%s4677_s15 + $0xd0] sm:$0xff] %vm353_vm0, %v2582_v46  ;;  %v2553_v43 = vadd.f32 %v2521_v2, %v2489_v61  ;;  %v2552_v29 = vadd.f32 %v2520_v26, %v2488_v36 }
 0x384   : > { %v2459_v16 = vpop.permute.xlu1 %2458  ;;  %v2455_v32 = vpop.permute.xlu0 %2454 }
 0x385   : > { %v2585_v14 = vmax.f32 %v2553_v43, 0.0  ;;  %v2584_v3 = vmax.f32 %v2552_v29, 0.0  ;;  %v2491_v52 = vmul.f32 %v2459_v16, %v4967_v51  ;;  %v2490_v9 = vmul.f32 %v2455_v32, %v4968_v25 }
 0x387   : > { %2617 = vst.msk [vmem:[%s4677_s15 + $0xe8] sm:$0xff] %vm353_vm0, %v2585_v14  ;;  %2616 = vst.msk [vmem:[%s4677_s15 + $0xe0] sm:$0xff] %vm353_vm0, %v2584_v3  ;;  %v2555_v44 = vadd.f32 %v2523_v15, %v2491_v52  ;;  %v2554_v49 = vadd.f32 %v2522_v31, %v2490_v9 }
 0x389   : > { %v2587_v21 = vmax.f32 %v2555_v44, 0.0  ;;  %v2586_v22 = vmax.f32 %v2554_v49, 0.0 }
 0x38b   : > { %2619 = vst.msk [vmem:[%s4677_s15 + $0xf8] sm:$0xff] %vm353_vm0, %v2587_v21  ;;  %2618 = vst.msk [vmem:[%s4677_s15 + $0xf0] sm:$0xff] %vm353_vm0, %v2586_v22 }
 0x38c   : > { %2945 = shalt.err (!%p2942_p2)
}
 0x38d   : > { %s2946_s11 = scalar_lea.hbm %s4800_s0, 4096  ;;  %s2950_s20 = scalar_lea.hbm %s4856_s5, 8192 }
 0x38e   : > { %p2947_p3 = scmp.ne.s32.totalorder %s4800_s0, %s2946_s11  ;;  %p2951_p8 = scmp.lt.u32.totalorder %s4800_s0, %s4856_s5 }
 0x38f   : > { %p2952_p11 = scmp.lt.u32.totalorder %s2950_s20, %s2946_s11  ;;  %p2954_p10 = scmp.lt.u32.totalorder %s2946_s11, %s4800_s0 }
 0x390   : > { %p2948_p4 = pnand %p2947_p3, %p3084_p5 }
 0x391   : > { %p2953_p9 = por %p2952_p11, %p2951_p8 }
 0x392   : > { %p2949_p7 = pneg %p2948_p4 }
 0x393   : > { %p2955_p12 = por %p2954_p10, %p2953_p9 }
 0x395   : > { %p2956_p13 = pnand %p2955_p12, %p2949_p7 }
 0x397   : > { %2959 = shalt.err (!%p2956_p13)
}
 0x398   : > { %s3011_s1 = smov 128   ;;  %s3012_s3 = smov 8  }
 0x399   : > { %2852 = dma.vmem_to_hbm [thread:$0]  (%p3084_p5), %s4802_s6, 4096, %s4800_s0, %s4810_s4, %s3011_s1, %s3011_s1, %s3012_s3  }
 0x39a PF: > { %s4969_s28 = sld [smem:[#allocation10_spill]]  ;;  %p2864_p0 = scmp.ge.s32.totalorder %s2998_s23, 2 }
 0x39c   : > { %p2859_p1 = pnand %p2864_p0, %p3088_p6 }
 0x3a0   : > { %s2649_s14 = sand.u32 1, %s4969_s28  }
 0x3a1   : > { %s2650_s24 = scalar_lea.sflag [#allocation5], %s2649_s14 }
 0x3a2   : > { %2981 = dma.done.wait (!%p2859_p1), %s2650_s24, 4096  }
 0x3a3   : > { %2983 = vsyncadd (!%p2859_p1), %s2650_s24, 4294963200  ;;  %s4971_s23 = sld [smem:[#allocation12_spill]]  ;;  %s4972_s30 = sld [smem:[#allocation11_spill]] }
 0x3a4   : > { %s4973_s22 = sld [smem:[#allocation13_spill]]  ;;  %s4974_s20 = smov %s2990_s21 }
 0x3a9   : > { %p17_p2 = scmp.ge.s32.totalorder %s4971_s23, 4   ;;  %s4975_s21 = smov %s4972_s30 }
 0x3ab   :  { %19 = sbr.rel (!%p17_p2) target bundleno = 9 (0x9), region = 87 }
 0x3b2   :  { %2655 = vsyncpa [#allocation5], 1 }
 0x3b3   :  { %2657 = vsyncpa [#allocation5 + $0x1], 1 }
 0x3b4   :  { %2658 = vsyncpa [#allocation6], 1 }
 0x3b5   :  { %2660 = vsyncpa [#allocation6 + $0x1], 1 }

</bundles_post_ra>
